<compile_context>
chip_gen: v7x
topology: tpu7x:2x2x1
jax: 0.10.0
libtpu: 0.0.40
codegen_flags: <defaults>
</compile_context>

<pallas_src>
import jax
import jax.numpy as jnp
import numpy as np
from jax import lax
from jax.experimental import pallas as pl
from jax.experimental.pallas import tpu as pltpu

# Governs the pure-JAX reference / wrapper only; in-kernel dots set precision
# explicitly.
jax.config.update("jax_default_matmul_precision", "highest")

HIDDEN = 32        # hidden_size
OUTPUT = 20        # output_size (vocab size)
MAX_LENGTH = 6     # max_length (number of encoder positions)
BATCH = 8          # parallel decoder streams per problem (one sublane tile)
T_STEPS = 6        # decode steps run inside the kernel
NUM_PROBLEMS = 2   # independent decode problems per pallas_call (grid axis)

LANE = 128
NEG = -1e9         # additive mask for softmax / log_softmax padding lanes

# xh column-group layout (each group starts on a 128-lane boundary):
#   [0*128 : 1*128)  attention logits      (real lanes [0:L))
#   [1*128 : 2*128)  attn_combine(embedded)(real lanes [0:H))
#   [2*128 : 3*128)  gh_r  (W_hh r-gate + b_hh_r)
#   [3*128 : 4*128)  gh_z
#   [4*128 : 5*128)  gh_n
XH_COLS = 5 * LANE                     # 640
# w_rest columns: [0:384) W_ih gates (128-aligned), [384:512) out_W, [512:544) comb_Wa
IH_COLS = 3 * LANE                     # 384
REST_COLS = IH_COLS + LANE + HIDDEN    # 544
# bias slab: [0:640) b_xh (incl. softmax mask), [640:1024) b_ih, [1024:1152) b_out (incl. mask)
B_COLS = XH_COLS + IH_COLS + LANE      # 1152


def _decoder_kernel(emb_ref, hid0_ref, enc_ref, we_ref, wh_ref, wrest_ref, b_ref,
                    logp_ref, attw_ref, hfin_ref, e_scr):
    f32 = jnp.float32
    prec = lax.Precision.HIGHEST       # explicit per-dot (see header note 7)
    H = HIDDEN
    T, B = logp_ref.shape[0], logp_ref.shape[1]

    # ---- loop-invariant, 128-lane-aligned weight / bias views (whole-tile loads) ----
    W_h   = wh_ref[...]                                   # (H, 640)
    W_ih  = wrest_ref[:, 0:IH_COLS]                       # (H, 384)
    W_out = wrest_ref[:, IH_COLS:IH_COLS + LANE]          # (H, 128)
    W_cwa = wrest_ref[:, IH_COLS + LANE:REST_COLS]        # (H, H)
    b_xh  = b_ref[:, 0:XH_COLS]                           # (1, 640)
    b_ih  = b_ref[:, XH_COLS:XH_COLS + IH_COLS]           # (1, 384)
    b_out = b_ref[:, XH_COLS + IH_COLS:B_COLS]            # (1, 128)

    # enc_proj = encoder_outputs @ comb_Wa: invariant across decode steps.
    enc_proj = jnp.dot(enc_ref[...], W_cwa, precision=prec,
                       preferred_element_type=f32)        # (128, H)

    # Embedding-side contribution for ALL T steps in one dot (no dependence on
    # the recurrent state); biases and the -1e9 softmax-mask lanes folded in.
    e_scr[...] = jnp.dot(emb_ref[...], we_ref[...], precision=prec,
                         preferred_element_type=f32) + b_xh   # (T*B, 640)

    hid = hid0_ref[...]                                   # (B, H)

    for t in range(T):   # fully unrolled; one recurrent MXU round-trip per step
        xh = e_scr[t * B:(t + 1) * B, :] + jnp.dot(
            hid, W_h, precision=prec, preferred_element_type=f32)   # (B, 640)

        # attention softmax over group 0 (padding lanes carry -1e9 bias -> exp == 0)
        a = xh[:, 0:LANE]
        m = jnp.max(a, axis=-1, keepdims=True)
        ea = jnp.exp(a - m)                                         # (B, 128)
        s = jnp.sum(ea, axis=-1, keepdims=True)
        # attention-apply on the UNNORMALIZED weights so the EUP reciprocal
        # overlaps the MXU dot instead of gating it.
        ctx = jnp.dot(ea, enc_proj, precision=prec,
                      preferred_element_type=f32)                   # (B, H)
        inv = pl.reciprocal(s, approx=True)
        inv = inv * (2.0 - s * inv)        # one Newton step -> ~f32 accuracy
        attw_ref[t] = ea * inv             # lane-dense (B, 128) store

        # attn_combine(cat(embedded, attn_applied)) + ReLU
        x = jnp.maximum(xh[:, LANE:LANE + H] + ctx * inv, 0.0)      # (B, H)

        # GRU cell; gate groups 128-aligned in both gi and xh
        gi = jnp.dot(x, W_ih, precision=prec,
                     preferred_element_type=f32) + b_ih             # (B, 384)
        r = jax.nn.sigmoid(gi[:, 0:LANE] + xh[:, 2 * LANE:3 * LANE])
        z = jax.nn.sigmoid(gi[:, LANE:2 * LANE] + xh[:, 3 * LANE:4 * LANE])
        n = jnp.tanh(gi[:, 2 * LANE:3 * LANE] + r * xh[:, 4 * LANE:5 * LANE])
        zc = z[:, 0:H]
        hid = (1.0 - zc) * n[:, 0:H] + zc * hid                     # (B, H)

        # output projection + log_softmax (padding lanes masked by -1e9 bias)
        logits = jnp.dot(hid, W_out, precision=prec,
                         preferred_element_type=f32) + b_out        # (B, 128)
        m2 = jnp.max(logits, axis=-1, keepdims=True)
        lse = jnp.log(jnp.sum(jnp.exp(logits - m2), axis=-1, keepdims=True)) + m2
        logp_ref[t] = logits - lse         # lane-dense (B, 128) store

    hfin_ref[...] = hid                    # only the final hidden is exported


def pack_params(p):
    """Pack weights/biases into 128-lane-aligned slabs (no group straddles a
    lane-tile boundary; softmax/log_softmax padding lanes carry a -1e9 mask)."""
    H, O, L = HIDDEN, OUTPUT, MAX_LENGTH
    f32 = jnp.float32

    w_e = jnp.zeros((H, XH_COLS), f32)                    # embedded -> xh groups
    w_e = w_e.at[:, 0:L].set(p["attn_We"])
    w_e = w_e.at[:, LANE:LANE + H].set(p["comb_We"])

    w_h = jnp.zeros((H, XH_COLS), f32)                    # hidden -> xh groups
    w_h = w_h.at[:, 0:L].set(p["attn_Wh"])
    w_h = w_h.at[:, 2 * LANE:2 * LANE + H].set(p["W_hh"][:, 0:H])
    w_h = w_h.at[:, 3 * LANE:3 * LANE + H].set(p["W_hh"][:, H:2 * H])
    w_h = w_h.at[:, 4 * LANE:4 * LANE + H].set(p["W_hh"][:, 2 * H:])

    w_rest = jnp.zeros((H, REST_COLS), f32)               # [W_ih | out_W | comb_Wa]
    w_rest = w_rest.at[:, 0:H].set(p["W_ih"][:, 0:H])
    w_rest = w_rest.at[:, LANE:LANE + H].set(p["W_ih"][:, H:2 * H])
    w_rest = w_rest.at[:, 2 * LANE:2 * LANE + H].set(p["W_ih"][:, 2 * H:])
    w_rest = w_rest.at[:, IH_COLS:IH_COLS + O].set(p["out_W"])
    w_rest = w_rest.at[:, IH_COLS + LANE:REST_COLS].set(p["comb_Wa"])

    b = jnp.zeros((1, B_COLS), f32)
    b = b.at[:, 0:L].set(p["attn_b"])
    b = b.at[:, L:LANE].set(NEG)                          # softmax mask lanes
    b = b.at[:, LANE:LANE + H].set(p["comb_b"])
    b = b.at[:, 2 * LANE:2 * LANE + H].set(p["b_hh"][:, 0:H])
    b = b.at[:, 3 * LANE:3 * LANE + H].set(p["b_hh"][:, H:2 * H])
    b = b.at[:, 4 * LANE:4 * LANE + H].set(p["b_hh"][:, 2 * H:])
    b = b.at[:, XH_COLS:XH_COLS + H].set(p["b_ih"][:, 0:H])
    b = b.at[:, XH_COLS + LANE:XH_COLS + LANE + H].set(p["b_ih"][:, H:2 * H])
    b = b.at[:, XH_COLS + 2 * LANE:XH_COLS + 2 * LANE + H].set(p["b_ih"][:, 2 * H:])
    b = b.at[:, XH_COLS + IH_COLS:XH_COLS + IH_COLS + O].set(p["out_b"])
    b = b.at[:, XH_COLS + IH_COLS + O:B_COLS].set(NEG)    # log_softmax mask lanes
    return w_e, w_h, w_rest, b


@jax.jit
def attn_decoder_decode(tokens, hidden0, encoder_outputs, embedding, packed):
    """Run T teacher-forced AttnDecoderRNN steps for G independent decode
    problems x B parallel streams in one pallas_call.

    tokens: (G,T,B) int32; hidden0: (G,B,H); encoder_outputs: (G,L,H)
    returns (log_probs (G,T,B,O), final hidden (G,1,B,H), attn_weights (G,T,B,L))
    """
    w_e, w_h, w_rest, b_slab = packed
    G, T, B = tokens.shape
    H, O, L = HIDDEN, OUTPUT, MAX_LENGTH

    # One XLA gather for all G*T*B embedding rows (amortized over the whole
    # decode); dropout is eval-mode identity.
    # TODO(synk): optionally fold this gather into the kernel via a one-hot dot.
    emb = embedding[tokens].astype(jnp.float32).reshape(G, T * B, H)
    hid0 = hidden0.astype(jnp.float32)
    enc = jnp.pad(encoder_outputs.astype(jnp.float32),
                  ((0, 0), (0, LANE - L), (0, 0)))        # (G, 128, H)

    logp, attw, hfin = pl.pallas_call(
        _decoder_kernel,
        grid=(G,),
        in_specs=[
            pl.BlockSpec((None, T * B, H), lambda g: (g, 0, 0)),     # embedded tokens
            pl.BlockSpec((None, B, H), lambda g: (g, 0, 0)),         # initial hidden
            pl.BlockSpec((None, LANE, H), lambda g: (g, 0, 0)),      # encoder outputs
            pl.BlockSpec((H, XH_COLS), lambda g: (0, 0)),            # W_e slab (shared)
            pl.BlockSpec((H, XH_COLS), lambda g: (0, 0)),            # W_h slab (shared)
            pl.BlockSpec((H, REST_COLS), lambda g: (0, 0)),          # W_ih|out_W|comb_Wa
            pl.BlockSpec((1, B_COLS), lambda g: (0, 0)),             # bias slab
        ],
        out_specs=(
            pl.BlockSpec((None, T, B, LANE), lambda g: (g, 0, 0, 0)),
            pl.BlockSpec((None, T, B, LANE), lambda g: (g, 0, 0, 0)),
            pl.BlockSpec((None, B, H), lambda g: (g, 0, 0)),
        ),
        out_shape=(
            jax.ShapeDtypeStruct((G, T, B, LANE), jnp.float32),  # log-probs (lane-padded)
            jax.ShapeDtypeStruct((G, T, B, LANE), jnp.float32),  # attn weights (lane-padded)
            jax.ShapeDtypeStruct((G, B, H), jnp.float32),        # final hidden only
        ),
        scratch_shapes=[pltpu.VMEM((T * B, XH_COLS), jnp.float32)],
        compiler_params=pltpu.CompilerParams(
            dimension_semantics=("parallel",)),   # v7x: second TC takes half the problems
    )(emb, hid0, enc, w_e, w_h, w_rest, b_slab)

    return logp[..., :O], hfin[:, None, :, :], attw[..., :L]


def init_params(key):
    """Deterministic parameter init matching the PyTorch module's shapes.

    All Linear / GRU weights are stored transposed: (in_features, out_features).
    """
    H, O, L = HIDDEN, OUTPUT, MAX_LENGTH
    ks = jax.random.split(key, 12)
    s = 0.1
    return {
        "embedding": s * jax.random.normal(ks[0], (O, H), jnp.float32),
        # attn: Linear(2H -> L), split over the concatenation [embedded ; hidden]
        "attn_We": s * jax.random.normal(ks[1], (H, L), jnp.float32),
        "attn_Wh": s * jax.random.normal(ks[2], (H, L), jnp.float32),
        "attn_b": s * jax.random.normal(ks[3], (1, L), jnp.float32),
        # attn_combine: Linear(2H -> H), split over [embedded ; attn_applied]
        "comb_We": s * jax.random.normal(ks[4], (H, H), jnp.float32),
        "comb_Wa": s * jax.random.normal(ks[5], (H, H), jnp.float32),
        "comb_b": s * jax.random.normal(ks[6], (1, H), jnp.float32),
        # GRU(H -> H): gates packed [r | z | n] along the output axis
        "W_ih": s * jax.random.normal(ks[7], (H, 3 * H), jnp.float32),
        "b_ih": s * jax.random.normal(ks[8], (1, 3 * H), jnp.float32),
        "W_hh": s * jax.random.normal(ks[9], (H, 3 * H), jnp.float32),
        "b_hh": s * jax.random.normal(ks[10], (1, 3 * H), jnp.float32),
        # out: Linear(H -> O)
        "out_W": s * jax.random.normal(ks[11], (H, O), jnp.float32),
        "out_b": jnp.zeros((1, O), jnp.float32),
    }


def reference_decode(tokens, hidden0, encoder_outputs, p):
    """Pure-JAX reference: the exact PyTorch per-step forward, looped over T."""
    H = HIDDEN
    T, B = tokens.shape
    hid = hidden0.reshape(B, H)
    logps, attws = [], []
    for t in range(T):
        emb = p["embedding"][tokens[t]]                              # (B, H)
        a_logits = emb @ p["attn_We"] + hid @ p["attn_Wh"] + p["attn_b"]
        attw = jax.nn.softmax(a_logits, axis=1)                      # (B, L)
        attn_applied = attw @ encoder_outputs                        # (B, H)
        comb = emb @ p["comb_We"] + attn_applied @ p["comb_Wa"] + p["comb_b"]
        x = jax.nn.relu(comb)
        gi = x @ p["W_ih"] + p["b_ih"]
        gh = hid @ p["W_hh"] + p["b_hh"]
        r = jax.nn.sigmoid(gi[:, :H] + gh[:, :H])
        z = jax.nn.sigmoid(gi[:, H:2 * H] + gh[:, H:2 * H])
        n = jnp.tanh(gi[:, 2 * H:] + r * gh[:, 2 * H:])
        hid = (1.0 - z) * n + z * hid
        logits = hid @ p["out_W"] + p["out_b"]
        logps.append(jax.nn.log_softmax(logits, axis=1))
        attws.append(attw)
    return jnp.stack(logps), hid.reshape(1, B, H), jnp.stack(attws)


if __name__ == "__main__":
    key = jax.random.PRNGKey(0)
    kp, ke, kt = jax.random.split(key, 3)

    params = init_params(kp)
    packed = pack_params(params)                         # packed once, reused per call

    G, T, B = NUM_PROBLEMS, T_STEPS, BATCH
    encoder_outputs = 0.2 * jax.random.normal(ke, (G, MAX_LENGTH, HIDDEN), jnp.float32)
    tokens = jax.random.randint(kt, (G, T, B), 0, OUTPUT, dtype=jnp.int32)
    hidden0 = jnp.zeros((G, B, HIDDEN), jnp.float32)     # initHidden per stream

    log_probs, new_hidden, attn_w = attn_decoder_decode(
        tokens, hidden0, encoder_outputs, params["embedding"], packed)
    jax.block_until_ready((log_probs, new_hidden, attn_w))

    assert log_probs.shape == (G, T, B, OUTPUT)
    assert new_hidden.shape == (G, 1, B, HIDDEN)
    assert attn_w.shape == (G, T, B, MAX_LENGTH)

    for g in range(G):
        ref_lp, ref_h, ref_aw = reference_decode(
            tokens[g], hidden0[g], encoder_outputs[g], params)
        assert np.allclose(np.asarray(log_probs[g]), np.asarray(ref_lp), atol=1e-4)
        assert np.allclose(np.asarray(new_hidden[g]), np.asarray(ref_h), atol=1e-4)
        assert np.allclose(np.asarray(attn_w[g]), np.asarray(ref_aw), atol=1e-4)

    print("KERNEL_OK")
</pallas_src>

<mosaic_0001>
module attributes {stable_mosaic.version = 11 : i64} {
  func.func @_decoder_kernel(%arg0: i32, %arg1: memref<1x48x32xf32, #tpu.memory_space<vmem>>, %arg2: memref<1x8x32xf32, #tpu.memory_space<vmem>>, %arg3: memref<1x128x32xf32, #tpu.memory_space<vmem>>, %arg4: memref<32x640xf32, #tpu.memory_space<vmem>>, %arg5: memref<32x640xf32, #tpu.memory_space<vmem>>, %arg6: memref<32x544xf32, #tpu.memory_space<vmem>>, %arg7: memref<1x1152xf32, #tpu.memory_space<vmem>>, %arg8: memref<1x6x8x128xf32, #tpu.memory_space<vmem>>, %arg9: memref<1x6x8x128xf32, #tpu.memory_space<vmem>>, %arg10: memref<1x8x32xf32, #tpu.memory_space<vmem>>, %arg11: memref<48x640xf32, #tpu.memory_space<vmem>>) attributes {dimension_semantics = [#tpu.dimension_semantics<parallel>], iteration_bounds = array<i64: 2>, scalar_prefetch = 0 : i64, scratch_operands = 1 : i64, tpu.core_type = #tpu.core_type<tc>, window_params = [{transform_indices = @transform_0, window_bounds = array<i64: 1, 48, 32>}, {transform_indices = @transform_1, window_bounds = array<i64: 1, 8, 32>}, {transform_indices = @transform_2, window_bounds = array<i64: 1, 128, 32>}, {pipeline_mode = #tpu.pipeline_mode<synchronous>, transform_indices = @transform_3, window_bounds = array<i64: 32, 640>}, {pipeline_mode = #tpu.pipeline_mode<synchronous>, transform_indices = @transform_4, window_bounds = array<i64: 32, 640>}, {pipeline_mode = #tpu.pipeline_mode<synchronous>, transform_indices = @transform_5, window_bounds = array<i64: 32, 544>}, {pipeline_mode = #tpu.pipeline_mode<synchronous>, transform_indices = @transform_6, window_bounds = array<i64: 1, 1152>}, {transform_indices = @transform_7, window_bounds = array<i64: 1, 6, 8, 128>}, {transform_indices = @transform_8, window_bounds = array<i64: 1, 6, 8, 128>}, {transform_indices = @transform_9, window_bounds = array<i64: 1, 8, 32>}]} {
    %c0 = arith.constant 0 : index
    %c0_0 = arith.constant 0 : index
    %0 = vector.load %arg5[%c0, %c0_0] : memref<32x640xf32, #tpu.memory_space<vmem>>, vector<32x640xf32>
    %c0_1 = arith.constant 0 : index
    %c0_2 = arith.constant 0 : index
    %1 = vector.load %arg6[%c0_1, %c0_2] : memref<32x544xf32, #tpu.memory_space<vmem>>, vector<32x384xf32>
    %c0_3 = arith.constant 0 : index
    %c384 = arith.constant 384 : index
    %2 = vector.load %arg6[%c0_3, %c384] : memref<32x544xf32, #tpu.memory_space<vmem>>, vector<32x128xf32>
    %c0_4 = arith.constant 0 : index
    %c512 = arith.constant 512 : index
    %3 = vector.load %arg6[%c0_4, %c512] : memref<32x544xf32, #tpu.memory_space<vmem>>, vector<32x32xf32>
    %c0_5 = arith.constant 0 : index
    %c0_6 = arith.constant 0 : index
    %4 = vector.load %arg7[%c0_5, %c0_6] : memref<1x1152xf32, #tpu.memory_space<vmem>>, vector<1x640xf32>
    %c0_7 = arith.constant 0 : index
    %c640 = arith.constant 640 : index
    %5 = vector.load %arg7[%c0_7, %c640] : memref<1x1152xf32, #tpu.memory_space<vmem>>, vector<1x384xf32>
    %c0_8 = arith.constant 0 : index
    %c1024 = arith.constant 1024 : index
    %6 = vector.load %arg7[%c0_8, %c1024] : memref<1x1152xf32, #tpu.memory_space<vmem>>, vector<1x128xf32>
    %c0_9 = arith.constant 0 : index
    %c0_10 = arith.constant 0 : index
    %c0_11 = arith.constant 0 : index
    %7 = vector.load %arg3[%c0_9, %c0_10, %c0_11] : memref<1x128x32xf32, #tpu.memory_space<vmem>>, vector<1x128x32xf32>
    %8 = vector.shape_cast %7 : vector<1x128x32xf32> to vector<128x32xf32>
    %cst = arith.constant dense<0.000000e+00> : vector<128x32xf32>
    %9 = tpu.matmul %8, %3, %cst {dimension_numbers = #tpu.dot_dimension_numbers<[1], [0], [0], [1], [0, 0, 1, 1], [], []>, precision = #tpu.contract_precision<fp32>} : vector<128x32xf32>, vector<32x32xf32>, vector<128x32xf32> -> vector<128x32xf32>
    %c0_12 = arith.constant 0 : index
    %c0_13 = arith.constant 0 : index
    %c0_14 = arith.constant 0 : index
    %10 = vector.load %arg1[%c0_12, %c0_13, %c0_14] : memref<1x48x32xf32, #tpu.memory_space<vmem>>, vector<1x48x32xf32>
    %11 = vector.shape_cast %10 : vector<1x48x32xf32> to vector<48x32xf32>
    %c0_15 = arith.constant 0 : index
    %c0_16 = arith.constant 0 : index
    %12 = vector.load %arg4[%c0_15, %c0_16] : memref<32x640xf32, #tpu.memory_space<vmem>>, vector<32x640xf32>
    %cst_17 = arith.constant dense<0.000000e+00> : vector<48x640xf32>
    %13 = tpu.matmul %11, %12, %cst_17 {dimension_numbers = #tpu.dot_dimension_numbers<[1], [0], [0], [1], [0, 0, 1, 1], [], []>, precision = #tpu.contract_precision<fp32>} : vector<48x32xf32>, vector<32x640xf32>, vector<48x640xf32> -> vector<48x640xf32>
    %14 = vector.broadcast %4 : vector<1x640xf32> to vector<48x640xf32>
    %15 = arith.addf %13, %14 : vector<48x640xf32>
    %c0_18 = arith.constant 0 : index
    %c0_19 = arith.constant 0 : index
    %16 = vector.load %arg11[%c0_18, %c0_19] : memref<48x640xf32, #tpu.memory_space<vmem>>, vector<48x640xf32>
    tpu.vector_store %arg11[%c0_18, %c0_19], %15 {strides = array<i32>} : memref<48x640xf32, #tpu.memory_space<vmem>>, vector<48x640xf32>,
    %c0_20 = arith.constant 0 : index
    %c0_21 = arith.constant 0 : index
    %c0_22 = arith.constant 0 : index
    %17 = vector.load %arg2[%c0_20, %c0_21, %c0_22] : memref<1x8x32xf32, #tpu.memory_space<vmem>>, vector<1x8x32xf32>
    %18 = vector.shape_cast %17 : vector<1x8x32xf32> to vector<8x32xf32>
    %c0_23 = arith.constant 0 : index
    %c0_24 = arith.constant 0 : index
    %19 = vector.load %arg11[%c0_23, %c0_24] : memref<48x640xf32, #tpu.memory_space<vmem>>, vector<8x640xf32>
    %cst_25 = arith.constant dense<0.000000e+00> : vector<8x640xf32>
    %20 = tpu.matmul %18, %0, %cst_25 {dimension_numbers = #tpu.dot_dimension_numbers<[1], [0], [0], [1], [0, 0, 1, 1], [], []>, precision = #tpu.contract_precision<fp32>} : vector<8x32xf32>, vector<32x640xf32>, vector<8x640xf32> -> vector<8x640xf32>
    %21 = arith.addf %19, %20 : vector<8x640xf32>
    %22 = vector.extract_strided_slice %21 {offsets = [0, 0], sizes = [8, 128], strides = [1, 1]} : vector<8x640xf32> to vector<8x128xf32>
    %cst_26 = arith.constant dense<0xFF800000> : vector<8xf32>
    %23 = vector.multi_reduction <maximumf>, %22, %cst_26 [1] : vector<8x128xf32> to vector<8xf32>
    %24 = vector.shape_cast %23 : vector<8xf32> to vector<8x1xf32>
    %25 = vector.broadcast %24 : vector<8x1xf32> to vector<8x128xf32>
    %26 = arith.subf %22, %25 : vector<8x128xf32>
    %27 = math.exp %26 : vector<8x128xf32>
    %cst_27 = arith.constant dense<0.000000e+00> : vector<8xf32>
    %28 = vector.multi_reduction <add>, %27, %cst_27 [1] : vector<8x128xf32> to vector<8xf32>
    %29 = vector.shape_cast %28 : vector<8xf32> to vector<8x1xf32>
    %cst_28 = arith.constant dense<0.000000e+00> : vector<8x32xf32>
    %30 = tpu.matmul %27, %9, %cst_28 {dimension_numbers = #tpu.dot_dimension_numbers<[1], [0], [0], [1], [0, 0, 1, 1], [], []>, precision = #tpu.contract_precision<fp32>} : vector<8x128xf32>, vector<128x32xf32>, vector<8x32xf32> -> vector<8x32xf32>
    %31 = tpu.reciprocal %29 {approx = true} : vector<8x1xf32> -> vector<8x1xf32>
    %32 = arith.mulf %29, %31 : vector<8x1xf32>
    %cst_29 = arith.constant 2.000000e+00 : f32
    %33 = vector.broadcast %cst_29 : f32 to vector<8x1xf32>
    %34 = arith.subf %33, %32 : vector<8x1xf32>
    %35 = arith.mulf %31, %34 : vector<8x1xf32>
    %36 = vector.broadcast %35 : vector<8x1xf32> to vector<8x128xf32>
    %37 = arith.mulf %27, %36 : vector<8x128xf32>
    %c0_30 = arith.constant 0 : index
    %c0_31 = arith.constant 0 : index
    %c0_32 = arith.constant 0 : index
    %c0_33 = arith.constant 0 : index
    %38 = vector.load %arg9[%c0_30, %c0_31, %c0_32, %c0_33] : memref<1x6x8x128xf32, #tpu.memory_space<vmem>>, vector<1x1x8x128xf32>
    %39 = vector.shape_cast %38 : vector<1x1x8x128xf32> to vector<8x128xf32>
    %40 = vector.shape_cast %37 : vector<8x128xf32> to vector<1x1x8x128xf32>
    tpu.vector_store %arg9[%c0_30, %c0_31, %c0_32, %c0_33], %40 {strides = array<i32>} : memref<1x6x8x128xf32, #tpu.memory_space<vmem>>, vector<1x1x8x128xf32>,
    %41 = vector.extract_strided_slice %21 {offsets = [0, 128], sizes = [8, 32], strides = [1, 1]} : vector<8x640xf32> to vector<8x32xf32>
    %42 = vector.broadcast %35 : vector<8x1xf32> to vector<8x32xf32>
    %43 = arith.mulf %30, %42 : vector<8x32xf32>
    %44 = arith.addf %41, %43 : vector<8x32xf32>
    %cst_34 = arith.constant 0.000000e+00 : f32
    %45 = vector.broadcast %cst_34 : f32 to vector<8x32xf32>
    %46 = arith.maximumf %44, %45 : vector<8x32xf32>
    %cst_35 = arith.constant dense<0.000000e+00> : vector<8x384xf32>
    %47 = tpu.matmul %46, %1, %cst_35 {dimension_numbers = #tpu.dot_dimension_numbers<[1], [0], [0], [1], [0, 0, 1, 1], [], []>, precision = #tpu.contract_precision<fp32>} : vector<8x32xf32>, vector<32x384xf32>, vector<8x384xf32> -> vector<8x384xf32>
    %48 = vector.broadcast %5 : vector<1x384xf32> to vector<8x384xf32>
    %49 = arith.addf %47, %48 : vector<8x384xf32>
    %50 = vector.extract_strided_slice %49 {offsets = [0, 0], sizes = [8, 128], strides = [1, 1]} : vector<8x384xf32> to vector<8x128xf32>
    %51 = vector.extract_strided_slice %21 {offsets = [0, 256], sizes = [8, 128], strides = [1, 1]} : vector<8x640xf32> to vector<8x128xf32>
    %52 = arith.addf %50, %51 : vector<8x128xf32>
    %53 = arith.negf %52 : vector<8x128xf32>
    %54 = math.exp %53 : vector<8x128xf32>
    %cst_36 = arith.constant 1.000000e+00 : f32
    %55 = vector.broadcast %cst_36 : f32 to vector<8x128xf32>
    %56 = arith.addf %55, %54 : vector<8x128xf32>
    %57 = arith.divf %55, %56 : vector<8x128xf32>
    %58 = vector.extract_strided_slice %49 {offsets = [0, 128], sizes = [8, 128], strides = [1, 1]} : vector<8x384xf32> to vector<8x128xf32>
    %59 = vector.extract_strided_slice %21 {offsets = [0, 384], sizes = [8, 128], strides = [1, 1]} : vector<8x640xf32> to vector<8x128xf32>
    %60 = arith.addf %58, %59 : vector<8x128xf32>
    %61 = arith.negf %60 : vector<8x128xf32>
    %62 = math.exp %61 : vector<8x128xf32>
    %cst_37 = arith.constant 1.000000e+00 : f32
    %63 = vector.broadcast %cst_37 : f32 to vector<8x128xf32>
    %64 = arith.addf %63, %62 : vector<8x128xf32>
    %65 = arith.divf %63, %64 : vector<8x128xf32>
    %66 = vector.extract_strided_slice %49 {offsets = [0, 256], sizes = [8, 128], strides = [1, 1]} : vector<8x384xf32> to vector<8x128xf32>
    %67 = vector.extract_strided_slice %21 {offsets = [0, 512], sizes = [8, 128], strides = [1, 1]} : vector<8x640xf32> to vector<8x128xf32>
    %68 = arith.mulf %57, %67 : vector<8x128xf32>
    %69 = arith.addf %66, %68 : vector<8x128xf32>
    %70 = math.tanh %69 : vector<8x128xf32>
    %71 = vector.extract_strided_slice %65 {offsets = [0, 0], sizes = [8, 32], strides = [1, 1]} : vector<8x128xf32> to vector<8x32xf32>
    %cst_38 = arith.constant 1.000000e+00 : f32
    %72 = vector.broadcast %cst_38 : f32 to vector<8x32xf32>
    %73 = arith.subf %72, %71 : vector<8x32xf32>
    %74 = vector.extract_strided_slice %70 {offsets = [0, 0], sizes = [8, 32], strides = [1, 1]} : vector<8x128xf32> to vector<8x32xf32>
    %75 = arith.mulf %73, %74 : vector<8x32xf32>
    %76 = arith.mulf %71, %18 : vector<8x32xf32>
    %77 = arith.addf %75, %76 : vector<8x32xf32>
    %cst_39 = arith.constant dense<0.000000e+00> : vector<8x128xf32>
    %78 = tpu.matmul %77, %2, %cst_39 {dimension_numbers = #tpu.dot_dimension_numbers<[1], [0], [0], [1], [0, 0, 1, 1], [], []>, precision = #tpu.contract_precision<fp32>} : vector<8x32xf32>, vector<32x128xf32>, vector<8x128xf32> -> vector<8x128xf32>
    %79 = vector.broadcast %6 : vector<1x128xf32> to vector<8x128xf32>
    %80 = arith.addf %78, %79 : vector<8x128xf32>
    %cst_40 = arith.constant dense<0xFF800000> : vector<8xf32>
    %81 = vector.multi_reduction <maximumf>, %80, %cst_40 [1] : vector<8x128xf32> to vector<8xf32>
    %82 = vector.shape_cast %81 : vector<8xf32> to vector<8x1xf32>
    %83 = vector.broadcast %82 : vector<8x1xf32> to vector<8x128xf32>
    %84 = arith.subf %80, %83 : vector<8x128xf32>
    %85 = math.exp %84 : vector<8x128xf32>
    %cst_41 = arith.constant dense<0.000000e+00> : vector<8xf32>
    %86 = vector.multi_reduction <add>, %85, %cst_41 [1] : vector<8x128xf32> to vector<8xf32>
    %87 = vector.shape_cast %86 : vector<8xf32> to vector<8x1xf32>
    %88 = math.log %87 : vector<8x1xf32>
    %89 = arith.addf %88, %82 : vector<8x1xf32>
    %90 = vector.broadcast %89 : vector<8x1xf32> to vector<8x128xf32>
    %91 = arith.subf %80, %90 : vector<8x128xf32>
    %c0_42 = arith.constant 0 : index
    %c0_43 = arith.constant 0 : index
    %c0_44 = arith.constant 0 : index
    %c0_45 = arith.constant 0 : index
    %92 = vector.load %arg8[%c0_42, %c0_43, %c0_44, %c0_45] : memref<1x6x8x128xf32, #tpu.memory_space<vmem>>, vector<1x1x8x128xf32>
    %93 = vector.shape_cast %92 : vector<1x1x8x128xf32> to vector<8x128xf32>
    %94 = vector.shape_cast %91 : vector<8x128xf32> to vector<1x1x8x128xf32>
    tpu.vector_store %arg8[%c0_42, %c0_43, %c0_44, %c0_45], %94 {strides = array<i32>} : memref<1x6x8x128xf32, #tpu.memory_space<vmem>>, vector<1x1x8x128xf32>,
    %c8 = arith.constant 8 : index
    %c0_46 = arith.constant 0 : index
    %95 = vector.load %arg11[%c8, %c0_46] : memref<48x640xf32, #tpu.memory_space<vmem>>, vector<8x640xf32>
    %cst_47 = arith.constant dense<0.000000e+00> : vector<8x640xf32>
    %96 = tpu.matmul %77, %0, %cst_47 {dimension_numbers = #tpu.dot_dimension_numbers<[1], [0], [0], [1], [0, 0, 1, 1], [], []>, precision = #tpu.contract_precision<fp32>} : vector<8x32xf32>, vector<32x640xf32>, vector<8x640xf32> -> vector<8x640xf32>
    %97 = arith.addf %95, %96 : vector<8x640xf32>
    %98 = vector.extract_strided_slice %97 {offsets = [0, 0], sizes = [8, 128], strides = [1, 1]} : vector<8x640xf32> to vector<8x128xf32>
    %cst_48 = arith.constant dense<0xFF800000> : vector<8xf32>
    %99 = vector.multi_reduction <maximumf>, %98, %cst_48 [1] : vector<8x128xf32> to vector<8xf32>
    %100 = vector.shape_cast %99 : vector<8xf32> to vector<8x1xf32>
    %101 = vector.broadcast %100 : vector<8x1xf32> to vector<8x128xf32>
    %102 = arith.subf %98, %101 : vector<8x128xf32>
    %103 = math.exp %102 : vector<8x128xf32>
    %cst_49 = arith.constant dense<0.000000e+00> : vector<8xf32>
    %104 = vector.multi_reduction <add>, %103, %cst_49 [1] : vector<8x128xf32> to vector<8xf32>
    %105 = vector.shape_cast %104 : vector<8xf32> to vector<8x1xf32>
    %cst_50 = arith.constant dense<0.000000e+00> : vector<8x32xf32>
    %106 = tpu.matmul %103, %9, %cst_50 {dimension_numbers = #tpu.dot_dimension_numbers<[1], [0], [0], [1], [0, 0, 1, 1], [], []>, precision = #tpu.contract_precision<fp32>} : vector<8x128xf32>, vector<128x32xf32>, vector<8x32xf32> -> vector<8x32xf32>
    %107 = tpu.reciprocal %105 {approx = true} : vector<8x1xf32> -> vector<8x1xf32>
    %108 = arith.mulf %105, %107 : vector<8x1xf32>
    %cst_51 = arith.constant 2.000000e+00 : f32
    %109 = vector.broadcast %cst_51 : f32 to vector<8x1xf32>
    %110 = arith.subf %109, %108 : vector<8x1xf32>
    %111 = arith.mulf %107, %110 : vector<8x1xf32>
    %112 = vector.broadcast %111 : vector<8x1xf32> to vector<8x128xf32>
    %113 = arith.mulf %103, %112 : vector<8x128xf32>
    %c0_52 = arith.constant 0 : index
    %c1 = arith.constant 1 : index
    %c0_53 = arith.constant 0 : index
    %c0_54 = arith.constant 0 : index
    %114 = vector.load %arg9[%c0_52, %c1, %c0_53, %c0_54] : memref<1x6x8x128xf32, #tpu.memory_space<vmem>>, vector<1x1x8x128xf32>
    %115 = vector.shape_cast %114 : vector<1x1x8x128xf32> to vector<8x128xf32>
    %116 = vector.shape_cast %113 : vector<8x128xf32> to vector<1x1x8x128xf32>
    tpu.vector_store %arg9[%c0_52, %c1, %c0_53, %c0_54], %116 {strides = array<i32>} : memref<1x6x8x128xf32, #tpu.memory_space<vmem>>, vector<1x1x8x128xf32>,
    %117 = vector.extract_strided_slice %97 {offsets = [0, 128], sizes = [8, 32], strides = [1, 1]} : vector<8x640xf32> to vector<8x32xf32>
    %118 = vector.broadcast %111 : vector<8x1xf32> to vector<8x32xf32>
    %119 = arith.mulf %106, %118 : vector<8x32xf32>
    %120 = arith.addf %117, %119 : vector<8x32xf32>
    %cst_55 = arith.constant 0.000000e+00 : f32
    %121 = vector.broadcast %cst_55 : f32 to vector<8x32xf32>
    %122 = arith.maximumf %120, %121 : vector<8x32xf32>
    %cst_56 = arith.constant dense<0.000000e+00> : vector<8x384xf32>
    %123 = tpu.matmul %122, %1, %cst_56 {dimension_numbers = #tpu.dot_dimension_numbers<[1], [0], [0], [1], [0, 0, 1, 1], [], []>, precision = #tpu.contract_precision<fp32>} : vector<8x32xf32>, vector<32x384xf32>, vector<8x384xf32> -> vector<8x384xf32>
    %124 = vector.broadcast %5 : vector<1x384xf32> to vector<8x384xf32>
    %125 = arith.addf %123, %124 : vector<8x384xf32>
    %126 = vector.extract_strided_slice %125 {offsets = [0, 0], sizes = [8, 128], strides = [1, 1]} : vector<8x384xf32> to vector<8x128xf32>
    %127 = vector.extract_strided_slice %97 {offsets = [0, 256], sizes = [8, 128], strides = [1, 1]} : vector<8x640xf32> to vector<8x128xf32>
    %128 = arith.addf %126, %127 : vector<8x128xf32>
    %129 = arith.negf %128 : vector<8x128xf32>
    %130 = math.exp %129 : vector<8x128xf32>
    %cst_57 = arith.constant 1.000000e+00 : f32
    %131 = vector.broadcast %cst_57 : f32 to vector<8x128xf32>
    %132 = arith.addf %131, %130 : vector<8x128xf32>
    %133 = arith.divf %131, %132 : vector<8x128xf32>
    %134 = vector.extract_strided_slice %125 {offsets = [0, 128], sizes = [8, 128], strides = [1, 1]} : vector<8x384xf32> to vector<8x128xf32>
    %135 = vector.extract_strided_slice %97 {offsets = [0, 384], sizes = [8, 128], strides = [1, 1]} : vector<8x640xf32> to vector<8x128xf32>
    %136 = arith.addf %134, %135 : vector<8x128xf32>
    %137 = arith.negf %136 : vector<8x128xf32>
    %138 = math.exp %137 : vector<8x128xf32>
    %cst_58 = arith.constant 1.000000e+00 : f32
    %139 = vector.broadcast %cst_58 : f32 to vector<8x128xf32>
    %140 = arith.addf %139, %138 : vector<8x128xf32>
    %141 = arith.divf %139, %140 : vector<8x128xf32>
    %142 = vector.extract_strided_slice %125 {offsets = [0, 256], sizes = [8, 128], strides = [1, 1]} : vector<8x384xf32> to vector<8x128xf32>
    %143 = vector.extract_strided_slice %97 {offsets = [0, 512], sizes = [8, 128], strides = [1, 1]} : vector<8x640xf32> to vector<8x128xf32>
    %144 = arith.mulf %133, %143 : vector<8x128xf32>
    %145 = arith.addf %142, %144 : vector<8x128xf32>
    %146 = math.tanh %145 : vector<8x128xf32>
    %147 = vector.extract_strided_slice %141 {offsets = [0, 0], sizes = [8, 32], strides = [1, 1]} : vector<8x128xf32> to vector<8x32xf32>
    %cst_59 = arith.constant 1.000000e+00 : f32
    %148 = vector.broadcast %cst_59 : f32 to vector<8x32xf32>
    %149 = arith.subf %148, %147 : vector<8x32xf32>
    %150 = vector.extract_strided_slice %146 {offsets = [0, 0], sizes = [8, 32], strides = [1, 1]} : vector<8x128xf32> to vector<8x32xf32>
    %151 = arith.mulf %149, %150 : vector<8x32xf32>
    %152 = arith.mulf %147, %77 : vector<8x32xf32>
    %153 = arith.addf %151, %152 : vector<8x32xf32>
    %cst_60 = arith.constant dense<0.000000e+00> : vector<8x128xf32>
    %154 = tpu.matmul %153, %2, %cst_60 {dimension_numbers = #tpu.dot_dimension_numbers<[1], [0], [0], [1], [0, 0, 1, 1], [], []>, precision = #tpu.contract_precision<fp32>} : vector<8x32xf32>, vector<32x128xf32>, vector<8x128xf32> -> vector<8x128xf32>
    %155 = vector.broadcast %6 : vector<1x128xf32> to vector<8x128xf32>
    %156 = arith.addf %154, %155 : vector<8x128xf32>
    %cst_61 = arith.constant dense<0xFF800000> : vector<8xf32>
    %157 = vector.multi_reduction <maximumf>, %156, %cst_61 [1] : vector<8x128xf32> to vector<8xf32>
    %158 = vector.shape_cast %157 : vector<8xf32> to vector<8x1xf32>
    %159 = vector.broadcast %158 : vector<8x1xf32> to vector<8x128xf32>
    %160 = arith.subf %156, %159 : vector<8x128xf32>
    %161 = math.exp %160 : vector<8x128xf32>
    %cst_62 = arith.constant dense<0.000000e+00> : vector<8xf32>
    %162 = vector.multi_reduction <add>, %161, %cst_62 [1] : vector<8x128xf32> to vector<8xf32>
    %163 = vector.shape_cast %162 : vector<8xf32> to vector<8x1xf32>
    %164 = math.log %163 : vector<8x1xf32>
    %165 = arith.addf %164, %158 : vector<8x1xf32>
    %166 = vector.broadcast %165 : vector<8x1xf32> to vector<8x128xf32>
    %167 = arith.subf %156, %166 : vector<8x128xf32>
    %c0_63 = arith.constant 0 : index
    %c1_64 = arith.constant 1 : index
    %c0_65 = arith.constant 0 : index
    %c0_66 = arith.constant 0 : index
    %168 = vector.load %arg8[%c0_63, %c1_64, %c0_65, %c0_66] : memref<1x6x8x128xf32, #tpu.memory_space<vmem>>, vector<1x1x8x128xf32>
    %169 = vector.shape_cast %168 : vector<1x1x8x128xf32> to vector<8x128xf32>
    %170 = vector.shape_cast %167 : vector<8x128xf32> to vector<1x1x8x128xf32>
    tpu.vector_store %arg8[%c0_63, %c1_64, %c0_65, %c0_66], %170 {strides = array<i32>} : memref<1x6x8x128xf32, #tpu.memory_space<vmem>>, vector<1x1x8x128xf32>,
    %c16 = arith.constant 16 : index
    %c0_67 = arith.constant 0 : index
    %171 = vector.load %arg11[%c16, %c0_67] : memref<48x640xf32, #tpu.memory_space<vmem>>, vector<8x640xf32>
    %cst_68 = arith.constant dense<0.000000e+00> : vector<8x640xf32>
    %172 = tpu.matmul %153, %0, %cst_68 {dimension_numbers = #tpu.dot_dimension_numbers<[1], [0], [0], [1], [0, 0, 1, 1], [], []>, precision = #tpu.contract_precision<fp32>} : vector<8x32xf32>, vector<32x640xf32>, vector<8x640xf32> -> vector<8x640xf32>
    %173 = arith.addf %171, %172 : vector<8x640xf32>
    %174 = vector.extract_strided_slice %173 {offsets = [0, 0], sizes = [8, 128], strides = [1, 1]} : vector<8x640xf32> to vector<8x128xf32>
    %cst_69 = arith.constant dense<0xFF800000> : vector<8xf32>
    %175 = vector.multi_reduction <maximumf>, %174, %cst_69 [1] : vector<8x128xf32> to vector<8xf32>
    %176 = vector.shape_cast %175 : vector<8xf32> to vector<8x1xf32>
    %177 = vector.broadcast %176 : vector<8x1xf32> to vector<8x128xf32>
    %178 = arith.subf %174, %177 : vector<8x128xf32>
    %179 = math.exp %178 : vector<8x128xf32>
    %cst_70 = arith.constant dense<0.000000e+00> : vector<8xf32>
    %180 = vector.multi_reduction <add>, %179, %cst_70 [1] : vector<8x128xf32> to vector<8xf32>
    %181 = vector.shape_cast %180 : vector<8xf32> to vector<8x1xf32>
    %cst_71 = arith.constant dense<0.000000e+00> : vector<8x32xf32>
    %182 = tpu.matmul %179, %9, %cst_71 {dimension_numbers = #tpu.dot_dimension_numbers<[1], [0], [0], [1], [0, 0, 1, 1], [], []>, precision = #tpu.contract_precision<fp32>} : vector<8x128xf32>, vector<128x32xf32>, vector<8x32xf32> -> vector<8x32xf32>
    %183 = tpu.reciprocal %181 {approx = true} : vector<8x1xf32> -> vector<8x1xf32>
    %184 = arith.mulf %181, %183 : vector<8x1xf32>
    %cst_72 = arith.constant 2.000000e+00 : f32
    %185 = vector.broadcast %cst_72 : f32 to vector<8x1xf32>
    %186 = arith.subf %185, %184 : vector<8x1xf32>
    %187 = arith.mulf %183, %186 : vector<8x1xf32>
    %188 = vector.broadcast %187 : vector<8x1xf32> to vector<8x128xf32>
    %189 = arith.mulf %179, %188 : vector<8x128xf32>
    %c0_73 = arith.constant 0 : index
    %c2 = arith.constant 2 : index
    %c0_74 = arith.constant 0 : index
    %c0_75 = arith.constant 0 : index
    %190 = vector.load %arg9[%c0_73, %c2, %c0_74, %c0_75] : memref<1x6x8x128xf32, #tpu.memory_space<vmem>>, vector<1x1x8x128xf32>
    %191 = vector.shape_cast %190 : vector<1x1x8x128xf32> to vector<8x128xf32>
    %192 = vector.shape_cast %189 : vector<8x128xf32> to vector<1x1x8x128xf32>
    tpu.vector_store %arg9[%c0_73, %c2, %c0_74, %c0_75], %192 {strides = array<i32>} : memref<1x6x8x128xf32, #tpu.memory_space<vmem>>, vector<1x1x8x128xf32>,
    %193 = vector.extract_strided_slice %173 {offsets = [0, 128], sizes = [8, 32], strides = [1, 1]} : vector<8x640xf32> to vector<8x32xf32>
    %194 = vector.broadcast %187 : vector<8x1xf32> to vector<8x32xf32>
    %195 = arith.mulf %182, %194 : vector<8x32xf32>
    %196 = arith.addf %193, %195 : vector<8x32xf32>
    %cst_76 = arith.constant 0.000000e+00 : f32
    %197 = vector.broadcast %cst_76 : f32 to vector<8x32xf32>
    %198 = arith.maximumf %196, %197 : vector<8x32xf32>
    %cst_77 = arith.constant dense<0.000000e+00> : vector<8x384xf32>
    %199 = tpu.matmul %198, %1, %cst_77 {dimension_numbers = #tpu.dot_dimension_numbers<[1], [0], [0], [1], [0, 0, 1, 1], [], []>, precision = #tpu.contract_precision<fp32>} : vector<8x32xf32>, vector<32x384xf32>, vector<8x384xf32> -> vector<8x384xf32>
    %200 = vector.broadcast %5 : vector<1x384xf32> to vector<8x384xf32>
    %201 = arith.addf %199, %200 : vector<8x384xf32>
    %202 = vector.extract_strided_slice %201 {offsets = [0, 0], sizes = [8, 128], strides = [1, 1]} : vector<8x384xf32> to vector<8x128xf32>
    %203 = vector.extract_strided_slice %173 {offsets = [0, 256], sizes = [8, 128], strides = [1, 1]} : vector<8x640xf32> to vector<8x128xf32>
    %204 = arith.addf %202, %203 : vector<8x128xf32>
    %205 = arith.negf %204 : vector<8x128xf32>
    %206 = math.exp %205 : vector<8x128xf32>
    %cst_78 = arith.constant 1.000000e+00 : f32
    %207 = vector.broadcast %cst_78 : f32 to vector<8x128xf32>
    %208 = arith.addf %207, %206 : vector<8x128xf32>
    %209 = arith.divf %207, %208 : vector<8x128xf32>
    %210 = vector.extract_strided_slice %201 {offsets = [0, 128], sizes = [8, 128], strides = [1, 1]} : vector<8x384xf32> to vector<8x128xf32>
    %211 = vector.extract_strided_slice %173 {offsets = [0, 384], sizes = [8, 128], strides = [1, 1]} : vector<8x640xf32> to vector<8x128xf32>
    %212 = arith.addf %210, %211 : vector<8x128xf32>
    %213 = arith.negf %212 : vector<8x128xf32>
    %214 = math.exp %213 : vector<8x128xf32>
    %cst_79 = arith.constant 1.000000e+00 : f32
    %215 = vector.broadcast %cst_79 : f32 to vector<8x128xf32>
    %216 = arith.addf %215, %214 : vector<8x128xf32>
    %217 = arith.divf %215, %216 : vector<8x128xf32>
    %218 = vector.extract_strided_slice %201 {offsets = [0, 256], sizes = [8, 128], strides = [1, 1]} : vector<8x384xf32> to vector<8x128xf32>
    %219 = vector.extract_strided_slice %173 {offsets = [0, 512], sizes = [8, 128], strides = [1, 1]} : vector<8x640xf32> to vector<8x128xf32>
    %220 = arith.mulf %209, %219 : vector<8x128xf32>
    %221 = arith.addf %218, %220 : vector<8x128xf32>
    %222 = math.tanh %221 : vector<8x128xf32>
    %223 = vector.extract_strided_slice %217 {offsets = [0, 0], sizes = [8, 32], strides = [1, 1]} : vector<8x128xf32> to vector<8x32xf32>
    %cst_80 = arith.constant 1.000000e+00 : f32
    %224 = vector.broadcast %cst_80 : f32 to vector<8x32xf32>
    %225 = arith.subf %224, %223 : vector<8x32xf32>
    %226 = vector.extract_strided_slice %222 {offsets = [0, 0], sizes = [8, 32], strides = [1, 1]} : vector<8x128xf32> to vector<8x32xf32>
    %227 = arith.mulf %225, %226 : vector<8x32xf32>
    %228 = arith.mulf %223, %153 : vector<8x32xf32>
    %229 = arith.addf %227, %228 : vector<8x32xf32>
    %cst_81 = arith.constant dense<0.000000e+00> : vector<8x128xf32>
    %230 = tpu.matmul %229, %2, %cst_81 {dimension_numbers = #tpu.dot_dimension_numbers<[1], [0], [0], [1], [0, 0, 1, 1], [], []>, precision = #tpu.contract_precision<fp32>} : vector<8x32xf32>, vector<32x128xf32>, vector<8x128xf32> -> vector<8x128xf32>
    %231 = vector.broadcast %6 : vector<1x128xf32> to vector<8x128xf32>
    %232 = arith.addf %230, %231 : vector<8x128xf32>
    %cst_82 = arith.constant dense<0xFF800000> : vector<8xf32>
    %233 = vector.multi_reduction <maximumf>, %232, %cst_82 [1] : vector<8x128xf32> to vector<8xf32>
    %234 = vector.shape_cast %233 : vector<8xf32> to vector<8x1xf32>
    %235 = vector.broadcast %234 : vector<8x1xf32> to vector<8x128xf32>
    %236 = arith.subf %232, %235 : vector<8x128xf32>
    %237 = math.exp %236 : vector<8x128xf32>
    %cst_83 = arith.constant dense<0.000000e+00> : vector<8xf32>
    %238 = vector.multi_reduction <add>, %237, %cst_83 [1] : vector<8x128xf32> to vector<8xf32>
    %239 = vector.shape_cast %238 : vector<8xf32> to vector<8x1xf32>
    %240 = math.log %239 : vector<8x1xf32>
    %241 = arith.addf %240, %234 : vector<8x1xf32>
    %242 = vector.broadcast %241 : vector<8x1xf32> to vector<8x128xf32>
    %243 = arith.subf %232, %242 : vector<8x128xf32>
    %c0_84 = arith.constant 0 : index
    %c2_85 = arith.constant 2 : index
    %c0_86 = arith.constant 0 : index
    %c0_87 = arith.constant 0 : index
    %244 = vector.load %arg8[%c0_84, %c2_85, %c0_86, %c0_87] : memref<1x6x8x128xf32, #tpu.memory_space<vmem>>, vector<1x1x8x128xf32>
    %245 = vector.shape_cast %244 : vector<1x1x8x128xf32> to vector<8x128xf32>
    %246 = vector.shape_cast %243 : vector<8x128xf32> to vector<1x1x8x128xf32>
    tpu.vector_store %arg8[%c0_84, %c2_85, %c0_86, %c0_87], %246 {strides = array<i32>} : memref<1x6x8x128xf32, #tpu.memory_space<vmem>>, vector<1x1x8x128xf32>,
    %c24 = arith.constant 24 : index
    %c0_88 = arith.constant 0 : index
    %247 = vector.load %arg11[%c24, %c0_88] : memref<48x640xf32, #tpu.memory_space<vmem>>, vector<8x640xf32>
    %cst_89 = arith.constant dense<0.000000e+00> : vector<8x640xf32>
    %248 = tpu.matmul %229, %0, %cst_89 {dimension_numbers = #tpu.dot_dimension_numbers<[1], [0], [0], [1], [0, 0, 1, 1], [], []>, precision = #tpu.contract_precision<fp32>} : vector<8x32xf32>, vector<32x640xf32>, vector<8x640xf32> -> vector<8x640xf32>
    %249 = arith.addf %247, %248 : vector<8x640xf32>
    %250 = vector.extract_strided_slice %249 {offsets = [0, 0], sizes = [8, 128], strides = [1, 1]} : vector<8x640xf32> to vector<8x128xf32>
    %cst_90 = arith.constant dense<0xFF800000> : vector<8xf32>
    %251 = vector.multi_reduction <maximumf>, %250, %cst_90 [1] : vector<8x128xf32> to vector<8xf32>
    %252 = vector.shape_cast %251 : vector<8xf32> to vector<8x1xf32>
    %253 = vector.broadcast %252 : vector<8x1xf32> to vector<8x128xf32>
    %254 = arith.subf %250, %253 : vector<8x128xf32>
    %255 = math.exp %254 : vector<8x128xf32>
    %cst_91 = arith.constant dense<0.000000e+00> : vector<8xf32>
    %256 = vector.multi_reduction <add>, %255, %cst_91 [1] : vector<8x128xf32> to vector<8xf32>
    %257 = vector.shape_cast %256 : vector<8xf32> to vector<8x1xf32>
    %cst_92 = arith.constant dense<0.000000e+00> : vector<8x32xf32>
    %258 = tpu.matmul %255, %9, %cst_92 {dimension_numbers = #tpu.dot_dimension_numbers<[1], [0], [0], [1], [0, 0, 1, 1], [], []>, precision = #tpu.contract_precision<fp32>} : vector<8x128xf32>, vector<128x32xf32>, vector<8x32xf32> -> vector<8x32xf32>
    %259 = tpu.reciprocal %257 {approx = true} : vector<8x1xf32> -> vector<8x1xf32>
    %260 = arith.mulf %257, %259 : vector<8x1xf32>
    %cst_93 = arith.constant 2.000000e+00 : f32
    %261 = vector.broadcast %cst_93 : f32 to vector<8x1xf32>
    %262 = arith.subf %261, %260 : vector<8x1xf32>
    %263 = arith.mulf %259, %262 : vector<8x1xf32>
    %264 = vector.broadcast %263 : vector<8x1xf32> to vector<8x128xf32>
    %265 = arith.mulf %255, %264 : vector<8x128xf32>
    %c0_94 = arith.constant 0 : index
    %c3 = arith.constant 3 : index
    %c0_95 = arith.constant 0 : index
    %c0_96 = arith.constant 0 : index
    %266 = vector.load %arg9[%c0_94, %c3, %c0_95, %c0_96] : memref<1x6x8x128xf32, #tpu.memory_space<vmem>>, vector<1x1x8x128xf32>
    %267 = vector.shape_cast %266 : vector<1x1x8x128xf32> to vector<8x128xf32>
    %268 = vector.shape_cast %265 : vector<8x128xf32> to vector<1x1x8x128xf32>
    tpu.vector_store %arg9[%c0_94, %c3, %c0_95, %c0_96], %268 {strides = array<i32>} : memref<1x6x8x128xf32, #tpu.memory_space<vmem>>, vector<1x1x8x128xf32>,
    %269 = vector.extract_strided_slice %249 {offsets = [0, 128], sizes = [8, 32], strides = [1, 1]} : vector<8x640xf32> to vector<8x32xf32>
    %270 = vector.broadcast %263 : vector<8x1xf32> to vector<8x32xf32>
    %271 = arith.mulf %258, %270 : vector<8x32xf32>
    %272 = arith.addf %269, %271 : vector<8x32xf32>
    %cst_97 = arith.constant 0.000000e+00 : f32
    %273 = vector.broadcast %cst_97 : f32 to vector<8x32xf32>
    %274 = arith.maximumf %272, %273 : vector<8x32xf32>
    %cst_98 = arith.constant dense<0.000000e+00> : vector<8x384xf32>
    %275 = tpu.matmul %274, %1, %cst_98 {dimension_numbers = #tpu.dot_dimension_numbers<[1], [0], [0], [1], [0, 0, 1, 1], [], []>, precision = #tpu.contract_precision<fp32>} : vector<8x32xf32>, vector<32x384xf32>, vector<8x384xf32> -> vector<8x384xf32>
    %276 = vector.broadcast %5 : vector<1x384xf32> to vector<8x384xf32>
    %277 = arith.addf %275, %276 : vector<8x384xf32>
    %278 = vector.extract_strided_slice %277 {offsets = [0, 0], sizes = [8, 128], strides = [1, 1]} : vector<8x384xf32> to vector<8x128xf32>
    %279 = vector.extract_strided_slice %249 {offsets = [0, 256], sizes = [8, 128], strides = [1, 1]} : vector<8x640xf32> to vector<8x128xf32>
    %280 = arith.addf %278, %279 : vector<8x128xf32>
    %281 = arith.negf %280 : vector<8x128xf32>
    %282 = math.exp %281 : vector<8x128xf32>
    %cst_99 = arith.constant 1.000000e+00 : f32
    %283 = vector.broadcast %cst_99 : f32 to vector<8x128xf32>
    %284 = arith.addf %283, %282 : vector<8x128xf32>
    %285 = arith.divf %283, %284 : vector<8x128xf32>
    %286 = vector.extract_strided_slice %277 {offsets = [0, 128], sizes = [8, 128], strides = [1, 1]} : vector<8x384xf32> to vector<8x128xf32>
    %287 = vector.extract_strided_slice %249 {offsets = [0, 384], sizes = [8, 128], strides = [1, 1]} : vector<8x640xf32> to vector<8x128xf32>
    %288 = arith.addf %286, %287 : vector<8x128xf32>
    %289 = arith.negf %288 : vector<8x128xf32>
    %290 = math.exp %289 : vector<8x128xf32>
    %cst_100 = arith.constant 1.000000e+00 : f32
    %291 = vector.broadcast %cst_100 : f32 to vector<8x128xf32>
    %292 = arith.addf %291, %290 : vector<8x128xf32>
    %293 = arith.divf %291, %292 : vector<8x128xf32>
    %294 = vector.extract_strided_slice %277 {offsets = [0, 256], sizes = [8, 128], strides = [1, 1]} : vector<8x384xf32> to vector<8x128xf32>
    %295 = vector.extract_strided_slice %249 {offsets = [0, 512], sizes = [8, 128], strides = [1, 1]} : vector<8x640xf32> to vector<8x128xf32>
    %296 = arith.mulf %285, %295 : vector<8x128xf32>
    %297 = arith.addf %294, %296 : vector<8x128xf32>
    %298 = math.tanh %297 : vector<8x128xf32>
    %299 = vector.extract_strided_slice %293 {offsets = [0, 0], sizes = [8, 32], strides = [1, 1]} : vector<8x128xf32> to vector<8x32xf32>
    %cst_101 = arith.constant 1.000000e+00 : f32
    %300 = vector.broadcast %cst_101 : f32 to vector<8x32xf32>
    %301 = arith.subf %300, %299 : vector<8x32xf32>
    %302 = vector.extract_strided_slice %298 {offsets = [0, 0], sizes = [8, 32], strides = [1, 1]} : vector<8x128xf32> to vector<8x32xf32>
    %303 = arith.mulf %301, %302 : vector<8x32xf32>
    %304 = arith.mulf %299, %229 : vector<8x32xf32>
    %305 = arith.addf %303, %304 : vector<8x32xf32>
    %cst_102 = arith.constant dense<0.000000e+00> : vector<8x128xf32>
    %306 = tpu.matmul %305, %2, %cst_102 {dimension_numbers = #tpu.dot_dimension_numbers<[1], [0], [0], [1], [0, 0, 1, 1], [], []>, precision = #tpu.contract_precision<fp32>} : vector<8x32xf32>, vector<32x128xf32>, vector<8x128xf32> -> vector<8x128xf32>
    %307 = vector.broadcast %6 : vector<1x128xf32> to vector<8x128xf32>
    %308 = arith.addf %306, %307 : vector<8x128xf32>
    %cst_103 = arith.constant dense<0xFF800000> : vector<8xf32>
    %309 = vector.multi_reduction <maximumf>, %308, %cst_103 [1] : vector<8x128xf32> to vector<8xf32>
    %310 = vector.shape_cast %309 : vector<8xf32> to vector<8x1xf32>
    %311 = vector.broadcast %310 : vector<8x1xf32> to vector<8x128xf32>
    %312 = arith.subf %308, %311 : vector<8x128xf32>
    %313 = math.exp %312 : vector<8x128xf32>
    %cst_104 = arith.constant dense<0.000000e+00> : vector<8xf32>
    %314 = vector.multi_reduction <add>, %313, %cst_104 [1] : vector<8x128xf32> to vector<8xf32>
    %315 = vector.shape_cast %314 : vector<8xf32> to vector<8x1xf32>
    %316 = math.log %315 : vector<8x1xf32>
    %317 = arith.addf %316, %310 : vector<8x1xf32>
    %318 = vector.broadcast %317 : vector<8x1xf32> to vector<8x128xf32>
    %319 = arith.subf %308, %318 : vector<8x128xf32>
    %c0_105 = arith.constant 0 : index
    %c3_106 = arith.constant 3 : index
    %c0_107 = arith.constant 0 : index
    %c0_108 = arith.constant 0 : index
    %320 = vector.load %arg8[%c0_105, %c3_106, %c0_107, %c0_108] : memref<1x6x8x128xf32, #tpu.memory_space<vmem>>, vector<1x1x8x128xf32>
    %321 = vector.shape_cast %320 : vector<1x1x8x128xf32> to vector<8x128xf32>
    %322 = vector.shape_cast %319 : vector<8x128xf32> to vector<1x1x8x128xf32>
    tpu.vector_store %arg8[%c0_105, %c3_106, %c0_107, %c0_108], %322 {strides = array<i32>} : memref<1x6x8x128xf32, #tpu.memory_space<vmem>>, vector<1x1x8x128xf32>,
    %c32 = arith.constant 32 : index
    %c0_109 = arith.constant 0 : index
    %323 = vector.load %arg11[%c32, %c0_109] : memref<48x640xf32, #tpu.memory_space<vmem>>, vector<8x640xf32>
    %cst_110 = arith.constant dense<0.000000e+00> : vector<8x640xf32>
    %324 = tpu.matmul %305, %0, %cst_110 {dimension_numbers = #tpu.dot_dimension_numbers<[1], [0], [0], [1], [0, 0, 1, 1], [], []>, precision = #tpu.contract_precision<fp32>} : vector<8x32xf32>, vector<32x640xf32>, vector<8x640xf32> -> vector<8x640xf32>
    %325 = arith.addf %323, %324 : vector<8x640xf32>
    %326 = vector.extract_strided_slice %325 {offsets = [0, 0], sizes = [8, 128], strides = [1, 1]} : vector<8x640xf32> to vector<8x128xf32>
    %cst_111 = arith.constant dense<0xFF800000> : vector<8xf32>
    %327 = vector.multi_reduction <maximumf>, %326, %cst_111 [1] : vector<8x128xf32> to vector<8xf32>
    %328 = vector.shape_cast %327 : vector<8xf32> to vector<8x1xf32>
    %329 = vector.broadcast %328 : vector<8x1xf32> to vector<8x128xf32>
    %330 = arith.subf %326, %329 : vector<8x128xf32>
    %331 = math.exp %330 : vector<8x128xf32>
    %cst_112 = arith.constant dense<0.000000e+00> : vector<8xf32>
    %332 = vector.multi_reduction <add>, %331, %cst_112 [1] : vector<8x128xf32> to vector<8xf32>
    %333 = vector.shape_cast %332 : vector<8xf32> to vector<8x1xf32>
    %cst_113 = arith.constant dense<0.000000e+00> : vector<8x32xf32>
    %334 = tpu.matmul %331, %9, %cst_113 {dimension_numbers = #tpu.dot_dimension_numbers<[1], [0], [0], [1], [0, 0, 1, 1], [], []>, precision = #tpu.contract_precision<fp32>} : vector<8x128xf32>, vector<128x32xf32>, vector<8x32xf32> -> vector<8x32xf32>
    %335 = tpu.reciprocal %333 {approx = true} : vector<8x1xf32> -> vector<8x1xf32>
    %336 = arith.mulf %333, %335 : vector<8x1xf32>
    %cst_114 = arith.constant 2.000000e+00 : f32
    %337 = vector.broadcast %cst_114 : f32 to vector<8x1xf32>
    %338 = arith.subf %337, %336 : vector<8x1xf32>
    %339 = arith.mulf %335, %338 : vector<8x1xf32>
    %340 = vector.broadcast %339 : vector<8x1xf32> to vector<8x128xf32>
    %341 = arith.mulf %331, %340 : vector<8x128xf32>
    %c0_115 = arith.constant 0 : index
    %c4 = arith.constant 4 : index
    %c0_116 = arith.constant 0 : index
    %c0_117 = arith.constant 0 : index
    %342 = vector.load %arg9[%c0_115, %c4, %c0_116, %c0_117] : memref<1x6x8x128xf32, #tpu.memory_space<vmem>>, vector<1x1x8x128xf32>
    %343 = vector.shape_cast %342 : vector<1x1x8x128xf32> to vector<8x128xf32>
    %344 = vector.shape_cast %341 : vector<8x128xf32> to vector<1x1x8x128xf32>
    tpu.vector_store %arg9[%c0_115, %c4, %c0_116, %c0_117], %344 {strides = array<i32>} : memref<1x6x8x128xf32, #tpu.memory_space<vmem>>, vector<1x1x8x128xf32>,
    %345 = vector.extract_strided_slice %325 {offsets = [0, 128], sizes = [8, 32], strides = [1, 1]} : vector<8x640xf32> to vector<8x32xf32>
    %346 = vector.broadcast %339 : vector<8x1xf32> to vector<8x32xf32>
    %347 = arith.mulf %334, %346 : vector<8x32xf32>
    %348 = arith.addf %345, %347 : vector<8x32xf32>
    %cst_118 = arith.constant 0.000000e+00 : f32
    %349 = vector.broadcast %cst_118 : f32 to vector<8x32xf32>
    %350 = arith.maximumf %348, %349 : vector<8x32xf32>
    %cst_119 = arith.constant dense<0.000000e+00> : vector<8x384xf32>
    %351 = tpu.matmul %350, %1, %cst_119 {dimension_numbers = #tpu.dot_dimension_numbers<[1], [0], [0], [1], [0, 0, 1, 1], [], []>, precision = #tpu.contract_precision<fp32>} : vector<8x32xf32>, vector<32x384xf32>, vector<8x384xf32> -> vector<8x384xf32>
    %352 = vector.broadcast %5 : vector<1x384xf32> to vector<8x384xf32>
    %353 = arith.addf %351, %352 : vector<8x384xf32>
    %354 = vector.extract_strided_slice %353 {offsets = [0, 0], sizes = [8, 128], strides = [1, 1]} : vector<8x384xf32> to vector<8x128xf32>
    %355 = vector.extract_strided_slice %325 {offsets = [0, 256], sizes = [8, 128], strides = [1, 1]} : vector<8x640xf32> to vector<8x128xf32>
    %356 = arith.addf %354, %355 : vector<8x128xf32>
    %357 = arith.negf %356 : vector<8x128xf32>
    %358 = math.exp %357 : vector<8x128xf32>
    %cst_120 = arith.constant 1.000000e+00 : f32
    %359 = vector.broadcast %cst_120 : f32 to vector<8x128xf32>
    %360 = arith.addf %359, %358 : vector<8x128xf32>
    %361 = arith.divf %359, %360 : vector<8x128xf32>
    %362 = vector.extract_strided_slice %353 {offsets = [0, 128], sizes = [8, 128], strides = [1, 1]} : vector<8x384xf32> to vector<8x128xf32>
    %363 = vector.extract_strided_slice %325 {offsets = [0, 384], sizes = [8, 128], strides = [1, 1]} : vector<8x640xf32> to vector<8x128xf32>
    %364 = arith.addf %362, %363 : vector<8x128xf32>
    %365 = arith.negf %364 : vector<8x128xf32>
    %366 = math.exp %365 : vector<8x128xf32>
    %cst_121 = arith.constant 1.000000e+00 : f32
    %367 = vector.broadcast %cst_121 : f32 to vector<8x128xf32>
    %368 = arith.addf %367, %366 : vector<8x128xf32>
    %369 = arith.divf %367, %368 : vector<8x128xf32>
    %370 = vector.extract_strided_slice %353 {offsets = [0, 256], sizes = [8, 128], strides = [1, 1]} : vector<8x384xf32> to vector<8x128xf32>
    %371 = vector.extract_strided_slice %325 {offsets = [0, 512], sizes = [8, 128], strides = [1, 1]} : vector<8x640xf32> to vector<8x128xf32>
    %372 = arith.mulf %361, %371 : vector<8x128xf32>
    %373 = arith.addf %370, %372 : vector<8x128xf32>
    %374 = math.tanh %373 : vector<8x128xf32>
    %375 = vector.extract_strided_slice %369 {offsets = [0, 0], sizes = [8, 32], strides = [1, 1]} : vector<8x128xf32> to vector<8x32xf32>
    %cst_122 = arith.constant 1.000000e+00 : f32
    %376 = vector.broadcast %cst_122 : f32 to vector<8x32xf32>
    %377 = arith.subf %376, %375 : vector<8x32xf32>
    %378 = vector.extract_strided_slice %374 {offsets = [0, 0], sizes = [8, 32], strides = [1, 1]} : vector<8x128xf32> to vector<8x32xf32>
    %379 = arith.mulf %377, %378 : vector<8x32xf32>
    %380 = arith.mulf %375, %305 : vector<8x32xf32>
    %381 = arith.addf %379, %380 : vector<8x32xf32>
    %cst_123 = arith.constant dense<0.000000e+00> : vector<8x128xf32>
    %382 = tpu.matmul %381, %2, %cst_123 {dimension_numbers = #tpu.dot_dimension_numbers<[1], [0], [0], [1], [0, 0, 1, 1], [], []>, precision = #tpu.contract_precision<fp32>} : vector<8x32xf32>, vector<32x128xf32>, vector<8x128xf32> -> vector<8x128xf32>
    %383 = vector.broadcast %6 : vector<1x128xf32> to vector<8x128xf32>
    %384 = arith.addf %382, %383 : vector<8x128xf32>
    %cst_124 = arith.constant dense<0xFF800000> : vector<8xf32>
    %385 = vector.multi_reduction <maximumf>, %384, %cst_124 [1] : vector<8x128xf32> to vector<8xf32>
    %386 = vector.shape_cast %385 : vector<8xf32> to vector<8x1xf32>
    %387 = vector.broadcast %386 : vector<8x1xf32> to vector<8x128xf32>
    %388 = arith.subf %384, %387 : vector<8x128xf32>
    %389 = math.exp %388 : vector<8x128xf32>
    %cst_125 = arith.constant dense<0.000000e+00> : vector<8xf32>
    %390 = vector.multi_reduction <add>, %389, %cst_125 [1] : vector<8x128xf32> to vector<8xf32>
    %391 = vector.shape_cast %390 : vector<8xf32> to vector<8x1xf32>
    %392 = math.log %391 : vector<8x1xf32>
    %393 = arith.addf %392, %386 : vector<8x1xf32>
    %394 = vector.broadcast %393 : vector<8x1xf32> to vector<8x128xf32>
    %395 = arith.subf %384, %394 : vector<8x128xf32>
    %c0_126 = arith.constant 0 : index
    %c4_127 = arith.constant 4 : index
    %c0_128 = arith.constant 0 : index
    %c0_129 = arith.constant 0 : index
    %396 = vector.load %arg8[%c0_126, %c4_127, %c0_128, %c0_129] : memref<1x6x8x128xf32, #tpu.memory_space<vmem>>, vector<1x1x8x128xf32>
    %397 = vector.shape_cast %396 : vector<1x1x8x128xf32> to vector<8x128xf32>
    %398 = vector.shape_cast %395 : vector<8x128xf32> to vector<1x1x8x128xf32>
    tpu.vector_store %arg8[%c0_126, %c4_127, %c0_128, %c0_129], %398 {strides = array<i32>} : memref<1x6x8x128xf32, #tpu.memory_space<vmem>>, vector<1x1x8x128xf32>,
    %c40 = arith.constant 40 : index
    %c0_130 = arith.constant 0 : index
    %399 = vector.load %arg11[%c40, %c0_130] : memref<48x640xf32, #tpu.memory_space<vmem>>, vector<8x640xf32>
    %cst_131 = arith.constant dense<0.000000e+00> : vector<8x640xf32>
    %400 = tpu.matmul %381, %0, %cst_131 {dimension_numbers = #tpu.dot_dimension_numbers<[1], [0], [0], [1], [0, 0, 1, 1], [], []>, precision = #tpu.contract_precision<fp32>} : vector<8x32xf32>, vector<32x640xf32>, vector<8x640xf32> -> vector<8x640xf32>
    %401 = arith.addf %399, %400 : vector<8x640xf32>
    %402 = vector.extract_strided_slice %401 {offsets = [0, 0], sizes = [8, 128], strides = [1, 1]} : vector<8x640xf32> to vector<8x128xf32>
    %cst_132 = arith.constant dense<0xFF800000> : vector<8xf32>
    %403 = vector.multi_reduction <maximumf>, %402, %cst_132 [1] : vector<8x128xf32> to vector<8xf32>
    %404 = vector.shape_cast %403 : vector<8xf32> to vector<8x1xf32>
    %405 = vector.broadcast %404 : vector<8x1xf32> to vector<8x128xf32>
    %406 = arith.subf %402, %405 : vector<8x128xf32>
    %407 = math.exp %406 : vector<8x128xf32>
    %cst_133 = arith.constant dense<0.000000e+00> : vector<8xf32>
    %408 = vector.multi_reduction <add>, %407, %cst_133 [1] : vector<8x128xf32> to vector<8xf32>
    %409 = vector.shape_cast %408 : vector<8xf32> to vector<8x1xf32>
    %cst_134 = arith.constant dense<0.000000e+00> : vector<8x32xf32>
    %410 = tpu.matmul %407, %9, %cst_134 {dimension_numbers = #tpu.dot_dimension_numbers<[1], [0], [0], [1], [0, 0, 1, 1], [], []>, precision = #tpu.contract_precision<fp32>} : vector<8x128xf32>, vector<128x32xf32>, vector<8x32xf32> -> vector<8x32xf32>
    %411 = tpu.reciprocal %409 {approx = true} : vector<8x1xf32> -> vector<8x1xf32>
    %412 = arith.mulf %409, %411 : vector<8x1xf32>
    %cst_135 = arith.constant 2.000000e+00 : f32
    %413 = vector.broadcast %cst_135 : f32 to vector<8x1xf32>
    %414 = arith.subf %413, %412 : vector<8x1xf32>
    %415 = arith.mulf %411, %414 : vector<8x1xf32>
    %416 = vector.broadcast %415 : vector<8x1xf32> to vector<8x128xf32>
    %417 = arith.mulf %407, %416 : vector<8x128xf32>
    %c0_136 = arith.constant 0 : index
    %c5 = arith.constant 5 : index
    %c0_137 = arith.constant 0 : index
    %c0_138 = arith.constant 0 : index
    %418 = vector.load %arg9[%c0_136, %c5, %c0_137, %c0_138] : memref<1x6x8x128xf32, #tpu.memory_space<vmem>>, vector<1x1x8x128xf32>
    %419 = vector.shape_cast %418 : vector<1x1x8x128xf32> to vector<8x128xf32>
    %420 = vector.shape_cast %417 : vector<8x128xf32> to vector<1x1x8x128xf32>
    tpu.vector_store %arg9[%c0_136, %c5, %c0_137, %c0_138], %420 {strides = array<i32>} : memref<1x6x8x128xf32, #tpu.memory_space<vmem>>, vector<1x1x8x128xf32>,
    %421 = vector.extract_strided_slice %401 {offsets = [0, 128], sizes = [8, 32], strides = [1, 1]} : vector<8x640xf32> to vector<8x32xf32>
    %422 = vector.broadcast %415 : vector<8x1xf32> to vector<8x32xf32>
    %423 = arith.mulf %410, %422 : vector<8x32xf32>
    %424 = arith.addf %421, %423 : vector<8x32xf32>
    %cst_139 = arith.constant 0.000000e+00 : f32
    %425 = vector.broadcast %cst_139 : f32 to vector<8x32xf32>
    %426 = arith.maximumf %424, %425 : vector<8x32xf32>
    %cst_140 = arith.constant dense<0.000000e+00> : vector<8x384xf32>
    %427 = tpu.matmul %426, %1, %cst_140 {dimension_numbers = #tpu.dot_dimension_numbers<[1], [0], [0], [1], [0, 0, 1, 1], [], []>, precision = #tpu.contract_precision<fp32>} : vector<8x32xf32>, vector<32x384xf32>, vector<8x384xf32> -> vector<8x384xf32>
    %428 = vector.broadcast %5 : vector<1x384xf32> to vector<8x384xf32>
    %429 = arith.addf %427, %428 : vector<8x384xf32>
    %430 = vector.extract_strided_slice %429 {offsets = [0, 0], sizes = [8, 128], strides = [1, 1]} : vector<8x384xf32> to vector<8x128xf32>
    %431 = vector.extract_strided_slice %401 {offsets = [0, 256], sizes = [8, 128], strides = [1, 1]} : vector<8x640xf32> to vector<8x128xf32>
    %432 = arith.addf %430, %431 : vector<8x128xf32>
    %433 = arith.negf %432 : vector<8x128xf32>
    %434 = math.exp %433 : vector<8x128xf32>
    %cst_141 = arith.constant 1.000000e+00 : f32
    %435 = vector.broadcast %cst_141 : f32 to vector<8x128xf32>
    %436 = arith.addf %435, %434 : vector<8x128xf32>
    %437 = arith.divf %435, %436 : vector<8x128xf32>
    %438 = vector.extract_strided_slice %429 {offsets = [0, 128], sizes = [8, 128], strides = [1, 1]} : vector<8x384xf32> to vector<8x128xf32>
    %439 = vector.extract_strided_slice %401 {offsets = [0, 384], sizes = [8, 128], strides = [1, 1]} : vector<8x640xf32> to vector<8x128xf32>
    %440 = arith.addf %438, %439 : vector<8x128xf32>
    %441 = arith.negf %440 : vector<8x128xf32>
    %442 = math.exp %441 : vector<8x128xf32>
    %cst_142 = arith.constant 1.000000e+00 : f32
    %443 = vector.broadcast %cst_142 : f32 to vector<8x128xf32>
    %444 = arith.addf %443, %442 : vector<8x128xf32>
    %445 = arith.divf %443, %444 : vector<8x128xf32>
    %446 = vector.extract_strided_slice %429 {offsets = [0, 256], sizes = [8, 128], strides = [1, 1]} : vector<8x384xf32> to vector<8x128xf32>
    %447 = vector.extract_strided_slice %401 {offsets = [0, 512], sizes = [8, 128], strides = [1, 1]} : vector<8x640xf32> to vector<8x128xf32>
    %448 = arith.mulf %437, %447 : vector<8x128xf32>
    %449 = arith.addf %446, %448 : vector<8x128xf32>
    %450 = math.tanh %449 : vector<8x128xf32>
    %451 = vector.extract_strided_slice %445 {offsets = [0, 0], sizes = [8, 32], strides = [1, 1]} : vector<8x128xf32> to vector<8x32xf32>
    %cst_143 = arith.constant 1.000000e+00 : f32
    %452 = vector.broadcast %cst_143 : f32 to vector<8x32xf32>
    %453 = arith.subf %452, %451 : vector<8x32xf32>
    %454 = vector.extract_strided_slice %450 {offsets = [0, 0], sizes = [8, 32], strides = [1, 1]} : vector<8x128xf32> to vector<8x32xf32>
    %455 = arith.mulf %453, %454 : vector<8x32xf32>
    %456 = arith.mulf %451, %381 : vector<8x32xf32>
    %457 = arith.addf %455, %456 : vector<8x32xf32>
    %cst_144 = arith.constant dense<0.000000e+00> : vector<8x128xf32>
    %458 = tpu.matmul %457, %2, %cst_144 {dimension_numbers = #tpu.dot_dimension_numbers<[1], [0], [0], [1], [0, 0, 1, 1], [], []>, precision = #tpu.contract_precision<fp32>} : vector<8x32xf32>, vector<32x128xf32>, vector<8x128xf32> -> vector<8x128xf32>
    %459 = vector.broadcast %6 : vector<1x128xf32> to vector<8x128xf32>
    %460 = arith.addf %458, %459 : vector<8x128xf32>
    %cst_145 = arith.constant dense<0xFF800000> : vector<8xf32>
    %461 = vector.multi_reduction <maximumf>, %460, %cst_145 [1] : vector<8x128xf32> to vector<8xf32>
    %462 = vector.shape_cast %461 : vector<8xf32> to vector<8x1xf32>
    %463 = vector.broadcast %462 : vector<8x1xf32> to vector<8x128xf32>
    %464 = arith.subf %460, %463 : vector<8x128xf32>
    %465 = math.exp %464 : vector<8x128xf32>
    %cst_146 = arith.constant dense<0.000000e+00> : vector<8xf32>
    %466 = vector.multi_reduction <add>, %465, %cst_146 [1] : vector<8x128xf32> to vector<8xf32>
    %467 = vector.shape_cast %466 : vector<8xf32> to vector<8x1xf32>
    %468 = math.log %467 : vector<8x1xf32>
    %469 = arith.addf %468, %462 : vector<8x1xf32>
    %470 = vector.broadcast %469 : vector<8x1xf32> to vector<8x128xf32>
    %471 = arith.subf %460, %470 : vector<8x128xf32>
    %c0_147 = arith.constant 0 : index
    %c5_148 = arith.constant 5 : index
    %c0_149 = arith.constant 0 : index
    %c0_150 = arith.constant 0 : index
    %472 = vector.load %arg8[%c0_147, %c5_148, %c0_149, %c0_150] : memref<1x6x8x128xf32, #tpu.memory_space<vmem>>, vector<1x1x8x128xf32>
    %473 = vector.shape_cast %472 : vector<1x1x8x128xf32> to vector<8x128xf32>
    %474 = vector.shape_cast %471 : vector<8x128xf32> to vector<1x1x8x128xf32>
    tpu.vector_store %arg8[%c0_147, %c5_148, %c0_149, %c0_150], %474 {strides = array<i32>} : memref<1x6x8x128xf32, #tpu.memory_space<vmem>>, vector<1x1x8x128xf32>,
    %c0_151 = arith.constant 0 : index
    %c0_152 = arith.constant 0 : index
    %c0_153 = arith.constant 0 : index
    %475 = vector.load %arg10[%c0_151, %c0_152, %c0_153] : memref<1x8x32xf32, #tpu.memory_space<vmem>>, vector<1x8x32xf32>
    %476 = vector.shape_cast %475 : vector<1x8x32xf32> to vector<8x32xf32>
    %477 = vector.shape_cast %457 : vector<8x32xf32> to vector<1x8x32xf32>
    tpu.vector_store %arg10[%c0_151, %c0_152, %c0_153], %477 {strides = array<i32>} : memref<1x8x32xf32, #tpu.memory_space<vmem>>, vector<1x8x32xf32>,
    return
  }
  func.func @transform_0(%arg0: i32) -> (i32, i32, i32) {
    %c0_i32 = arith.constant 0 : i32
    %c0_i32_0 = arith.constant 0 : i32
    %c0_i32_1 = arith.constant 0 : i32
    return %arg0, %c0_i32, %c0_i32_0 : i32, i32, i32
  }
  func.func @transform_1(%arg0: i32) -> (i32, i32, i32) {
    %c0_i32 = arith.constant 0 : i32
    %c0_i32_0 = arith.constant 0 : i32
    %c0_i32_1 = arith.constant 0 : i32
    return %arg0, %c0_i32, %c0_i32_0 : i32, i32, i32
  }
  func.func @transform_2(%arg0: i32) -> (i32, i32, i32) {
    %c0_i32 = arith.constant 0 : i32
    %c0_i32_0 = arith.constant 0 : i32
    %c0_i32_1 = arith.constant 0 : i32
    return %arg0, %c0_i32, %c0_i32_0 : i32, i32, i32
  }
  func.func @transform_3(%arg0: i32) -> (i32, i32) {
    %c0_i32 = arith.constant 0 : i32
    %c0_i32_0 = arith.constant 0 : i32
    %c0_i32_1 = arith.constant 0 : i32
    return %c0_i32, %c0_i32_0 : i32, i32
  }
  func.func @transform_4(%arg0: i32) -> (i32, i32) {
    %c0_i32 = arith.constant 0 : i32
    %c0_i32_0 = arith.constant 0 : i32
    %c0_i32_1 = arith.constant 0 : i32
    return %c0_i32, %c0_i32_0 : i32, i32
  }
  func.func @transform_5(%arg0: i32) -> (i32, i32) {
    %c0_i32 = arith.constant 0 : i32
    %c0_i32_0 = arith.constant 0 : i32
    %c0_i32_1 = arith.constant 0 : i32
    return %c0_i32, %c0_i32_0 : i32, i32
  }
  func.func @transform_6(%arg0: i32) -> (i32, i32) {
    %c0_i32 = arith.constant 0 : i32
    %c0_i32_0 = arith.constant 0 : i32
    %c0_i32_1 = arith.constant 0 : i32
    return %c0_i32, %c0_i32_0 : i32, i32
  }
  func.func @transform_7(%arg0: i32) -> (i32, i32, i32, i32) {
    %c0_i32 = arith.constant 0 : i32
    %c0_i32_0 = arith.constant 0 : i32
    %c0_i32_1 = arith.constant 0 : i32
    %c0_i32_2 = arith.constant 0 : i32
    return %arg0, %c0_i32, %c0_i32_0, %c0_i32_1 : i32, i32, i32, i32
  }
  func.func @transform_8(%arg0: i32) -> (i32, i32, i32, i32) {
    %c0_i32 = arith.constant 0 : i32
    %c0_i32_0 = arith.constant 0 : i32
    %c0_i32_1 = arith.constant 0 : i32
    %c0_i32_2 = arith.constant 0 : i32
    return %arg0, %c0_i32, %c0_i32_0, %c0_i32_1 : i32, i32, i32, i32
  }
  func.func @transform_9(%arg0: i32) -> (i32, i32, i32) {
    %c0_i32 = arith.constant 0 : i32
    %c0_i32_0 = arith.constant 0 : i32
    %c0_i32_1 = arith.constant 0 : i32
    return %arg0, %c0_i32, %c0_i32_0 : i32, i32, i32
  }
}

</mosaic_0001>

<bundles_post_ra>
// kernel: attn_decoder_decode.1
= control target key start
LH: loop header
LB: loop body
LE: loop exit
PB: predicated region body
PF: predicated region fallthrough
CT: control target
= control target key end

     0   :  { %s38728_s0 = inlined_call_operand.vmem [shape: f32[2,48,32], index: 0, kind: input, shape index: {}]   ;;  %s38729_s1 = inlined_call_operand.vmem [shape: f32[2,8,32], index: 1, kind: input, shape index: {}]   ;;  %s38730_s2 = inlined_call_operand.vmem [shape: f32[2,128,32], index: 2, kind: input, shape index: {}]   ;;  %s38731_s3 = inlined_call_operand.vmem [shape: f32[32,640], index: 3, kind: input, shape index: {}]   ;;  %s38732_s4 = inlined_call_operand.vmem [shape: f32[32,640], index: 4, kind: input, shape index: {}]   ;;  %s38733_s5 = inlined_call_operand.vmem [shape: f32[32,544], index: 5, kind: input, shape index: {}]   ;;  %s38734_s6 = inlined_call_operand.vmem [shape: f32[1,1152], index: 6, kind: input, shape index: {}]   ;;  %s38735_s7 = inlined_call_operand.hbm [shape: f32[2,6,8,128], index: 7, kind: output, shape index: {0}]   ;;  %s38736_s8 = inlined_call_operand.vmem [shape: f32[2,6,8,128], index: 8, kind: output, shape index: {1}]   ;;  %s38737_s9 = inlined_call_operand.hbm [shape: f32[2,8,32], index: 9, kind: output, shape index: {2}]  }
   0x1   :  { %39065 = sst [smem:[#allocation108_spill]] %s38728_s0 }
   0x2   :  { %15 = vsyncpa [#allocation4], 0 }
   0x3   :  { %17 = vsyncpa [#allocation4 + $0x1], 0 }
   0x4   :  { %18 = vsyncpa [#allocation6], 0 }
   0x5   :  { %20 = vsyncpa [#allocation6 + $0x1], 0  ;;  %s34638_s30 = smov 0   ;;  %s34640_s10 = smov 0  }
   0x6   :  { %s34642_s11 = smov 0   ;;  %s34644_s12 = smov 0  }
   0x7 LB: > { %s34659_s13 = sadd.s32 4294967295, %s34579_s12   ;;  %s26965_s14 = sadd.s32 4294967294, %s34579_s12   ;;  %s34579_s12 = sphi %s34644_s12, %s39672_s12   ;;  %s34575_s11 = sphi %s34642_s11, %s39671_s11   ;;  %s34571_s10 = sphi %s34640_s10, %s39670_s10   ;;  %s34567_s30 = sphi %s34638_s30, %s39669_s30  }
   0x8   : > { %s34663_s15 = sadd.s32 1, %s34579_s12   ;;  %s195_s16 = sadd.s32 1, %s34575_s11 }
   0x9   : > { %s192_s17 = ssub.s32 %s34579_s12, %s34663_s15  ;;  %p205_p0 = scmp.ne.s32.totalorder %s34575_s11, %s34571_s10 }
   0xa   : > { %p193_p1 = scmp.eq.s32.totalorder %s192_s17, 0  ;;  %p206_p2 = scmp.eq.s32.totalorder %s34659_s13, 1 }
   0xb   : > { %p211_p3 = scmp.ne.s32.totalorder %s34571_s10, %s34567_s30  ;;  %p212_p4 = scmp.eq.s32.totalorder %s26965_s14, 1 }
   0xc   : > { %s34674_s18 = scalar_select %p193_p1, %s34575_s11, %s195_s16  }
   0xd   : > { %p34676_p5 = por %p206_p2, %p205_p0  ;;  %p34680_p6 = por %p212_p4, %p211_p3 }
   0xe   : > { %p26968_p7 = scmp.ge.s32.totalorder %s34579_s12, 1  ;;  %p317_p8 = scmp.lt.s32.totalorder %s34579_s12, 3 }
  0x10   : > { %p318_p9 = pnand %p26968_p7, %p317_p8 }
  0x12   : > { %321 = sbr.rel (%p318_p9) target bundleno = 7996 (0x1f3c), region = 48 }
  0x19   : > { %v34689_v0 = vld [vmem:[%s38733_s5 + $0x20] sm:$0xff]  ;;  %v34694_v1 = vld [vmem:[%s38733_s5 + $0x48] sm:$0xff]  ;;  %p372_p10 = scmp.lt.s32.totalorder %s34659_s13, 1  ;;  %vm450_vm0 = vcmask 261120   ;;  %v1641_v5 = vld [vmem:[%s38731_s3 + $0x30] sm:$0xff]  ;;  %v38757_v9 = vmov 0.0  }
  0x1a   : > { %v1636_v2 = vld [vmem:[%s38731_s3 + $0x8] sm:$0xff]  ;;  %v38754_v3 = vand.u32 4294901760, %v34689_v0  ;;  %v38752_v4 = vand.u32 4294901760, %v34694_v1  ;;  %v1635_v7 = vld [vmem:[%s38731_s3] sm:$0xff]  ;;  %1804 = vmatprep.mubr.f32.mxu1 %v38757_v9  ;;  %v1703_v10 = vand.u32 4294901760, %v1641_v5  ;;  %v34715_v13 = vld [vmem:[%s38733_s5 + $0x70] sm:$0xff] }
  0x1b   : > { %v1699_v6 = vand.u32 4294901760, %v1636_v2  ;;  %v1640_v8 = vld [vmem:[%s38731_s3 + $0x28] sm:$0xff]  ;;  %v1701_v11 = vand.u32 4294901760, %v1635_v7  ;;  %v34720_v14 = vld [vmem:[%s38733_s5 + $0x98] sm:$0xff]  ;;  %v38751_v17 = vand.u32 4294901760, %v34715_v13  ;;  %v34738_v19 = vld [vmem:[%s38731_s3 + $0x80] sm:$0xff] }
  0x1c   : > { %v1705_v12 = vand.u32 4294901760, %v1640_v8  ;;  %v34725_v15 = vld [vmem:[%s38731_s3 + $0x58] sm:$0xff]  ;;  %v34731_v16 = vpack.c.bf16 %v38752_v4, %v38754_v3  ;;  %v38749_v18 = vand.u32 4294901760, %v34720_v14  ;;  %v1645_v21 = vld [vmem:[%s38731_s3 + $0x50] sm:$0xff]  ;;  %s34758_s21 = scalar_select %p372_p10, %s34659_s13, 1  ;;  %v1711_v28 = vand.u32 4294901760, %v34738_v19 }
  0x1d   : > { %v1707_v20 = vand.u32 4294901760, %v34725_v15  ;;  %v1650_v22 = vld [vmem:[%s38731_s3 + $0x78] sm:$0xff]  ;;  %v34747_v23 = vpack.c.bf16 %v1703_v10, %v1699_v6  ;;  %v34751_v25 = vsub.f32 %v1635_v7, %v1701_v11  ;;  %v1709_v29 = vand.u32 4294901760, %v1645_v21  ;;  %s39071_s0 = sld [smem:[#allocation108_spill]]  ;;  %s27000_s24 = sshll.u32 %s34659_s13, 7 }
  0x1e   : > { %v34749_v24 = vpack.c.bf16 %v1705_v12, %v1701_v11  ;;  %v34753_v26 = vsub.f32 %v1640_v8, %v1705_v12  ;;  %31079 = vmatprep.subr.bf16.mxu0 %v34731_v16  ;;  %v34765_v27 = vpack.c.bf16 %v38749_v18, %v38751_v17  ;;  %v1713_v30 = vand.u32 4294901760, %v1650_v22  ;;  %s27003_s22 = sshll.u32 %s34758_s21, 7  ;;  %s34325_s23 = smul.u32 48, %s34758_s21 }
  0x1f   : > { %39068 = vst [vmem:[#allocation9_spill] sm:$0xff] %v34747_v23  ;;  %33646 = vmatprep.subr.bf16.mxu1 %v34747_v23  ;;  %31081 = vmatpush3.bf16.msra.mxu0 %v34731_v16  ;;  %v34772_v31 = vsub.f32 %v1636_v2, %v1699_v6  ;;  %v34774_v32 = vsub.f32 %v1641_v5, %v1703_v10  ;;  %v38748_v33 = vand.u32 4294901760, %v34751_v25  ;;  %s34793_s26 = scalar_lea.vmem %s38730_s2, %s27003_s22  ;;  %vm34583_vm1 = vmmov 0  }
  0x20   : > { %39069 = vst [vmem:[#allocation10_spill] sm:$0xff] %v34749_v24  ;;  %39070 = vst [vmem:[#allocation11_spill] sm:$0xff] %v34765_v27  ;;  %v38746_v34 = vand.u32 4294901760, %v34753_v26  ;;  %33648 = vmatpush1.bf16.msra.mxu1 %v34749_v24  ;;  %31083 = vmatprep.subr.bf16.mxu0 %v34765_v27  ;;  %v34784_v35 = vpack.c.bf16 %v1711_v28, %v1707_v20  ;;  %v34786_v36 = vpack.c.bf16 %v1713_v30, %v1709_v29  ;;  %v434_v39 = vld [vmem:[%s34793_s26] sm:$0xff]  ;;  %v435_v40 = vld [vmem:[%s34793_s26 + $0x8] sm:$0xff]  ;;  %s36378_s25 = scalar_lea.vmem %s38736_s8, %s34325_s23 }
  0x21   : > { %v34788_v37 = vsub.f32 %v1645_v21, %v1709_v29  ;;  %v34795_v38 = vsub.f32 %v1650_v22, %v1713_v30  ;;  %v38742_v41 = vand.u32 4294901760, %v34772_v31  ;;  %v38741_v42 = vand.u32 4294901760, %v34774_v32  ;;  %v436_v44 = vld [vmem:[%s34793_s26 + $0x10] sm:$0xff]  ;;  %v437_v5 = vld [vmem:[%s34793_s26 + $0x18] sm:$0xff]  ;;  %v442_v17 = vld [vmem:[%s34793_s26 + $0x40] sm:$0xff] }
  0x22   : > { %v1847_v43 = vsub.f32 %v34751_v25, %v38748_v33  ;;  %33647 = vmatprep.subr.bf16.mxu1 %v34784_v35  ;;  %v452_v45 = vsel %vm450_vm0, %v434_v39, 0  ;;  %v455_v46 = vsel %vm450_vm0, %v435_v40, 0  ;;  %v1859_v50 = vsub.f32 %v34753_v26, %v38746_v34  ;;  %v441_v33 = vld [vmem:[%s34793_s26 + $0x38] sm:$0xff] }
  0x23   : > { %s34804_s29 = scalar_lea.vmem %s39071_s0, %s34325_s23  ;;  %v458_v51 = vsel %vm450_vm0, %v436_v44, 0  ;;  %31085 = vmatpush3.bf16.msra.mxu0 %v34765_v27  ;;  %v34823_v52 = vand.u32 4294901760, %v452_v45  ;;  %v34825_v53 = vand.u32 4294901760, %v455_v46  ;;  %v1841_v6 = vsub.f32 %v34772_v31, %v38742_v41 }
  0x24   : > { %v1629_v47 = vld [vmem:[%s34804_s29] sm:$0xff]  ;;  %v1630_v48 = vld [vmem:[%s34804_s29 + $0x8] sm:$0xff]  ;;  %v1631_v49 = vld [vmem:[%s34804_s29 + $0x10] sm:$0xff]  ;;  %33649 = vmatpush1.bf16.msra.mxu1 %v34786_v36  ;;  %v1853_v7 = vsub.f32 %v34774_v32, %v38741_v42  ;;  %v1848_v8 = vand.u32 4294901760, %v1847_v43  ;;  %v1860_v10 = vand.u32 4294901760, %v1859_v50  ;;  %v34868_v22 = vand.u32 4294901760, %v458_v51 }
  0x25   : > { %v1632_v54 = vld [vmem:[%s34804_s29 + $0x18] sm:$0xff]  ;;  %v34829_v55 = vsel %vm450_vm0, %v1629_v47, 0  ;;  %v34832_v56 = vsel %vm450_vm0, %v1630_v48, 0  ;;  %v34836_v57 = vsel %vm450_vm0, %v1631_v49, 0  ;;  %v34846_v61 = vsub.f32 %v452_v45, %v34823_v52  ;;  %v1633_v29 = vld [vmem:[%s34804_s29 + $0x20] sm:$0xff]  ;;  %v440_v42 = vld [vmem:[%s34793_s26 + $0x30] sm:$0xff] }
  0x26   : > { %v1691_v58 = vsel %vm450_vm0, %v1632_v54, 0  ;;  %v34840_v59 = vand.u32 4294901760, %v34829_v55  ;;  %v34843_v60 = vand.u32 4294901760, %v34832_v56  ;;  %v34849_v62 = vsub.f32 %v455_v46, %v34825_v53 }
  0x27   : > { %39072 = vst [vmem:[#allocation12_spill] sm:$0xff] %v34846_v61  ;;  %v34852_v63 = vand.u32 4294901760, %v34836_v57  ;;  %v34854_v2 = vand.u32 4294901760, %v1691_v58  ;;  %v38740_v11 = vand.u32 4294901760, %v34846_v61  ;;  %v1842_v30 = vand.u32 4294901760, %v1841_v6 }
  0x28   : > { %39073 = vst [vmem:[#allocation13_spill] sm:$0xff] %v34849_v62  ;;  %v38739_v12 = vand.u32 4294901760, %v34849_v62  ;;  %v1854_v39 = vand.u32 4294901760, %v1853_v7  ;;  %v31136_v40 = vpack.c.bf16 %v1860_v10, %v1848_v8  ;;  %v461_v44 = vsel %vm450_vm0, %v437_v5, 0 }
  0x29   : > { %v34866_v21 = vsub.f32 %v1691_v58, %v34854_v2  ;;  %v571_v43 = vsub.f32 %v34846_v61, %v38740_v11  ;;  %v34882_v47 = vsub.f32 %v458_v51, %v34868_v22  ;;  %v34884_v49 = vand.u32 4294901760, %v461_v44  ;;  %v438_v58 = vld [vmem:[%s34793_s26 + $0x20] sm:$0xff]  ;;  %v1634_v11 = vld [vmem:[%s34804_s29 + $0x28] sm:$0xff]  ;;  %s38497_s29 = sand.u32 1, %s34571_s10  }
  0x2a   : > { %v581_v45 = vsub.f32 %v34849_v62, %v38739_v12  ;;  %v31134_v48 = vpack.c.bf16 %v1854_v39, %v1842_v30  ;;  %v1694_v50 = vsel %vm450_vm0, %v1633_v29, 0  ;;  %v34890_v54 = vsub.f32 %v34725_v15, %v1707_v20  ;;  %s34324_s14 = smul.u32 48, %s38497_s29 }
  0x2b   : > { %39074 = vst [vmem:[#allocation14_spill] sm:$0xff] %v34866_v21  ;;  %v34879_v46 = vand.u32 4294901760, %v34866_v21  ;;  %39076 = vst [vmem:[#allocation16_spill] sm:$0xff] %v34882_v47  ;;  %v572_v5 = vand.u32 4294901760, %v571_v43  ;;  %v38738_v8 = vand.u32 4294901760, %v34882_v47  ;;  %v34897_v51 = vsub.f32 %v461_v44, %v34884_v49 }
  0x2c   : > { %v582_v6 = vand.u32 4294901760, %v581_v45  ;;  %31135 = vmatprep.subr.bf16.mxu1 %v31134_v48  ;;  %v34899_v10 = vand.u32 4294901760, %v1694_v50  ;;  %v38745_v29 = vand.u32 4294901760, %v34890_v54  ;;  %v34905_v15 = vsub.f32 %v34738_v19, %v1711_v28  ;;  %v439_v48 = vld [vmem:[%s34793_s26 + $0x28] sm:$0xff]  ;;  %s38508_s16 = scalar_lea.vmem [#allocation3], %s34324_s14  ;;  %s34584_s14 = smov [#allocation5]  }
  0x2d   : > { %39075 = vst [vmem:[#allocation15_spill] sm:$0xff] %v34879_v46  ;;  %v1808_v7 = vsub.f32 %v34866_v21, %v34879_v46  ;;  %39077 = vst [vmem:[#allocation17_spill] sm:$0xff] %v34897_v51  ;;  %28344 = vmatprep.mubr.f32.mxu0 %v572_v5  ;;  %v591_v30 = vsub.f32 %v34882_v47, %v38738_v8  ;;  %v464_v39 = vsel %vm450_vm0, %v438_v58, 0  ;;  %v38743_v44 = vand.u32 4294901760, %v34788_v37 }
  0x2e   : > { %28345 = vmatmul.mubr.f32.vlgmr.msra.gmra.mrb[0].mxu0 %v582_v6  ;;  %v38744_v43 = vand.u32 4294901760, %v34897_v51  ;;  %v34916_v45 = vsub.f32 %v1694_v50, %v34899_v10  ;;  %v1865_v19 = vsub.f32 %v34890_v54, %v38745_v29  ;;  %v38747_v28 = vand.u32 4294901760, %v34905_v15 }
  0x2f   : > { %v34907_v20 = vand.u32 4294901760, %v1808_v7  ;;  %v592_v58 = vand.u32 4294901760, %v591_v30  ;;  %v34924_v5 = vand.u32 4294901760, %v464_v39  ;;  %v1871_v6 = vsub.f32 %v34788_v37, %v38743_v44 }
  0x30   : > { %39079 = vst [vmem:[#allocation19_spill] sm:$0xff] %v34916_v45  ;;  %v38750_v50 = vand.u32 4294901760, %v34795_v38  ;;  %v601_v7 = vsub.f32 %v34897_v51, %v38744_v43  ;;  %v34935_v8 = vand.u32 4294901760, %v34916_v45  ;;  %v1866_v30 = vand.u32 4294901760, %v1865_v19 }
  0x31   : > { %39078 = vst [vmem:[#allocation18_spill] sm:$0xff] %v34907_v20  ;;  %1810 = vmatmul.mubr.f32.vlgmr.msra.gmra.mrb[0].mxu1 %v34907_v20  ;;  %v1877_v12 = vsub.f32 %v34905_v15, %v38747_v28  ;;  %28347 = vmatprep.mubr.f32.mxu0 %v592_v58  ;;  %v1872_v41 = vand.u32 4294901760, %v1871_v6  ;;  %v467_v43 = vsel %vm450_vm0, %v439_v48, 0  ;;  %v1697_v6 = vsel %vm450_vm0, %v1634_v11, 0 }
  0x32   : > { %31137 = vmatpush1.bf16.msra.mxu1 %v31136_v40  ;;  %1815 = vmatprep.mubr.f32.mxu1 %v38757_v9  ;;  %39080 = vst [vmem:[#allocation20_spill] sm:$0xff] %v34935_v8  ;;  %v34943_v40 = vsub.f32 %v464_v39, %v34924_v5  ;;  %v1883_v44 = vsub.f32 %v34795_v38, %v38750_v50  ;;  %v602_v29 = vand.u32 4294901760, %v601_v7  ;;  %v34951_v28 = vand.u32 4294901760, %v467_v43 }
  0x33   : > { %v1819_v19 = vsub.f32 %v34916_v45, %v34935_v8  ;;  %v1878_v34 = vand.u32 4294901760, %v1877_v12  ;;  %v470_v18 = vsel %vm450_vm0, %v440_v42, 0  ;;  %v34962_v12 = vand.u32 4294901760, %v1697_v6 }
  0x34   : > { %39081 = vst [vmem:[#allocation21_spill] sm:$0xff] %v34943_v40  ;;  %39082 = vst [vmem:[#allocation22_spill] sm:$0xff] %v34951_v28  ;;  %v38753_v58 = vand.u32 4294901760, %v34943_v40  ;;  %v1884_v39 = vand.u32 4294901760, %v1883_v44  ;;  %28348 = vmatmul.mubr.f32.gmra.mrb[2].mxu0 %v602_v29  ;;  %v34960_v7 = vsub.f32 %v467_v43, %v34951_v28  ;;  %v34968_v4 = vand.u32 4294901760, %v470_v18 }
  0x35   : > { %v34957_v50 = vand.u32 4294901760, %v1819_v19  ;;  %v31138_v48 = vpack.c.bf16 %v1878_v34, %v1866_v30  ;;  %v473_v42 = vsel %vm450_vm0, %v441_v33, 0  ;;  %v34974_v29 = vsub.f32 %v1697_v6, %v34962_v12  ;;  %v443_v19 = vld [vmem:[%s34793_s26 + $0x48] sm:$0xff] }
  0x36   : > { %39084 = vst [vmem:[#allocation24_spill] sm:$0xff] %v34960_v7  ;;  %v611_v44 = vsub.f32 %v34943_v40, %v38753_v58  ;;  %v31140_v11 = vpack.c.bf16 %v1884_v39, %v1872_v41  ;;  %39085 = vst [vmem:[#allocation25_spill] sm:$0xff] %v34968_v4  ;;  %v38761_v34 = vand.u32 4294901760, %v34960_v7  ;;  %v34976_v43 = vand.u32 4294901760, %v473_v42  ;;  %v444_v58 = vld [vmem:[%s34793_s26 + $0x50] sm:$0xff]  ;;  %v445_v41 = vld [vmem:[%s34793_s26 + $0x58] sm:$0xff] }
  0x37   : > { %39083 = vst [vmem:[#allocation23_spill] sm:$0xff] %v34957_v50  ;;  %1821 = vmatmul.mubr.f32.gmra.mrb[2].mxu1 %v34957_v50  ;;  %31139 = vmatprep.subr.bf16.mxu1 %v31138_v48  ;;  %39086 = vst [vmem:[#allocation26_spill] sm:$0xff] %v34974_v29  ;;  %v31142_v30 = vpack.c.bf16 %v34774_v32, %v34772_v31  ;;  %v34985_v33 = vsub.f32 %v470_v18, %v34968_v4  ;;  %v476_v48 = vsel %vm450_vm0, %v442_v17, 0 }
  0x38   : > { %39087 = vst [vmem:[#allocation27_spill] sm:$0xff] %v34976_v43  ;;  %v612_v39 = vand.u32 4294901760, %v611_v44  ;;  %1826 = vmatprep.mubr.f32.mxu1 %v38757_v9  ;;  %31141 = vmatpush1.bf16.msra.mxu1 %v31140_v11  ;;  %v31144_v6 = vpack.c.bf16 %v34753_v26, %v34751_v25  ;;  %v621_v3 = vsub.f32 %v34960_v7, %v38761_v34  ;;  %v34994_v50 = vand.u32 4294901760, %v34974_v29  ;;  %v446_v34 = vld [vmem:[%s34793_s26 + $0x60] sm:$0xff] }
  0x39   : > { %39088 = vst [vmem:[#allocation28_spill] sm:$0xff] %v34985_v33  ;;  %v34997_v44 = vsub.f32 %v473_v42, %v34976_v43  ;;  %31143 = vmatprep.subr.bf16.mxu1 %v31142_v30  ;;  %v34999_v11 = vand.u32 4294901760, %v476_v48  ;;  %v38774_v18 = vand.u32 4294901760, %v34985_v33  ;;  %v479_v9 = vsel %vm450_vm0, %v443_v19, 0 }
  0x3a   : > { %39089 = vst [vmem:[#allocation29_spill] sm:$0xff] %v34994_v50  ;;  %28350 = vmatprep.mubr.f32.mxu0 %v612_v39  ;;  %v482_v17 = vsel %vm450_vm0, %v444_v58, 0  ;;  %v485_v20 = vsel %vm450_vm0, %v445_v41, 0  ;;  %v622_v8 = vand.u32 4294901760, %v621_v3  ;;  %v1830_v46 = vsub.f32 %v34974_v29, %v34994_v50  ;;  %v447_v41 = vld [vmem:[%s34793_s26 + $0x68] sm:$0xff] }
  0x3b   : > { %39090 = vst [vmem:[#allocation30_spill] sm:$0xff] %v34997_v44  ;;  %39091 = vst [vmem:[#allocation31_spill] sm:$0xff] %v34999_v11  ;;  %v38779_v42 = vand.u32 4294901760, %v34997_v44  ;;  %v35010_v30 = vsub.f32 %v476_v48, %v34999_v11  ;;  %v631_v39 = vsub.f32 %v34985_v33, %v38774_v18  ;;  %v35015_v7 = vand.u32 4294901760, %v479_v9 }
  0x3c   : > { %v35017_v19 = vand.u32 4294901760, %v482_v17  ;;  %v35019_v58 = vand.u32 4294901760, %v485_v20  ;;  %28351 = vmatmul.mubr.f32.gmra.mrb[4].mxu0 %v622_v8  ;;  %v35022_v3 = vand.u32 4294901760, %v1830_v46  ;;  %v488_v40 = vsel %vm450_vm0, %v446_v34, 0 }
  0x3d   : > { %39092 = vst [vmem:[#allocation32_spill] sm:$0xff] %v35010_v30  ;;  %39093 = vst [vmem:[#allocation33_spill] sm:$0xff] %v35015_v7  ;;  %v641_v50 = vsub.f32 %v34997_v44, %v38779_v42  ;;  %v38782_v48 = vand.u32 4294901760, %v35010_v30  ;;  %v632_v27 = vand.u32 4294901760, %v631_v39  ;;  %v35030_v18 = vsub.f32 %v479_v9, %v35015_v7 }
  0x3e   : > { %39094 = vst [vmem:[#allocation34_spill] sm:$0xff] %v35017_v19  ;;  %39095 = vst [vmem:[#allocation35_spill] sm:$0xff] %v35019_v58  ;;  %v35033_v33 = vsub.f32 %v482_v17, %v35017_v19  ;;  %v35036_v51 = vsub.f32 %v485_v20, %v35019_v58  ;;  %1832 = vmatmul.mubr.f32.gmra.mrb[4].mxu1 %v35022_v3  ;;  %v35042_v42 = vand.u32 4294901760, %v488_v40  ;;  %v491_v34 = vsel %vm450_vm0, %v447_v41, 0 }
  0x3f   : > { %39096 = vst [vmem:[#allocation36_spill] sm:$0xff] %v35022_v3  ;;  %39097 = vst [vmem:[#allocation37_spill] sm:$0xff] %v35030_v18  ;;  %v642_v46 = vand.u32 4294901760, %v641_v50  ;;  %v651_v8 = vsub.f32 %v35010_v30, %v38782_v48  ;;  %28353 = vmatprep.mubr.f32.mxu0 %v632_v27  ;;  %v39101_v9 = vmov 0.0   ;;  %v35049_v44 = vand.u32 4294901760, %v491_v34 }
  0x40   : > { %39098 = vst [vmem:[#allocation38_spill] sm:$0xff] %v35033_v33  ;;  %39099 = vst [vmem:[#allocation39_spill] sm:$0xff] %v35036_v51  ;;  %1942 = vmatprep.mubr.f32.mxu1 %v39101_v9  ;;  %v35052_v48 = vsub.f32 %v488_v40, %v35042_v42  ;;  %v39104_v41 = vand.u32 4294901760, %v34689_v0  ;;  %v39105_v17 = vand.u32 4294901760, %v34694_v1  ;;  %v39106_v20 = vand.u32 4294901760, %v35030_v18 }
  0x41   : > { %39100 = vst [vmem:[#allocation40_spill] sm:$0xff] %v35042_v42  ;;  %39102 = vst [vmem:[#allocation41_spill] sm:$0xff] %v35049_v44  ;;  %28354 = vmatmul.mubr.f32.gmra.mrb[6].mxu0 %v642_v46  ;;  %v652_v50 = vand.u32 4294901760, %v651_v8  ;;  %v39107_v46 = vand.u32 4294901760, %v35033_v33  ;;  %v39108_v40 = vand.u32 4294901760, %v35036_v51 }
  0x42   : > { %39103 = vst [vmem:[#allocation42_spill] sm:$0xff] %v35052_v48  ;;  %v35057_v27 = vsub.f32 %v34689_v0, %v39104_v41  ;;  %v35062_v39 = vsub.f32 %v34694_v1, %v39105_v17  ;;  %v661_v3 = vsub.f32 %v35030_v18, %v39106_v20  ;;  %v35074_v0 = vsub.f32 %v491_v34, %v35049_v44 }
  0x43   : > { %v671_v8 = vsub.f32 %v35033_v33, %v39107_v46  ;;  %v681_v30 = vsub.f32 %v35036_v51, %v39108_v40  ;;  %1944 = vmatmul.mubr.f32.vlgmr.msra.gmra.mrb[6].mxu1 %v34840_v59  ;;  %28356 = vmatprep.mubr.f32.mxu0 %v652_v50  ;;  %v38797_v1 = vand.u32 4294901760, %v35052_v48  ;;  %v31146_v41 = vpack.c.bf16 %v34905_v15, %v34890_v54  ;;  %v448_v46 = vld [vmem:[%s34793_s26 + $0x70] sm:$0xff]  ;;  %v449_v33 = vld [vmem:[%s34793_s26 + $0x78] sm:$0xff]  ;;  %s26971_s26 = sshll.u32 %s34758_s21, 3 }
  0x44   : > { %39109 = vst [vmem:[#allocation43_spill] sm:$0xff] %v35074_v0  ;;  %v38798_v17 = vand.u32 4294901760, %v35057_v27  ;;  %31145 = vmatpush1.bf16.msra.mxu1 %v31144_v6  ;;  %1949 = vmatprep.mubr.f32.mxu1 %v39101_v9  ;;  %v662_v40 = vand.u32 4294901760, %v661_v3  ;;  %v38803_v18 = vand.u32 4294901760, %v35074_v0  ;;  %v39110_v47 = vand.u32 4294901760, %v35062_v39  ;;  %s35696_s22 = scalar_lea.vmem %s38729_s1, %s26971_s26  ;;  %s38655_s26 = scalar_lea.hbm %s38737_s9, %s27000_s24 }
  0x45   : > { %v672_v34 = vand.u32 4294901760, %v671_v8  ;;  %v682_v51 = vand.u32 4294901760, %v681_v30  ;;  %v691_v50 = vsub.f32 %v35052_v48, %v38797_v1  ;;  %31147 = vmatprep.subr.bf16.mxu1 %v31146_v41  ;;  %v31148_v6 = vpack.c.bf16 %v34795_v38, %v34788_v37 }
  0x46   : > { %v732_v20 = vsub.f32 %v35057_v27, %v38798_v17  ;;  %v739_v62 = vsub.f32 %v35062_v39, %v39110_v47  ;;  %28357 = vmatmul.mubr.f32.gmra.mrb[8].mxu0 %v662_v40  ;;  %v701_v30 = vsub.f32 %v35074_v0, %v38803_v18  ;;  %v494_v3 = vsel %vm450_vm0, %v448_v46, 0 }
  0x47   : > { %v497_v8 = vsel %vm450_vm0, %v449_v33, 0  ;;  %v39111_v1 = vand.u32 4294901760, %v34715_v13  ;;  %1951 = vmatmul.mubr.f32.gmra.mrb[8].mxu1 %v34843_v60  ;;  %28359 = vmatprep.mubr.f32.mxu0 %v672_v34  ;;  %v692_v47 = vand.u32 4294901760, %v691_v50  ;;  %v35106_v61 = vand.u32 4294901760, %v494_v3 }
  0x48   : > { %v733_v41 = vand.u32 4294901760, %v732_v20  ;;  %v740_v48 = vand.u32 4294901760, %v739_v62  ;;  %1956 = vmatprep.mubr.f32.mxu1 %v39101_v9  ;;  %31149 = vmatpush1.bf16.msra.mxu1 %v31148_v6  ;;  %v35109_v40 = vand.u32 4294901760, %v497_v8  ;;  %v39114_v33 = vand.u32 4294901760, %v34720_v14 }
  0x49   : > { %v744_v17 = vsub.f32 %v34715_v13, %v39111_v1  ;;  %39112 = vst [vmem:[#allocation44_spill] sm:$0xff] %v35106_v61  ;;  %v35115_v13 = vsub.f32 %v494_v3, %v35106_v61  ;;  %31151 = vmatprep.subr.bf16.mxu1 %v34747_v23  ;;  %v702_v62 = vand.u32 4294901760, %v701_v30  ;;  %v39116_v30 = vand.u32 4294901760, %v34751_v25 }
  0x4a   : > { %39113 = vst [vmem:[#allocation45_spill] sm:$0xff] %v35109_v40  ;;  %v751_v18 = vsub.f32 %v34720_v14, %v39114_v33  ;;  %v31086_v0 = vpack.c.bf16 %v740_v48, %v733_v41  ;;  %28360 = vmatmul.mubr.f32.gmra.mrb[10].mxu0 %v682_v51  ;;  %v35119_v1 = vsub.f32 %v497_v8, %v35109_v40  ;;  %v39117_v3 = vand.u32 4294901760, %v34753_v26 }
  0x4b   : > { %v745_v46 = vand.u32 4294901760, %v744_v17  ;;  %39115 = vst [vmem:[#allocation46_spill] sm:$0xff] %v35115_v13  ;;  %1958 = vmatmul.mubr.f32.gmra.mrb[10].mxu1 %v34852_v63  ;;  %28362 = vmatprep.mubr.f32.mxu0 %v692_v47  ;;  %v38806_v50 = vand.u32 4294901760, %v35115_v13  ;;  %v39118_v33 = vand.u32 4294901760, %v34890_v54  ;;  %v39121_v25 = vand.u32 4294901760, %v34795_v38 }
  0x4c   : > { %v752_v34 = vand.u32 4294901760, %v751_v18  ;;  %1963 = vmatprep.mubr.f32.mxu1 %v39101_v9  ;;  %31087 = vmatprep.subr.bf16.mxu0 %v31086_v0  ;;  %v38809_v14 = vand.u32 4294901760, %v35119_v1  ;;  %v35132_v8 = vpack.c.bf16 %v39117_v3, %v39116_v30  ;;  %v31094_v54 = vpack.c.bf16 %v35062_v39, %v35057_v27  ;;  %v35235_v3 = vld [vmem:[%s38731_s3 + $0x10] sm:$0xff] }
  0x4d   : > { %v746_v20 = vsub.f32 %v744_v17, %v745_v46  ;;  %31089 = vmatpush3.bf16.msra.mxu0 %v31086_v0  ;;  %v711_v51 = vsub.f32 %v35115_v13, %v38806_v50  ;;  %v39119_v0 = vand.u32 4294901760, %v34905_v15  ;;  %v39120_v50 = vand.u32 4294901760, %v34788_v37 }
  0x4e   : > { %v753_v6 = vsub.f32 %v751_v18, %v752_v34  ;;  %28363 = vmatmul.mubr.f32.gmra.mrb[12].mxu0 %v702_v62  ;;  %v721_v47 = vsub.f32 %v35119_v1, %v38809_v14  ;;  %v35154_v37 = vpack.c.bf16 %v752_v34, %v745_v46  ;;  %v31098_v38 = vpack.c.bf16 %v751_v18, %v744_v17  ;;  %v39125_v34 = vld [vmem:[#allocation13_spill] sm:$0xff]  ;;  %v39135_v14 = vld [vmem:[#allocation30_spill] sm:$0xff] }
  0x4f   : > { %v747_v48 = vand.u32 4294901760, %v746_v20  ;;  %v35141_v20 = vpack.c.bf16 %v39119_v0, %v39118_v33  ;;  %v35147_v13 = vpack.c.bf16 %v39121_v25, %v39120_v50  ;;  %1965 = vmatmul.mubr.f32.gmra.mrb[0].mxu1 %v34854_v2  ;;  %v712_v26 = vand.u32 4294901760, %v711_v51  ;;  %v39126_v50 = vld [vmem:[#allocation16_spill] sm:$0xff] }
  0x50   : > { %v754_v41 = vand.u32 4294901760, %v753_v6  ;;  %1970 = vmatprep.mubr.f32.mxu1 %v39101_v9  ;;  %v722_v62 = vand.u32 4294901760, %v721_v47  ;;  %v35163_v15 = vsub.f32 %v34829_v55, %v34840_v59  ;;  %v35171_v18 = vsub.f32 %v34832_v56, %v34843_v60  ;;  %v1638_v6 = vld [vmem:[%s38731_s3 + $0x18] sm:$0xff]  ;;  %v1643_v51 = vld [vmem:[%s38731_s3 + $0x40] sm:$0xff]  ;;  %v39127_v47 = vld [vmem:[#allocation17_spill] sm:$0xff] }
  0x51   : > { %28365 = vmatprep.mubr.f32.mxu0 %v712_v26  ;;  %v39122_v55 = vand.u32 4294901760, %v34772_v31  ;;  %v39123_v17 = vand.u32 4294901760, %v34774_v32  ;;  %v35186_v56 = vsub.f32 %v34836_v57, %v34852_v63  ;;  %v39124_v32 = vld [vmem:[#allocation12_spill] sm:$0xff]  ;;  %v39130_v33 = vand.u32 4294901760, %v35062_v39 }
  0x52   : > { %v31090_v30 = vpack.c.bf16 %v754_v41, %v747_v48  ;;  %28366 = vmatmul.mubr.f32.gmra.mrb[14].mxu0 %v722_v62  ;;  %v35206_v31 = vand.u32 4294901760, %v35163_v15  ;;  %v35213_v57 = vand.u32 4294901760, %v35171_v18  ;;  %v39129_v41 = vand.u32 4294901760, %v35057_v27 }
  0x53   : > { %1972 = vmatmul.mubr.f32.gmra.mrb[2].mxu1 %v34899_v10  ;;  %28376 = vmatprep.mubr.f32.mxu0 %v34823_v52  ;;  %v31158_v46 = vpack.c.bf16 %v39123_v17, %v39122_v55  ;;  %v35222_v48 = vand.u32 4294901760, %v35186_v56  ;;  %v2487_v25 = vand.u32 4294901760, %v1638_v6  ;;  %v2491_v26 = vand.u32 4294901760, %v1643_v51  ;;  %v39132_v55 = vld [vmem:[#allocation24_spill] sm:$0xff]  ;;  %v39133_v17 = vld [vmem:[#allocation15_spill] sm:$0xff] }
  0x54   : > { %31091 = vmatprep.subr.bf16.mxu0 %v31090_v30  ;;  %1977 = vmatprep.mubr.f32.mxu1 %v39101_v9  ;;  %v35250_v0 = vpack.c.bf16 %v39130_v33, %v39129_v41  ;;  %v38811_v62 = vand.u32 4294901760, %v35235_v3 }
  0x55   : > { %31093 = vmatpush3.bf16.msra.mxu0 %v31090_v30  ;;  %v35260_v27 = vsub.f32 %v1643_v51, %v2491_v26 }
  0x56   : > { %31095 = vmatprep.subr.bf16.mxu0 %v31094_v54  ;;  %v35265_v39 = vsub.f32 %v35235_v3, %v38811_v62  ;;  %v39137_v62 = vld [vmem:[#allocation32_spill] sm:$0xff] }
  0x57   : > { %1979 = vmatmul.mubr.f32.gmra.mrb[4].mxu1 %v34962_v12  ;;  %v2640_v51 = vand.u32 4294901760, %v35260_v27 }
  0x58   : > { %28377 = vmatmul.mubr.f32.vlgmr.msra.gmra.mrb[0].mxu0 %v34825_v53  ;;  %2065 = vmatprep.mubr.f32.mxu1 %v39101_v9  ;;  %v38821_v41 = vand.u32 4294901760, %v35265_v39 }
  0x59   : > { %28379 = vmatprep.mubr.f32.mxu0 %v34868_v22  ;;  %31097 = vmatpush3.bf16.msra.mxu0 %v31094_v54  ;;  %v35258_v54 = vsub.f32 %v1638_v6, %v2487_v25 }
  0x5a   : > { %31099 = vmatprep.subr.bf16.mxu0 %v31098_v38 }
  0x5b   : > { %2068 = vmatmul.mubr.f32.vlgmr.msra.gmra.mrb[6].mxu1 %v35163_v15  ;;  %v2628_v6 = vand.u32 4294901760, %v35258_v54 }
  0x5c   : > { %28380 = vmatmul.mubr.f32.gmra.mrb[2].mxu0 %v34884_v49  ;;  %31153 = vmatpush1.bf16.msra.mxu1 %v34749_v24 }
  0x5d   : > { %28382 = vmatprep.mubr.f32.mxu0 %v34924_v5  ;;  %2073 = vmatprep.mubr.f32.mxu1 %v39101_v9 }
  0x5e   : > { %31155 = vmatprep.subr.bf16.mxu1 %v34784_v35  ;;  %31101 = vmatpush3.bf16.msra.mxu0 %v31098_v38 }
  0x5f   : > { %31103 = vmatprep.subr.bf16.mxu0 %v34731_v16  ;;  %2076 = vmatmul.mubr.f32.gmra.mrb[8].mxu1 %v35171_v18 }
  0x60   : > { %28383 = vmatmul.mubr.f32.gmra.mrb[4].mxu0 %v34951_v28  ;;  %2081 = vmatprep.mubr.f32.mxu1 %v39101_v9  ;;  %v39146_v28 = vld [vmem:[#allocation46_spill] sm:$0xff] }
  0x61   : > { %28385 = vmatprep.mubr.f32.mxu0 %v34968_v4  ;;  %31157 = vmatpush1.bf16.msra.mxu1 %v34786_v36 }
  0x62   : > { %31159 = vmatprep.subr.bf16.mxu1 %v31158_v46  ;;  %v39134_v46 = vld [vmem:[#allocation28_spill] sm:$0xff] }
  0x63   : > { %2084 = vmatmul.mubr.f32.gmra.mrb[10].mxu1 %v35186_v56 }
  0x64   : > { %28386 = vmatmul.mubr.f32.gmra.mrb[6].mxu0 %v34976_v43  ;;  %2089 = vmatprep.mubr.f32.mxu1 %v39101_v9  ;;  %v39144_v43 = vld [vmem:[#allocation42_spill] sm:$0xff] }
  0x65   : > { %28388 = vmatprep.mubr.f32.mxu0 %v34999_v11 }
  0x67   : > { %2092 = vmatmul.mubr.f32.gmra.mrb[0].mxu1 %v34866_v21  ;;  %v35302_v21 = vld [vmem:[%s38731_s3 + $0x60] sm:$0xff] }
  0x68   : > { %28389 = vmatmul.mubr.f32.gmra.mrb[8].mxu0 %v35015_v7  ;;  %2097 = vmatprep.mubr.f32.mxu1 %v39101_v9 }
  0x69   : > { %28391 = vmatprep.mubr.f32.mxu0 %v35017_v19 }
  0x6b   : > { %2100 = vmatmul.mubr.f32.gmra.mrb[2].mxu1 %v34916_v45 }
  0x6c   : > { %28392 = vmatmul.mubr.f32.gmra.mrb[10].mxu0 %v35019_v58  ;;  %2105 = vmatprep.mubr.f32.mxu1 %v39101_v9 }
  0x6d   : > { %28394 = vmatprep.mubr.f32.mxu0 %v35042_v42 }
  0x6f   : > { %2108 = vmatmul.mubr.f32.gmra.mrb[4].mxu1 %v34974_v29  ;;  %v35287_v29 = vpack.c.bf16 %v2640_v51, %v2628_v6 }
  0x70   : > { %28395 = vmatmul.mubr.f32.gmra.mrb[12].mxu0 %v35049_v44  ;;  %2186 = vmatprep.mubr.f32.mxu1 %v39101_v9  ;;  %v2497_v44 = vand.u32 4294901760, %v35302_v21 }
  0x71   : > { %28397 = vmatprep.mubr.f32.mxu0 %v35106_v61  ;;  %39138 = vst [vmem:[#allocation12_spill] sm:$0xff] %v35287_v29  ;;  %v35307_v29 = vld [vmem:[%s38731_s3 + $0x88] sm:$0xff] }
  0x72   : > { %v2501_v42 = vand.u32 4294901760, %v35307_v29  ;;  %v35320_v7 = vsub.f32 %v35302_v21, %v2497_v44 }
  0x73   : > { %2190 = vmatmul.mubr.f32.vlgmr.msra.gmra.mrb[6].mxu1 %v35206_v31 }
  0x74   : > { %28398 = vmatmul.mubr.f32.gmra.mrb[14].mxu0 %v35109_v40  ;;  %31161 = vmatpush1.bf16.msra.mxu1 %v35132_v8  ;;  %v35240_v8 = vld [vmem:[%s38731_s3 + $0x38] sm:$0xff]  ;;  %v39140_v40 = vld [vmem:[#allocation37_spill] sm:$0xff]  ;;  %v35323_v11 = vsub.f32 %v35307_v29, %v2501_v42  ;;  %v38845_v29 = vand.u32 4294901760, %v35320_v7 }
  0x75   : > { %28408 = vmatprep.mubr.f32.mxu0 %v39124_v32  ;;  %2195 = vmatprep.mubr.f32.mxu1 %v39101_v9  ;;  %v38810_v30 = vand.u32 4294901760, %v35240_v8 }
  0x76   : > { %31163 = vmatprep.subr.bf16.mxu1 %v35141_v20  ;;  %v39131_v20 = vld [vmem:[#allocation21_spill] sm:$0xff]  ;;  %v38844_v4 = vand.u32 4294901760, %v35323_v11 }
  0x77   : > { %2199 = vmatmul.mubr.f32.gmra.mrb[8].mxu1 %v35213_v57  ;;  %v35270_v38 = vsub.f32 %v35240_v8, %v38810_v30  ;;  %v39136_v30 = vld [vmem:[#allocation20_spill] sm:$0xff] }
  0x78   : > { %28409 = vmatmul.mubr.f32.vlgmr.msra.gmra.mrb[0].mxu0 %v39125_v34  ;;  %2204 = vmatprep.mubr.f32.mxu1 %v39101_v9 }
  0x79   : > { %28411 = vmatprep.mubr.f32.mxu0 %v39126_v50  ;;  %31165 = vmatpush1.bf16.msra.mxu1 %v35147_v13  ;;  %v39128_v13 = vld [vmem:[#allocation11_spill] sm:$0xff]  ;;  %v38820_v33 = vand.u32 4294901760, %v35270_v38 }
  0x7a   : > { %31167 = vmatprep.subr.bf16.mxu1 %v34747_v23  ;;  %31105 = vmatpush3.bf16.msra.mxu0 %v34731_v16  ;;  %v39145_v23 = vld [vmem:[#allocation43_spill] sm:$0xff] }
  0x7b   : > { %31107 = vmatprep.subr.bf16.mxu0 %v39128_v13  ;;  %2208 = vmatmul.mubr.f32.gmra.mrb[10].mxu1 %v35222_v48  ;;  %v35293_v45 = vpack.c.bf16 %v38820_v33, %v38821_v41  ;;  %v39141_v33 = vld [vmem:[#allocation29_spill] sm:$0xff]  ;;  %v39142_v41 = vld [vmem:[#allocation38_spill] sm:$0xff] }
  0x7c   : > { %28412 = vmatmul.mubr.f32.gmra.mrb[2].mxu0 %v39127_v47  ;;  %2213 = vmatprep.mubr.f32.mxu1 %v39101_v9 }
  0x7d   : > { %28414 = vmatprep.mubr.f32.mxu0 %v39131_v20  ;;  %39139 = vst [vmem:[#allocation13_spill] sm:$0xff] %v35293_v45 }
  0x7e   : > { %31109 = vmatpush3.bf16.msra.mxu0 %v39128_v13 }
  0x7f   : > { %31111 = vmatprep.subr.bf16.mxu0 %v35250_v0  ;;  %2217 = vmatmul.mubr.f32.gmra.mrb[0].mxu1 %v39133_v17  ;;  %v1648_v17 = vld [vmem:[%s38731_s3 + $0x68] sm:$0xff] }
  0x80   : > { %28415 = vmatmul.mubr.f32.gmra.mrb[4].mxu0 %v39132_v55  ;;  %2222 = vmatprep.mubr.f32.mxu1 %v39101_v9  ;;  %v2495_v45 = vand.u32 4294901760, %v1648_v17 }
  0x81   : > { %28417 = vmatprep.mubr.f32.mxu0 %v39134_v46 }
  0x82   : > { %v35315_v58 = vsub.f32 %v1648_v17, %v2495_v45  ;;  %v35330_v17 = vpack.c.bf16 %v2491_v26, %v2487_v25  ;;  %v35346_v25 = vpack.c.bf16 %v38844_v4, %v38845_v29  ;;  %v39148_v26 = vand.u32 4294901760, %v39124_v32 }
  0x83   : > { %2226 = vmatmul.mubr.f32.gmra.mrb[2].mxu1 %v39136_v30  ;;  %v1653_v30 = vld [vmem:[%s38731_s3 + $0x90] sm:$0xff]  ;;  %v39150_v4 = vand.u32 4294901760, %v39126_v50  ;;  %v39151_v29 = vand.u32 4294901760, %v39127_v47  ;;  %v39152_v32 = vand.u32 4294901760, %v39131_v20  ;;  %v39154_v50 = vand.u32 4294901760, %v39134_v46 }
  0x84   : > { %28418 = vmatmul.mubr.f32.gmra.mrb[6].mxu0 %v39135_v14  ;;  %2231 = vmatprep.mubr.f32.mxu1 %v39101_v9  ;;  %v2499_v61 = vand.u32 4294901760, %v1653_v30  ;;  %v2652_v21 = vand.u32 4294901760, %v35315_v58  ;;  %v39155_v47 = vand.u32 4294901760, %v35235_v3  ;;  %v39158_v46 = vand.u32 4294901760, %v39137_v62 }
  0x85   : > { %28420 = vmatprep.mubr.f32.mxu0 %v39137_v62  ;;  %v35395_v3 = vpack.c.bf16 %v2501_v42, %v2497_v44  ;;  %v39162_v44 = vand.u32 4294901760, %v39144_v43  ;;  %v39163_v42 = vand.u32 4294901760, %v39145_v23  ;;  %v39165_v62 = vand.u32 4294901760, %v35265_v39 }
  0x86   : > { %v35317_v19 = vsub.f32 %v1653_v30, %v2499_v61  ;;  %v35386_v20 = vpack.c.bf16 %v2499_v61, %v2495_v45  ;;  %v39159_v45 = vand.u32 4294901760, %v39140_v40 }
  0x87   : > { %2235 = vmatmul.mubr.f32.gmra.mrb[4].mxu1 %v39141_v33  ;;  %v39143_v33 = vld [vmem:[#allocation39_spill] sm:$0xff] }
  0x88   : > { %28421 = vmatmul.mubr.f32.gmra.mrb[8].mxu0 %v39140_v40  ;;  %2329 = vmatprep.mubr.f32.mxu1 %v39101_v9  ;;  %v2664_v30 = vand.u32 4294901760, %v35317_v19  ;;  %v39164_v40 = vand.u32 4294901760, %v39146_v28 }
  0x89   : > { %28423 = vmatprep.mubr.f32.mxu0 %v39142_v41 }
  0x8b   : > { %2331 = vmatmul.mubr.f32.vlgmr.msra.gmra.mrb[6].mxu1 %v34840_v59 }
  0x8c   : > { %28424 = vmatmul.mubr.f32.gmra.mrb[10].mxu0 %v39143_v33  ;;  %31169 = vmatpush1.bf16.msra.mxu1 %v34749_v24  ;;  %v35340_v24 = vpack.c.bf16 %v2664_v30, %v2652_v21 }
  0x8d   : > { %28426 = vmatprep.mubr.f32.mxu0 %v39144_v43  ;;  %2336 = vmatprep.mubr.f32.mxu1 %v39101_v9 }
  0x8e   : > { %31171 = vmatprep.subr.bf16.mxu1 %v34784_v35  ;;  %39147 = vst [vmem:[#allocation16_spill] sm:$0xff] %v35340_v24  ;;  %v39149_v24 = vand.u32 4294901760, %v39125_v34  ;;  %v39153_v34 = vand.u32 4294901760, %v39132_v55  ;;  %v39157_v55 = vand.u32 4294901760, %v39135_v14  ;;  %v39160_v14 = vand.u32 4294901760, %v39142_v41 }
  0x8f   : > { %2338 = vmatmul.mubr.f32.gmra.mrb[8].mxu1 %v34843_v60  ;;  %v2635_v41 = vsub.f32 %v35265_v39, %v39165_v62  ;;  %v39173_v62 = vld [vmem:[#allocation27_spill] sm:$0xff] }
  0x90   : > { %28427 = vmatmul.mubr.f32.gmra.mrb[12].mxu0 %v39145_v23  ;;  %2343 = vmatprep.mubr.f32.mxu1 %v39101_v9  ;;  %v2665_v23 = vsub.f32 %v35317_v19, %v2664_v30  ;;  %v39169_v30 = vand.u32 4294901760, %v35323_v11 }
  0x91   : > { %28429 = vmatprep.mubr.f32.mxu0 %v39146_v28  ;;  %31173 = vmatpush1.bf16.msra.mxu1 %v34786_v36  ;;  %v1775_v28 = vsub.f32 %v35163_v15, %v35206_v31 }
  0x92   : > { %31175 = vmatprep.subr.bf16.mxu1 %v35330_v17 }
  0x93   : > { %2345 = vmatmul.mubr.f32.gmra.mrb[10].mxu1 %v34852_v63 }
  0x94   : > { %28430 = vmatmul.mubr.f32.gmra.mrb[14].mxu0 %v35119_v1  ;;  %2350 = vmatprep.mubr.f32.mxu1 %v39101_v9 }
  0x95   : > { %28440 = vmatprep.mubr.f32.mxu0 %v39148_v26  ;;  %v39167_v26 = vand.u32 4294901760, %v35119_v1  ;;  %v2671_v1 = vsub.f32 %v35323_v11, %v39169_v30  ;;  %v1644_v30 = vld [vmem:[%s38731_s3 + $0x48] sm:$0xff] }
  0x97   : > { %2352 = vmatmul.mubr.f32.gmra.mrb[0].mxu1 %v34854_v2 }
  0x98   : > { %28441 = vmatmul.mubr.f32.vlgmr.msra.gmra.mrb[0].mxu0 %v39149_v24  ;;  %2357 = vmatprep.mubr.f32.mxu1 %v39101_v9  ;;  %v2641_v24 = vsub.f32 %v35260_v27, %v2640_v51 }
  0x99   : > { %28443 = vmatprep.mubr.f32.mxu0 %v39150_v4  ;;  %31113 = vmatpush3.bf16.msra.mxu0 %v35250_v0  ;;  %v2629_v4 = vsub.f32 %v35258_v54, %v2628_v6 }
  0x9a   : > { %31115 = vmatprep.subr.bf16.mxu0 %v35154_v37  ;;  %v2642_v51 = vand.u32 4294901760, %v2641_v24  ;;  %v39168_v24 = vand.u32 4294901760, %v35320_v7 }
  0x9b   : > { %2359 = vmatmul.mubr.f32.gmra.mrb[2].mxu1 %v34899_v10  ;;  %v2630_v6 = vand.u32 4294901760, %v2629_v4 }
  0x9c   : > { %28444 = vmatmul.mubr.f32.gmra.mrb[2].mxu0 %v39151_v29  ;;  %2364 = vmatprep.mubr.f32.mxu1 %v39101_v9  ;;  %v2653_v29 = vsub.f32 %v35315_v58, %v2652_v21  ;;  %v2659_v21 = vsub.f32 %v35320_v7, %v39168_v24  ;;  %v39184_v24 = vld [vmem:[#allocation45_spill] sm:$0xff] }
  0x9d   : > { %28446 = vmatprep.mubr.f32.mxu0 %v39152_v32  ;;  %31117 = vmatpush3.bf16.msra.mxu0 %v35154_v37  ;;  %v39156_v37 = vand.u32 4294901760, %v35240_v8  ;;  %v31182_v61 = vpack.c.bf16 %v2642_v51, %v2630_v6  ;;  %v39161_v8 = vand.u32 4294901760, %v39143_v33  ;;  %v39166_v33 = vand.u32 4294901760, %v35270_v38 }
  0x9e   : > { %31119 = vmatprep.subr.bf16.mxu0 %v34731_v16  ;;  %v2636_v32 = vand.u32 4294901760, %v2635_v41  ;;  %v2660_v51 = vand.u32 4294901760, %v2659_v21  ;;  %v39177_v41 = vld [vmem:[#allocation34_spill] sm:$0xff]  ;;  %v1639_v21 = vld [vmem:[%s38731_s3 + $0x20] sm:$0xff] }
  0x9f   : > { %2366 = vmatmul.mubr.f32.gmra.mrb[4].mxu1 %v34962_v12  ;;  %v35384_v0 = vpack.c.bf16 %v39156_v37, %v39155_v47  ;;  %v2647_v43 = vsub.f32 %v35270_v38, %v39166_v33  ;;  %v35441_v47 = vand.u32 4294901760, %v1775_v28  ;;  %v1786_v37 = vsub.f32 %v35171_v18, %v35213_v57  ;;  %v39178_v33 = vld [vmem:[#allocation35_spill] sm:$0xff]  ;;  %v39183_v28 = vld [vmem:[#allocation44_spill] sm:$0xff] }
  0xa0   : > { %28447 = vmatmul.mubr.f32.gmra.mrb[4].mxu0 %v39153_v34  ;;  %2444 = vmatprep.mubr.f32.mxu1 %v39101_v9  ;;  %v2654_v34 = vand.u32 4294901760, %v2653_v29  ;;  %v39180_v29 = vld [vmem:[#allocation40_spill] sm:$0xff] }
  0xa1   : > { %28449 = vmatprep.mubr.f32.mxu0 %v39154_v50  ;;  %v2648_v4 = vand.u32 4294901760, %v2647_v43  ;;  %v2666_v50 = vand.u32 4294901760, %v2665_v23  ;;  %v39179_v43 = vld [vmem:[#allocation23_spill] sm:$0xff]  ;;  %v39181_v23 = vld [vmem:[#allocation41_spill] sm:$0xff] }
  0xa3   : > { %2446 = vmatmul.mubr.f32.vlgmr.msra.gmra.mrb[6].mxu1 %v34840_v59  ;;  %v31184_v6 = vpack.c.bf16 %v2648_v4, %v2636_v32  ;;  %v31192_v32 = vpack.c.bf16 %v35270_v38, %v35265_v39  ;;  %v31194_v4 = vpack.c.bf16 %v35317_v19, %v35315_v58  ;;  %v31196_v19 = vpack.c.bf16 %v35323_v11, %v35320_v7 }
  0xa4   : > { %28450 = vmatmul.mubr.f32.gmra.mrb[6].mxu0 %v39157_v55  ;;  %31177 = vmatpush1.bf16.msra.mxu1 %v35384_v0  ;;  %v2672_v55 = vand.u32 4294901760, %v2671_v1  ;;  %v3276_v58 = vand.u32 4294901760, %v1639_v21  ;;  %v3279_v39 = vand.u32 4294901760, %v1644_v30  ;;  %v39186_v1 = vld [vmem:[#allocation12_spill] sm:$0xff] }
  0xa5   : > { %28452 = vmatprep.mubr.f32.mxu0 %v39158_v46  ;;  %2451 = vmatprep.mubr.f32.mxu1 %v39101_v9  ;;  %v31186_v46 = vpack.c.bf16 %v2666_v50, %v2654_v34 }
  0xa6   : > { %31179 = vmatprep.subr.bf16.mxu1 %v35386_v20  ;;  %v35506_v7 = vpack.c.bf16 %v3279_v39, %v3276_v58 }
  0xa7   : > { %2453 = vmatmul.mubr.f32.gmra.mrb[8].mxu1 %v34843_v60 }
  0xa8   : > { %28453 = vmatmul.mubr.f32.gmra.mrb[8].mxu0 %v39159_v45  ;;  %2458 = vmatprep.mubr.f32.mxu1 %v39101_v9  ;;  %v1797_v45 = vsub.f32 %v35186_v56, %v35222_v48 }
  0xa9   : > { %28455 = vmatprep.mubr.f32.mxu0 %v39160_v14  ;;  %31181 = vmatpush1.bf16.msra.mxu1 %v35395_v3  ;;  %v31188_v14 = vpack.c.bf16 %v2672_v55, %v2660_v51 }
  0xaa   : > { %31183 = vmatprep.subr.bf16.mxu1 %v31182_v61  ;;  %v35451_v61 = vand.u32 4294901760, %v1786_v37 }
  0xab   : > { %2460 = vmatmul.mubr.f32.gmra.mrb[10].mxu1 %v34852_v63 }
  0xac   : > { %28456 = vmatmul.mubr.f32.gmra.mrb[10].mxu0 %v39161_v8  ;;  %2465 = vmatprep.mubr.f32.mxu1 %v39101_v9  ;;  %v39170_v8 = vld [vmem:[#allocation22_spill] sm:$0xff] }
  0xad   : > { %28458 = vmatprep.mubr.f32.mxu0 %v39162_v44  ;;  %v39171_v44 = vld [vmem:[#allocation9_spill] sm:$0xff] }
  0xaf   : > { %2467 = vmatmul.mubr.f32.gmra.mrb[0].mxu1 %v34854_v2 }
  0xb0   : > { %28459 = vmatmul.mubr.f32.gmra.mrb[12].mxu0 %v39163_v42  ;;  %2472 = vmatprep.mubr.f32.mxu1 %v39101_v9  ;;  %v39172_v42 = vld [vmem:[#allocation25_spill] sm:$0xff] }
  0xb1   : > { %28461 = vmatprep.mubr.f32.mxu0 %v39164_v40  ;;  %v35463_v40 = vand.u32 4294901760, %v1797_v45 }
  0xb3   : > { %2474 = vmatmul.mubr.f32.gmra.mrb[2].mxu1 %v34899_v10 }
  0xb4   : > { %28462 = vmatmul.mubr.f32.gmra.mrb[14].mxu0 %v39167_v26  ;;  %2479 = vmatprep.mubr.f32.mxu1 %v39101_v9  ;;  %v39182_v26 = vld [vmem:[#allocation36_spill] sm:$0xff] }
  0xb5   : > { %28472 = vmatprep.mubr.f32.mxu0 %v34823_v52 }
  0xb7   : > { %2481 = vmatmul.mubr.f32.gmra.mrb[4].mxu1 %v34962_v12 }
  0xb8   : > { %28473 = vmatmul.mubr.f32.vlgmr.msra.gmra.mrb[0].mxu0 %v34825_v53  ;;  %2559 = vmatprep.mubr.f32.mxu1 %v39101_v9 }
  0xb9   : > { %28475 = vmatprep.mubr.f32.mxu0 %v34868_v22  ;;  %31121 = vmatpush3.bf16.msra.mxu0 %v34731_v16  ;;  %v31190_v16 = vpack.c.bf16 %v35260_v27, %v35258_v54  ;;  %v39174_v54 = vld [vmem:[#allocation31_spill] sm:$0xff]  ;;  %v39176_v27 = vld [vmem:[#allocation18_spill] sm:$0xff] }
  0xba   : > { %31123 = vmatprep.subr.bf16.mxu0 %v39128_v13 }
  0xbb   : > { %2565 = vmatmul.mubr.f32.vlgmr.msra.gmra.mrb[12].mxu1 %v35441_v47 }
  0xbc   : > { %28476 = vmatmul.mubr.f32.gmra.mrb[2].mxu0 %v34884_v49  ;;  %31185 = vmatpush1.bf16.msra.mxu1 %v31184_v6 }
  0xbd   : > { %28478 = vmatprep.mubr.f32.mxu0 %v34924_v5  ;;  %2570 = vmatprep.mubr.f32.mxu1 %v39101_v9 }
  0xbe   : > { %31187 = vmatprep.subr.bf16.mxu1 %v31186_v46  ;;  %31125 = vmatpush3.bf16.msra.mxu0 %v39128_v13  ;;  %v39175_v13 = vld [vmem:[#allocation33_spill] sm:$0xff] }
  0xbf   : > { %31127 = vmatprep.subr.bf16.mxu0 %v39171_v44  ;;  %2576 = vmatmul.mubr.f32.gmra.mrb[14].mxu1 %v35451_v61 }
  0xc0   : > { %28479 = vmatmul.mubr.f32.gmra.mrb[4].mxu0 %v39170_v8  ;;  %2581 = vmatprep.mubr.f32.mxu1 %v39101_v9 }
  0xc1   : > { %28481 = vmatprep.mubr.f32.mxu0 %v39172_v42  ;;  %31189 = vmatpush1.bf16.msra.mxu1 %v31188_v14 }
  0xc2   : > { %31191 = vmatprep.subr.bf16.mxu1 %v31190_v16  ;;  %v39187_v16 = vld [vmem:[#allocation14_spill] sm:$0xff] }
  0xc3   : > { %2587 = vmatmul.mubr.f32.gmra.mrb[16].mxu1 %v35463_v40 }
  0xc4   : > { %28482 = vmatmul.mubr.f32.gmra.mrb[6].mxu0 %v39173_v62  ;;  %2592 = vmatprep.mubr.f32.mxu1 %v39101_v9 }
  0xc5   : > { %28484 = vmatprep.mubr.f32.mxu0 %v39174_v54 }
  0xc7   : > { %2598 = vmatmul.mubr.f32.gmra.mrb[18].mxu1 %v39176_v27 }
  0xc8   : > { %28485 = vmatmul.mubr.f32.gmra.mrb[8].mxu0 %v39175_v13  ;;  %2603 = vmatprep.mubr.f32.mxu1 %v39101_v9 }
  0xc9   : > { %28487 = vmatprep.mubr.f32.mxu0 %v39177_v41 }
  0xcb   : > { %2609 = vmatmul.mubr.f32.gmra.mrb[20].mxu1 %v39179_v43 }
  0xcc   : > { %28488 = vmatmul.mubr.f32.gmra.mrb[10].mxu0 %v39178_v33  ;;  %2614 = vmatprep.mubr.f32.mxu1 %v39101_v9 }
  0xcd   : > { %28490 = vmatprep.mubr.f32.mxu0 %v39180_v29 }
  0xcf   : > { %2620 = vmatmul.mubr.f32.gmra.mrb[22].mxu1 %v39182_v26 }
  0xd0   : > { %28491 = vmatmul.mubr.f32.gmra.mrb[12].mxu0 %v39181_v23  ;;  %2730 = vmatprep.mubr.f32.mxu1 %v39101_v9 }
  0xd1   : > { %28493 = vmatprep.mubr.f32.mxu0 %v39183_v28 }
  0xd3   : > { %2732 = vmatmul.mubr.f32.vlgmr.msra.gmra.mrb[12].mxu1 %v34840_v59 }
  0xd4   : > { %28494 = vmatmul.mubr.f32.gmra.mrb[14].mxu0 %v39184_v24  ;;  %31193 = vmatpush1.bf16.msra.mxu1 %v31192_v32 }
  0xd5   : > { %28504 = vmatprep.mubr.f32.mxu0 %v34823_v52  ;;  %2737 = vmatprep.mubr.f32.mxu1 %v39101_v9  ;;  %v39185_v52 = vld [vmem:[#allocation10_spill] sm:$0xff] }
  0xd6   : > { %31195 = vmatprep.subr.bf16.mxu1 %v31194_v4 }
  0xd7   : > { %2739 = vmatmul.mubr.f32.gmra.mrb[14].mxu1 %v34843_v60 }
  0xd8   : > { %28505 = vmatmul.mubr.f32.vlgmr.msra.gmra.mrb[0].mxu0 %v34825_v53  ;;  %2744 = vmatprep.mubr.f32.mxu1 %v39101_v9  ;;  %v1649_v53 = vld [vmem:[%s38731_s3 + $0x70] sm:$0xff] }
  0xd9   : > { %28507 = vmatprep.mubr.f32.mxu0 %v34868_v22  ;;  %31197 = vmatpush1.bf16.msra.mxu1 %v31196_v19  ;;  %v1654_v22 = vld [vmem:[%s38731_s3 + $0x98] sm:$0xff]  ;;  %v3282_v11 = vand.u32 4294901760, %v1649_v53 }
  0xda   : > { %31199 = vmatprep.subr.bf16.mxu1 %v35330_v17  ;;  %31129 = vmatpush1.bf16.msra.mxu0 %v39185_v52  ;;  %v3285_v38 = vand.u32 4294901760, %v1654_v22 }
  0xdb   : > { %31131 = vmatprep.subr.bf16.mxu0 %v34784_v35  ;;  %2746 = vmatmul.mubr.f32.gmra.mrb[16].mxu1 %v34852_v63  ;;  %v35525_v35 = vsub.f32 %v1639_v21, %v3276_v58  ;;  %v35556_v37 = vsub.f32 %v1649_v53, %v3282_v11  ;;  %v35686_v58 = vld [vmem:[%s38732_s4 + $0x50] sm:$0xff] }
  0xdc   : > { %28508 = vmatmul.mubr.f32.gmra.mrb[2].mxu0 %v34884_v49  ;;  %2751 = vmatprep.mubr.f32.mxu1 %v39101_v9  ;;  %v35558_v6 = vsub.f32 %v1654_v22, %v3285_v38  ;;  %v35563_v51 = vpack.c.bf16 %v3285_v38, %v3282_v11  ;;  %v4024_v53 = vand.u32 4294901760, %v35686_v58  ;;  %v400_v11 = vld [vmem:[%s38732_s4 + $0x48] sm:$0xff] }
  0xdd   : > { %28510 = vmatprep.mubr.f32.mxu0 %v34924_v5  ;;  %v3407_v49 = vand.u32 4294901760, %v35525_v35  ;;  %v3421_v45 = vand.u32 4294901760, %v35556_v37 }
  0xde   : > { %31133 = vmatpush1.bf16.msra.mxu0 %v34786_v36  ;;  %v35527_v36 = vsub.f32 %v1644_v30, %v3279_v39  ;;  %v3428_v14 = vand.u32 4294901760, %v35558_v6  ;;  %v35691_v39 = vld [vmem:[%s38732_s4 + $0x78] sm:$0xff] }
  0xdf   : > { %31223 = vmatprep.subr.bf16.mxu0 %v35506_v7  ;;  %2753 = vmatmul.mubr.f32.gmra.mrb[18].mxu1 %v34854_v2  ;;  %v3408_v34 = vsub.f32 %v35525_v35, %v3407_v49  ;;  %v3422_v44 = vsub.f32 %v35556_v37, %v3421_v45  ;;  %v4028_v22 = vand.u32 4294901760, %v35691_v39 }
  0xe0   : > { %28511 = vmatmul.mubr.f32.gmra.mrb[4].mxu0 %v39170_v8  ;;  %2758 = vmatprep.mubr.f32.mxu1 %v39101_v9  ;;  %v3414_v5 = vand.u32 4294901760, %v35527_v36 }
  0xe1   : > { %28513 = vmatprep.mubr.f32.mxu0 %v39172_v42  ;;  %v3409_v55 = vand.u32 4294901760, %v3408_v34  ;;  %v3429_v42 = vsub.f32 %v35558_v6, %v3428_v14 }
  0xe2   : > { %v3415_v50 = vsub.f32 %v35527_v36, %v3414_v5 }
  0xe3   : > { %2760 = vmatmul.mubr.f32.gmra.mrb[20].mxu1 %v34899_v10 }
  0xe4   : > { %28514 = vmatmul.mubr.f32.gmra.mrb[6].mxu0 %v39173_v62  ;;  %2765 = vmatprep.mubr.f32.mxu1 %v39101_v9  ;;  %v3416_v46 = vand.u32 4294901760, %v3415_v50  ;;  %v39188_v62 = vld [vmem:[#allocation19_spill] sm:$0xff] }
  0xe5   : > { %28516 = vmatprep.mubr.f32.mxu0 %v39174_v54  ;;  %v3423_v54 = vand.u32 4294901760, %v3422_v44 }
  0xe6   : > { %v31230_v8 = vpack.c.bf16 %v3416_v46, %v3409_v55  ;;  %v35728_v55 = vpack.c.bf16 %v4028_v22, %v4024_v53  ;;  %v405_v46 = vld [vmem:[%s38732_s4 + $0x70] sm:$0xff] }
  0xe7   : > { %2767 = vmatmul.mubr.f32.gmra.mrb[22].mxu1 %v34962_v12  ;;  %v5107_v44 = vand.u32 4294901760, %v405_v46 }
  0xe8   : > { %28517 = vmatmul.mubr.f32.gmra.mrb[8].mxu0 %v39175_v13  ;;  %2853 = vmatprep.mubr.f32.mxu1 %v39101_v9  ;;  %v3430_v13 = vand.u32 4294901760, %v3429_v42  ;;  %39198 = vst [vmem:[#allocation24_spill] sm:$0xff] %v35728_v55 }
  0xe9   : > { %28519 = vmatprep.mubr.f32.mxu0 %v39177_v41  ;;  %v39189_v41 = vld [vmem:[#allocation26_spill] sm:$0xff] }
  0xeb   : > { %2856 = vmatmul.mubr.f32.vlgmr.msra.gmra.mrb[12].mxu1 %v35163_v15 }
  0xec   : > { %28520 = vmatmul.mubr.f32.gmra.mrb[10].mxu0 %v39178_v33  ;;  %31201 = vmatpush1.bf16.msra.mxu1 %v35384_v0  ;;  %v31234_v33 = vpack.c.bf16 %v3430_v13, %v3423_v54 }
  0xed   : > { %28522 = vmatprep.mubr.f32.mxu0 %v39180_v29  ;;  %2861 = vmatprep.mubr.f32.mxu1 %v39101_v9  ;;  %v39190_v29 = vld [vmem:[#allocation13_spill] sm:$0xff] }
  0xee   : > { %31203 = vmatprep.subr.bf16.mxu1 %v35386_v20 }
  0xef   : > { %2864 = vmatmul.mubr.f32.gmra.mrb[14].mxu1 %v35171_v18 }
  0xf0   : > { %28523 = vmatmul.mubr.f32.gmra.mrb[12].mxu0 %v39181_v23  ;;  %2869 = vmatprep.mubr.f32.mxu1 %v39101_v9  ;;  %v39191_v23 = vld [vmem:[#allocation16_spill] sm:$0xff] }
  0xf1   : > { %28525 = vmatprep.mubr.f32.mxu0 %v39183_v28  ;;  %31205 = vmatpush1.bf16.msra.mxu1 %v35395_v3 }
  0xf2   : > { %31207 = vmatprep.subr.bf16.mxu1 %v39186_v1 }
  0xf3   : > { %2872 = vmatmul.mubr.f32.gmra.mrb[16].mxu1 %v35186_v56 }
  0xf4   : > { %28526 = vmatmul.mubr.f32.gmra.mrb[14].mxu0 %v39184_v24  ;;  %2877 = vmatprep.mubr.f32.mxu1 %v39101_v9 }
  0xf5   : > { %1771 = vmatprep.mubr.f32.mxu0 %v39101_v9 }
  0xf7   : > { %2880 = vmatmul.mubr.f32.gmra.mrb[18].mxu1 %v39187_v16 }
  0xf8   : > { %1777 = vmatmul.mubr.f32.vlgmr.msra.gmra.mrb[16].mxu0 %v35441_v47  ;;  %2885 = vmatprep.mubr.f32.mxu1 %v39101_v9 }
  0xf9   : > { %1782 = vmatprep.mubr.f32.mxu0 %v39101_v9  ;;  %31225 = vmatpush3.bf16.msra.mxu0 %v35506_v7 }
  0xfa   : > { %31227 = vmatprep.subr.bf16.mxu0 %v35563_v51 }
  0xfb   : > { %2888 = vmatmul.mubr.f32.gmra.mrb[20].mxu1 %v39188_v62 }
  0xfc   : > { %1788 = vmatmul.mubr.f32.gmra.mrb[18].mxu0 %v35451_v61  ;;  %2893 = vmatprep.mubr.f32.mxu1 %v39101_v9 }
  0xfd   : > { %1793 = vmatprep.mubr.f32.mxu0 %v39101_v9  ;;  %31229 = vmatpush3.bf16.msra.mxu0 %v35563_v51 }
  0xfe   : > { %31231 = vmatprep.subr.bf16.mxu0 %v31230_v8 }
  0xff   : > { %2896 = vmatmul.mubr.f32.gmra.mrb[22].mxu1 %v39189_v41 }
 0x100   : > { %1799 = vmatmul.mubr.f32.gmra.mrb[20].mxu0 %v35463_v40  ;;  %2974 = vmatprep.mubr.f32.mxu1 %v39101_v9 }
 0x101   : > { %28536 = vmatprep.mubr.f32.mxu0 %v35441_v47  ;;  %v31238_v47 = vpack.c.bf16 %v35527_v36, %v35525_v35 }
 0x103   : > { %2978 = vmatmul.mubr.f32.vlgmr.msra.gmra.mrb[12].mxu1 %v35206_v31 }
 0x104   : > { %28537 = vmatmul.mubr.f32.vlgmr.msra.gmra.mrb[22].mxu0 %v35451_v61  ;;  %31209 = vmatpush1.bf16.msra.mxu1 %v39190_v29  ;;  %v31242_v61 = vpack.c.bf16 %v35558_v6, %v35556_v37  ;;  %v5104_v6 = vand.u32 4294901760, %v400_v11 }
 0x105   : > { %28539 = vmatprep.mubr.f32.mxu0 %v35463_v40  ;;  %2983 = vmatprep.mubr.f32.mxu1 %v39101_v9  ;;  %v39192_v40 = vld [vmem:[#allocation15_spill] sm:$0xff] }
 0x106   : > { %31211 = vmatprep.subr.bf16.mxu1 %v39191_v23  ;;  %31233 = vmatpush3.bf16.msra.mxu0 %v31230_v8  ;;  %v35750_v54 = vsub.f32 %v400_v11, %v5104_v6  ;;  %v38875_v23 = vmov 0.0|0.0  }
 0x107   : > { %31235 = vmatprep.subr.bf16.mxu0 %v31234_v33  ;;  %2987 = vmatmul.mubr.f32.gmra.mrb[14].mxu1 %v35213_v57 }
 0x108   : > { %28540 = vmatmul.mubr.f32.gmra.mrb[24].mxu0 %v39176_v27  ;;  %2992 = vmatprep.mubr.f32.mxu1 %v39101_v9  ;;  %v397_v27 = vld [vmem:[%s38732_s4 + $0x30] sm:$0xff] }
 0x109   : > { %28542 = vmatprep.mubr.f32.mxu0 %v39179_v43  ;;  %31213 = vmatpush1.bf16.msra.mxu1 %v35346_v25  ;;  %v392_v25 = vld [vmem:[%s38732_s4 + $0x8] sm:$0xff]  ;;  %v4018_v28 = vand.u32 4294901760, %v397_v27 }
 0x10a   : > { %31215 = vmatprep.subr.bf16.mxu1 %v35330_v17  ;;  %31237 = vmatpush3.bf16.msra.mxu0 %v31234_v33  ;;  %v39193_v17 = vld [vmem:[#allocation20_spill] sm:$0xff]  ;;  %v39194_v43 = vld [vmem:[#allocation29_spill] sm:$0xff] }
 0x10b   : > { %31239 = vmatprep.subr.bf16.mxu0 %v31238_v47  ;;  %2996 = vmatmul.mubr.f32.gmra.mrb[16].mxu1 %v35222_v48 }
 0x10c   : > { %28543 = vmatmul.mubr.f32.gmra.mrb[26].mxu0 %v39182_v26  ;;  %3001 = vmatprep.mubr.f32.mxu1 %v39101_v9  ;;  %v4014_v26 = vand.u32 4294901760, %v392_v25 }
 0x10d   : > { %28553 = vmatprep.mubr.f32.mxu0 %v34840_v59 }
 0x10e   : > { %v35633_v32 = vpack.c.bf16 %v4018_v28, %v4014_v26 }
 0x10f   : > { %3005 = vmatmul.mubr.f32.gmra.mrb[18].mxu1 %v39192_v40 }
 0x110   : > { %28554 = vmatmul.mubr.f32.vlgmr.msra.gmra.mrb[22].mxu0 %v34843_v60  ;;  %3010 = vmatprep.mubr.f32.mxu1 %v39101_v9  ;;  %39195 = vst [vmem:[#allocation17_spill] sm:$0xff] %v35633_v32 }
 0x111   : > { %28556 = vmatprep.mubr.f32.mxu0 %v34852_v63  ;;  %31241 = vmatpush3.bf16.msra.mxu0 %v31238_v47 }
 0x112   : > { %31243 = vmatprep.subr.bf16.mxu0 %v31242_v61 }
 0x113   : > { %3014 = vmatmul.mubr.f32.gmra.mrb[20].mxu1 %v39193_v17 }
 0x114   : > { %28557 = vmatmul.mubr.f32.gmra.mrb[24].mxu0 %v34854_v2  ;;  %3019 = vmatprep.mubr.f32.mxu1 %v39101_v9 }
 0x115   : > { %28559 = vmatprep.mubr.f32.mxu0 %v34899_v10  ;;  %31245 = vmatpush3.bf16.msra.mxu0 %v31242_v61  ;;  %v5189_v61 = vand.u32 4294901760, %v35750_v54 }
 0x116   : > { %31247 = vmatprep.subr.bf16.mxu0 %v35506_v7 }
 0x117   : > { %3023 = vmatmul.mubr.f32.gmra.mrb[22].mxu1 %v39194_v43 }
 0x118   : > { %28560 = vmatmul.mubr.f32.gmra.mrb[26].mxu0 %v34962_v12  ;;  %3117 = vmatprep.mubr.f32.mxu1 %v39101_v9 }
 0x119   : > { %28570 = vmatprep.mubr.f32.mxu0 %v35163_v15  ;;  %v31254_v15 = vpack.c.bf16 %v3414_v5, %v3407_v49  ;;  %v4005_v49 = vld [vmem:[%s35696_s22] sm:$0xff] }
 0x11a   : > { %v395_v5 = vld [vmem:[%s38732_s4 + $0x20] sm:$0xff]  ;;  %v4012_v50 = vsel %vm450_vm0, %v4005_v49, 0 }
 0x11b   : > { %3119 = vmatmul.mubr.f32.vlgmr.msra.gmra.mrb[12].mxu1 %v34840_v59  ;;  %v5101_v37 = vand.u32 4294901760, %v395_v5 }
 0x11c   : > { %28571 = vmatmul.mubr.f32.vlgmr.msra.gmra.mrb[22].mxu0 %v35171_v18  ;;  %31217 = vmatpush1.bf16.msra.mxu1 %v35384_v0  ;;  %v35652_v18 = vsub.f32 %v392_v25, %v4014_v26  ;;  %v31258_v0 = vpack.c.bf16 %v3428_v14, %v3421_v45  ;;  %v410_v45 = vld [vmem:[%s38732_s4 + $0x98] sm:$0xff]  ;;  %v35779_v25 = vsub.f32 %v35686_v58, %v4024_v53 }
 0x11d   : > { %28573 = vmatprep.mubr.f32.mxu0 %v35186_v56  ;;  %3124 = vmatprep.mubr.f32.mxu1 %v39101_v9  ;;  %v35654_v56 = vsub.f32 %v397_v27, %v4018_v28  ;;  %v5110_v42 = vand.u32 4294901760, %v410_v45  ;;  %v35782_v27 = vsub.f32 %v35691_v39, %v4028_v22 }
 0x11e   : > { %31219 = vmatprep.subr.bf16.mxu1 %v35386_v20  ;;  %31249 = vmatpush3.bf16.msra.mxu0 %v35506_v7  ;;  %v396_v20 = vld [vmem:[%s38732_s4 + $0x28] sm:$0xff] }
 0x11f   : > { %31251 = vmatprep.subr.bf16.mxu0 %v35563_v51  ;;  %3126 = vmatmul.mubr.f32.gmra.mrb[14].mxu1 %v34843_v60  ;;  %v4112_v4 = vand.u32 4294901760, %v35654_v56  ;;  %v4020_v21 = vand.u32 4294901760, %v396_v20 }
 0x120   : > { %28574 = vmatmul.mubr.f32.gmra.mrb[24].mxu0 %v39187_v16  ;;  %3131 = vmatprep.mubr.f32.mxu1 %v39101_v9  ;;  %v35740_v16 = vand.u32 4294901760, %v4012_v50 }
 0x121   : > { %28576 = vmatprep.mubr.f32.mxu0 %v39188_v62  ;;  %31221 = vmatpush1.bf16.msra.mxu1 %v35395_v3  ;;  %v4100_v3 = vand.u32 4294901760, %v35652_v18  ;;  %v4113_v35 = vsub.f32 %v35654_v56, %v4112_v4  ;;  %v35748_v62 = vsub.f32 %v395_v5, %v5101_v37 }
 0x122   : > { %31271 = vmatprep.subr.bf16.mxu1 %v35633_v32  ;;  %31253 = vmatpush3.bf16.msra.mxu0 %v35563_v51  ;;  %v35763_v33 = vsub.f32 %v4012_v50, %v35740_v16 }
 0x123   : > { %31255 = vmatprep.subr.bf16.mxu0 %v31254_v15  ;;  %3133 = vmatmul.mubr.f32.gmra.mrb[16].mxu1 %v34852_v63  ;;  %v4101_v52 = vsub.f32 %v35652_v18, %v4100_v3  ;;  %v4114_v34 = vand.u32 4294901760, %v4113_v35  ;;  %v5182_v47 = vand.u32 4294901760, %v35748_v62 }
 0x124   : > { %28577 = vmatmul.mubr.f32.gmra.mrb[26].mxu0 %v39189_v41  ;;  %3138 = vmatprep.mubr.f32.mxu1 %v39101_v9  ;;  %v35789_v28 = vand.u32 4294901760, %v35763_v33 }
 0x125   : > { %28587 = vmatprep.mubr.f32.mxu0 %v35206_v31  ;;  %v391_v31 = vld [vmem:[%s38732_s4] sm:$0xff]  ;;  %v4102_v1 = vand.u32 4294901760, %v4101_v52 }
 0x126   : > { %v4016_v24 = vand.u32 4294901760, %v391_v31 }
 0x127   : > { %3140 = vmatmul.mubr.f32.gmra.mrb[18].mxu1 %v34854_v2  ;;  %v35737_v14 = vpack.c.bf16 %v4114_v34, %v4102_v1 }
 0x128   : > { %28588 = vmatmul.mubr.f32.vlgmr.msra.gmra.mrb[22].mxu0 %v35213_v57  ;;  %3145 = vmatprep.mubr.f32.mxu1 %v39101_v9  ;;  %v402_v57 = vld [vmem:[%s38732_s4 + $0x58] sm:$0xff]  ;;  %v35709_v36 = vpack.c.bf16 %v4020_v21, %v4016_v24  ;;  %v35742_v8 = vsub.f32 %v391_v31, %v4016_v24  ;;  %v5190_v31 = vsub.f32 %v35750_v54, %v5189_v61 }
 0x129   : > { %28590 = vmatprep.mubr.f32.mxu0 %v35222_v48  ;;  %31257 = vmatpush3.bf16.msra.mxu0 %v31254_v15  ;;  %v407_v48 = vld [vmem:[%s38732_s4 + $0x80] sm:$0xff]  ;;  %v4022_v30 = vand.u32 4294901760, %v402_v57  ;;  %39199 = vst [vmem:[#allocation28_spill] sm:$0xff] %v35737_v14  ;;  %v35812_v24 = vpack.c.bf16 %v5110_v42, %v5107_v44 }
 0x12a   : > { %31259 = vmatprep.subr.bf16.mxu0 %v31258_v0  ;;  %v4026_v19 = vand.u32 4294901760, %v407_v48  ;;  %39196 = vst [vmem:[#allocation11_spill] sm:$0xff] %v35709_v36  ;;  %v4106_v29 = vand.u32 4294901760, %v35742_v8  ;;  %v5191_v52 = vand.u32 4294901760, %v5190_v31 }
 0x12b   : > { %3147 = vmatmul.mubr.f32.gmra.mrb[20].mxu1 %v34899_v10  ;;  %v35757_v13 = vsub.f32 %v402_v57, %v4022_v30 }
 0x12c   : > { %28591 = vmatmul.mubr.f32.gmra.mrb[24].mxu0 %v39192_v40  ;;  %3152 = vmatprep.mubr.f32.mxu1 %v39101_v9  ;;  %v35720_v38 = vpack.c.bf16 %v4026_v19, %v4022_v30  ;;  %v35759_v41 = vsub.f32 %v407_v48, %v4026_v19  ;;  %v35772_v40 = vsub.f32 %v405_v46, %v5107_v44  ;;  %v4142_v48 = vand.u32 4294901760, %v35782_v27 }
 0x12d   : > { %28593 = vmatprep.mubr.f32.mxu0 %v39193_v17  ;;  %31261 = vmatpush3.bf16.msra.mxu0 %v31258_v0  ;;  %v4107_v15 = vsub.f32 %v35742_v8, %v4106_v29  ;;  %v5183_v0 = vsub.f32 %v35748_v62, %v5182_v47  ;;  %v4090_v19 = vsub.f32 %v35763_v33, %v35789_v28 }
 0x12e   : > { %31263 = vmatprep.subr.bf16.mxu0 %v35506_v7  ;;  %39197 = vst [vmem:[#allocation21_spill] sm:$0xff] %v35720_v38  ;;  %v4136_v26 = vand.u32 4294901760, %v35759_v41  ;;  %v35885_v31 = vpack.c.bf16 %v35759_v41, %v35757_v13 }
 0x12f   : > { %3154 = vmatmul.mubr.f32.gmra.mrb[22].mxu1 %v34962_v12  ;;  %v4108_v58 = vand.u32 4294901760, %v4107_v15  ;;  %v5184_v39 = vand.u32 4294901760, %v5183_v0  ;;  %v35843_v11 = vand.u32 4294901760, %v4090_v19  ;;  %v35874_v15 = vpack.c.bf16 %v35750_v54, %v35748_v62 }
 0x130   : > { %28594 = vmatmul.mubr.f32.gmra.mrb[26].mxu0 %v39194_v43  ;;  %3232 = vmatprep.mubr.f32.mxu1 %v39101_v9  ;;  %v35784_v43 = vpack.c.bf16 %v5104_v6, %v5101_v37  ;;  %v4137_v30 = vsub.f32 %v35759_v41, %v4136_v26  ;;  %39208 = vst [vmem:[#allocation22_spill] sm:$0xff] %v35885_v31 }
 0x131   : > { %28604 = vmatprep.mubr.f32.mxu0 %v34840_v59  ;;  %v35847_v1 = vpack.c.bf16 %v5191_v52, %v5184_v39  ;;  %39206 = vst [vmem:[#allocation43_spill] sm:$0xff] %v35874_v15  ;;  %v35928_v19 = vpack.c.bf16 %v5189_v61, %v5182_v47 }
 0x132   : > { %v4138_v5 = vand.u32 4294901760, %v4137_v30  ;;  %v35918_v30 = vpack.c.bf16 %v4112_v4, %v4100_v3 }
 0x133   : > { %3234 = vmatmul.mubr.f32.vlgmr.msra.gmra.mrb[12].mxu1 %v34840_v59  ;;  %39200 = vst [vmem:[#allocation30_spill] sm:$0xff] %v35847_v1  ;;  %39212 = vst [vmem:[#allocation31_spill] sm:$0xff] %v35928_v19 }
 0x134   : > { %28605 = vmatmul.mubr.f32.vlgmr.msra.gmra.mrb[22].mxu0 %v34843_v60  ;;  %31273 = vmatpush1.bf16.msra.mxu1 %v35709_v36  ;;  %39211 = vst [vmem:[#allocation27_spill] sm:$0xff] %v35918_v30 }
 0x135   : > { %28607 = vmatprep.mubr.f32.mxu0 %v34852_v63  ;;  %3239 = vmatprep.mubr.f32.mxu1 %v39101_v9 }
 0x136   : > { %31275 = vmatprep.subr.bf16.mxu1 %v35720_v38  ;;  %31265 = vmatpush3.bf16.msra.mxu0 %v35506_v7  ;;  %v35754_v7 = vsub.f32 %v396_v20, %v4020_v21  ;;  %v5196_v20 = vand.u32 4294901760, %v35772_v40 }
 0x137   : > { %31267 = vmatprep.subr.bf16.mxu0 %v35563_v51  ;;  %3241 = vmatmul.mubr.f32.gmra.mrb[14].mxu1 %v34843_v60 }
 0x138   : > { %28608 = vmatmul.mubr.f32.gmra.mrb[24].mxu0 %v34854_v2  ;;  %3246 = vmatprep.mubr.f32.mxu1 %v39101_v9  ;;  %v4118_v17 = vand.u32 4294901760, %v35754_v7  ;;  %v5197_v35 = vsub.f32 %v35772_v40, %v5196_v20  ;;  %v35879_v0 = vpack.c.bf16 %v35754_v7, %v35742_v8 }
 0x139   : > { %28610 = vmatprep.mubr.f32.mxu0 %v34899_v10  ;;  %31277 = vmatpush1.bf16.msra.mxu1 %v35728_v55 }
 0x13a   : > { %31279 = vmatprep.subr.bf16.mxu1 %v35737_v14  ;;  %31269 = vmatpush3.bf16.msra.mxu0 %v35563_v51  ;;  %v35774_v51 = vsub.f32 %v410_v45, %v5110_v42  ;;  %v5198_v34 = vand.u32 4294901760, %v5197_v35  ;;  %v35866_v42 = vpack.c.bf16 %v35654_v56, %v35652_v18  ;;  %39207 = vst [vmem:[#allocation46_spill] sm:$0xff] %v35879_v0 }
 0x13b   : > { %31366 = vmatprep.subr.bf16.mxu0 %v38875_v23  ;;  %3248 = vmatmul.mubr.f32.gmra.mrb[16].mxu1 %v34852_v63  ;;  %v35935_v18 = vpack.c.bf16 %v4118_v17, %v4106_v29 }
 0x13c   : > { %28611 = vmatmul.mubr.f32.gmra.mrb[26].mxu0 %v34962_v12  ;;  %3253 = vmatprep.mubr.f32.mxu1 %v39101_v9  ;;  %v5203_v57 = vand.u32 4294901760, %v35774_v51  ;;  %39205 = vst [vmem:[#allocation42_spill] sm:$0xff] %v35866_v42 }
 0x13d   : > { %28621 = vmatprep.mubr.f32.mxu0 %v34840_v59  ;;  %v4124_v59 = vand.u32 4294901760, %v35757_v13  ;;  %39213 = vst [vmem:[#allocation33_spill] sm:$0xff] %v35935_v18 }
 0x13e   : > { %v5204_v53 = vsub.f32 %v35774_v51, %v5203_v57  ;;  %v35952_v3 = vpack.c.bf16 %v5203_v57, %v5196_v20 }
 0x13f   : > { %3255 = vmatmul.mubr.f32.gmra.mrb[18].mxu1 %v34854_v2  ;;  %v4125_v21 = vsub.f32 %v35757_v13, %v4124_v59  ;;  %v35943_v56 = vpack.c.bf16 %v4136_v26, %v4124_v59 }
 0x140   : > { %28622 = vmatmul.mubr.f32.vlgmr.msra.gmra.mrb[22].mxu0 %v34843_v60  ;;  %3260 = vmatprep.mubr.f32.mxu1 %v39101_v9  ;;  %v4119_v60 = vsub.f32 %v35754_v7, %v4118_v17  ;;  %v5205_v50 = vand.u32 4294901760, %v5204_v53  ;;  %39215 = vst [vmem:[#allocation34_spill] sm:$0xff] %v35952_v3 }
 0x141   : > { %28624 = vmatprep.mubr.f32.mxu0 %v34852_v63  ;;  %v4130_v63 = vand.u32 4294901760, %v35779_v25  ;;  %31368 = vmatpush3.bf16.msra.mxu0 %v35784_v43  ;;  %v4126_v49 = vand.u32 4294901760, %v4125_v21  ;;  %v35897_v21 = vpack.c.bf16 %v35782_v27, %v35779_v25  ;;  %39214 = vst [vmem:[#allocation18_spill] sm:$0xff] %v35943_v56 }
 0x142   : > { %31369 = vmatprep.subr.bf16.mxu0 %v38875_v23  ;;  %v4120_v22 = vand.u32 4294901760, %v4119_v60  ;;  %v35892_v60 = vpack.c.bf16 %v35774_v51, %v35772_v40 }
 0x143   : > { %3262 = vmatmul.mubr.f32.gmra.mrb[20].mxu1 %v34899_v10  ;;  %v35852_v45 = vpack.c.bf16 %v4138_v5, %v4126_v49  ;;  %39210 = vst [vmem:[#allocation25_spill] sm:$0xff] %v35897_v21  ;;  %v35959_v4 = vpack.c.bf16 %v4142_v48, %v4130_v63 }
 0x144   : > { %28625 = vmatmul.mubr.f32.gmra.mrb[24].mxu0 %v34854_v2  ;;  %3267 = vmatprep.mubr.f32.mxu1 %v39101_v9  ;;  %v4131_v2 = vsub.f32 %v35779_v25, %v4130_v63  ;;  %v35850_v37 = vpack.c.bf16 %v4120_v22, %v4108_v58  ;;  %39209 = vst [vmem:[#allocation9_spill] sm:$0xff] %v35892_v60 }
 0x145   : > { %28627 = vmatprep.mubr.f32.mxu0 %v34899_v10  ;;  %v4143_v10 = vsub.f32 %v35782_v27, %v4142_v48  ;;  %31371 = vmatpush3.bf16.msra.mxu0 %v35812_v24  ;;  %39202 = vst [vmem:[#allocation37_spill] sm:$0xff] %v35852_v45  ;;  %39216 = vst [vmem:[#allocation35_spill] sm:$0xff] %v35959_v4 }
 0x146   : > { %31372 = vmatprep.subr.bf16.mxu0 %v38875_v23  ;;  %39201 = vst [vmem:[#allocation32_spill] sm:$0xff] %v35850_v37  ;;  %v4132_v6 = vand.u32 4294901760, %v4131_v2 }
 0x147   : > { %3269 = vmatmul.mubr.f32.gmra.mrb[22].mxu1 %v34962_v12  ;;  %v4144_v46 = vand.u32 4294901760, %v4143_v10 }
 0x148   : > { %28628 = vmatmul.mubr.f32.gmra.mrb[26].mxu0 %v34962_v12  ;;  %4086 = vmatprep.mubr.f32.mxu1 %v39101_v9  ;;  %v35857_v12 = vpack.c.bf16 %v5205_v50, %v5198_v34 }
 0x149   : > { %28638 = vmatprep.mubr.msk.f32.mxu0 %vm34583_vm1, %v39101_v9  ;;  %v35860_v44 = vpack.c.bf16 %v4144_v46, %v4132_v6 }
 0x14a   : > { %39203 = vst [vmem:[#allocation38_spill] sm:$0xff] %v35857_v12 }
 0x14b   : > { %4092 = vmatmul.mubr.f32.vlgmr.msra.gmra.mrb[6].mxu1 %v35843_v11  ;;  %39204 = vst [vmem:[#allocation39_spill] sm:$0xff] %v35860_v44 }
 0x14c   : > { %28639 = vmatmul.mubr.f32.vlgmr.msra.gmra.mrb[28].mxu0 %v35843_v11  ;;  %31281 = vmatpush1.bf16.msra.mxu1 %v35850_v37 }
 0x14d   : > { %31374 = vmatpush3.bf16.msra.mxu0 %v35847_v1  ;;  %4202 = vmatprep.mubr.f32.mxu1 %v39101_v9 }
 0x14e   : > { %31283 = vmatprep.subr.bf16.mxu1 %v35852_v45  ;;  %31375 = vmatprep.subr.bf16.mxu0 %v38875_v23 }
 0x14f   : > { %28649 = vmatprep.mubr.msk.f32.mxu0 %vm34583_vm1, %v39101_v9 }
 0x150   : > { %31285 = vmatpush1.bf16.msra.mxu1 %v35860_v44 }
 0x151   : > { %31377 = vmatpush3.bf16.msra.mxu0 %v35857_v12  ;;  %31287 = vmatprep.subr.bf16.mxu1 %v35866_v42 }
 0x152   : > { %31378 = vmatprep.subr.bf16.mxu0 %v38875_v23 }
 0x153   : > { %4204 = vmatmul.mubr.f32.vlgmr.msra.gmra.mrb[6].mxu1 %v35740_v16 }
 0x154   : > { %28650 = vmatmul.mubr.f32.vlgmr.msra.gmra.mrb[28].mxu0 %v35740_v16  ;;  %31289 = vmatpush1.bf16.msra.mxu1 %v35879_v0 }
 0x155   : > { %31380 = vmatpush3.bf16.msra.mxu0 %v35874_v15  ;;  %4290 = vmatprep.mubr.f32.mxu1 %v39101_v9 }
 0x156   : > { %31291 = vmatprep.subr.bf16.mxu1 %v35885_v31  ;;  %31381 = vmatprep.subr.bf16.mxu0 %v38875_v23 }
 0x157   : > { %28660 = vmatprep.mubr.msk.f32.mxu0 %vm34583_vm1, %v39101_v9 }
 0x158   : > { %31293 = vmatpush1.bf16.msra.mxu1 %v35897_v21 }
 0x159   : > { %31383 = vmatpush3.bf16.msra.mxu0 %v35892_v60  ;;  %31295 = vmatprep.subr.bf16.mxu1 %v35633_v32 }
 0x15a   : > { %31384 = vmatprep.subr.bf16.mxu0 %v38875_v23 }
 0x15b   : > { %4293 = vmatmul.mubr.f32.vlgmr.msra.gmra.mrb[6].mxu1 %v35763_v33 }
 0x15c   : > { %28661 = vmatmul.mubr.f32.vlgmr.msra.gmra.mrb[28].mxu0 %v35763_v33  ;;  %31297 = vmatpush1.bf16.msra.mxu1 %v35709_v36 }
 0x15d   : > { %31386 = vmatpush3.bf16.msra.mxu0 %v35784_v43  ;;  %4371 = vmatprep.mubr.f32.mxu1 %v39101_v9 }
 0x15e   : > { %31299 = vmatprep.subr.bf16.mxu1 %v35720_v38  ;;  %31387 = vmatprep.subr.bf16.mxu0 %v38875_v23 }
 0x15f   : > { %28671 = vmatprep.mubr.msk.f32.mxu0 %vm34583_vm1, %v39101_v9 }
 0x160   : > { %31301 = vmatpush1.bf16.msra.mxu1 %v35728_v55 }
 0x161   : > { %31389 = vmatpush3.bf16.msra.mxu0 %v35812_v24  ;;  %31303 = vmatprep.subr.bf16.mxu1 %v35918_v30 }
 0x162   : > { %31390 = vmatprep.subr.bf16.mxu0 %v38875_v23 }
 0x163   : > { %4375 = vmatmul.mubr.f32.vlgmr.msra.gmra.mrb[6].mxu1 %v35789_v28 }
 0x164   : > { %28672 = vmatmul.mubr.f32.vlgmr.msra.gmra.mrb[28].mxu0 %v35789_v28  ;;  %31305 = vmatpush1.bf16.msra.mxu1 %v35935_v18 }
 0x165   : > { %31392 = vmatpush3.bf16.msra.mxu0 %v35928_v19  ;;  %4469 = vmatprep.mubr.f32.mxu1 %v39101_v9 }
 0x166   : > { %31307 = vmatprep.subr.bf16.mxu1 %v35943_v56  ;;  %31393 = vmatprep.subr.bf16.mxu0 %v38875_v23 }
 0x167   : > { %28682 = vmatprep.mubr.msk.f32.mxu0 %vm34583_vm1, %v39101_v9 }
 0x168   : > { %31309 = vmatpush1.bf16.msra.mxu1 %v35959_v4 }
 0x169   : > { %31395 = vmatpush3.bf16.msra.mxu0 %v35952_v3  ;;  %31311 = vmatprep.subr.bf16.mxu1 %v35633_v32 }
 0x16a   : > { %31396 = vmatprep.subr.bf16.mxu0 %v38875_v23 }
 0x16b   : > { %4471 = vmatmul.mubr.f32.vlgmr.msra.gmra.mrb[6].mxu1 %v35740_v16 }
 0x16c   : > { %28683 = vmatmul.mubr.f32.vlgmr.msra.gmra.mrb[28].mxu0 %v35740_v16  ;;  %31313 = vmatpush1.bf16.msra.mxu1 %v35709_v36 }
 0x16d   : > { %31398 = vmatpush3.bf16.msra.mxu0 %v35784_v43  ;;  %4549 = vmatprep.mubr.f32.mxu1 %v39101_v9 }
 0x16e   : > { %31315 = vmatprep.subr.bf16.mxu1 %v35720_v38  ;;  %31399 = vmatprep.subr.bf16.mxu0 %v38875_v23 }
 0x16f   : > { %28693 = vmatprep.mubr.msk.f32.mxu0 %vm34583_vm1, %v39101_v9 }
 0x170   : > { %31317 = vmatpush1.bf16.msra.mxu1 %v35728_v55 }
 0x171   : > { %31401 = vmatpush3.bf16.msra.mxu0 %v35812_v24 }
 0x172   : > { %31402 = vmatprep.subr.bf16.mxu0 %v38875_v23 }
 0x173   : > { %4551 = vmatmul.mubr.f32.vlgmr.msra.gmra.mrb[6].mxu1 %v35740_v16 }
 0x174   : > { %28694 = vmatmul.mubr.f32.vlgmr.msra.gmra.mrb[28].mxu0 %v35740_v16  ;;  %4629 = vmatprep.mubr.f32.mxu1 %v39101_v9 }
 0x175   : > { %28728 = vmatprep.mubr.msk.f32.mxu0 %vm34583_vm1, %v39101_v9 }
 0x1ab   : > { %v28506_v8 = vpop.f32.mrb[0].mxu0 }
 0x1ac   : > { %v5601_v62 = vand.u32 4294901760, %v28506_v8  ;;  %v1535_v54 = vpop.f32.mrb[1].mxu0 }
 0x1ad   : > { %v5598_v7 = vand.u32 4294901760, %v1535_v54 }
 0x1ae   : > { %v5697_v13 = vsub.f32 %v28506_v8, %v5601_v62 }
 0x1af   : > { %v35987_v41 = vpack.c.bf16 %v5601_v62, %v5598_v7  ;;  %v5690_v29 = vsub.f32 %v1535_v54, %v5598_v7  ;;  %v28509_v47 = vpop.f32.mrb[2].mxu0 }
 0x1b0   : > { %v5698_v61 = vand.u32 4294901760, %v5697_v13  ;;  %v5607_v40 = vand.u32 4294901760, %v28509_v47  ;;  %v1547_v51 = vpop.f32.mrb[3].mxu0 }
 0x1b1   : > { %v5691_v17 = vand.u32 4294901760, %v5690_v29  ;;  %v35989_v25 = vpack.c.bf16 %v5697_v13, %v5690_v29  ;;  %v5604_v27 = vand.u32 4294901760, %v1547_v51  ;;  %31404 = vmatpush3.bf16.msra.mxu0 %v35987_v41 }
 0x1b2   : > { %v5699_v59 = vsub.f32 %v5697_v13, %v5698_v61  ;;  %v5711_v26 = vsub.f32 %v28509_v47, %v5607_v40  ;;  %31405 = vmatprep.subr.bf16.mxu0 %v38875_v23 }
 0x1b3   : > { %39217 = vst [vmem:[#allocation23_spill] sm:$0xff] %v35989_v25  ;;  %v5692_v20 = vsub.f32 %v5690_v29, %v5691_v17  ;;  %v35993_v57 = vpack.c.bf16 %v5698_v61, %v5691_v17  ;;  %v35995_v63 = vpack.c.bf16 %v5607_v40, %v5604_v27  ;;  %v5704_v48 = vsub.f32 %v1547_v51, %v5604_v27  ;;  %v28512_v58 = vpop.f32.mrb[4].mxu0 }
 0x1b4   : > { %v5700_v39 = vand.u32 4294901760, %v5699_v59  ;;  %v5712_v52 = vand.u32 4294901760, %v5711_v26  ;;  %v5613_v35 = vand.u32 4294901760, %v28512_v58  ;;  %v1559_v53 = vpop.f32.mrb[5].mxu0 }
 0x1b5   : > { %39218 = vst [vmem:[#allocation40_spill] sm:$0xff] %v35993_v57  ;;  %v5693_v22 = vand.u32 4294901760, %v5692_v20  ;;  %v5705_v2 = vand.u32 4294901760, %v5704_v48  ;;  %v35997_v10 = vpack.c.bf16 %v5711_v26, %v5704_v48  ;;  %v5610_v49 = vand.u32 4294901760, %v1559_v53  ;;  %31407 = vmatpush3.bf16.msra.mxu0 %v35995_v63 }
 0x1b6   : > { %v5713_v5 = vsub.f32 %v5711_v26, %v5712_v52  ;;  %v5725_v34 = vsub.f32 %v28512_v58, %v5613_v35  ;;  %31408 = vmatprep.subr.bf16.mxu0 %v38875_v23 }
 0x1b7   : > { %39219 = vst [vmem:[#allocation41_spill] sm:$0xff] %v35997_v10  ;;  %v36001_v50 = vpack.c.bf16 %v5700_v39, %v5693_v22  ;;  %v5706_v6 = vsub.f32 %v5704_v48, %v5705_v2  ;;  %v36003_v46 = vpack.c.bf16 %v5712_v52, %v5705_v2  ;;  %v36005_v8 = vpack.c.bf16 %v5613_v35, %v5610_v49  ;;  %v28515_v62 = vpop.f32.mrb[6].mxu0 }
 0x1b8   : > { %v5714_v54 = vand.u32 4294901760, %v5713_v5  ;;  %v5726_v7 = vand.u32 4294901760, %v5725_v34  ;;  %v5718_v13 = vsub.f32 %v1559_v53, %v5610_v49  ;;  %v5619_v29 = vand.u32 4294901760, %v28515_v62  ;;  %v1571_v47 = vpop.f32.mrb[7].mxu0 }
 0x1b9   : > { %39220 = vst [vmem:[#allocation36_spill] sm:$0xff] %v36001_v50  ;;  %39221 = vst [vmem:[#allocation44_spill] sm:$0xff] %v36003_v46  ;;  %v5707_v61 = vand.u32 4294901760, %v5706_v6  ;;  %v5616_v40 = vand.u32 4294901760, %v1571_v47  ;;  %31410 = vmatpush3.bf16.msra.mxu0 %v36005_v8 }
 0x1ba   : > { %v5727_v51 = vsub.f32 %v5725_v34, %v5726_v7  ;;  %v5719_v17 = vand.u32 4294901760, %v5718_v13  ;;  %v36008_v27 = vpack.c.bf16 %v5725_v34, %v5718_v13  ;;  %v5739_v59 = vsub.f32 %v28515_v62, %v5619_v29  ;;  %31411 = vmatprep.subr.bf16.mxu0 %v38875_v23 }
 0x1bb   : > { %v36011_v26 = vpack.c.bf16 %v5714_v54, %v5707_v61  ;;  %v36013_v20 = vpack.c.bf16 %v5619_v29, %v5616_v40  ;;  %v5732_v48 = vsub.f32 %v1571_v47, %v5616_v40  ;;  %v28518_v58 = vpop.f32.mrb[8].mxu0 }
 0x1bc   : > { %39222 = vst [vmem:[#allocation45_spill] sm:$0xff] %v36008_v27  ;;  %v5728_v39 = vand.u32 4294901760, %v5727_v51  ;;  %v5720_v52 = vsub.f32 %v5718_v13, %v5719_v17  ;;  %v36015_v35 = vpack.c.bf16 %v5726_v7, %v5719_v17  ;;  %v5740_v53 = vand.u32 4294901760, %v5739_v59  ;;  %v1583_v22 = vpop.f32.mrb[9].mxu0 }
 0x1bd   : > { %39223 = vst [vmem:[#allocation10_spill] sm:$0xff] %v36011_v26  ;;  %v5733_v2 = vand.u32 4294901760, %v5732_v48  ;;  %v36017_v49 = vpack.c.bf16 %v5739_v59, %v5732_v48  ;;  %v5625_v5 = vand.u32 4294901760, %v28518_v58  ;;  %v5622_v34 = vand.u32 4294901760, %v1583_v22  ;;  %31413 = vmatpush3.bf16.msra.mxu0 %v36013_v20 }
 0x1be   : > { %39224 = vst [vmem:[#allocation12_spill] sm:$0xff] %v36015_v35  ;;  %v5721_v6 = vand.u32 4294901760, %v5720_v52  ;;  %v5741_v62 = vsub.f32 %v5739_v59, %v5740_v53  ;;  %31414 = vmatprep.subr.bf16.mxu0 %v38875_v23 }
 0x1bf   : > { %39225 = vst [vmem:[#allocation14_spill] sm:$0xff] %v36017_v49  ;;  %v5734_v54 = vsub.f32 %v5732_v48, %v5733_v2  ;;  %v36021_v29 = vpack.c.bf16 %v5740_v53, %v5733_v2  ;;  %v5753_v47 = vsub.f32 %v28518_v58, %v5625_v5  ;;  %v36023_v13 = vpack.c.bf16 %v5625_v5, %v5622_v34  ;;  %v28521_v7 = vpop.f32.mrb[10].mxu0 }
 0x1c0   : > { %v36025_v61 = vpack.c.bf16 %v5728_v39, %v5721_v6  ;;  %v5742_v40 = vand.u32 4294901760, %v5741_v62  ;;  %v5746_v51 = vsub.f32 %v1583_v22, %v5622_v34  ;;  %v5631_v17 = vand.u32 4294901760, %v28521_v7  ;;  %v1595_v4 = vpop.f32.mrb[11].mxu0 }
 0x1c1   : > { %39226 = vst [vmem:[#allocation19_spill] sm:$0xff] %v36021_v29  ;;  %v5735_v56 = vand.u32 4294901760, %v5734_v54  ;;  %v5754_v18 = vand.u32 4294901760, %v5753_v47  ;;  %v5628_v30 = vand.u32 4294901760, %v1595_v4  ;;  %31416 = vmatpush3.bf16.msra.mxu0 %v36023_v13 }
 0x1c2   : > { %39227 = vst [vmem:[#allocation26_spill] sm:$0xff] %v36025_v61  ;;  %v5747_v59 = vand.u32 4294901760, %v5746_v51  ;;  %v36028_v52 = vpack.c.bf16 %v5753_v47, %v5746_v51  ;;  %v5767_v48 = vsub.f32 %v28521_v7, %v5631_v17  ;;  %31417 = vmatprep.subr.bf16.mxu0 %v38875_v23 }
 0x1c3   : > { %v36031_v58 = vpack.c.bf16 %v5742_v40, %v5735_v56  ;;  %v5755_v53 = vsub.f32 %v5753_v47, %v5754_v18  ;;  %v36033_v39 = vpack.c.bf16 %v5631_v17, %v5628_v30  ;;  %v5760_v2 = vsub.f32 %v1595_v4, %v5628_v30  ;;  %v28524_v22 = vpop.f32.mrb[12].mxu0 }
 0x1c4   : > { %39228 = vst [vmem:[#allocation13_spill] sm:$0xff] %v36028_v52  ;;  %v5748_v5 = vsub.f32 %v5746_v51, %v5747_v59  ;;  %v36035_v34 = vpack.c.bf16 %v5754_v18, %v5747_v59  ;;  %v5768_v6 = vand.u32 4294901760, %v5767_v48  ;;  %v5637_v62 = vand.u32 4294901760, %v28524_v22  ;;  %v1607_v54 = vpop.f32.mrb[13].mxu0 }
 0x1c5   : > { %39229 = vst [vmem:[#allocation16_spill] sm:$0xff] %v36031_v58  ;;  %v5756_v21 = vand.u32 4294901760, %v5755_v53  ;;  %v5761_v31 = vand.u32 4294901760, %v5760_v2  ;;  %v36037_v0 = vpack.c.bf16 %v5767_v48, %v5760_v2  ;;  %v5634_v7 = vand.u32 4294901760, %v1607_v54  ;;  %31419 = vmatpush3.bf16.msra.mxu0 %v36033_v39 }
 0x1c6   : > { %39230 = vst [vmem:[#allocation15_spill] sm:$0xff] %v36035_v34  ;;  %v5749_v56 = vand.u32 4294901760, %v5748_v5  ;;  %v5769_v40 = vsub.f32 %v5767_v48, %v5768_v6  ;;  %v5781_v47 = vsub.f32 %v28524_v22, %v5637_v62  ;;  %31420 = vmatprep.subr.bf16.mxu0 %v38875_v23 }
 0x1c7   : > { %39231 = vst [vmem:[#allocation20_spill] sm:$0xff] %v36037_v0  ;;  %v5762_v30 = vsub.f32 %v5760_v2, %v5761_v31  ;;  %v36041_v4 = vpack.c.bf16 %v5768_v6, %v5761_v31  ;;  %v36043_v18 = vpack.c.bf16 %v5637_v62, %v5634_v7  ;;  %v5774_v51 = vsub.f32 %v1607_v54, %v5634_v7  ;;  %v28527_v17 = vpop.f32.mrb[14].mxu0 }
 0x1c8   : > { %v36045_v59 = vpack.c.bf16 %v5756_v21, %v5749_v56  ;;  %v5770_v53 = vand.u32 4294901760, %v5769_v40  ;;  %v5782_v42 = vand.u32 4294901760, %v5781_v47  ;;  %v5643_v44 = vand.u32 4294901760, %v28527_v17  ;;  %v1619_v45 = vpop.f32.mrb[15].mxu0 }
 0x1c9   : > { %39232 = vst [vmem:[#allocation29_spill] sm:$0xff] %v36041_v4  ;;  %v5763_v37 = vand.u32 4294901760, %v5762_v30  ;;  %v5775_v14 = vand.u32 4294901760, %v5774_v51  ;;  %v36047_v5 = vpack.c.bf16 %v5781_v47, %v5774_v51  ;;  %v5640_v48 = vand.u32 4294901760, %v1619_v45  ;;  %31422 = vmatpush3.bf16.msra.mxu0 %v36043_v18 }
 0x1ca   : > { %39233 = vst [vmem:[#allocation47_spill] sm:$0xff] %v36045_v59  ;;  %v5783_v2 = vsub.f32 %v5781_v47, %v5782_v42  ;;  %v5795_v31 = vsub.f32 %v28527_v17, %v5643_v44  ;;  %31423 = vmatprep.subr.bf16.mxu0 %v38875_v23 }
 0x1cb   : > { %39234 = vst [vmem:[#allocation48_spill] sm:$0xff] %v36047_v5  ;;  %v36051_v22 = vpack.c.bf16 %v5770_v53, %v5763_v37  ;;  %v5776_v6 = vsub.f32 %v5774_v51, %v5775_v14  ;;  %v36053_v21 = vpack.c.bf16 %v5782_v42, %v5775_v14  ;;  %v36055_v62 = vpack.c.bf16 %v5643_v44, %v5640_v48  ;;  %v1778_v54 = vpop.f32.mrb[16].mxu0 }
 0x1cc   : > { %v5784_v7 = vand.u32 4294901760, %v5783_v2  ;;  %v5796_v56 = vand.u32 4294901760, %v5795_v31  ;;  %v5788_v40 = vsub.f32 %v1619_v45, %v5640_v48  ;;  %v1780_v30 = vpop.f32.mrb[17].mxu0  ;;  %v1656_v45 = vlaneseq }
 0x1cd   : > { %39235 = vst [vmem:[#allocation49_spill] sm:$0xff] %v36051_v22  ;;  %39236 = vst [vmem:[#allocation50_spill] sm:$0xff] %v36053_v21  ;;  %v5777_v55 = vand.u32 4294901760, %v5776_v6  ;;  %31425 = vmatpush3.bf16.msra.mxu0 %v36055_v62 }
 0x1ce   : > { %v5797_v38 = vsub.f32 %v5795_v31, %v5796_v56  ;;  %v5789_v47 = vand.u32 4294901760, %v5788_v40  ;;  %v36058_v17 = vpack.c.bf16 %v5795_v31, %v5788_v40  ;;  %31426 = vmatprep.subr.bf16.mxu0 %v38875_v23  ;;  %v36067_v48 = vshrl.u32 %v1656_v45, 7  ;;  %v36073_v31 = vld [vmem:[%s38734_s6] sm:$0x1f] }
 0x1cf   : > { %v36061_v37 = vpack.c.bf16 %v5784_v7, %v5777_v55  ;;  %39241 = vst [vmem:[#allocation55_spill] sm:$0xff] %v36073_v31 }
 0x1d0   : > { %39237 = vst [vmem:[#allocation51_spill] sm:$0xff] %v36058_v17  ;;  %v5798_v14 = vand.u32 4294901760, %v5797_v38  ;;  %v5790_v42 = vsub.f32 %v5788_v40, %v5789_v47  ;;  %v36063_v44 = vpack.c.bf16 %v5796_v56, %v5789_v47  ;;  %v38874_v2 = vsub.s32 0, %v36067_v48 }
 0x1d1   : > { %39238 = vst [vmem:[#allocation52_spill] sm:$0xff] %v36061_v37  ;;  %v38877_v55 = vsub.s32 1, %v36067_v48  ;;  %v1674_v23 = vsub.s32 4, %v36067_v48 }
 0x1d2   : > { %39239 = vst [vmem:[#allocation53_spill] sm:$0xff] %v36063_v44  ;;  %v5791_v51 = vand.u32 4294901760, %v5790_v42  ;;  %v36079_v38 = vrot.slane %v36073_v31, %v38874_v2 }
 0x1d3   : > { %v36084_v6 = vrot.slane %v36073_v31, %v38877_v55 }
 0x1d4   : > { %v36065_v53 = vpack.c.bf16 %v5798_v14, %v5791_v51  ;;  %39242 = vst [vmem:[#allocation56_spill] sm:$0xff] %v36079_v38  ;;  %v1779_v7 = vadd.f32 %v1778_v54, %v36079_v38  ;;  %v36090_v51 = vpop.f32.mrb[18].mxu0  ;;  %v1675_v54 = vrot.slane %v36073_v31, %v1674_v23 }
 0x1d5   : > { %39243 = vst [vmem:[#allocation57_spill] sm:$0xff] %v36084_v6  ;;  %v1781_v56 = vadd.f32 %v1780_v30, %v36084_v6  ;;  %39244 = vst [vmem:[#allocation58_spill] sm:$0xff] %v36090_v51  ;;  %v36092_v45 = vpop.f32.mrb[19].mxu0 }
 0x1d6   : > { %39240 = vst [vmem:[#allocation54_spill] sm:$0xff] %v36065_v53  ;;  %39245 = vst [vmem:[#allocation59_spill] sm:$0xff] %v36092_v45  ;;  %v36094_v2 = vpop.f32.mrb[20].mxu0 }
 0x1d7   : > { %39246 = vst [vmem:[#allocation60_spill] sm:$0xff] %v36094_v2  ;;  %v36097_v55 = vpop.f32.mrb[21].mxu0 }
 0x1d8   : > { %39247 = vst [vmem:[#allocation61_spill] sm:$0xff] %v36097_v55 }
 0x213   : > { %v28623_v38 = vpop.f32.mrb[22].mxu0 }
 0x214   : > { %v3941_v30 = vpop.f32.mrb[23].mxu0  ;;  %v36100_v6 = vadd.f32 %v28623_v38, %v1675_v54 }
 0x216   : > { %39248 = vst [vmem:[#allocation62_spill] sm:$0xff] %v36100_v6 }
 0x246   : > { %v4552_v40 = vpop.f32.mrb[6].mxu1 }
 0x247   : > { %v33651_v47 = vadd.f32 %v4552_v40, %v1779_v7  ;;  %v4554_v14 = vpop.f32.mrb[7].mxu1  ;;  %v28626_v7 = vpop.f32.mrb[24].mxu0 }
 0x248   : > { %v36088_v42 = vadd.f32 %v4554_v14, %v1781_v56  ;;  %v33693_v56 = vadd.f32 %v3941_v30, %v1675_v54  ;;  %v36102_v40 = vadd.f32 %v28626_v7, %v1675_v54  ;;  %v3953_v14 = vpop.f32.mrb[25].mxu0 }
 0x249   : > { %5590 = vmax.xlane.f32.xlu0 %v33651_v47  ;;  %v36104_v51 = vadd.f32 %v3953_v14, %v1675_v54  ;;  %v28629_v45 = vpop.f32.mrb[26].mxu0 }
 0x24a   : > { %39249 = vst [vmem:[#allocation63_spill] sm:$0xff] %v36102_v40  ;;  %v36106_v36 = vadd.f32 %v28629_v45, %v1675_v54  ;;  %v3965_v2 = vpop.f32.mrb[27].mxu0 }
 0x24b   : > { %39250 = vst [vmem:[#allocation64_spill] sm:$0xff] %v36104_v51  ;;  %v36108_v32 = vadd.f32 %v3965_v2, %v1675_v54  ;;  %v5581_v55 = vpop.f32.mrb[28].mxu0  ;;  %v399_v54 = vld [vmem:[%s38732_s4 + $0x40] sm:$0xff] }
 0x24c   : > { %39251 = vst [vmem:[#allocation65_spill] sm:$0xff] %v36106_v36  ;;  %v36110_v3 = vadd.f32 %v33693_v56, %v5581_v55  ;;  %v28695_v23 = vpop.f32.mrb[29].mxu0  ;;  %v393_v56 = vld [vmem:[%s38732_s4 + $0x10] sm:$0xff]  ;;  %v403_v51 = vld [vmem:[%s38732_s4 + $0x60] sm:$0xff] }
 0x24d   : > { %39252 = vst [vmem:[#allocation66_spill] sm:$0xff] %v36108_v32  ;;  %v4561_v23 = vand.u32 4294901760, %v399_v54 }
 0x24e   : > { %39253 = vst [vmem:[#allocation67_spill] sm:$0xff] %v36110_v3 }
 0x2d6   : > { %v5591_v19 = vpop.xlane.xlu0 %5590 }
 0x2d7   : > { %v5592_v38 = vsub.f32 %v33651_v47, %v5591_v19  ;;  %v394_v47 = vld [vmem:[%s38732_s4 + $0x18] sm:$0xff] }
 0x2d8   : > { %v4557_v14 = vand.u32 4294901760, %v394_v47 }
 0x2d9   : > { %v5593_v6 = vmul.f32 1.442695, %v5592_v38  ;;  %v398_v38 = vld [vmem:[%s38732_s4 + $0x38] sm:$0xff] }
 0x2da   : > { %v4563_v36 = vand.u32 4294901760, %v398_v38 }
 0x2db   : > { %34376 = vpow2.f32 %v5593_v6  ;;  %v39254_v6 = vmov 0.0|0.0  }
 0x2dc   : > { %v36190_v12 = vsub.f32 %v398_v38, %v4563_v36 }
 0x2e5   : > { %v36112_v30 = vpop.eup %34376 }
 0x2e6   : > { %5595 = vadd.xlane.f32.xlu0 %v36112_v30  ;;  %v36116_v7 = vand.u32 4294901760, %v36112_v30 }
 0x2e8   : > { %v36120_v45 = vsub.f32 %v36112_v30, %v36116_v7 }
 0x2ea   : > { %v38890_v2 = vand.u32 4294901760, %v36120_v45 }
 0x2ec   : > { %v5681_v55 = vsub.f32 %v36120_v45, %v38890_v2  ;;  %v409_v2 = vld [vmem:[%s38732_s4 + $0x90] sm:$0xff] }
 0x2ed   : > { %v4569_v40 = vand.u32 4294901760, %v409_v2 }
 0x2ee   : > { %v5682_v19 = vand.u32 4294901760, %v5681_v55  ;;  %v4559_v55 = vand.u32 4294901760, %v393_v56 }
 0x2f0   : > { %28729 = vmatmul.mubr.f32.vlgmr.msra.gmra.mrb[30].mxu0 %v5682_v19  ;;  %v404_v19 = vld [vmem:[%s38732_s4 + $0x68] sm:$0xff] }
 0x2f1   : > { %31428 = vmatpush3.bf16.msra.mxu0 %v36001_v50  ;;  %28763 = vmatprep.mubr.msk.f32.mxu0 %vm34583_vm1, %v39101_v9  ;;  %v4565_v32 = vand.u32 4294901760, %v404_v19  ;;  %v36183_v50 = vsub.f32 %v393_v56, %v4559_v55 }
 0x2f2   : > { %31429 = vmatprep.subr.bf16.mxu0 %v39254_v6 }
 0x2f3   : > { %v38916_v56 = vand.u32 4294901760, %v36183_v50 }
 0x2f5   : > { %31431 = vmatpush3.bf16.msra.mxu0 %v36011_v26  ;;  %v36181_v26 = vsub.f32 %v399_v54, %v4561_v23 }
 0x2f6   : > { %31432 = vmatprep.subr.bf16.mxu0 %v39254_v6 }
 0x2f7   : > { %v38915_v54 = vand.u32 4294901760, %v36181_v26 }
 0x2f9   : > { %31434 = vmatpush3.bf16.msra.mxu0 %v36025_v61  ;;  %v36179_v61 = vpack.c.bf16 %v4569_v40, %v4565_v32 }
 0x2fa   : > { %31435 = vmatprep.subr.bf16.mxu0 %v39254_v6 }
 0x2fb   : > { %39257 = vst [vmem:[#allocation70_spill] sm:$0xff] %v36179_v61 }
 0x2fd   : > { %31437 = vmatpush3.bf16.msra.mxu0 %v36031_v58  ;;  %v36177_v58 = vpack.c.bf16 %v4563_v36, %v4559_v55 }
 0x2fe   : > { %31438 = vmatprep.subr.bf16.mxu0 %v39254_v6 }
 0x2ff   : > { %39256 = vst [vmem:[#allocation69_spill] sm:$0xff] %v36177_v58 }
 0x301   : > { %31440 = vmatpush3.bf16.msra.mxu0 %v36045_v59  ;;  %v36175_v59 = vsub.f32 %v394_v47, %v4557_v14  ;;  %v36192_v47 = vsub.f32 %v404_v19, %v4565_v32  ;;  %v38922_v32 = vand.u32 4294901760, %v36190_v12  ;;  %v4656_v19 = vsub.f32 %v36181_v26, %v38915_v54 }
 0x302   : > { %31441 = vmatprep.subr.bf16.mxu0 %v39254_v6 }
 0x303   : > { %v38917_v15 = vand.u32 4294901760, %v36175_v59  ;;  %v38925_v38 = vand.u32 4294901760, %v36192_v47 }
 0x305   : > { %31443 = vmatpush3.bf16.msra.mxu0 %v36051_v22  ;;  %v4644_v36 = vsub.f32 %v36175_v59, %v38917_v15 }
 0x306   : > { %31444 = vmatprep.subr.bf16.mxu0 %v39254_v6 }
 0x309   : > { %31446 = vmatpush3.bf16.msra.mxu0 %v36061_v37  ;;  %v4567_v37 = vand.u32 4294901760, %v403_v51 }
 0x30a   : > { %31447 = vmatprep.subr.bf16.mxu0 %v39254_v6 }
 0x30d   : > { %31449 = vmatpush3.bf16.msra.mxu0 %v36065_v53  ;;  %v36173_v53 = vpack.c.bf16 %v4561_v23, %v4557_v14  ;;  %v36198_v14 = vsub.f32 %v409_v2, %v4569_v40  ;;  %v36200_v23 = vsub.f32 %v403_v51, %v4567_v37  ;;  %v4645_v2 = vand.u32 4294901760, %v4644_v36 }
 0x30e   : > { %31450 = vmatprep.subr.bf16.mxu0 %v39254_v6 }
 0x30f   : > { %39255 = vst [vmem:[#allocation68_spill] sm:$0xff] %v36173_v53  ;;  %31319 = vmatprep.subr.bf16.mxu1 %v36173_v53  ;;  %v4679_v51 = vand.u32 4294901760, %v36198_v14  ;;  %v39259_v36 = vand.u32 4294901760, %v36200_v23 }
 0x310   : > { %28764 = vmatmul.mubr.f32.vlgmr.msra.gmra.mrb[30].mxu0 %v36116_v7  ;;  %31321 = vmatpush1.bf16.msra.mxu1 %v36177_v58 }
 0x311   : > { %31452 = vmatpush3.bf16.msra.mxu0 %v35989_v25  ;;  %28798 = vmatprep.mubr.msk.f32.mxu0 %vm34583_vm1, %v39101_v9  ;;  %v408_v25 = vld [vmem:[%s38732_s4 + $0x88] sm:$0xff]  ;;  %v4680_v40 = vsub.f32 %v36198_v14, %v4679_v51 }
 0x312   : > { %31453 = vmatprep.subr.bf16.mxu0 %v39254_v6  ;;  %v4571_v22 = vand.u32 4294901760, %v408_v25  ;;  %31323 = vmatprep.subr.bf16.mxu1 %v36179_v61 }
 0x314   : > { %v36187_v60 = vpack.c.bf16 %v4571_v22, %v4567_v37  ;;  %v36208_v55 = vsub.f32 %v408_v25, %v4571_v22  ;;  %v4650_v37 = vsub.f32 %v36183_v50, %v38916_v56  ;;  %v4662_v25 = vsub.f32 %v36190_v12, %v38922_v32 }
 0x315   : > { %31455 = vmatpush3.bf16.msra.mxu0 %v35997_v10  ;;  %v4668_v22 = vsub.f32 %v36192_v47, %v38925_v38  ;;  %v4657_v56 = vand.u32 4294901760, %v4656_v19  ;;  %v4681_v38 = vand.u32 4294901760, %v4680_v40  ;;  %v411_v40 = vld [vmem:[%s38733_s5] sm:$0xff] }
 0x316   : > { %39258 = vst [vmem:[#allocation71_spill] sm:$0xff] %v36187_v60  ;;  %31456 = vmatprep.subr.bf16.mxu0 %v39254_v6  ;;  %v4685_v54 = vand.u32 4294901760, %v36208_v55  ;;  %31325 = vmatpush1.bf16.msra.mxu1 %v36187_v60  ;;  %v4651_v15 = vand.u32 4294901760, %v4650_v37  ;;  %v4663_v10 = vand.u32 4294901760, %v4662_v25 }
 0x317   : > { %v4669_v32 = vand.u32 4294901760, %v4668_v22  ;;  %v36233_v3 = vpack.c.bf16 %v4657_v56, %v4645_v2  ;;  %v414_v2 = vld [vmem:[%s38733_s5 + $0x28] sm:$0xff]  ;;  %v6268_v22 = vand.u32 4294901760, %v411_v40 }
 0x318   : > { %v4686_v1 = vsub.f32 %v36208_v55, %v4685_v54  ;;  %v36237_v19 = vpack.c.bf16 %v4663_v10, %v4651_v15  ;;  %v36262_v15 = vpack.c.bf16 %v36198_v14, %v36192_v47  ;;  %v36270_v10 = vpack.c.bf16 %v36208_v55, %v36200_v23  ;;  %v415_v55 = vld [vmem:[%s38733_s5 + $0x30] sm:$0xff] }
 0x319   : > { %31458 = vmatpush3.bf16.msra.mxu0 %v36008_v27  ;;  %v4674_v27 = vsub.f32 %v36200_v23, %v39259_v36  ;;  %39260 = vst [vmem:[#allocation72_spill] sm:$0xff] %v36233_v3  ;;  %4635 = vmatmul.mubr.f32.vlgmr.msra.gmra.mrb[12].mxu1 %v35843_v11  ;;  %v36241_v36 = vpack.c.bf16 %v4681_v38, %v4669_v32  ;;  %v39272_v14 = vand.u32 4294901760, %v36190_v12 }
 0x31a   : > { %31459 = vmatprep.subr.bf16.mxu0 %v39254_v6  ;;  %39261 = vst [vmem:[#allocation73_spill] sm:$0xff] %v36237_v19  ;;  %v4687_v37 = vand.u32 4294901760, %v4686_v1  ;;  %31327 = vmatprep.subr.bf16.mxu1 %v36233_v3  ;;  %v36250_v11 = vpack.c.bf16 %v36181_v26, %v36175_v59  ;;  %v36257_v1 = vpack.c.bf16 %v36190_v12, %v36183_v50  ;;  %39266 = vst [vmem:[#allocation78_spill] sm:$0xff] %v36262_v15 }
 0x31b   : > { %v4675_v31 = vand.u32 4294901760, %v4674_v27  ;;  %39262 = vst [vmem:[#allocation74_spill] sm:$0xff] %v36241_v36  ;;  %31329 = vmatpush1.bf16.msra.mxu1 %v36237_v19  ;;  %4745 = vmatprep.mubr.f32.mxu1 %v39101_v9  ;;  %39267 = vst [vmem:[#allocation79_spill] sm:$0xff] %v36270_v10  ;;  %v39268_v27 = vand.u32 4294901760, %v36175_v59 }
 0x31c   : > { %31331 = vmatprep.subr.bf16.mxu1 %v36241_v36  ;;  %39264 = vst [vmem:[#allocation76_spill] sm:$0xff] %v36250_v11  ;;  %39265 = vst [vmem:[#allocation77_spill] sm:$0xff] %v36257_v1 }
 0x31d   : > { %31461 = vmatpush3.bf16.msra.mxu0 %v36017_v49  ;;  %v36244_v25 = vpack.c.bf16 %v4687_v37, %v4675_v31  ;;  %v39269_v31 = vand.u32 4294901760, %v36181_v26  ;;  %v39274_v26 = vand.u32 4294901760, %v36192_v47  ;;  %v6272_v37 = vand.u32 4294901760, %v414_v2 }
 0x31e   : > { %31462 = vmatprep.subr.bf16.mxu0 %v39254_v6 }
 0x31f   : > { %39263 = vst [vmem:[#allocation75_spill] sm:$0xff] %v36244_v25  ;;  %31333 = vmatpush1.bf16.msra.mxu1 %v36244_v25  ;;  %v36289_v56 = vpack.c.bf16 %v39269_v31, %v39268_v27  ;;  %v36305_v59 = vpack.c.bf16 %v4679_v51, %v39274_v26  ;;  %v6270_v51 = vand.u32 4294901760, %v415_v55  ;;  %v418_v26 = vld [vmem:[%s38733_s5 + $0x58] sm:$0xff] }
 0x320   : > { %31335 = vmatprep.subr.bf16.mxu1 %v36250_v11 }
 0x321   : > { %31464 = vmatpush3.bf16.msra.mxu0 %v36028_v52  ;;  %39270 = vst [vmem:[#allocation80_spill] sm:$0xff] %v36289_v56  ;;  %39275 = vst [vmem:[#allocation82_spill] sm:$0xff] %v36305_v59 }
 0x322   : > { %31465 = vmatprep.subr.bf16.mxu0 %v39254_v6  ;;  %4747 = vmatmul.mubr.f32.vlgmr.msra.gmra.mrb[12].mxu1 %v35740_v16 }
 0x323   : > { %31337 = vmatpush1.bf16.msra.mxu1 %v36257_v1  ;;  %4833 = vmatprep.mubr.f32.mxu1 %v39101_v9 }
 0x324   : > { %31339 = vmatprep.subr.bf16.mxu1 %v36262_v15 }
 0x325   : > { %31467 = vmatpush3.bf16.msra.mxu0 %v36037_v0 }
 0x326   : > { %31468 = vmatprep.subr.bf16.mxu0 %v39254_v6 }
 0x327   : > { %31341 = vmatpush1.bf16.msra.mxu1 %v36270_v10 }
 0x328   : > { %31343 = vmatprep.subr.bf16.mxu1 %v36173_v53 }
 0x329   : > { %31470 = vmatpush3.bf16.msra.mxu0 %v36047_v5 }
 0x32a   : > { %31471 = vmatprep.subr.bf16.mxu0 %v39254_v6  ;;  %4836 = vmatmul.mubr.f32.vlgmr.msra.gmra.mrb[12].mxu1 %v35763_v33  ;;  %v39271_v33 = vand.u32 4294901760, %v36183_v50  ;;  %v39276_v50 = vand.u32 4294901760, %v36200_v23 }
 0x32b   : > { %31345 = vmatpush1.bf16.msra.mxu1 %v36177_v58  ;;  %4914 = vmatprep.mubr.f32.mxu1 %v39101_v9 }
 0x32c   : > { %31347 = vmatprep.subr.bf16.mxu1 %v36179_v61  ;;  %v36300_v32 = vpack.c.bf16 %v39272_v14, %v39271_v33  ;;  %v36313_v38 = vpack.c.bf16 %v4685_v54, %v39276_v50  ;;  %v6363_v33 = vsub.f32 %v415_v55, %v6270_v51  ;;  %v36410_v14 = vpack.c.bf16 %v6272_v37, %v6268_v22  ;;  %v421_v50 = vld [vmem:[%s38733_s5 + $0x80] sm:$0xff] }
 0x32d   : > { %31473 = vmatpush3.bf16.msra.mxu0 %v36058_v17 }
 0x32e   : > { %31474 = vmatprep.subr.bf16.mxu0 %v39254_v6  ;;  %39273 = vst [vmem:[#allocation81_spill] sm:$0xff] %v36300_v32  ;;  %39277 = vst [vmem:[#allocation83_spill] sm:$0xff] %v36313_v38  ;;  %v6364_v55 = vand.u32 4294901760, %v6363_v33 }
 0x32f   : > { %31349 = vmatpush1.bf16.msra.mxu1 %v36187_v60  ;;  %39279 = vst [vmem:[#allocation84_spill] sm:$0xff] %v36410_v14 }
 0x330   : > { %28799 = vmatmul.mubr.f32.vlgmr.msra.gmra.mrb[30].mxu0 %v36120_v45  ;;  %31351 = vmatprep.subr.bf16.mxu1 %v36289_v56 }
 0x331   : > { %31476 = vmatpush3.bf16.msra.mxu0 %v35987_v41  ;;  %28833 = vmatprep.mubr.msk.f32.mxu0 %vm34583_vm1, %v39101_v9 }
 0x332   : > { %31477 = vmatprep.subr.bf16.mxu0 %v39254_v6  ;;  %4918 = vmatmul.mubr.f32.vlgmr.msra.gmra.mrb[12].mxu1 %v35789_v28  ;;  %v39278_v28 = vand.u32 4294901760, %v36120_v45 }
 0x333   : > { %31353 = vmatpush1.bf16.msra.mxu1 %v36300_v32  ;;  %5012 = vmatprep.mubr.f32.mxu1 %v39101_v9 }
 0x334   : > { %31355 = vmatprep.subr.bf16.mxu1 %v36305_v59 }
 0x335   : > { %31479 = vmatpush3.bf16.msra.mxu0 %v35995_v63 }
 0x336   : > { %31480 = vmatprep.subr.bf16.mxu0 %v39254_v6 }
 0x337   : > { %31357 = vmatpush1.bf16.msra.mxu1 %v36313_v38 }
 0x338   : > { %31359 = vmatprep.subr.bf16.mxu1 %v36173_v53 }
 0x339   : > { %31482 = vmatpush3.bf16.msra.mxu0 %v36005_v8 }
 0x33a   : > { %31483 = vmatprep.subr.bf16.mxu0 %v39254_v6  ;;  %5014 = vmatmul.mubr.f32.vlgmr.msra.gmra.mrb[12].mxu1 %v35740_v16 }
 0x33b   : > { %31361 = vmatpush1.bf16.msra.mxu1 %v36177_v58  ;;  %5092 = vmatprep.mubr.f32.mxu1 %v39101_v9 }
 0x33c   : > { %31363 = vmatprep.subr.bf16.mxu1 %v36179_v61 }
 0x33d   : > { %31485 = vmatpush3.bf16.msra.mxu0 %v36013_v20 }
 0x33e   : > { %31486 = vmatprep.subr.bf16.mxu0 %v39254_v6 }
 0x33f   : > { %31365 = vmatpush1.bf16.msra.mxu1 %v36187_v60 }
 0x341   : > { %31488 = vmatpush3.bf16.msra.mxu0 %v36023_v13 }
 0x342   : > { %31489 = vmatprep.subr.bf16.mxu0 %v39254_v6  ;;  %5094 = vmatmul.mubr.f32.vlgmr.msra.gmra.mrb[12].mxu1 %v35740_v16 }
 0x343   : > { %6338 = vmatprep.mubr.f32.mxu1 %v39101_v9 }
 0x345   : > { %31491 = vmatpush3.bf16.msra.mxu0 %v36033_v39 }
 0x346   : > { %31492 = vmatprep.subr.bf16.mxu0 %v39254_v6 }
 0x349   : > { %31494 = vmatpush3.bf16.msra.mxu0 %v36043_v18 }
 0x34a   : > { %31495 = vmatprep.subr.bf16.mxu0 %v39254_v6 }
 0x34d   : > { %31497 = vmatpush3.bf16.msra.mxu0 %v36055_v62 }
 0x34e   : > { %31498 = vmatprep.subr.bf16.mxu0 %v39254_v6 }
 0x350   : > { %28834 = vmatmul.mubr.f32.vlgmr.msra.gmra.mrb[30].mxu0 %v39278_v28  ;;  %v6357_v28 = vsub.f32 %v411_v40, %v6268_v22 }
 0x351   : > { %31500 = vmatpush3.bf16.msra.mxu0 %v35993_v57  ;;  %28868 = vmatprep.mubr.msk.f32.mxu0 %vm34583_vm1, %v39101_v9 }
 0x352   : > { %31501 = vmatprep.subr.bf16.mxu0 %v39254_v6  ;;  %v6358_v40 = vand.u32 4294901760, %v6357_v28 }
 0x355   : > { %31503 = vmatpush3.bf16.msra.mxu0 %v36003_v46 }
 0x356   : > { %31504 = vmatprep.subr.bf16.mxu0 %v39254_v6 }
 0x359   : > { %31506 = vmatpush3.bf16.msra.mxu0 %v36015_v35 }
 0x35a   : > { %31507 = vmatprep.subr.bf16.mxu0 %v39254_v6 }
 0x35d   : > { %31509 = vmatpush3.bf16.msra.mxu0 %v36021_v29 }
 0x35e   : > { %31510 = vmatprep.subr.bf16.mxu0 %v39254_v6 }
 0x361   : > { %31512 = vmatpush3.bf16.msra.mxu0 %v36035_v34 }
 0x362   : > { %31513 = vmatprep.subr.bf16.mxu0 %v39254_v6 }
 0x365   : > { %31515 = vmatpush3.bf16.msra.mxu0 %v36041_v4  ;;  %v6359_v4 = vsub.f32 %v6357_v28, %v6358_v40 }
 0x366   : > { %31516 = vmatprep.subr.bf16.mxu0 %v39254_v6 }
 0x367   : > { %v6360_v5 = vand.u32 4294901760, %v6359_v4 }
 0x369   : > { %31518 = vmatpush3.bf16.msra.mxu0 %v36053_v21 }
 0x36a   : > { %31519 = vmatprep.subr.bf16.mxu0 %v39254_v6 }
 0x36d   : > { %31521 = vmatpush3.bf16.msra.mxu0 %v36063_v44  ;;  %v6365_v44 = vsub.f32 %v6363_v33, %v6364_v55 }
 0x36e   : > { %31522 = vmatprep.subr.bf16.mxu0 %v39254_v6 }
 0x36f   : > { %v6366_v46 = vand.u32 4294901760, %v6365_v44 }
 0x370   : > { %28869 = vmatmul.mubr.f32.vlgmr.msra.gmra.mrb[30].mxu0 %v36116_v7 }
 0x371   : > { %31524 = vmatpush3.bf16.msra.mxu0 %v35987_v41  ;;  %28903 = vmatprep.mubr.msk.f32.mxu0 %vm34583_vm1, %v39101_v9 }
 0x372   : > { %31525 = vmatprep.subr.bf16.mxu0 %v39254_v6 }
 0x373   : > { %v5596_v16 = vpop.xlane.xlu0 %5595 }
 0x374   : > { %34378 = vrcp.f32 %v5596_v16 }
 0x375   : > { %31527 = vmatpush3.bf16.msra.mxu0 %v35995_v63 }
 0x376   : > { %31528 = vmatprep.subr.bf16.mxu0 %v39254_v6 }
 0x379   : > { %31530 = vmatpush3.bf16.msra.mxu0 %v36005_v8 }
 0x37a   : > { %31531 = vmatprep.subr.bf16.mxu0 %v39254_v6 }
 0x37d   : > { %31533 = vmatpush3.bf16.msra.mxu0 %v36013_v20 }
 0x37e   : > { %v34379_v12 = vpop.eup %34378  ;;  %31534 = vmatprep.subr.bf16.mxu0 %v39254_v6 }
 0x37f   : > { %v6239_v45 = vmul.f32 %v34379_v12, %v5596_v16  ;;  %v6369_v16 = vsub.f32 %v414_v2, %v6272_v37 }
 0x381   : > { %v6240_v47 = vsub.f32 2.0, %v6239_v45  ;;  %31536 = vmatpush3.bf16.msra.mxu0 %v36023_v13  ;;  %v6278_v45 = vand.u32 4294901760, %v421_v50  ;;  %v6370_v2 = vand.u32 4294901760, %v6369_v16 }
 0x382   : > { %31537 = vmatprep.subr.bf16.mxu0 %v39254_v6 }
 0x383   : > { %v36371_v54 = vmul.f32 %v34379_v12, %v6240_v47  ;;  %v6274_v12 = vand.u32 4294901760, %v418_v26  ;;  %v417_v47 = vld [vmem:[%s38733_s5 + $0x50] sm:$0xff]  ;;  %v6371_v34 = vsub.f32 %v6369_v16, %v6370_v2  ;;  %v6387_v57 = vsub.f32 %v421_v50, %v6278_v45 }
 0x385   : > { %31539 = vmatpush3.bf16.msra.mxu0 %v36033_v39  ;;  %v6242_v23 = vmul.f32 %v36112_v30, %v36371_v54  ;;  %v412_v30 = vld [vmem:[%s38733_s5 + $0x8] sm:$0xff]  ;;  %v36426_v22 = vpack.c.bf16 %v6278_v45, %v6274_v12  ;;  %v6375_v29 = vsub.f32 %v418_v26, %v6274_v12  ;;  %v6372_v0 = vand.u32 4294901760, %v6371_v34 }
 0x386   : > { %31540 = vmatprep.subr.bf16.mxu0 %v39254_v6  ;;  %v6388_v59 = vand.u32 4294901760, %v6387_v57 }
 0x387   : > { %6243 = vst [vmem:[%s36378_s25] sm:$0xff] %v6242_v23  ;;  %v420_v23 = vld [vmem:[%s38733_s5 + $0x78] sm:$0xff]  ;;  %39280 = vst [vmem:[#allocation85_spill] sm:$0xff] %v36426_v22  ;;  %v6376_v52 = vand.u32 4294901760, %v6375_v29  ;;  %v36434_v56 = vpack.c.bf16 %v6372_v0, %v6360_v5  ;;  %v36445_v0 = vpack.c.bf16 %v6387_v57, %v6375_v29 }
 0x388   : > { %v6389_v12 = vsub.f32 %v6387_v57, %v6388_v59 }
 0x389   : > { %31542 = vmatpush3.bf16.msra.mxu0 %v36043_v18  ;;  %39283 = vst [vmem:[#allocation88_spill] sm:$0xff] %v36434_v56  ;;  %v6377_v10 = vsub.f32 %v6375_v29, %v6376_v52  ;;  %39288 = vst [vmem:[#allocation93_spill] sm:$0xff] %v36445_v0 }
 0x38a   : > { %31543 = vmatprep.subr.bf16.mxu0 %v39254_v6 }
 0x38b   : > { %v6378_v50 = vand.u32 4294901760, %v6377_v10  ;;  %v36453_v10 = vpack.c.bf16 %v6388_v59, %v6376_v52  ;;  %v416_v59 = vld [vmem:[%s38733_s5 + $0x38] sm:$0xff] }
 0x38d   : > { %31545 = vmatpush3.bf16.msra.mxu0 %v36055_v62  ;;  %39292 = vst [vmem:[#allocation97_spill] sm:$0xff] %v36453_v10 }
 0x38e   : > { %31762 = vmatprep.subr.bf16.mxu0 %v39254_v6 }
 0x390   : > { %28904 = vmatmul.mubr.f32.vlgmr.msra.gmra.mrb[30].mxu0 %v36116_v7  ;;  %v6266_v7 = vand.u32 4294901760, %v412_v30 }
 0x391   : > { %31764 = vmatpush3.bf16.msra.mxu0 %v35784_v43  ;;  %29046 = vmatprep.mubr.msk.f32.mxu0 %vm34583_vm1, %v39101_v9 }
 0x392   : > { %31765 = vmatprep.subr.bf16.mxu0 %v39254_v6  ;;  %v36408_v27 = vpack.c.bf16 %v6270_v51, %v6266_v7  ;;  %v6351_v31 = vsub.f32 %v412_v30, %v6266_v7  ;;  %v6276_v7 = vand.u32 4294901760, %v417_v47  ;;  %v6280_v51 = vand.u32 4294901760, %v420_v23 }
 0x394   : > { %31547 = vmatprep.subr.bf16.mxu1 %v36408_v27  ;;  %v6352_v30 = vand.u32 4294901760, %v6351_v31  ;;  %v36428_v21 = vpack.c.bf16 %v6280_v51, %v6276_v7  ;;  %v6381_v17 = vsub.f32 %v417_v47, %v6276_v7  ;;  %v6393_v49 = vsub.f32 %v420_v23, %v6280_v51 }
 0x395   : > { %31767 = vmatpush3.bf16.msra.mxu0 %v35812_v24  ;;  %31549 = vmatpush1.bf16.msra.mxu1 %v36410_v14  ;;  %v6390_v47 = vand.u32 4294901760, %v6389_v12 }
 0x396   : > { %31768 = vmatprep.subr.bf16.mxu0 %v39254_v6  ;;  %v6353_v37 = vsub.f32 %v6351_v31, %v6352_v30  ;;  %39281 = vst [vmem:[#allocation86_spill] sm:$0xff] %v36428_v21  ;;  %31551 = vmatprep.subr.bf16.mxu1 %v36426_v22  ;;  %v6382_v32 = vand.u32 4294901760, %v6381_v17  ;;  %v6394_v26 = vand.u32 4294901760, %v6393_v49  ;;  %v36447_v5 = vpack.c.bf16 %v6393_v49, %v6381_v17 }
 0x397   : > { %v36437_v34 = vpack.c.bf16 %v6390_v47, %v6378_v50  ;;  %v36449_v51 = vpack.c.bf16 %v6364_v55, %v6352_v30  ;;  %v422_v30 = vld [vmem:[%s38733_s5 + $0x88] sm:$0xff] }
 0x398   : > { %v6354_v35 = vand.u32 4294901760, %v6353_v37  ;;  %v6383_v44 = vsub.f32 %v6381_v17, %v6382_v32  ;;  %v6395_v45 = vsub.f32 %v6393_v49, %v6394_v26  ;;  %39289 = vst [vmem:[#allocation94_spill] sm:$0xff] %v36447_v5  ;;  %v36451_v37 = vpack.c.bf16 %v6370_v2, %v6358_v40 }
 0x399   : > { %31553 = vmatpush1.bf16.msra.mxu1 %v36428_v21  ;;  %39284 = vst [vmem:[#allocation89_spill] sm:$0xff] %v36437_v34  ;;  %39290 = vst [vmem:[#allocation95_spill] sm:$0xff] %v36449_v51  ;;  %v36455_v12 = vpack.c.bf16 %v6394_v26, %v6382_v32  ;;  %v6819_v40 = vand.u32 4294901760, %v422_v30 }
 0x39a   : > { %v36432_v38 = vpack.c.bf16 %v6366_v46, %v6354_v35  ;;  %v6384_v7 = vand.u32 4294901760, %v6383_v44  ;;  %v6396_v4 = vand.u32 4294901760, %v6395_v45  ;;  %v36441_v46 = vpack.c.bf16 %v6363_v33, %v6351_v31  ;;  %39291 = vst [vmem:[#allocation96_spill] sm:$0xff] %v36451_v37 }
 0x39b   : > { %v36443_v35 = vpack.c.bf16 %v6369_v16, %v6357_v28  ;;  %39293 = vst [vmem:[#allocation98_spill] sm:$0xff] %v36455_v12  ;;  %v6813_v28 = vand.u32 4294901760, %v416_v59  ;;  %v419_v16 = vld [vmem:[%s38733_s5 + $0x60] sm:$0xff] }
 0x39c   : > { %39282 = vst [vmem:[#allocation87_spill] sm:$0xff] %v36432_v38  ;;  %31555 = vmatprep.subr.bf16.mxu1 %v36432_v38  ;;  %v36439_v23 = vpack.c.bf16 %v6396_v4, %v6384_v7  ;;  %39286 = vst [vmem:[#allocation91_spill] sm:$0xff] %v36441_v46  ;;  %v6816_v55 = vand.u32 4294901760, %v419_v16 }
 0x39d   : > { %39287 = vst [vmem:[#allocation92_spill] sm:$0xff] %v36443_v35  ;;  %v6897_v26 = vsub.f32 %v416_v59, %v6813_v28 }
 0x39e   : > { %39285 = vst [vmem:[#allocation90_spill] sm:$0xff] %v36439_v23  ;;  %v6904_v4 = vsub.f32 %v419_v16, %v6816_v55 }
 0x39f   : > { %v6898_v7 = vand.u32 4294901760, %v6897_v26 }
 0x463   : > { %v6234_v44 = vpop.f32.mrb[30].mxu0 }
 0x464   : > { %v6244_v50 = vmul.f32 %v36371_v54, %v6234_v44  ;;  %v28905_v45 = vpop.f32.mrb[31].mxu0  ;;  %v6911_v44 = vsub.f32 %v422_v30, %v6819_v40 }
 0x466   : > { %v6245_v31 = vadd.f32 %v36088_v42, %v6244_v50  ;;  %v413_v42 = vld [vmem:[%s38733_s5 + $0x10] sm:$0xff] }
 0x467   : > { %v6810_v54 = vand.u32 4294901760, %v413_v42 }
 0x468   : > { %v6246_v33 = vmax.f32 %v6245_v31, 0.0  ;;  %v6899_v31 = vsub.f32 %v6897_v26, %v6898_v7 }
 0x469   : > { %v6890_v2 = vsub.f32 %v413_v42, %v6810_v54  ;;  %v36512_v50 = vpack.c.bf16 %v6813_v28, %v6810_v54 }
 0x46a   : > { %v6264_v57 = vsel %vm450_vm0, %v6246_v33, 0  ;;  %v6905_v33 = vand.u32 4294901760, %v6904_v4  ;;  %v6900_v59 = vand.u32 4294901760, %v6899_v31 }
 0x46b   : > { %v36460_v29 = vand.u32 4294901760, %v6264_v57  ;;  %v6891_v47 = vand.u32 4294901760, %v6890_v2  ;;  %39294 = vst [vmem:[#allocation99_spill] sm:$0xff] %v36512_v50 }
 0x46c   : > { %v6906_v54 = vsub.f32 %v6904_v4, %v6905_v33 }
 0x46d   : > { %v36463_v49 = vsub.f32 %v6264_v57, %v36460_v29  ;;  %v6892_v45 = vsub.f32 %v6890_v2, %v6891_v47  ;;  %v6912_v57 = vand.u32 4294901760, %v6911_v44 }
 0x46e   : > { %v6907_v30 = vand.u32 4294901760, %v6906_v54 }
 0x46f   : > { %v36466_v17 = vand.u32 4294901760, %v36463_v49  ;;  %v6893_v42 = vand.u32 4294901760, %v6892_v45  ;;  %v6913_v28 = vsub.f32 %v6911_v44, %v6912_v57  ;;  %v426_v45 = vld [vmem:[%s38733_s5 + $0x90] sm:$0xff] }
 0x471   : > { %v6342_v52 = vsub.f32 %v36463_v49, %v36466_v17  ;;  %v36524_v16 = vpack.c.bf16 %v6900_v59, %v6893_v42 }
 0x473   : > { %v36470_v32 = vand.u32 4294901760, %v6342_v52  ;;  %v36517_v52 = vpack.c.bf16 %v6819_v40, %v6816_v55  ;;  %39296 = vst [vmem:[#allocation101_spill] sm:$0xff] %v36524_v16  ;;  %v36535_v40 = vpack.c.bf16 %v6897_v26, %v6890_v2  ;;  %v36558_v2 = vpack.c.bf16 %v6912_v57, %v6905_v33 }
 0x474   : > { %v7334_v33 = vand.u32 4294901760, %v426_v45 }
 0x475   : > { %6344 = vmatmul.mubr.f32.vlgmr.msra.gmra.mrb[12].mxu1 %v36470_v32  ;;  %39295 = vst [vmem:[#allocation100_spill] sm:$0xff] %v36517_v52  ;;  %39298 = vst [vmem:[#allocation103_spill] sm:$0xff] %v36535_v40 }
 0x476   : > { %31557 = vmatpush1.bf16.msra.mxu1 %v36434_v56  ;;  %6454 = vmatprep.mubr.f32.mxu1 %v39101_v9  ;;  %39301 = vst [vmem:[#allocation106_spill] sm:$0xff] %v36558_v2 }
 0x477   : > { %31559 = vmatprep.subr.bf16.mxu1 %v36437_v34 }
 0x47a   : > { %31561 = vmatpush1.bf16.msra.mxu1 %v36439_v23 }
 0x47b   : > { %31563 = vmatprep.subr.bf16.mxu1 %v36441_v46 }
 0x47d   : > { %6456 = vmatmul.mubr.f32.vlgmr.msra.gmra.mrb[12].mxu1 %v36460_v29 }
 0x47e   : > { %31565 = vmatpush1.bf16.msra.mxu1 %v36443_v35  ;;  %6542 = vmatprep.mubr.f32.mxu1 %v39101_v9 }
 0x47f   : > { %31567 = vmatprep.subr.bf16.mxu1 %v36445_v0 }
 0x482   : > { %31569 = vmatpush1.bf16.msra.mxu1 %v36447_v5 }
 0x483   : > { %31571 = vmatprep.subr.bf16.mxu1 %v36408_v27 }
 0x485   : > { %6545 = vmatmul.mubr.f32.vlgmr.msra.gmra.mrb[12].mxu1 %v36463_v49 }
 0x486   : > { %31573 = vmatpush1.bf16.msra.mxu1 %v36410_v14  ;;  %6623 = vmatprep.mubr.f32.mxu1 %v39101_v9 }
 0x487   : > { %31575 = vmatprep.subr.bf16.mxu1 %v36426_v22 }
 0x48a   : > { %31577 = vmatpush1.bf16.msra.mxu1 %v36428_v21 }
 0x48b   : > { %31579 = vmatprep.subr.bf16.mxu1 %v36449_v51 }
 0x48d   : > { %6627 = vmatmul.mubr.f32.vlgmr.msra.gmra.mrb[12].mxu1 %v36466_v17 }
 0x48e   : > { %31581 = vmatpush1.bf16.msra.mxu1 %v36451_v37  ;;  %6721 = vmatprep.mubr.f32.mxu1 %v39101_v9 }
 0x48f   : > { %31583 = vmatprep.subr.bf16.mxu1 %v36453_v10 }
 0x492   : > { %31585 = vmatpush1.bf16.msra.mxu1 %v36455_v12  ;;  %v6914_v12 = vand.u32 4294901760, %v6913_v28 }
 0x493   : > { %31587 = vmatprep.subr.bf16.mxu1 %v36408_v27 }
 0x494   : > { %v36529_v55 = vpack.c.bf16 %v6914_v12, %v6907_v30  ;;  %v36553_v12 = vpack.c.bf16 %v6898_v7, %v6891_v47 }
 0x495   : > { %6723 = vmatmul.mubr.f32.vlgmr.msra.gmra.mrb[12].mxu1 %v36460_v29 }
 0x496   : > { %31589 = vmatpush1.bf16.msra.mxu1 %v36410_v14  ;;  %6801 = vmatprep.mubr.f32.mxu1 %v39101_v9  ;;  %39297 = vst [vmem:[#allocation102_spill] sm:$0xff] %v36529_v55  ;;  %39300 = vst [vmem:[#allocation105_spill] sm:$0xff] %v36553_v12 }
 0x497   : > { %31591 = vmatprep.subr.bf16.mxu1 %v36426_v22 }
 0x49a   : > { %31593 = vmatpush1.bf16.msra.mxu1 %v36428_v21 }
 0x49b   : > { %31594 = vmatprep.subr.bf16.mxu1 %v39254_v6 }
 0x49d   : > { %6803 = vmatmul.mubr.f32.vlgmr.msra.gmra.mrb[12].mxu1 %v36460_v29 }
 0x49e   : > { %31596 = vmatpush3.bf16.msra.mxu1 %v36512_v50  ;;  %28914 = vmatprep.mubr.msk.f32.mxu1 %vm34583_vm1, %v39101_v9 }
 0x49f   : > { %31597 = vmatprep.subr.bf16.mxu1 %v39254_v6 }
 0x4a2   : > { %31599 = vmatpush3.bf16.msra.mxu1 %v36517_v52 }
 0x4a3   : > { %31600 = vmatprep.subr.bf16.mxu1 %v39254_v6 }
 0x4a5   : > { %28915 = vmatmul.mubr.f32.vlgmr.msra.gmra.mrb[24].mxu1 %v36470_v32  ;;  %v36540_v32 = vpack.c.bf16 %v6911_v44, %v6904_v4 }
 0x4a6   : > { %31602 = vmatpush3.bf16.msra.mxu1 %v36524_v16  ;;  %28925 = vmatprep.mubr.msk.f32.mxu1 %vm34583_vm1, %v39101_v9 }
 0x4a7   : > { %31603 = vmatprep.subr.bf16.mxu1 %v39254_v6  ;;  %39299 = vst [vmem:[#allocation104_spill] sm:$0xff] %v36540_v32 }
 0x4aa   : > { %31605 = vmatpush3.bf16.msra.mxu1 %v36529_v55 }
 0x4ab   : > { %31606 = vmatprep.subr.bf16.mxu1 %v39254_v6 }
 0x4ad   : > { %28926 = vmatmul.mubr.f32.vlgmr.msra.gmra.mrb[26].mxu1 %v36460_v29 }
 0x4ae   : > { %31608 = vmatpush3.bf16.msra.mxu1 %v36535_v40  ;;  %28936 = vmatprep.mubr.msk.f32.mxu1 %vm34583_vm1, %v39101_v9 }
 0x4af   : > { %31609 = vmatprep.subr.bf16.mxu1 %v39254_v6 }
 0x4b2   : > { %31611 = vmatpush3.bf16.msra.mxu1 %v36540_v32 }
 0x4b3   : > { %31612 = vmatprep.subr.bf16.mxu1 %v39254_v6 }
 0x4b5   : > { %28937 = vmatmul.mubr.f32.vlgmr.msra.gmra.mrb[28].mxu1 %v36463_v49  ;;  %v423_v49 = vld [vmem:[%s38733_s5 + $0x18] sm:$0xff] }
 0x4b6   : > { %31614 = vmatpush3.bf16.msra.mxu1 %v36512_v50  ;;  %28947 = vmatprep.mubr.msk.f32.mxu1 %vm34583_vm1, %v39101_v9  ;;  %v7325_v26 = vand.u32 4294901760, %v423_v49 }
 0x4b7   : > { %31615 = vmatprep.subr.bf16.mxu1 %v39254_v6 }
 0x4b8   : > { %v7405_v4 = vsub.f32 %v423_v49, %v7325_v26  ;;  %v7426_v49 = vsub.f32 %v426_v45, %v7334_v33 }
 0x4ba   : > { %31617 = vmatpush3.bf16.msra.mxu1 %v36517_v52  ;;  %v7406_v57 = vand.u32 4294901760, %v7405_v4 }
 0x4bb   : > { %31618 = vmatprep.subr.bf16.mxu1 %v39254_v6 }
 0x4bc   : > { %v7407_v54 = vsub.f32 %v7405_v4, %v7406_v57 }
 0x4bd   : > { %28948 = vmatmul.mubr.f32.vlgmr.msra.gmra.mrb[30].mxu1 %v36466_v17  ;;  %v424_v17 = vld [vmem:[%s38733_s5 + $0x40] sm:$0xff] }
 0x4be   : > { %31620 = vmatpush3.bf16.msra.mxu1 %v36553_v12  ;;  %28958 = vmatprep.mubr.msk.f32.mxu1 %vm34583_vm1, %v39101_v9  ;;  %v7328_v47 = vand.u32 4294901760, %v424_v17 }
 0x4bf   : > { %31621 = vmatprep.subr.bf16.mxu1 %v39254_v6 }
 0x4c0   : > { %v36581_v7 = vpack.c.bf16 %v7328_v47, %v7325_v26  ;;  %v7412_v44 = vsub.f32 %v424_v17, %v7328_v47  ;;  %v7408_v17 = vand.u32 4294901760, %v7407_v54  ;;  %v432_v54 = vld [vmem:[%s38734_s6 + $0x5] sm:$0x7] }
 0x4c2   : > { %31623 = vmatpush3.bf16.msra.mxu1 %v36558_v2  ;;  %v7413_v42 = vand.u32 4294901760, %v7412_v44  ;;  %v7427_v2 = vand.u32 4294901760, %v7426_v49 }
 0x4c3   : > { %31624 = vmatprep.subr.bf16.mxu1 %v39254_v6 }
 0x4c4   : > { %v7414_v28 = vsub.f32 %v7412_v44, %v7413_v42  ;;  %v7428_v40 = vsub.f32 %v7426_v49, %v7427_v2  ;;  %v36603_v45 = vpack.c.bf16 %v7413_v42, %v7406_v57 }
 0x4c5   : > { %28959 = vmatmul.mubr.f32.vlgmr.msra.gmra.mrb[32].mxu1 %v36460_v29 }
 0x4c6   : > { %31626 = vmatpush3.bf16.msra.mxu1 %v36512_v50  ;;  %28969 = vmatprep.mubr.msk.f32.mxu1 %vm34583_vm1, %v39101_v9  ;;  %v7415_v26 = vand.u32 4294901760, %v7414_v28  ;;  %v7429_v16 = vand.u32 4294901760, %v7428_v40  ;;  %v36599_v50 = vpack.c.bf16 %v7412_v44, %v7405_v4  ;;  %v39302_v28 = vld [vmem:[#allocation55_spill] sm:$0xff]  ;;  %v39303_v40 = vsub.s32 0, %v36067_v48 }
 0x4c7   : > { %31627 = vmatprep.subr.bf16.mxu1 %v39254_v6 }
 0x4c8   : > { %v36595_v12 = vpack.c.bf16 %v7415_v26, %v7408_v17 }
 0x4ca   : > { %31629 = vmatpush3.bf16.msra.mxu1 %v36517_v52 }
 0x4cb   : > { %31630 = vmatprep.subr.bf16.mxu1 %v39254_v6 }
 0x4cd   : > { %28970 = vmatmul.mubr.f32.vlgmr.msra.gmra.mrb[34].mxu1 %v36460_v29  ;;  %v425_v29 = vld [vmem:[%s38733_s5 + $0x68] sm:$0xff] }
 0x4ce   : > { %28980 = vmatprep.mubr.msk.f32.mxu1 %vm34583_vm1, %v39101_v9  ;;  %31632 = vmatpush3.bf16.msra.mxu1 %v36581_v7  ;;  %v7331_v31 = vand.u32 4294901760, %v425_v29 }
 0x4cf   : > { %31633 = vmatprep.subr.bf16.mxu1 %v39254_v6 }
 0x4d0   : > { %v36591_v59 = vpack.c.bf16 %v7334_v33, %v7331_v31  ;;  %v7419_v30 = vsub.f32 %v425_v29, %v7331_v31  ;;  %v1666_v33 = vsub.s32 2, %v36067_v48 }
 0x4d2   : > { %31635 = vmatpush3.bf16.msra.mxu1 %v36591_v59  ;;  %v7420_v47 = vand.u32 4294901760, %v7419_v30  ;;  %v36601_v29 = vpack.c.bf16 %v7426_v49, %v7419_v30  ;;  %v1667_v17 = vrot.slane %v39302_v28, %v1666_v33  ;;  %v1670_v49 = vsub.s32 3, %v36067_v48 }
 0x4d3   : > { %31636 = vmatprep.subr.bf16.mxu1 %v39254_v6 }
 0x4d4   : > { %v7421_v32 = vsub.f32 %v7419_v30, %v7420_v47  ;;  %v36605_v31 = vpack.c.bf16 %v7427_v2, %v7420_v47  ;;  %v36617_v30 = vrot.slane %v432_v54, %v1666_v33 }
 0x4d6   : > { %v7422_v55 = vand.u32 4294901760, %v7421_v32  ;;  %39305 = vst [vmem:[#allocation107_spill] sm:$0xff] %v36617_v30 }
 0x4d8   : > { %v36597_v52 = vpack.c.bf16 %v7429_v16, %v7422_v55  ;;  %v6251_v16 = vrot.slane %v432_v54, %v39303_v40  ;;  %v1671_v40 = vrot.slane %v39302_v28, %v1670_v49 }
 0x4da   : > { %v36614_v55 = vadd.f32 %v6251_v16, %v1667_v17  ;;  %v39306_v17 = vsub.s32 1, %v36067_v48 }
 0x4dc   : > { %39304 = vst [vmem:[#allocation55_spill] sm:$0xff] %v36614_v55  ;;  %v6255_v16 = vrot.slane %v432_v54, %v39306_v17 }
 0x570   : > { %v6804_v32 = vpop.f32.mrb[12].mxu1 }
 0x571   : > { %v33669_v4 = vadd.f32 %v36614_v55, %v6804_v32  ;;  %v6806_v44 = vpop.f32.mrb[13].mxu1 }
 0x573   : > { %v26975_v57 = vmul.f32 -1.442695, %v33669_v4  ;;  %v36624_v4 = vadd.f32 %v6255_v16, %v1671_v40 }
 0x575   : > { %34380 = vpow2.f32 %v26975_v57  ;;  %v33671_v33 = vadd.f32 %v36624_v4, %v6806_v44 }
 0x577   : > { %v26976_v0 = vmul.f32 -1.442695, %v33671_v33 }
 0x578   : > { %v6884_v2 = vpop.f32.mrb[24].mxu1 }
 0x579   : > { %v28916_v42 = vpop.f32.mrb[25].mxu1  ;;  %v6885_v47 = vadd.f32 %v6884_v2, %v36617_v30  ;;  %v39307_v2 = vld [vmem:[#allocation67_spill] sm:$0xff] }
 0x57f   : > { %v34381_v26 = vpop.eup %34380 }
 0x580   : > { %v7298_v10 = vadd.f32 1.0, %v34381_v26  ;;  %v6975_v37 = vpop.f32.mrb[26].mxu1 }
 0x581   : > { %v6976_v32 = vadd.f32 %v6975_v37, %v6885_v47  ;;  %v28927_v55 = vpop.f32.mrb[27].mxu1 }
 0x582   : > { %34382 = vrcp.f32 %v7298_v10 }
 0x583   : > { %34384 = vpow2.f32 %v26976_v0 }
 0x588   : > { %v7055_v57 = vpop.f32.mrb[28].mxu1 }
 0x589   : > { %v7056_v42 = vadd.f32 %v7055_v57, %v6976_v32  ;;  %v28938_v51 = vpop.f32.mrb[29].mxu1 }
 0x58c   : > { %v34383_v5 = vpop.eup %34382 }
 0x58d   : > { %v7308_v26 = vmul.f32 %v34383_v5, %v39307_v2  ;;  %v34385_v10 = vpop.eup %34384  ;;  %v34484_v5 = vld [vmem:[%s35696_s22] sm:$0xff]  ;;  %s26793_s22 = scalar_lea.sflag [#allocation6], %s38497_s29 }
 0x58e   : > { %v7305_v47 = vadd.f32 1.0, %v34385_v10  ;;  %v39310_v10 = vld [vmem:[#allocation43_spill] sm:$0xff] }
 0x590   : > { %v7132_v28 = vpop.f32.mrb[30].mxu1  ;;  %34386 = vrcp.f32 %v7305_v47  ;;  %v39311_v47 = vld [vmem:[#allocation9_spill] sm:$0xff] }
 0x591   : > { %v7133_v49 = vadd.f32 %v7132_v28, %v7056_v42  ;;  %v28949_v48 = vpop.f32.mrb[31].mxu1 }
 0x598   : > { %v7215_v54 = vpop.f32.mrb[32].mxu1 }
 0x599   : > { %v7216_v37 = vadd.f32 %v7215_v54, %v7133_v49  ;;  %v28960_v55 = vpop.f32.mrb[33].mxu1 }
 0x59a   : > { %v34387_v51 = vpop.eup %34386  ;;  %v39309_v55 = vld [vmem:[#allocation38_spill] sm:$0xff] }
 0x59b   : > { %v7311_v32 = vsub.f32 1.0, %v34387_v51  ;;  %v7313_v0 = vmul.f32 %v34484_v5, %v34387_v51  ;;  %v39316_v51 = vld [vmem:[#allocation21_spill] sm:$0xff]  ;;  %v39319_v5 = vld [vmem:[#allocation32_spill] sm:$0xff] }
 0x5a0   : > { %v7290_v40 = vpop.f32.mrb[34].mxu1 }
 0x5a1   : > { %v7291_v44 = vadd.f32 %v7290_v40, %v7216_v37  ;;  %v28971_v17 = vpop.f32.mrb[35].mxu1  ;;  %v39308_v37 = vld [vmem:[#allocation30_spill] sm:$0xff]  ;;  %v39312_v40 = vld [vmem:[#allocation31_spill] sm:$0xff] }
 0x5a2   : > { %v39314_v17 = vld [vmem:[#allocation17_spill] sm:$0xff] }
 0x5a3   : > { %v7309_v16 = vadd.f32 %v7308_v26, %v7291_v44  ;;  %v39313_v44 = vld [vmem:[#allocation34_spill] sm:$0xff] }
 0x5a5   : > { %34388 = vtanh.f32 %v7309_v16  ;;  %v39315_v16 = vld [vmem:[#allocation11_spill] sm:$0xff] }
 0x5af   : > { %v34389_v33 = vpop.eup %34388 }
 0x5b0   : > { %v7312_v57 = vmul.f32 %v34389_v33, %v7311_v32  ;;  %v39317_v32 = vld [vmem:[#allocation24_spill] sm:$0xff] }
 0x5b1   : > { %v39318_v33 = vld [vmem:[#allocation28_spill] sm:$0xff] }
 0x5b2   : > { %v36629_v42 = vadd.f32 %v7313_v0, %v7312_v57  ;;  %v39320_v0 = vld [vmem:[#allocation37_spill] sm:$0xff]  ;;  %v39321_v57 = vld [vmem:[#allocation39_spill] sm:$0xff] }
 0x5b4   : > { %v7322_v2 = vsel %vm450_vm0, %v36629_v42, 0 }
 0x5b5   : > { %v36633_v28 = vand.u32 4294901760, %v7322_v2 }
 0x5b7   : > { %v36636_v49 = vsub.f32 %v7322_v2, %v36633_v28  ;;  %v39322_v2 = vld [vmem:[#allocation42_spill] sm:$0xff] }
 0x5b9   : > { %v36639_v48 = vand.u32 4294901760, %v36636_v49 }
 0x5bb   : > { %v7396_v26 = vsub.f32 %v36636_v49, %v36639_v48 }
 0x5bd   : > { %v36643_v54 = vand.u32 4294901760, %v7396_v26  ;;  %v39323_v26 = vld [vmem:[#allocation46_spill] sm:$0xff] }
 0x5bf   : > { %28981 = vmatmul.mubr.f32.vlgmr.msra.gmra.mrb[36].mxu1 %v36643_v54  ;;  %29047 = vmatmul.mubr.f32.vlgmr.msra.gmra.mrb[32].mxu0 %v36643_v54 }
 0x5c0   : > { %31638 = vmatpush3.bf16.msra.mxu1 %v36595_v12  ;;  %31770 = vmatpush3.bf16.msra.mxu0 %v39308_v37 }
 0x5c1   : > { %31639 = vmatprep.subr.bf16.mxu1 %v39254_v6  ;;  %31771 = vmatprep.subr.bf16.mxu0 %v39254_v6 }
 0x5c2   : > { %28991 = vmatprep.mubr.msk.f32.mxu1 %vm34583_vm1, %v39101_v9  ;;  %29057 = vmatprep.mubr.msk.f32.mxu0 %vm34583_vm1, %v39101_v9 }
 0x5c4   : > { %31641 = vmatpush3.bf16.msra.mxu1 %v36597_v52  ;;  %31773 = vmatpush3.bf16.msra.mxu0 %v39309_v55 }
 0x5c5   : > { %31642 = vmatprep.subr.bf16.mxu1 %v39254_v6  ;;  %31774 = vmatprep.subr.bf16.mxu0 %v39254_v6 }
 0x5c7   : > { %28992 = vmatmul.mubr.f32.vlgmr.msra.gmra.mrb[36].mxu1 %v36633_v28  ;;  %29058 = vmatmul.mubr.f32.vlgmr.msra.gmra.mrb[32].mxu0 %v36633_v28 }
 0x5c8   : > { %31644 = vmatpush3.bf16.msra.mxu1 %v36599_v50  ;;  %31776 = vmatpush3.bf16.msra.mxu0 %v39310_v10 }
 0x5c9   : > { %31645 = vmatprep.subr.bf16.mxu1 %v39254_v6  ;;  %31777 = vmatprep.subr.bf16.mxu0 %v39254_v6 }
 0x5ca   : > { %29002 = vmatprep.mubr.msk.f32.mxu1 %vm34583_vm1, %v39101_v9  ;;  %29068 = vmatprep.mubr.msk.f32.mxu0 %vm34583_vm1, %v39101_v9 }
 0x5cc   : > { %31647 = vmatpush3.bf16.msra.mxu1 %v36601_v29  ;;  %31779 = vmatpush3.bf16.msra.mxu0 %v39311_v47 }
 0x5cd   : > { %31648 = vmatprep.subr.bf16.mxu1 %v39254_v6  ;;  %31780 = vmatprep.subr.bf16.mxu0 %v39254_v6 }
 0x5cf   : > { %29003 = vmatmul.mubr.f32.vlgmr.msra.gmra.mrb[36].mxu1 %v36636_v49  ;;  %29069 = vmatmul.mubr.f32.vlgmr.msra.gmra.mrb[32].mxu0 %v36636_v49 }
 0x5d0   : > { %31650 = vmatpush3.bf16.msra.mxu1 %v36581_v7  ;;  %31782 = vmatpush3.bf16.msra.mxu0 %v35784_v43 }
 0x5d1   : > { %31651 = vmatprep.subr.bf16.mxu1 %v39254_v6  ;;  %31783 = vmatprep.subr.bf16.mxu0 %v39254_v6 }
 0x5d2   : > { %29013 = vmatprep.mubr.msk.f32.mxu1 %vm34583_vm1, %v39101_v9  ;;  %29079 = vmatprep.mubr.msk.f32.mxu0 %vm34583_vm1, %v39101_v9 }
 0x5d4   : > { %31653 = vmatpush3.bf16.msra.mxu1 %v36591_v59  ;;  %31785 = vmatpush3.bf16.msra.mxu0 %v35812_v24 }
 0x5d5   : > { %31654 = vmatprep.subr.bf16.mxu1 %v39254_v6  ;;  %31786 = vmatprep.subr.bf16.mxu0 %v39254_v6 }
 0x5d7   : > { %29014 = vmatmul.mubr.f32.vlgmr.msra.gmra.mrb[36].mxu1 %v36639_v48  ;;  %29080 = vmatmul.mubr.f32.vlgmr.msra.gmra.mrb[32].mxu0 %v36639_v48 }
 0x5d8   : > { %31656 = vmatpush3.bf16.msra.mxu1 %v36603_v45  ;;  %31788 = vmatpush3.bf16.msra.mxu0 %v39312_v40 }
 0x5d9   : > { %31657 = vmatprep.subr.bf16.mxu1 %v39254_v6  ;;  %31789 = vmatprep.subr.bf16.mxu0 %v39254_v6 }
 0x5da   : > { %29024 = vmatprep.mubr.msk.f32.mxu1 %vm34583_vm1, %v39101_v9  ;;  %29090 = vmatprep.mubr.msk.f32.mxu0 %vm34583_vm1, %v39101_v9 }
 0x5dc   : > { %31659 = vmatpush3.bf16.msra.mxu1 %v36605_v31  ;;  %31791 = vmatpush3.bf16.msra.mxu0 %v39313_v44 }
 0x5dd   : > { %31660 = vmatprep.subr.bf16.mxu1 %v39254_v6  ;;  %31792 = vmatprep.subr.bf16.mxu0 %v39254_v6 }
 0x5df   : > { %29025 = vmatmul.mubr.f32.vlgmr.msra.gmra.mrb[36].mxu1 %v36633_v28  ;;  %29091 = vmatmul.mubr.f32.vlgmr.msra.gmra.mrb[32].mxu0 %v36633_v28 }
 0x5e0   : > { %31662 = vmatpush3.bf16.msra.mxu1 %v36581_v7  ;;  %31794 = vmatpush3.bf16.msra.mxu0 %v35784_v43 }
 0x5e1   : > { %31663 = vmatprep.subr.bf16.mxu1 %v39254_v6  ;;  %31795 = vmatprep.subr.bf16.mxu0 %v39254_v6 }
 0x5e2   : > { %29035 = vmatprep.mubr.msk.f32.mxu1 %vm34583_vm1, %v39101_v9  ;;  %29101 = vmatprep.mubr.msk.f32.mxu0 %vm34583_vm1, %v39101_v9 }
 0x5e4   : > { %31665 = vmatpush3.bf16.msra.mxu1 %v36591_v59  ;;  %31797 = vmatpush3.bf16.msra.mxu0 %v35812_v24 }
 0x5e5   : > { %31667 = vmatprep.subr.bf16.mxu1 %v39314_v17  ;;  %31798 = vmatprep.subr.bf16.mxu0 %v39254_v6 }
 0x5e7   : > { %29036 = vmatmul.mubr.f32.vlgmr.msra.gmra.mrb[36].mxu1 %v36633_v28  ;;  %29102 = vmatmul.mubr.f32.vlgmr.msra.gmra.mrb[32].mxu0 %v36633_v28 }
 0x5e8   : > { %31669 = vmatpush1.bf16.msra.mxu1 %v39315_v16  ;;  %31800 = vmatpush3.bf16.msra.mxu0 %v35987_v41 }
 0x5e9   : > { %31671 = vmatprep.subr.bf16.mxu1 %v39316_v51  ;;  %31801 = vmatprep.subr.bf16.mxu0 %v39254_v6 }
 0x5ea   : > { %7898 = vmatprep.mubr.f32.mxu1 %v39101_v9  ;;  %29136 = vmatprep.mubr.msk.f32.mxu0 %vm34583_vm1, %v39101_v9 }
 0x5ec   : > { %31673 = vmatpush1.bf16.msra.mxu1 %v39317_v32  ;;  %31803 = vmatpush3.bf16.msra.mxu0 %v35995_v63 }
 0x5ed   : > { %31675 = vmatprep.subr.bf16.mxu1 %v39318_v33  ;;  %31804 = vmatprep.subr.bf16.mxu0 %v39254_v6 }
 0x5ef   : > { %7904 = vmatmul.mubr.f32.vlgmr.msra.gmra.mrb[8].mxu1 %v36643_v54 }
 0x5f0   : > { %31677 = vmatpush1.bf16.msra.mxu1 %v39319_v5  ;;  %31806 = vmatpush3.bf16.msra.mxu0 %v36005_v8  ;;  %v39324_v5 = vld [vmem:[#allocation22_spill] sm:$0xff] }
 0x5f1   : > { %31679 = vmatprep.subr.bf16.mxu1 %v39320_v0  ;;  %31807 = vmatprep.subr.bf16.mxu0 %v39254_v6  ;;  %v39325_v0 = vld [vmem:[#allocation25_spill] sm:$0xff] }
 0x5f2   : > { %8014 = vmatprep.mubr.f32.mxu1 %v39101_v9 }
 0x5f4   : > { %31681 = vmatpush1.bf16.msra.mxu1 %v39321_v57  ;;  %31809 = vmatpush3.bf16.msra.mxu0 %v36013_v20 }
 0x5f5   : > { %31683 = vmatprep.subr.bf16.mxu1 %v39322_v2  ;;  %31810 = vmatprep.subr.bf16.mxu0 %v39254_v6  ;;  %v39329_v2 = vld [vmem:[#allocation35_spill] sm:$0xff] }
 0x5f7   : > { %8016 = vmatmul.mubr.f32.vlgmr.msra.gmra.mrb[8].mxu1 %v36633_v28 }
 0x5f8   : > { %31685 = vmatpush1.bf16.msra.mxu1 %v39323_v26  ;;  %31812 = vmatpush3.bf16.msra.mxu0 %v36023_v13  ;;  %v39328_v26 = vld [vmem:[#allocation18_spill] sm:$0xff] }
 0x5f9   : > { %31687 = vmatprep.subr.bf16.mxu1 %v39324_v5  ;;  %31813 = vmatprep.subr.bf16.mxu0 %v39254_v6  ;;  %v39327_v5 = vld [vmem:[#allocation33_spill] sm:$0xff] }
 0x5fa   : > { %8102 = vmatprep.mubr.f32.mxu1 %v39101_v9 }
 0x5fc   : > { %31689 = vmatpush1.bf16.msra.mxu1 %v39325_v0  ;;  %31815 = vmatpush3.bf16.msra.mxu0 %v36033_v39  ;;  %v39326_v0 = vld [vmem:[#allocation27_spill] sm:$0xff] }
 0x5fd   : > { %31691 = vmatprep.subr.bf16.mxu1 %v39314_v17  ;;  %31816 = vmatprep.subr.bf16.mxu0 %v39254_v6 }
 0x5ff   : > { %8105 = vmatmul.mubr.f32.vlgmr.msra.gmra.mrb[8].mxu1 %v36636_v49 }
 0x600   : > { %31693 = vmatpush1.bf16.msra.mxu1 %v39315_v16  ;;  %31818 = vmatpush3.bf16.msra.mxu0 %v36043_v18 }
 0x601   : > { %31695 = vmatprep.subr.bf16.mxu1 %v39316_v51  ;;  %31819 = vmatprep.subr.bf16.mxu0 %v39254_v6 }
 0x602   : > { %8183 = vmatprep.mubr.f32.mxu1 %v39101_v9 }
 0x604   : > { %31697 = vmatpush1.bf16.msra.mxu1 %v39317_v32  ;;  %31821 = vmatpush3.bf16.msra.mxu0 %v36055_v62 }
 0x605   : > { %31699 = vmatprep.subr.bf16.mxu1 %v39326_v0  ;;  %31822 = vmatprep.subr.bf16.mxu0 %v39254_v6 }
 0x607   : > { %8187 = vmatmul.mubr.f32.vlgmr.msra.gmra.mrb[8].mxu1 %v36639_v48 }
 0x608   : > { %31701 = vmatpush1.bf16.msra.mxu1 %v39327_v5  ;;  %8281 = vmatprep.mubr.f32.mxu1 %v39101_v9 }
 0x609   : > { %31703 = vmatprep.subr.bf16.mxu1 %v39328_v26 }
 0x60c   : > { %31705 = vmatpush1.bf16.msra.mxu1 %v39329_v2 }
 0x60d   : > { %31707 = vmatprep.subr.bf16.mxu1 %v39314_v17 }
 0x60f   : > { %8283 = vmatmul.mubr.f32.vlgmr.msra.gmra.mrb[8].mxu1 %v36633_v28 }
 0x610   : > { %31709 = vmatpush1.bf16.msra.mxu1 %v39315_v16  ;;  %8361 = vmatprep.mubr.f32.mxu1 %v39101_v9 }
 0x611   : > { %31711 = vmatprep.subr.bf16.mxu1 %v39316_v51 }
 0x614   : > { %31713 = vmatpush1.bf16.msra.mxu1 %v39317_v32 }
 0x615   : > { %31715 = vmatprep.subr.bf16.mxu1 %v36173_v53 }
 0x617   : > { %8363 = vmatmul.mubr.f32.vlgmr.msra.gmra.mrb[8].mxu1 %v36633_v28 }
 0x618   : > { %31717 = vmatpush1.bf16.msra.mxu1 %v36177_v58  ;;  %8441 = vmatprep.mubr.f32.mxu1 %v39101_v9 }
 0x619   : > { %31719 = vmatprep.subr.bf16.mxu1 %v36179_v61 }
 0x61c   : > { %31721 = vmatpush1.bf16.msra.mxu1 %v36187_v60 }
 0x61d   : > { %31723 = vmatprep.subr.bf16.mxu1 %v36233_v3  ;;  %v39330_v3 = vld [vmem:[#allocation79_spill] sm:$0xff] }
 0x61f   : > { %8447 = vmatmul.mubr.f32.vlgmr.msra.gmra.mrb[14].mxu1 %v36643_v54  ;;  %v39331_v54 = vld [vmem:[#allocation80_spill] sm:$0xff] }
 0x620   : > { %31725 = vmatpush1.bf16.msra.mxu1 %v36237_v19  ;;  %8557 = vmatprep.mubr.f32.mxu1 %v39101_v9  ;;  %v39340_v19 = vld [vmem:[#allocation59_spill] sm:$0xff] }
 0x621   : > { %31727 = vmatprep.subr.bf16.mxu1 %v36241_v36  ;;  %v39339_v36 = vld [vmem:[#allocation57_spill] sm:$0xff] }
 0x624   : > { %31729 = vmatpush1.bf16.msra.mxu1 %v36244_v25 }
 0x625   : > { %31731 = vmatprep.subr.bf16.mxu1 %v36250_v11  ;;  %v39337_v11 = vld [vmem:[#allocation56_spill] sm:$0xff] }
 0x627   : > { %8559 = vmatmul.mubr.f32.vlgmr.msra.gmra.mrb[14].mxu1 %v36633_v28 }
 0x628   : > { %31733 = vmatpush1.bf16.msra.mxu1 %v36257_v1  ;;  %8645 = vmatprep.mubr.f32.mxu1 %v39101_v9  ;;  %v39332_v1 = vld [vmem:[#allocation81_spill] sm:$0xff] }
 0x629   : > { %31735 = vmatprep.subr.bf16.mxu1 %v36262_v15  ;;  %v39334_v15 = vld [vmem:[#allocation83_spill] sm:$0xff] }
 0x62c   : > { %31737 = vmatpush1.bf16.msra.mxu1 %v39330_v3  ;;  %v39333_v3 = vld [vmem:[#allocation82_spill] sm:$0xff] }
 0x62d   : > { %31739 = vmatprep.subr.bf16.mxu1 %v36173_v53 }
 0x62f   : > { %8648 = vmatmul.mubr.f32.vlgmr.msra.gmra.mrb[14].mxu1 %v36636_v49 }
 0x630   : > { %31741 = vmatpush1.bf16.msra.mxu1 %v36177_v58  ;;  %8726 = vmatprep.mubr.f32.mxu1 %v39101_v9 }
 0x631   : > { %31743 = vmatprep.subr.bf16.mxu1 %v36179_v61 }
 0x634   : > { %31745 = vmatpush1.bf16.msra.mxu1 %v36187_v60 }
 0x635   : > { %31747 = vmatprep.subr.bf16.mxu1 %v39331_v54 }
 0x637   : > { %8730 = vmatmul.mubr.f32.vlgmr.msra.gmra.mrb[14].mxu1 %v36639_v48 }
 0x638   : > { %31749 = vmatpush1.bf16.msra.mxu1 %v39332_v1  ;;  %8824 = vmatprep.mubr.f32.mxu1 %v39101_v9 }
 0x639   : > { %31751 = vmatprep.subr.bf16.mxu1 %v39333_v3 }
 0x63c   : > { %31753 = vmatpush1.bf16.msra.mxu1 %v39334_v15  ;;  %v39336_v15 = vld [vmem:[#allocation62_spill] sm:$0xff] }
 0x63d   : > { %31755 = vmatprep.subr.bf16.mxu1 %v36173_v53 }
 0x63f   : > { %8826 = vmatmul.mubr.f32.vlgmr.msra.gmra.mrb[14].mxu1 %v36633_v28 }
 0x640   : > { %31757 = vmatpush1.bf16.msra.mxu1 %v36177_v58  ;;  %8904 = vmatprep.mubr.f32.mxu1 %v39101_v9 }
 0x641   : > { %31759 = vmatprep.subr.bf16.mxu1 %v36179_v61 }
 0x644   : > { %31761 = vmatpush1.bf16.msra.mxu1 %v36187_v60  ;;  %v1792_v60 = vadd.f32 %v39340_v19, %v39339_v36 }
 0x645   : > { %31943 = vmatprep.subr.bf16.mxu1 %v36408_v27 }
 0x647   : > { %8906 = vmatmul.mubr.f32.vlgmr.msra.gmra.mrb[14].mxu1 %v36633_v28  ;;  %v39338_v28 = vld [vmem:[#allocation58_spill] sm:$0xff] }
 0x648   : > { %31945 = vmatpush1.bf16.msra.mxu1 %v36410_v14  ;;  %10135 = vmatprep.mubr.f32.mxu1 %v39101_v9  ;;  %v1790_v25 = vadd.f32 %v39338_v28, %v39337_v11  ;;  %v39348_v28 = vld [vmem:[#allocation54_spill] sm:$0xff] }
 0x649   : > { %31947 = vmatprep.subr.bf16.mxu1 %v36426_v22 }
 0x64c   : > { %31949 = vmatpush1.bf16.msra.mxu1 %v36428_v21 }
 0x64d   : > { %31951 = vmatprep.subr.bf16.mxu1 %v36432_v38 }
 0x6ba   : > { %v36812_v49 = vpop.f32.mrb[36].mxu1  ;;  %v9393_v48 = vpop.f32.mrb[32].mxu0 }
 0x6bb   : > { %39335 = vst [vmem:[#allocation67_spill] sm:$0xff] %v36812_v49  ;;  %v36815_v3 = vadd.f32 %v39336_v15, %v9393_v48  ;;  %v29037_v1 = vpop.f32.mrb[37].mxu1  ;;  %v29103_v54 = vpop.f32.mrb[33].mxu0  ;;  %v39347_v48 = vld [vmem:[#allocation52_spill] sm:$0xff] }
 0x6ea   : > { %v8364_v61 = vpop.f32.mrb[8].mxu1 }
 0x6eb   : > { %v33655_v58 = vadd.f32 %v8364_v61, %v1790_v25  ;;  %v8366_v53 = vpop.f32.mrb[9].mxu1 }
 0x6ec   : > { %v36821_v2 = vadd.f32 %v8366_v53, %v1792_v60  ;;  %v39341_v60 = vld [vmem:[#allocation36_spill] sm:$0xff]  ;;  %v39343_v53 = vld [vmem:[#allocation26_spill] sm:$0xff] }
 0x6ed   : > { %9402 = vmax.xlane.f32.xlu1 %v33655_v58 }
 0x77a   : > { %v9403_v38 = vpop.xlane.xlu1 %9402 }
 0x77b   : > { %v9404_v49 = vsub.f32 %v33655_v58, %v9403_v38  ;;  %v39342_v58 = vld [vmem:[#allocation10_spill] sm:$0xff]  ;;  %v39344_v38 = vld [vmem:[#allocation16_spill] sm:$0xff] }
 0x77d   : > { %v9405_v26 = vmul.f32 1.442695, %v9404_v49  ;;  %v39346_v49 = vld [vmem:[#allocation49_spill] sm:$0xff] }
 0x77f   : > { %34390 = vpow2.f32 %v9405_v26  ;;  %v39345_v26 = vld [vmem:[#allocation47_spill] sm:$0xff] }
 0x789   : > { %v36823_v15 = vpop.eup %34390 }
 0x78a   : > { %9407 = vadd.xlane.f32.xlu1 %v36823_v15  ;;  %v36827_v1 = vand.u32 4294901760, %v36823_v15 }
 0x78c   : > { %v9491_v19 = vsub.f32 %v36823_v15, %v36827_v1 }
 0x78e   : > { %v9492_v54 = vand.u32 4294901760, %v9491_v19 }
 0x790   : > { %v9493_v61 = vsub.f32 %v9491_v19, %v9492_v54 }
 0x792   : > { %v9494_v25 = vand.u32 4294901760, %v9493_v61  ;;  %v39349_v61 = vld [vmem:[#allocation23_spill] sm:$0xff] }
 0x794   : > { %29137 = vmatmul.mubr.f32.vlgmr.msra.gmra.mrb[34].mxu0 %v9494_v25  ;;  %v39350_v25 = vld [vmem:[#allocation41_spill] sm:$0xff] }
 0x795   : > { %31824 = vmatpush3.bf16.msra.mxu0 %v39341_v60  ;;  %29171 = vmatprep.mubr.msk.f32.mxu0 %vm34583_vm1, %v39101_v9 }
 0x796   : > { %31825 = vmatprep.subr.bf16.mxu0 %v39254_v6 }
 0x799   : > { %31827 = vmatpush3.bf16.msra.mxu0 %v39342_v58 }
 0x79a   : > { %31828 = vmatprep.subr.bf16.mxu0 %v39254_v6 }
 0x79d   : > { %31830 = vmatpush3.bf16.msra.mxu0 %v39343_v53 }
 0x79e   : > { %31831 = vmatprep.subr.bf16.mxu0 %v39254_v6 }
 0x7a1   : > { %31833 = vmatpush3.bf16.msra.mxu0 %v39344_v38 }
 0x7a2   : > { %31834 = vmatprep.subr.bf16.mxu0 %v39254_v6 }
 0x7a5   : > { %31836 = vmatpush3.bf16.msra.mxu0 %v39345_v26  ;;  %v39355_v26 = vld [vmem:[#allocation48_spill] sm:$0xff] }
 0x7a6   : > { %31837 = vmatprep.subr.bf16.mxu0 %v39254_v6 }
 0x7a9   : > { %31839 = vmatpush3.bf16.msra.mxu0 %v39346_v49  ;;  %v39353_v49 = vld [vmem:[#allocation13_spill] sm:$0xff] }
 0x7aa   : > { %31840 = vmatprep.subr.bf16.mxu0 %v39254_v6 }
 0x7ad   : > { %31842 = vmatpush3.bf16.msra.mxu0 %v39347_v48  ;;  %v39351_v48 = vld [vmem:[#allocation45_spill] sm:$0xff] }
 0x7ae   : > { %31843 = vmatprep.subr.bf16.mxu0 %v39254_v6 }
 0x7b1   : > { %31845 = vmatpush3.bf16.msra.mxu0 %v39348_v28  ;;  %v39352_v28 = vld [vmem:[#allocation14_spill] sm:$0xff] }
 0x7b2   : > { %31846 = vmatprep.subr.bf16.mxu0 %v39254_v6 }
 0x7b4   : > { %29172 = vmatmul.mubr.f32.vlgmr.msra.gmra.mrb[34].mxu0 %v36827_v1 }
 0x7b5   : > { %31848 = vmatpush3.bf16.msra.mxu0 %v39349_v61  ;;  %29206 = vmatprep.mubr.msk.f32.mxu0 %vm34583_vm1, %v39101_v9  ;;  %v39354_v61 = vld [vmem:[#allocation20_spill] sm:$0xff] }
 0x7b6   : > { %31849 = vmatprep.subr.bf16.mxu0 %v39254_v6 }
 0x7b9   : > { %31851 = vmatpush3.bf16.msra.mxu0 %v39350_v25  ;;  %v39356_v25 = vld [vmem:[#allocation51_spill] sm:$0xff] }
 0x7ba   : > { %31852 = vmatprep.subr.bf16.mxu0 %v39254_v6 }
 0x7bd   : > { %31854 = vmatpush3.bf16.msra.mxu0 %v39351_v48 }
 0x7be   : > { %31855 = vmatprep.subr.bf16.mxu0 %v39254_v6 }
 0x7c1   : > { %31857 = vmatpush3.bf16.msra.mxu0 %v39352_v28 }
 0x7c2   : > { %31858 = vmatprep.subr.bf16.mxu0 %v39254_v6 }
 0x7c5   : > { %31860 = vmatpush3.bf16.msra.mxu0 %v39353_v49  ;;  %v39363_v49 = vld [vmem:[#allocation50_spill] sm:$0xff] }
 0x7c6   : > { %31861 = vmatprep.subr.bf16.mxu0 %v39254_v6 }
 0x7c9   : > { %31863 = vmatpush3.bf16.msra.mxu0 %v39354_v61  ;;  %v39360_v61 = vld [vmem:[#allocation19_spill] sm:$0xff] }
 0x7ca   : > { %31864 = vmatprep.subr.bf16.mxu0 %v39254_v6 }
 0x7cd   : > { %31866 = vmatpush3.bf16.msra.mxu0 %v39355_v26  ;;  %v39359_v26 = vld [vmem:[#allocation12_spill] sm:$0xff] }
 0x7ce   : > { %31867 = vmatprep.subr.bf16.mxu0 %v39254_v6 }
 0x7d1   : > { %31869 = vmatpush3.bf16.msra.mxu0 %v39356_v25  ;;  %v39358_v25 = vld [vmem:[#allocation44_spill] sm:$0xff] }
 0x7d2   : > { %31870 = vmatprep.subr.bf16.mxu0 %v39254_v6 }
 0x7d4   : > { %29207 = vmatmul.mubr.f32.vlgmr.msra.gmra.mrb[34].mxu0 %v9491_v19  ;;  %v39357_v19 = vld [vmem:[#allocation40_spill] sm:$0xff] }
 0x7d5   : > { %31872 = vmatpush3.bf16.msra.mxu0 %v35987_v41  ;;  %29241 = vmatprep.mubr.msk.f32.mxu0 %vm34583_vm1, %v39101_v9 }
 0x7d6   : > { %31873 = vmatprep.subr.bf16.mxu0 %v39254_v6 }
 0x7d9   : > { %31875 = vmatpush3.bf16.msra.mxu0 %v35995_v63 }
 0x7da   : > { %31876 = vmatprep.subr.bf16.mxu0 %v39254_v6 }
 0x7dd   : > { %31878 = vmatpush3.bf16.msra.mxu0 %v36005_v8 }
 0x7de   : > { %31879 = vmatprep.subr.bf16.mxu0 %v39254_v6 }
 0x7e1   : > { %31881 = vmatpush3.bf16.msra.mxu0 %v36013_v20 }
 0x7e2   : > { %31882 = vmatprep.subr.bf16.mxu0 %v39254_v6 }
 0x7e5   : > { %31884 = vmatpush3.bf16.msra.mxu0 %v36023_v13 }
 0x7e6   : > { %31885 = vmatprep.subr.bf16.mxu0 %v39254_v6 }
 0x7e9   : > { %31887 = vmatpush3.bf16.msra.mxu0 %v36033_v39 }
 0x7ea   : > { %31888 = vmatprep.subr.bf16.mxu0 %v39254_v6 }
 0x7ed   : > { %31890 = vmatpush3.bf16.msra.mxu0 %v36043_v18 }
 0x7ee   : > { %31891 = vmatprep.subr.bf16.mxu0 %v39254_v6 }
 0x7f1   : > { %31893 = vmatpush3.bf16.msra.mxu0 %v36055_v62 }
 0x7f2   : > { %31894 = vmatprep.subr.bf16.mxu0 %v39254_v6 }
 0x7f4   : > { %29242 = vmatmul.mubr.f32.vlgmr.msra.gmra.mrb[34].mxu0 %v9492_v54  ;;  %v39361_v54 = vld [vmem:[#allocation15_spill] sm:$0xff] }
 0x7f5   : > { %31896 = vmatpush3.bf16.msra.mxu0 %v39357_v19  ;;  %29276 = vmatprep.mubr.msk.f32.mxu0 %vm34583_vm1, %v39101_v9  ;;  %v39362_v19 = vld [vmem:[#allocation29_spill] sm:$0xff] }
 0x7f6   : > { %31897 = vmatprep.subr.bf16.mxu0 %v39254_v6 }
 0x7f9   : > { %31899 = vmatpush3.bf16.msra.mxu0 %v39358_v25  ;;  %v39364_v25 = vld [vmem:[#allocation53_spill] sm:$0xff] }
 0x7fa   : > { %31900 = vmatprep.subr.bf16.mxu0 %v39254_v6 }
 0x7fd   : > { %31902 = vmatpush3.bf16.msra.mxu0 %v39359_v26 }
 0x7fe   : > { %31903 = vmatprep.subr.bf16.mxu0 %v39254_v6 }
 0x801   : > { %31905 = vmatpush3.bf16.msra.mxu0 %v39360_v61 }
 0x802   : > { %31906 = vmatprep.subr.bf16.mxu0 %v39254_v6 }
 0x805   : > { %31908 = vmatpush3.bf16.msra.mxu0 %v39361_v54 }
 0x806   : > { %31909 = vmatprep.subr.bf16.mxu0 %v39254_v6 }
 0x809   : > { %31911 = vmatpush3.bf16.msra.mxu0 %v39362_v19 }
 0x80a   : > { %31912 = vmatprep.subr.bf16.mxu0 %v39254_v6 }
 0x80d   : > { %31914 = vmatpush3.bf16.msra.mxu0 %v39363_v49 }
 0x80e   : > { %31915 = vmatprep.subr.bf16.mxu0 %v39254_v6 }
 0x811   : > { %31917 = vmatpush3.bf16.msra.mxu0 %v39364_v25 }
 0x812   : > { %31918 = vmatprep.subr.bf16.mxu0 %v39254_v6 }
 0x814   : > { %29277 = vmatmul.mubr.f32.vlgmr.msra.gmra.mrb[34].mxu0 %v36827_v1 }
 0x815   : > { %31920 = vmatpush3.bf16.msra.mxu0 %v35987_v41  ;;  %29311 = vmatprep.mubr.msk.f32.mxu0 %vm34583_vm1, %v39101_v9 }
 0x816   : > { %31921 = vmatprep.subr.bf16.mxu0 %v39254_v6 }
 0x817   : > { %v9408_v19 = vpop.xlane.xlu1 %9407 }
 0x818   : > { %34392 = vrcp.f32 %v9408_v19 }
 0x819   : > { %31923 = vmatpush3.bf16.msra.mxu0 %v35995_v63 }
 0x81a   : > { %31924 = vmatprep.subr.bf16.mxu0 %v39254_v6 }
 0x81d   : > { %31926 = vmatpush3.bf16.msra.mxu0 %v36005_v8 }
 0x81e   : > { %31927 = vmatprep.subr.bf16.mxu0 %v39254_v6 }
 0x821   : > { %31929 = vmatpush3.bf16.msra.mxu0 %v36013_v20 }
 0x822   : > { %v34393_v25 = vpop.eup %34392  ;;  %31930 = vmatprep.subr.bf16.mxu0 %v39254_v6 }
 0x823   : > { %v10051_v49 = vmul.f32 %v34393_v25, %v9408_v19 }
 0x825   : > { %v10052_v54 = vsub.f32 2.0, %v10051_v49  ;;  %31932 = vmatpush3.bf16.msra.mxu0 %v36023_v13 }
 0x826   : > { %31933 = vmatprep.subr.bf16.mxu0 %v39254_v6 }
 0x827   : > { %v10053_v61 = vmul.f32 %v34393_v25, %v10052_v54 }
 0x829   : > { %31935 = vmatpush3.bf16.msra.mxu0 %v36033_v39  ;;  %v10054_v26 = vmul.f32 %v36823_v15, %v10053_v61 }
 0x82a   : > { %31936 = vmatprep.subr.bf16.mxu0 %v39254_v6 }
 0x82b   : > { %26978 = vst [vmem:[%s36378_s25 + $0x8] sm:$0xff] %v10054_v26 }
 0x82d   : > { %31938 = vmatpush3.bf16.msra.mxu0 %v36043_v18 }
 0x82e   : > { %31939 = vmatprep.subr.bf16.mxu0 %v39254_v6 }
 0x831   : > { %31941 = vmatpush3.bf16.msra.mxu0 %v36055_v62 }
 0x832   : > { %32158 = vmatprep.subr.bf16.mxu0 %v39254_v6 }
 0x834   : > { %29312 = vmatmul.mubr.f32.vlgmr.msra.gmra.mrb[34].mxu0 %v36827_v1 }
 0x835   : > { %32160 = vmatpush3.bf16.msra.mxu0 %v35784_v43  ;;  %29454 = vmatprep.mubr.msk.f32.mxu0 %vm34583_vm1, %v39101_v9 }
 0x836   : > { %32161 = vmatprep.subr.bf16.mxu0 %v39254_v6 }
 0x839   : > { %32163 = vmatpush3.bf16.msra.mxu0 %v35812_v24 }
 0x83a   : > { %32164 = vmatprep.subr.bf16.mxu0 %v39254_v6 }
 0x907   : > { %v10046_v15 = vpop.f32.mrb[34].mxu0 }
 0x908   : > { %v10057_v26 = vmul.f32 %v10053_v61, %v10046_v15  ;;  %v29313_v49 = vpop.f32.mrb[35].mxu0  ;;  %v39367_v61 = vld [vmem:[#allocation95_spill] sm:$0xff]  ;;  %v39368_v15 = vld [vmem:[#allocation96_spill] sm:$0xff] }
 0x909   : > { %v39370_v49 = vld [vmem:[#allocation98_spill] sm:$0xff] }
 0x90a   : > { %v10058_v25 = vadd.f32 %v36821_v2, %v10057_v26  ;;  %v39365_v2 = vld [vmem:[#allocation93_spill] sm:$0xff] }
 0x90b   : > { %v39369_v26 = vld [vmem:[#allocation97_spill] sm:$0xff] }
 0x90c   : > { %v10059_v19 = vmax.f32 %v10058_v25, 0.0  ;;  %v39371_v25 = vld [vmem:[#allocation99_spill] sm:$0xff] }
 0x90e   : > { %v10061_v54 = vsel %vm450_vm0, %v10059_v19, 0  ;;  %v39372_v19 = vld [vmem:[#allocation100_spill] sm:$0xff] }
 0x90f   : > { %v36934_v1 = vand.u32 4294901760, %v10061_v54 }
 0x911   : > { %v10137_v28 = vsub.f32 %v10061_v54, %v36934_v1  ;;  %v39373_v54 = vld [vmem:[#allocation101_spill] sm:$0xff] }
 0x913   : > { %v10138_v48 = vand.u32 4294901760, %v10137_v28 }
 0x915   : > { %v10139_v38 = vsub.f32 %v10137_v28, %v10138_v48 }
 0x917   : > { %v10140_v53 = vand.u32 4294901760, %v10139_v38  ;;  %v39366_v38 = vld [vmem:[#allocation94_spill] sm:$0xff] }
 0x919   : > { %10141 = vmatmul.mubr.f32.vlgmr.msra.gmra.mrb[14].mxu1 %v10140_v53 }
 0x91a   : > { %31953 = vmatpush1.bf16.msra.mxu1 %v36434_v56  ;;  %10251 = vmatprep.mubr.f32.mxu1 %v39101_v9 }
 0x91b   : > { %31955 = vmatprep.subr.bf16.mxu1 %v36437_v34 }
 0x91e   : > { %31957 = vmatpush1.bf16.msra.mxu1 %v36439_v23 }
 0x91f   : > { %31959 = vmatprep.subr.bf16.mxu1 %v36441_v46 }
 0x921   : > { %10253 = vmatmul.mubr.f32.vlgmr.msra.gmra.mrb[14].mxu1 %v36934_v1 }
 0x922   : > { %31961 = vmatpush1.bf16.msra.mxu1 %v36443_v35  ;;  %10339 = vmatprep.mubr.f32.mxu1 %v39101_v9 }
 0x923   : > { %31963 = vmatprep.subr.bf16.mxu1 %v39365_v2 }
 0x926   : > { %31965 = vmatpush1.bf16.msra.mxu1 %v39366_v38 }
 0x927   : > { %31967 = vmatprep.subr.bf16.mxu1 %v36408_v27 }
 0x929   : > { %10342 = vmatmul.mubr.f32.vlgmr.msra.gmra.mrb[14].mxu1 %v10137_v28 }
 0x92a   : > { %31969 = vmatpush1.bf16.msra.mxu1 %v36410_v14  ;;  %10420 = vmatprep.mubr.f32.mxu1 %v39101_v9 }
 0x92b   : > { %31971 = vmatprep.subr.bf16.mxu1 %v36426_v22 }
 0x92e   : > { %31973 = vmatpush1.bf16.msra.mxu1 %v36428_v21 }
 0x92f   : > { %31975 = vmatprep.subr.bf16.mxu1 %v39367_v61 }
 0x931   : > { %10424 = vmatmul.mubr.f32.vlgmr.msra.gmra.mrb[14].mxu1 %v10138_v48 }
 0x932   : > { %31977 = vmatpush1.bf16.msra.mxu1 %v39368_v15  ;;  %10518 = vmatprep.mubr.f32.mxu1 %v39101_v9 }
 0x933   : > { %31979 = vmatprep.subr.bf16.mxu1 %v39369_v26  ;;  %v39375_v26 = vld [vmem:[#allocation103_spill] sm:$0xff] }
 0x936   : > { %31981 = vmatpush1.bf16.msra.mxu1 %v39370_v49  ;;  %v39374_v49 = vld [vmem:[#allocation102_spill] sm:$0xff] }
 0x937   : > { %31983 = vmatprep.subr.bf16.mxu1 %v36408_v27 }
 0x939   : > { %10520 = vmatmul.mubr.f32.vlgmr.msra.gmra.mrb[14].mxu1 %v36934_v1 }
 0x93a   : > { %31985 = vmatpush1.bf16.msra.mxu1 %v36410_v14  ;;  %10598 = vmatprep.mubr.f32.mxu1 %v39101_v9 }
 0x93b   : > { %31987 = vmatprep.subr.bf16.mxu1 %v36426_v22 }
 0x93e   : > { %31989 = vmatpush1.bf16.msra.mxu1 %v36428_v21 }
 0x93f   : > { %31990 = vmatprep.subr.bf16.mxu1 %v39254_v6 }
 0x941   : > { %10600 = vmatmul.mubr.f32.vlgmr.msra.gmra.mrb[14].mxu1 %v36934_v1 }
 0x942   : > { %31992 = vmatpush3.bf16.msra.mxu1 %v39371_v25  ;;  %29322 = vmatprep.mubr.msk.f32.mxu1 %vm34583_vm1, %v39101_v9 }
 0x943   : > { %31993 = vmatprep.subr.bf16.mxu1 %v39254_v6 }
 0x946   : > { %31995 = vmatpush3.bf16.msra.mxu1 %v39372_v19 }
 0x947   : > { %31996 = vmatprep.subr.bf16.mxu1 %v39254_v6 }
 0x949   : > { %29323 = vmatmul.mubr.f32.vlgmr.msra.gmra.mrb[38].mxu1 %v10140_v53  ;;  %v39376_v53 = vld [vmem:[#allocation104_spill] sm:$0xff] }
 0x94a   : > { %31998 = vmatpush3.bf16.msra.mxu1 %v39373_v54  ;;  %29333 = vmatprep.mubr.msk.f32.mxu1 %vm34583_vm1, %v39101_v9 }
 0x94b   : > { %31999 = vmatprep.subr.bf16.mxu1 %v39254_v6 }
 0x94e   : > { %32001 = vmatpush3.bf16.msra.mxu1 %v39374_v49 }
 0x94f   : > { %32002 = vmatprep.subr.bf16.mxu1 %v39254_v6 }
 0x951   : > { %29334 = vmatmul.mubr.f32.vlgmr.msra.gmra.mrb[40].mxu1 %v36934_v1 }
 0x952   : > { %32004 = vmatpush3.bf16.msra.mxu1 %v39375_v26  ;;  %29344 = vmatprep.mubr.msk.f32.mxu1 %vm34583_vm1, %v39101_v9  ;;  %v39377_v26 = vld [vmem:[#allocation105_spill] sm:$0xff] }
 0x953   : > { %32005 = vmatprep.subr.bf16.mxu1 %v39254_v6 }
 0x956   : > { %32007 = vmatpush3.bf16.msra.mxu1 %v39376_v53 }
 0x957   : > { %32008 = vmatprep.subr.bf16.mxu1 %v39254_v6 }
 0x959   : > { %29345 = vmatmul.mubr.f32.vlgmr.msra.gmra.mrb[42].mxu1 %v10137_v28  ;;  %v39378_v28 = vld [vmem:[#allocation106_spill] sm:$0xff] }
 0x95a   : > { %32010 = vmatpush3.bf16.msra.mxu1 %v39371_v25  ;;  %29355 = vmatprep.mubr.msk.f32.mxu1 %vm34583_vm1, %v39101_v9 }
 0x95b   : > { %32011 = vmatprep.subr.bf16.mxu1 %v39254_v6 }
 0x95e   : > { %32013 = vmatpush3.bf16.msra.mxu1 %v39372_v19 }
 0x95f   : > { %32014 = vmatprep.subr.bf16.mxu1 %v39254_v6 }
 0x961   : > { %29356 = vmatmul.mubr.f32.vlgmr.msra.gmra.mrb[44].mxu1 %v10138_v48 }
 0x962   : > { %32016 = vmatpush3.bf16.msra.mxu1 %v39377_v26  ;;  %29366 = vmatprep.mubr.msk.f32.mxu1 %vm34583_vm1, %v39101_v9 }
 0x963   : > { %32017 = vmatprep.subr.bf16.mxu1 %v39254_v6 }
 0x966   : > { %32019 = vmatpush3.bf16.msra.mxu1 %v39378_v28  ;;  %v39379_v28 = vld [vmem:[#allocation55_spill] sm:$0xff] }
 0x967   : > { %32020 = vmatprep.subr.bf16.mxu1 %v39254_v6 }
 0x969   : > { %29367 = vmatmul.mubr.f32.vlgmr.msra.gmra.mrb[46].mxu1 %v36934_v1 }
 0x96a   : > { %32022 = vmatpush3.bf16.msra.mxu1 %v39371_v25  ;;  %29377 = vmatprep.mubr.msk.f32.mxu1 %vm34583_vm1, %v39101_v9 }
 0x96b   : > { %32023 = vmatprep.subr.bf16.mxu1 %v39254_v6 }
 0x96e   : > { %32025 = vmatpush3.bf16.msra.mxu1 %v39372_v19 }
 0x96f   : > { %32026 = vmatprep.subr.bf16.mxu1 %v39254_v6 }
 0x971   : > { %29378 = vmatmul.mubr.f32.vlgmr.msra.gmra.mrb[48].mxu1 %v36934_v1 }
 0x972   : > { %32028 = vmatpush3.bf16.msra.mxu1 %v36581_v7  ;;  %29388 = vmatprep.mubr.msk.f32.mxu1 %vm34583_vm1, %v39101_v9 }
 0x973   : > { %32029 = vmatprep.subr.bf16.mxu1 %v39254_v6 }
 0x976   : > { %32031 = vmatpush3.bf16.msra.mxu1 %v36591_v59 }
 0x977   : > { %32032 = vmatprep.subr.bf16.mxu1 %v39254_v6 }
 0xa14   : > { %v10601_v48 = vpop.f32.mrb[14].mxu1 }
 0xa15   : > { %v33673_v26 = vadd.f32 %v39379_v28, %v10601_v48  ;;  %v10603_v53 = vpop.f32.mrb[15].mxu1 }
 0xa16   : > { %v33675_v35 = vadd.f32 %v36624_v4, %v10603_v53 }
 0xa17   : > { %v26979_v49 = vmul.f32 -1.442695, %v33673_v26 }
 0xa18   : > { %v26980_v48 = vmul.f32 -1.442695, %v33675_v35 }
 0xa19   : > { %34394 = vpow2.f32 %v26979_v49 }
 0xa1c   : > { %v10681_v54 = vpop.f32.mrb[38].mxu1 }
 0xa1d   : > { %v29324_v19 = vpop.f32.mrb[39].mxu1  ;;  %v10682_v25 = vadd.f32 %v10681_v54, %v36617_v30 }
 0xa23   : > { %v34395_v1 = vpop.eup %34394 }
 0xa24   : > { %v11095_v15 = vadd.f32 1.0, %v34395_v1  ;;  %v10772_v61 = vpop.f32.mrb[40].mxu1 }
 0xa25   : > { %v10773_v38 = vadd.f32 %v10772_v61, %v10682_v25  ;;  %v29335_v2 = vpop.f32.mrb[41].mxu1 }
 0xa26   : > { %34396 = vrcp.f32 %v11095_v15 }
 0xa27   : > { %34398 = vpow2.f32 %v26980_v48 }
 0xa2c   : > { %v10852_v46 = vpop.f32.mrb[42].mxu1 }
 0xa2d   : > { %v10853_v23 = vadd.f32 %v10852_v46, %v10773_v38  ;;  %v29346_v34 = vpop.f32.mrb[43].mxu1 }
 0xa30   : > { %v34397_v56 = vpop.eup %34396 }
 0xa31   : > { %v11105_v26 = vmul.f32 %v34397_v56, %v36815_v3  ;;  %v34399_v30 = vpop.eup %34398 }
 0xa32   : > { %v11102_v61 = vadd.f32 1.0, %v34399_v30 }
 0xa34   : > { %v10929_v49 = vpop.f32.mrb[44].mxu1  ;;  %34400 = vrcp.f32 %v11102_v61  ;;  %v39385_v61 = vld [vmem:[#allocation25_spill] sm:$0xff] }
 0xa35   : > { %v10930_v19 = vadd.f32 %v10929_v49, %v10853_v23  ;;  %v29357_v28 = vpop.f32.mrb[45].mxu1  ;;  %v39381_v49 = vld [vmem:[#allocation37_spill] sm:$0xff] }
 0xa3c   : > { %v11012_v58 = vpop.f32.mrb[46].mxu1 }
 0xa3d   : > { %v11013_v54 = vadd.f32 %v11012_v58, %v10930_v19  ;;  %v29368_v1 = vpop.f32.mrb[47].mxu1  ;;  %v39382_v19 = vld [vmem:[#allocation42_spill] sm:$0xff] }
 0xa3e   : > { %v34401_v34 = vpop.eup %34400  ;;  %v39384_v1 = vld [vmem:[#allocation22_spill] sm:$0xff] }
 0xa3f   : > { %v11108_v46 = vsub.f32 1.0, %v34401_v34  ;;  %v11110_v3 = vmul.f32 %v34401_v34, %v36629_v42  ;;  %v39380_v42 = vld [vmem:[#allocation32_spill] sm:$0xff]  ;;  %v39390_v34 = vld [vmem:[#allocation70_spill] sm:$0xff] }
 0xa44   : > { %v11087_v2 = vpop.f32.mrb[48].mxu1 }
 0xa45   : > { %v11088_v15 = vadd.f32 %v11087_v2, %v11013_v54  ;;  %v29379_v25 = vpop.f32.mrb[49].mxu1  ;;  %v39383_v54 = vld [vmem:[#allocation46_spill] sm:$0xff] }
 0xa46   : > { %v39386_v2 = vld [vmem:[#allocation18_spill] sm:$0xff]  ;;  %v39388_v25 = vld [vmem:[#allocation68_spill] sm:$0xff] }
 0xa47   : > { %v11106_v53 = vadd.f32 %v11105_v26, %v11088_v15  ;;  %v39387_v15 = vld [vmem:[#allocation35_spill] sm:$0xff] }
 0xa49   : > { %34402 = vtanh.f32 %v11106_v53  ;;  %v39389_v53 = vld [vmem:[#allocation69_spill] sm:$0xff] }
 0xa53   : > { %v34403_v35 = vpop.eup %34402 }
 0xa54   : > { %v11109_v56 = vmul.f32 %v34403_v35, %v11108_v46  ;;  %v39391_v46 = vld [vmem:[#allocation71_spill] sm:$0xff]  ;;  %v39392_v35 = vld [vmem:[#allocation72_spill] sm:$0xff] }
 0xa56   : > { %v37015_v38 = vadd.f32 %v11110_v3, %v11109_v56  ;;  %v39393_v3 = vld [vmem:[#allocation73_spill] sm:$0xff]  ;;  %v39394_v56 = vld [vmem:[#allocation74_spill] sm:$0xff] }
 0xa58   : > { %v11113_v23 = vsel %vm450_vm0, %v37015_v38, 0 }
 0xa59   : > { %v37019_v58 = vand.u32 4294901760, %v11113_v23 }
 0xa5b   : > { %v37022_v30 = vsub.f32 %v11113_v23, %v37019_v58  ;;  %v39395_v23 = vld [vmem:[#allocation75_spill] sm:$0xff] }
 0xa5d   : > { %v37025_v28 = vand.u32 4294901760, %v37022_v30 }
 0xa5f   : > { %v11187_v48 = vsub.f32 %v37022_v30, %v37025_v28 }
 0xa61   : > { %v37029_v26 = vand.u32 4294901760, %v11187_v48  ;;  %v39396_v48 = vld [vmem:[#allocation76_spill] sm:$0xff] }
 0xa63   : > { %29389 = vmatmul.mubr.f32.vlgmr.msra.gmra.mrb[50].mxu1 %v37029_v26  ;;  %29455 = vmatmul.mubr.f32.vlgmr.msra.gmra.mrb[36].mxu0 %v37029_v26 }
 0xa64   : > { %32034 = vmatpush3.bf16.msra.mxu1 %v36595_v12  ;;  %32166 = vmatpush3.bf16.msra.mxu0 %v39308_v37 }
 0xa65   : > { %32035 = vmatprep.subr.bf16.mxu1 %v39254_v6  ;;  %32167 = vmatprep.subr.bf16.mxu0 %v39254_v6 }
 0xa66   : > { %29399 = vmatprep.mubr.msk.f32.mxu1 %vm34583_vm1, %v39101_v9  ;;  %29465 = vmatprep.mubr.msk.f32.mxu0 %vm34583_vm1, %v39101_v9 }
 0xa68   : > { %32037 = vmatpush3.bf16.msra.mxu1 %v36597_v52  ;;  %32169 = vmatpush3.bf16.msra.mxu0 %v39309_v55 }
 0xa69   : > { %32038 = vmatprep.subr.bf16.mxu1 %v39254_v6  ;;  %32170 = vmatprep.subr.bf16.mxu0 %v39254_v6 }
 0xa6b   : > { %29400 = vmatmul.mubr.f32.vlgmr.msra.gmra.mrb[50].mxu1 %v37019_v58  ;;  %29466 = vmatmul.mubr.f32.vlgmr.msra.gmra.mrb[36].mxu0 %v37019_v58 }
 0xa6c   : > { %32040 = vmatpush3.bf16.msra.mxu1 %v36599_v50  ;;  %32172 = vmatpush3.bf16.msra.mxu0 %v39310_v10 }
 0xa6d   : > { %32041 = vmatprep.subr.bf16.mxu1 %v39254_v6  ;;  %32173 = vmatprep.subr.bf16.mxu0 %v39254_v6 }
 0xa6e   : > { %29410 = vmatprep.mubr.msk.f32.mxu1 %vm34583_vm1, %v39101_v9  ;;  %29476 = vmatprep.mubr.msk.f32.mxu0 %vm34583_vm1, %v39101_v9 }
 0xa70   : > { %32043 = vmatpush3.bf16.msra.mxu1 %v36601_v29  ;;  %32175 = vmatpush3.bf16.msra.mxu0 %v39311_v47 }
 0xa71   : > { %32044 = vmatprep.subr.bf16.mxu1 %v39254_v6  ;;  %32176 = vmatprep.subr.bf16.mxu0 %v39254_v6 }
 0xa73   : > { %29411 = vmatmul.mubr.f32.vlgmr.msra.gmra.mrb[50].mxu1 %v37022_v30  ;;  %29477 = vmatmul.mubr.f32.vlgmr.msra.gmra.mrb[36].mxu0 %v37022_v30 }
 0xa74   : > { %32046 = vmatpush3.bf16.msra.mxu1 %v36581_v7  ;;  %32178 = vmatpush3.bf16.msra.mxu0 %v35784_v43 }
 0xa75   : > { %32047 = vmatprep.subr.bf16.mxu1 %v39254_v6  ;;  %32179 = vmatprep.subr.bf16.mxu0 %v39254_v6 }
 0xa76   : > { %29421 = vmatprep.mubr.msk.f32.mxu1 %vm34583_vm1, %v39101_v9  ;;  %29487 = vmatprep.mubr.msk.f32.mxu0 %vm34583_vm1, %v39101_v9 }
 0xa78   : > { %32049 = vmatpush3.bf16.msra.mxu1 %v36591_v59  ;;  %32181 = vmatpush3.bf16.msra.mxu0 %v35812_v24 }
 0xa79   : > { %32050 = vmatprep.subr.bf16.mxu1 %v39254_v6  ;;  %32182 = vmatprep.subr.bf16.mxu0 %v39254_v6 }
 0xa7b   : > { %29422 = vmatmul.mubr.f32.vlgmr.msra.gmra.mrb[50].mxu1 %v37025_v28  ;;  %29488 = vmatmul.mubr.f32.vlgmr.msra.gmra.mrb[36].mxu0 %v37025_v28 }
 0xa7c   : > { %32052 = vmatpush3.bf16.msra.mxu1 %v36603_v45  ;;  %32184 = vmatpush3.bf16.msra.mxu0 %v39312_v40 }
 0xa7d   : > { %32053 = vmatprep.subr.bf16.mxu1 %v39254_v6  ;;  %32185 = vmatprep.subr.bf16.mxu0 %v39254_v6 }
 0xa7e   : > { %29432 = vmatprep.mubr.msk.f32.mxu1 %vm34583_vm1, %v39101_v9  ;;  %29498 = vmatprep.mubr.msk.f32.mxu0 %vm34583_vm1, %v39101_v9 }
 0xa80   : > { %32055 = vmatpush3.bf16.msra.mxu1 %v36605_v31  ;;  %32187 = vmatpush3.bf16.msra.mxu0 %v39313_v44 }
 0xa81   : > { %32056 = vmatprep.subr.bf16.mxu1 %v39254_v6  ;;  %32188 = vmatprep.subr.bf16.mxu0 %v39254_v6 }
 0xa83   : > { %29433 = vmatmul.mubr.f32.vlgmr.msra.gmra.mrb[50].mxu1 %v37019_v58  ;;  %29499 = vmatmul.mubr.f32.vlgmr.msra.gmra.mrb[36].mxu0 %v37019_v58 }
 0xa84   : > { %32058 = vmatpush3.bf16.msra.mxu1 %v36581_v7  ;;  %32190 = vmatpush3.bf16.msra.mxu0 %v35784_v43 }
 0xa85   : > { %32059 = vmatprep.subr.bf16.mxu1 %v39254_v6  ;;  %32191 = vmatprep.subr.bf16.mxu0 %v39254_v6 }
 0xa86   : > { %29443 = vmatprep.mubr.msk.f32.mxu1 %vm34583_vm1, %v39101_v9  ;;  %29509 = vmatprep.mubr.msk.f32.mxu0 %vm34583_vm1, %v39101_v9 }
 0xa88   : > { %32061 = vmatpush3.bf16.msra.mxu1 %v36591_v59  ;;  %32193 = vmatpush3.bf16.msra.mxu0 %v35812_v24 }
 0xa89   : > { %32063 = vmatprep.subr.bf16.mxu1 %v39314_v17  ;;  %32194 = vmatprep.subr.bf16.mxu0 %v39254_v6 }
 0xa8b   : > { %29444 = vmatmul.mubr.f32.vlgmr.msra.gmra.mrb[50].mxu1 %v37019_v58  ;;  %29510 = vmatmul.mubr.f32.vlgmr.msra.gmra.mrb[36].mxu0 %v37019_v58 }
 0xa8c   : > { %32065 = vmatpush1.bf16.msra.mxu1 %v39315_v16  ;;  %32196 = vmatpush3.bf16.msra.mxu0 %v35987_v41 }
 0xa8d   : > { %32067 = vmatprep.subr.bf16.mxu1 %v39316_v51  ;;  %32197 = vmatprep.subr.bf16.mxu0 %v39254_v6 }
 0xa8e   : > { %11690 = vmatprep.mubr.f32.mxu1 %v39101_v9  ;;  %29544 = vmatprep.mubr.msk.f32.mxu0 %vm34583_vm1, %v39101_v9 }
 0xa90   : > { %32069 = vmatpush1.bf16.msra.mxu1 %v39317_v32  ;;  %32199 = vmatpush3.bf16.msra.mxu0 %v35995_v63 }
 0xa91   : > { %32071 = vmatprep.subr.bf16.mxu1 %v39318_v33  ;;  %32200 = vmatprep.subr.bf16.mxu0 %v39254_v6 }
 0xa93   : > { %11696 = vmatmul.mubr.f32.vlgmr.msra.gmra.mrb[10].mxu1 %v37029_v26 }
 0xa94   : > { %32073 = vmatpush1.bf16.msra.mxu1 %v39380_v42  ;;  %32202 = vmatpush3.bf16.msra.mxu0 %v36005_v8 }
 0xa95   : > { %32075 = vmatprep.subr.bf16.mxu1 %v39381_v49  ;;  %32203 = vmatprep.subr.bf16.mxu0 %v39254_v6 }
 0xa96   : > { %11806 = vmatprep.mubr.f32.mxu1 %v39101_v9 }
 0xa98   : > { %32077 = vmatpush1.bf16.msra.mxu1 %v39321_v57  ;;  %32205 = vmatpush3.bf16.msra.mxu0 %v36013_v20 }
 0xa99   : > { %32079 = vmatprep.subr.bf16.mxu1 %v39382_v19  ;;  %32206 = vmatprep.subr.bf16.mxu0 %v39254_v6 }
 0xa9b   : > { %11808 = vmatmul.mubr.f32.vlgmr.msra.gmra.mrb[10].mxu1 %v37019_v58 }
 0xa9c   : > { %32081 = vmatpush1.bf16.msra.mxu1 %v39383_v54  ;;  %32208 = vmatpush3.bf16.msra.mxu0 %v36023_v13 }
 0xa9d   : > { %32083 = vmatprep.subr.bf16.mxu1 %v39384_v1  ;;  %32209 = vmatprep.subr.bf16.mxu0 %v39254_v6 }
 0xa9e   : > { %11894 = vmatprep.mubr.f32.mxu1 %v39101_v9 }
 0xaa0   : > { %32085 = vmatpush1.bf16.msra.mxu1 %v39385_v61  ;;  %32211 = vmatpush3.bf16.msra.mxu0 %v36033_v39 }
 0xaa1   : > { %32087 = vmatprep.subr.bf16.mxu1 %v39314_v17  ;;  %32212 = vmatprep.subr.bf16.mxu0 %v39254_v6 }
 0xaa3   : > { %11897 = vmatmul.mubr.f32.vlgmr.msra.gmra.mrb[10].mxu1 %v37022_v30 }
 0xaa4   : > { %32089 = vmatpush1.bf16.msra.mxu1 %v39315_v16  ;;  %32214 = vmatpush3.bf16.msra.mxu0 %v36043_v18 }
 0xaa5   : > { %32091 = vmatprep.subr.bf16.mxu1 %v39316_v51  ;;  %32215 = vmatprep.subr.bf16.mxu0 %v39254_v6 }
 0xaa6   : > { %11975 = vmatprep.mubr.f32.mxu1 %v39101_v9 }
 0xaa8   : > { %32093 = vmatpush1.bf16.msra.mxu1 %v39317_v32  ;;  %32217 = vmatpush3.bf16.msra.mxu0 %v36055_v62 }
 0xaa9   : > { %32095 = vmatprep.subr.bf16.mxu1 %v39326_v0  ;;  %32218 = vmatprep.subr.bf16.mxu0 %v39254_v6 }
 0xaab   : > { %11979 = vmatmul.mubr.f32.vlgmr.msra.gmra.mrb[10].mxu1 %v37025_v28 }
 0xaac   : > { %32097 = vmatpush1.bf16.msra.mxu1 %v39327_v5  ;;  %12073 = vmatprep.mubr.f32.mxu1 %v39101_v9 }
 0xaad   : > { %32099 = vmatprep.subr.bf16.mxu1 %v39386_v2  ;;  %v39398_v2 = vld [vmem:[#allocation78_spill] sm:$0xff] }
 0xab0   : > { %32101 = vmatpush1.bf16.msra.mxu1 %v39387_v15  ;;  %v39397_v15 = vld [vmem:[#allocation77_spill] sm:$0xff] }
 0xab1   : > { %32103 = vmatprep.subr.bf16.mxu1 %v39314_v17 }
 0xab3   : > { %12075 = vmatmul.mubr.f32.vlgmr.msra.gmra.mrb[10].mxu1 %v37019_v58 }
 0xab4   : > { %32105 = vmatpush1.bf16.msra.mxu1 %v39315_v16  ;;  %12153 = vmatprep.mubr.f32.mxu1 %v39101_v9 }
 0xab5   : > { %32107 = vmatprep.subr.bf16.mxu1 %v39316_v51 }
 0xab8   : > { %32109 = vmatpush1.bf16.msra.mxu1 %v39317_v32 }
 0xab9   : > { %32111 = vmatprep.subr.bf16.mxu1 %v39388_v25 }
 0xabb   : > { %12155 = vmatmul.mubr.f32.vlgmr.msra.gmra.mrb[10].mxu1 %v37019_v58 }
 0xabc   : > { %32113 = vmatpush1.bf16.msra.mxu1 %v39389_v53  ;;  %12233 = vmatprep.mubr.f32.mxu1 %v39101_v9 }
 0xabd   : > { %32115 = vmatprep.subr.bf16.mxu1 %v39390_v34 }
 0xac0   : > { %32117 = vmatpush1.bf16.msra.mxu1 %v39391_v46 }
 0xac1   : > { %32119 = vmatprep.subr.bf16.mxu1 %v39392_v35  ;;  %v39399_v35 = vld [vmem:[#allocation79_spill] sm:$0xff] }
 0xac3   : > { %12239 = vmatmul.mubr.f32.vlgmr.msra.gmra.mrb[16].mxu1 %v37029_v26  ;;  %v39400_v26 = vld [vmem:[#allocation80_spill] sm:$0xff] }
 0xac4   : > { %32121 = vmatpush1.bf16.msra.mxu1 %v39393_v3  ;;  %12349 = vmatprep.mubr.f32.mxu1 %v39101_v9 }
 0xac5   : > { %32123 = vmatprep.subr.bf16.mxu1 %v39394_v56  ;;  %v39408_v56 = vld [vmem:[#allocation61_spill] sm:$0xff] }
 0xac6   : > { %v1803_v3 = vadd.f32 %v39408_v56, %v39339_v36  ;;  %v39419_v36 = vld [vmem:[#allocation14_spill] sm:$0xff] }
 0xac8   : > { %32125 = vmatpush1.bf16.msra.mxu1 %v39395_v23 }
 0xac9   : > { %32127 = vmatprep.subr.bf16.mxu1 %v39396_v48 }
 0xacb   : > { %12351 = vmatmul.mubr.f32.vlgmr.msra.gmra.mrb[16].mxu1 %v37019_v58 }
 0xacc   : > { %32129 = vmatpush1.bf16.msra.mxu1 %v39397_v15  ;;  %12437 = vmatprep.mubr.f32.mxu1 %v39101_v9  ;;  %v39401_v15 = vld [vmem:[#allocation81_spill] sm:$0xff] }
 0xacd   : > { %32131 = vmatprep.subr.bf16.mxu1 %v39398_v2  ;;  %v39403_v2 = vld [vmem:[#allocation83_spill] sm:$0xff] }
 0xad0   : > { %32133 = vmatpush1.bf16.msra.mxu1 %v39399_v35  ;;  %v39402_v35 = vld [vmem:[#allocation82_spill] sm:$0xff] }
 0xad1   : > { %32135 = vmatprep.subr.bf16.mxu1 %v39388_v25 }
 0xad3   : > { %12440 = vmatmul.mubr.f32.vlgmr.msra.gmra.mrb[16].mxu1 %v37022_v30  ;;  %v39404_v30 = vld [vmem:[#allocation87_spill] sm:$0xff] }
 0xad4   : > { %32137 = vmatpush1.bf16.msra.mxu1 %v39389_v53  ;;  %12518 = vmatprep.mubr.f32.mxu1 %v39101_v9 }
 0xad5   : > { %32139 = vmatprep.subr.bf16.mxu1 %v39390_v34 }
 0xad8   : > { %32141 = vmatpush1.bf16.msra.mxu1 %v39391_v46 }
 0xad9   : > { %32143 = vmatprep.subr.bf16.mxu1 %v39400_v26 }
 0xadb   : > { %12522 = vmatmul.mubr.f32.vlgmr.msra.gmra.mrb[16].mxu1 %v37025_v28 }
 0xadc   : > { %32145 = vmatpush1.bf16.msra.mxu1 %v39401_v15  ;;  %12616 = vmatprep.mubr.f32.mxu1 %v39101_v9 }
 0xadd   : > { %32147 = vmatprep.subr.bf16.mxu1 %v39402_v35  ;;  %v39406_v35 = vld [vmem:[#allocation64_spill] sm:$0xff] }
 0xae0   : > { %32149 = vmatpush1.bf16.msra.mxu1 %v39403_v2 }
 0xae1   : > { %32151 = vmatprep.subr.bf16.mxu1 %v39388_v25 }
 0xae3   : > { %12618 = vmatmul.mubr.f32.vlgmr.msra.gmra.mrb[16].mxu1 %v37019_v58 }
 0xae4   : > { %32153 = vmatpush1.bf16.msra.mxu1 %v39389_v53  ;;  %12696 = vmatprep.mubr.f32.mxu1 %v39101_v9 }
 0xae5   : > { %32155 = vmatprep.subr.bf16.mxu1 %v39390_v34 }
 0xae8   : > { %32157 = vmatpush1.bf16.msra.mxu1 %v39391_v46 }
 0xae9   : > { %32339 = vmatprep.subr.bf16.mxu1 %v36408_v27 }
 0xaeb   : > { %12698 = vmatmul.mubr.f32.vlgmr.msra.gmra.mrb[16].mxu1 %v37019_v58  ;;  %v39407_v58 = vld [vmem:[#allocation60_spill] sm:$0xff] }
 0xaec   : > { %32341 = vmatpush1.bf16.msra.mxu1 %v36410_v14  ;;  %13927 = vmatprep.mubr.f32.mxu1 %v39101_v9  ;;  %v1801_v23 = vadd.f32 %v39407_v58, %v39337_v11  ;;  %v39416_v58 = vld [vmem:[#allocation23_spill] sm:$0xff] }
 0xaed   : > { %32343 = vmatprep.subr.bf16.mxu1 %v36426_v22 }
 0xaf0   : > { %32345 = vmatpush1.bf16.msra.mxu1 %v36428_v21 }
 0xaf1   : > { %32347 = vmatprep.subr.bf16.mxu1 %v39404_v30 }
 0xb5e   : > { %v37198_v28 = vpop.f32.mrb[50].mxu1  ;;  %v13185_v2 = vpop.f32.mrb[36].mxu0 }
 0xb5f   : > { %39405 = vst [vmem:[#allocation30_spill] sm:$0xff] %v37198_v28  ;;  %v37201_v15 = vadd.f32 %v39406_v35, %v13185_v2  ;;  %v29445_v26 = vpop.f32.mrb[51].mxu1  ;;  %v29511_v48 = vpop.f32.mrb[37].mxu0 }
 0xb60   : > { %v39413_v26 = vld [vmem:[#allocation49_spill] sm:$0xff] }
 0xb8e   : > { %v12156_v46 = vpop.f32.mrb[10].mxu1 }
 0xb8f   : > { %v33659_v34 = vadd.f32 %v12156_v46, %v1801_v23  ;;  %v12158_v53 = vpop.f32.mrb[11].mxu1 }
 0xb90   : > { %v37207_v25 = vadd.f32 %v12158_v53, %v1803_v3  ;;  %v39410_v53 = vld [vmem:[#allocation26_spill] sm:$0xff]  ;;  %v39412_v3 = vld [vmem:[#allocation47_spill] sm:$0xff] }
 0xb91   : > { %13194 = vmax.xlane.f32.xlu0 %v33659_v34 }
 0xc1e   : > { %v13195_v30 = vpop.xlane.xlu0 %13194 }
 0xc1f   : > { %v13196_v28 = vsub.f32 %v33659_v34, %v13195_v30  ;;  %v39411_v34 = vld [vmem:[#allocation16_spill] sm:$0xff] }
 0xc20   : > { %v39414_v30 = vld [vmem:[#allocation52_spill] sm:$0xff] }
 0xc21   : > { %v13197_v5 = vmul.f32 1.442695, %v13196_v28  ;;  %v39415_v28 = vld [vmem:[#allocation54_spill] sm:$0xff] }
 0xc23   : > { %34404 = vpow2.f32 %v13197_v5  ;;  %v39409_v5 = vld [vmem:[#allocation10_spill] sm:$0xff] }
 0xc2d   : > { %v37209_v2 = vpop.eup %34404 }
 0xc2e   : > { %13199 = vadd.xlane.f32.xlu1 %v37209_v2  ;;  %v37213_v35 = vand.u32 4294901760, %v37209_v2 }
 0xc30   : > { %v13283_v56 = vsub.f32 %v37209_v2, %v37213_v35 }
 0xc32   : > { %v13284_v48 = vand.u32 4294901760, %v13283_v56 }
 0xc34   : > { %v13285_v46 = vsub.f32 %v13283_v56, %v13284_v48 }
 0xc36   : > { %v13286_v23 = vand.u32 4294901760, %v13285_v46  ;;  %v39417_v46 = vld [vmem:[#allocation41_spill] sm:$0xff] }
 0xc38   : > { %29545 = vmatmul.mubr.f32.vlgmr.msra.gmra.mrb[38].mxu0 %v13286_v23  ;;  %v39418_v23 = vld [vmem:[#allocation45_spill] sm:$0xff] }
 0xc39   : > { %32220 = vmatpush3.bf16.msra.mxu0 %v39341_v60  ;;  %29579 = vmatprep.mubr.msk.f32.mxu0 %vm34583_vm1, %v39101_v9 }
 0xc3a   : > { %32221 = vmatprep.subr.bf16.mxu0 %v39254_v6 }
 0xc3d   : > { %32223 = vmatpush3.bf16.msra.mxu0 %v39409_v5 }
 0xc3e   : > { %32224 = vmatprep.subr.bf16.mxu0 %v39254_v6 }
 0xc41   : > { %32226 = vmatpush3.bf16.msra.mxu0 %v39410_v53  ;;  %v39433_v53 = vld [vmem:[#allocation89_spill] sm:$0xff] }
 0xc42   : > { %32227 = vmatprep.subr.bf16.mxu0 %v39254_v6 }
 0xc45   : > { %32229 = vmatpush3.bf16.msra.mxu0 %v39411_v34  ;;  %v39432_v34 = vld [vmem:[#allocation88_spill] sm:$0xff] }
 0xc46   : > { %32230 = vmatprep.subr.bf16.mxu0 %v39254_v6 }
 0xc49   : > { %32232 = vmatpush3.bf16.msra.mxu0 %v39412_v3 }
 0xc4a   : > { %32233 = vmatprep.subr.bf16.mxu0 %v39254_v6 }
 0xc4d   : > { %32235 = vmatpush3.bf16.msra.mxu0 %v39413_v26 }
 0xc4e   : > { %32236 = vmatprep.subr.bf16.mxu0 %v39254_v6 }
 0xc51   : > { %32238 = vmatpush3.bf16.msra.mxu0 %v39414_v30  ;;  %v39422_v30 = vld [vmem:[#allocation48_spill] sm:$0xff] }
 0xc52   : > { %32239 = vmatprep.subr.bf16.mxu0 %v39254_v6 }
 0xc55   : > { %32241 = vmatpush3.bf16.msra.mxu0 %v39415_v28  ;;  %v39420_v28 = vld [vmem:[#allocation13_spill] sm:$0xff] }
 0xc56   : > { %32242 = vmatprep.subr.bf16.mxu0 %v39254_v6 }
 0xc58   : > { %29580 = vmatmul.mubr.f32.vlgmr.msra.gmra.mrb[38].mxu0 %v37213_v35 }
 0xc59   : > { %32244 = vmatpush3.bf16.msra.mxu0 %v39416_v58  ;;  %29614 = vmatprep.mubr.msk.f32.mxu0 %vm34583_vm1, %v39101_v9  ;;  %v39421_v58 = vld [vmem:[#allocation20_spill] sm:$0xff] }
 0xc5a   : > { %32245 = vmatprep.subr.bf16.mxu0 %v39254_v6 }
 0xc5d   : > { %32247 = vmatpush3.bf16.msra.mxu0 %v39417_v46  ;;  %v39423_v46 = vld [vmem:[#allocation51_spill] sm:$0xff] }
 0xc5e   : > { %32248 = vmatprep.subr.bf16.mxu0 %v39254_v6 }
 0xc61   : > { %32250 = vmatpush3.bf16.msra.mxu0 %v39418_v23 }
 0xc62   : > { %32251 = vmatprep.subr.bf16.mxu0 %v39254_v6 }
 0xc65   : > { %32253 = vmatpush3.bf16.msra.mxu0 %v39419_v36 }
 0xc66   : > { %32254 = vmatprep.subr.bf16.mxu0 %v39254_v6 }
 0xc69   : > { %32256 = vmatpush3.bf16.msra.mxu0 %v39420_v28  ;;  %v39430_v28 = vld [vmem:[#allocation50_spill] sm:$0xff] }
 0xc6a   : > { %32257 = vmatprep.subr.bf16.mxu0 %v39254_v6 }
 0xc6d   : > { %32259 = vmatpush3.bf16.msra.mxu0 %v39421_v58  ;;  %v39427_v58 = vld [vmem:[#allocation19_spill] sm:$0xff] }
 0xc6e   : > { %32260 = vmatprep.subr.bf16.mxu0 %v39254_v6 }
 0xc71   : > { %32262 = vmatpush3.bf16.msra.mxu0 %v39422_v30  ;;  %v39426_v30 = vld [vmem:[#allocation12_spill] sm:$0xff] }
 0xc72   : > { %32263 = vmatprep.subr.bf16.mxu0 %v39254_v6 }
 0xc75   : > { %32265 = vmatpush3.bf16.msra.mxu0 %v39423_v46  ;;  %v39425_v46 = vld [vmem:[#allocation44_spill] sm:$0xff] }
 0xc76   : > { %32266 = vmatprep.subr.bf16.mxu0 %v39254_v6 }
 0xc78   : > { %29615 = vmatmul.mubr.f32.vlgmr.msra.gmra.mrb[38].mxu0 %v13283_v56  ;;  %v39424_v56 = vld [vmem:[#allocation40_spill] sm:$0xff] }
 0xc79   : > { %32268 = vmatpush3.bf16.msra.mxu0 %v35987_v41  ;;  %29649 = vmatprep.mubr.msk.f32.mxu0 %vm34583_vm1, %v39101_v9 }
 0xc7a   : > { %32269 = vmatprep.subr.bf16.mxu0 %v39254_v6 }
 0xc7d   : > { %32271 = vmatpush3.bf16.msra.mxu0 %v35995_v63 }
 0xc7e   : > { %32272 = vmatprep.subr.bf16.mxu0 %v39254_v6 }
 0xc81   : > { %32274 = vmatpush3.bf16.msra.mxu0 %v36005_v8 }
 0xc82   : > { %32275 = vmatprep.subr.bf16.mxu0 %v39254_v6 }
 0xc85   : > { %32277 = vmatpush3.bf16.msra.mxu0 %v36013_v20 }
 0xc86   : > { %32278 = vmatprep.subr.bf16.mxu0 %v39254_v6 }
 0xc89   : > { %32280 = vmatpush3.bf16.msra.mxu0 %v36023_v13 }
 0xc8a   : > { %32281 = vmatprep.subr.bf16.mxu0 %v39254_v6 }
 0xc8d   : > { %32283 = vmatpush3.bf16.msra.mxu0 %v36033_v39 }
 0xc8e   : > { %32284 = vmatprep.subr.bf16.mxu0 %v39254_v6 }
 0xc91   : > { %32286 = vmatpush3.bf16.msra.mxu0 %v36043_v18 }
 0xc92   : > { %32287 = vmatprep.subr.bf16.mxu0 %v39254_v6 }
 0xc95   : > { %32289 = vmatpush3.bf16.msra.mxu0 %v36055_v62 }
 0xc96   : > { %32290 = vmatprep.subr.bf16.mxu0 %v39254_v6 }
 0xc98   : > { %29650 = vmatmul.mubr.f32.vlgmr.msra.gmra.mrb[38].mxu0 %v13284_v48  ;;  %v39428_v48 = vld [vmem:[#allocation15_spill] sm:$0xff] }
 0xc99   : > { %32292 = vmatpush3.bf16.msra.mxu0 %v39424_v56  ;;  %29684 = vmatprep.mubr.msk.f32.mxu0 %vm34583_vm1, %v39101_v9  ;;  %v39429_v56 = vld [vmem:[#allocation29_spill] sm:$0xff] }
 0xc9a   : > { %32293 = vmatprep.subr.bf16.mxu0 %v39254_v6 }
 0xc9d   : > { %32295 = vmatpush3.bf16.msra.mxu0 %v39425_v46  ;;  %v39431_v46 = vld [vmem:[#allocation53_spill] sm:$0xff] }
 0xc9e   : > { %32296 = vmatprep.subr.bf16.mxu0 %v39254_v6 }
 0xca1   : > { %32298 = vmatpush3.bf16.msra.mxu0 %v39426_v30 }
 0xca2   : > { %32299 = vmatprep.subr.bf16.mxu0 %v39254_v6 }
 0xca5   : > { %32301 = vmatpush3.bf16.msra.mxu0 %v39427_v58 }
 0xca6   : > { %32302 = vmatprep.subr.bf16.mxu0 %v39254_v6 }
 0xca9   : > { %32304 = vmatpush3.bf16.msra.mxu0 %v39428_v48 }
 0xcaa   : > { %32305 = vmatprep.subr.bf16.mxu0 %v39254_v6 }
 0xcad   : > { %32307 = vmatpush3.bf16.msra.mxu0 %v39429_v56 }
 0xcae   : > { %32308 = vmatprep.subr.bf16.mxu0 %v39254_v6 }
 0xcb1   : > { %32310 = vmatpush3.bf16.msra.mxu0 %v39430_v28 }
 0xcb2   : > { %32311 = vmatprep.subr.bf16.mxu0 %v39254_v6 }
 0xcb5   : > { %32313 = vmatpush3.bf16.msra.mxu0 %v39431_v46 }
 0xcb6   : > { %32314 = vmatprep.subr.bf16.mxu0 %v39254_v6 }
 0xcb8   : > { %29685 = vmatmul.mubr.f32.vlgmr.msra.gmra.mrb[38].mxu0 %v37213_v35 }
 0xcb9   : > { %32316 = vmatpush3.bf16.msra.mxu0 %v35987_v41  ;;  %29719 = vmatprep.mubr.msk.f32.mxu0 %vm34583_vm1, %v39101_v9 }
 0xcba   : > { %32317 = vmatprep.subr.bf16.mxu0 %v39254_v6 }
 0xcbb   : > { %v13200_v56 = vpop.xlane.xlu1 %13199 }
 0xcbc   : > { %34406 = vrcp.f32 %v13200_v56 }
 0xcbd   : > { %32319 = vmatpush3.bf16.msra.mxu0 %v35995_v63 }
 0xcbe   : > { %32320 = vmatprep.subr.bf16.mxu0 %v39254_v6 }
 0xcc1   : > { %32322 = vmatpush3.bf16.msra.mxu0 %v36005_v8 }
 0xcc2   : > { %32323 = vmatprep.subr.bf16.mxu0 %v39254_v6 }
 0xcc5   : > { %32325 = vmatpush3.bf16.msra.mxu0 %v36013_v20 }
 0xcc6   : > { %v34407_v46 = vpop.eup %34406  ;;  %32326 = vmatprep.subr.bf16.mxu0 %v39254_v6 }
 0xcc7   : > { %v13843_v28 = vmul.f32 %v34407_v46, %v13200_v56 }
 0xcc9   : > { %v13844_v48 = vsub.f32 2.0, %v13843_v28  ;;  %32328 = vmatpush3.bf16.msra.mxu0 %v36023_v13 }
 0xcca   : > { %32329 = vmatprep.subr.bf16.mxu0 %v39254_v6 }
 0xccb   : > { %v13845_v58 = vmul.f32 %v34407_v46, %v13844_v48 }
 0xccd   : > { %32331 = vmatpush3.bf16.msra.mxu0 %v36033_v39  ;;  %v13846_v30 = vmul.f32 %v37209_v2, %v13845_v58 }
 0xcce   : > { %32332 = vmatprep.subr.bf16.mxu0 %v39254_v6 }
 0xccf   : > { %26982 = vst [vmem:[%s36378_s25 + $0x10] sm:$0xff] %v13846_v30 }
 0xcd1   : > { %32334 = vmatpush3.bf16.msra.mxu0 %v36043_v18 }
 0xcd2   : > { %32335 = vmatprep.subr.bf16.mxu0 %v39254_v6 }
 0xcd5   : > { %32337 = vmatpush3.bf16.msra.mxu0 %v36055_v62 }
 0xcd6   : > { %32554 = vmatprep.subr.bf16.mxu0 %v39254_v6 }
 0xcd8   : > { %29720 = vmatmul.mubr.f32.vlgmr.msra.gmra.mrb[38].mxu0 %v37213_v35 }
 0xcd9   : > { %32556 = vmatpush3.bf16.msra.mxu0 %v35784_v43  ;;  %29862 = vmatprep.mubr.msk.f32.mxu0 %vm34583_vm1, %v39101_v9 }
 0xcda   : > { %32557 = vmatprep.subr.bf16.mxu0 %v39254_v6 }
 0xcdd   : > { %32559 = vmatpush3.bf16.msra.mxu0 %v35812_v24 }
 0xcde   : > { %32560 = vmatprep.subr.bf16.mxu0 %v39254_v6 }
 0xdab   : > { %v13838_v2 = vpop.f32.mrb[38].mxu0 }
 0xdac   : > { %v13849_v30 = vmul.f32 %v13845_v58, %v13838_v2  ;;  %v29721_v28 = vpop.f32.mrb[39].mxu0  ;;  %v39434_v58 = vld [vmem:[#allocation90_spill] sm:$0xff]  ;;  %v39436_v2 = vld [vmem:[#allocation92_spill] sm:$0xff] }
 0xdad   : > { %v39439_v28 = vld [vmem:[#allocation95_spill] sm:$0xff] }
 0xdae   : > { %v13850_v46 = vadd.f32 %v37207_v25, %v13849_v30  ;;  %v39435_v25 = vld [vmem:[#allocation91_spill] sm:$0xff]  ;;  %v39437_v30 = vld [vmem:[#allocation93_spill] sm:$0xff] }
 0xdb0   : > { %v13851_v56 = vmax.f32 %v13850_v46, 0.0  ;;  %v39440_v46 = vld [vmem:[#allocation96_spill] sm:$0xff] }
 0xdb2   : > { %v13853_v48 = vsel %vm450_vm0, %v13851_v56, 0  ;;  %v39441_v56 = vld [vmem:[#allocation97_spill] sm:$0xff] }
 0xdb3   : > { %v37320_v35 = vand.u32 4294901760, %v13853_v48 }
 0xdb5   : > { %v13929_v36 = vsub.f32 %v13853_v48, %v37320_v35  ;;  %v39442_v48 = vld [vmem:[#allocation98_spill] sm:$0xff] }
 0xdb7   : > { %v13930_v23 = vand.u32 4294901760, %v13929_v36 }
 0xdb9   : > { %v13931_v26 = vsub.f32 %v13929_v36, %v13930_v23 }
 0xdbb   : > { %v13932_v3 = vand.u32 4294901760, %v13931_v26  ;;  %v39438_v26 = vld [vmem:[#allocation94_spill] sm:$0xff] }
 0xdbd   : > { %13933 = vmatmul.mubr.f32.vlgmr.msra.gmra.mrb[16].mxu1 %v13932_v3 }
 0xdbe   : > { %32349 = vmatpush1.bf16.msra.mxu1 %v39432_v34  ;;  %14043 = vmatprep.mubr.f32.mxu1 %v39101_v9 }
 0xdbf   : > { %32351 = vmatprep.subr.bf16.mxu1 %v39433_v53 }
 0xdc2   : > { %32353 = vmatpush1.bf16.msra.mxu1 %v39434_v58 }
 0xdc3   : > { %32355 = vmatprep.subr.bf16.mxu1 %v39435_v25 }
 0xdc5   : > { %14045 = vmatmul.mubr.f32.vlgmr.msra.gmra.mrb[16].mxu1 %v37320_v35 }
 0xdc6   : > { %32357 = vmatpush1.bf16.msra.mxu1 %v39436_v2  ;;  %14131 = vmatprep.mubr.f32.mxu1 %v39101_v9 }
 0xdc7   : > { %32359 = vmatprep.subr.bf16.mxu1 %v39437_v30 }
 0xdca   : > { %32361 = vmatpush1.bf16.msra.mxu1 %v39438_v26  ;;  %v39447_v26 = vld [vmem:[#allocation103_spill] sm:$0xff] }
 0xdcb   : > { %32363 = vmatprep.subr.bf16.mxu1 %v36408_v27 }
 0xdcd   : > { %14134 = vmatmul.mubr.f32.vlgmr.msra.gmra.mrb[16].mxu1 %v13929_v36 }
 0xdce   : > { %32365 = vmatpush1.bf16.msra.mxu1 %v36410_v14  ;;  %14212 = vmatprep.mubr.f32.mxu1 %v39101_v9 }
 0xdcf   : > { %32367 = vmatprep.subr.bf16.mxu1 %v36426_v22 }
 0xdd2   : > { %32369 = vmatpush1.bf16.msra.mxu1 %v36428_v21 }
 0xdd3   : > { %32371 = vmatprep.subr.bf16.mxu1 %v39439_v28  ;;  %v39446_v28 = vld [vmem:[#allocation102_spill] sm:$0xff] }
 0xdd5   : > { %14216 = vmatmul.mubr.f32.vlgmr.msra.gmra.mrb[16].mxu1 %v13930_v23 }
 0xdd6   : > { %32373 = vmatpush1.bf16.msra.mxu1 %v39440_v46  ;;  %14310 = vmatprep.mubr.f32.mxu1 %v39101_v9  ;;  %v39443_v46 = vld [vmem:[#allocation99_spill] sm:$0xff] }
 0xdd7   : > { %32375 = vmatprep.subr.bf16.mxu1 %v39441_v56  ;;  %v39445_v56 = vld [vmem:[#allocation101_spill] sm:$0xff] }
 0xdda   : > { %32377 = vmatpush1.bf16.msra.mxu1 %v39442_v48  ;;  %v39444_v48 = vld [vmem:[#allocation100_spill] sm:$0xff] }
 0xddb   : > { %32379 = vmatprep.subr.bf16.mxu1 %v36408_v27 }
 0xddd   : > { %14312 = vmatmul.mubr.f32.vlgmr.msra.gmra.mrb[16].mxu1 %v37320_v35 }
 0xdde   : > { %32381 = vmatpush1.bf16.msra.mxu1 %v36410_v14  ;;  %14390 = vmatprep.mubr.f32.mxu1 %v39101_v9 }
 0xddf   : > { %32383 = vmatprep.subr.bf16.mxu1 %v36426_v22 }
 0xde2   : > { %32385 = vmatpush1.bf16.msra.mxu1 %v36428_v21 }
 0xde3   : > { %32386 = vmatprep.subr.bf16.mxu1 %v39254_v6 }
 0xde5   : > { %14392 = vmatmul.mubr.f32.vlgmr.msra.gmra.mrb[16].mxu1 %v37320_v35 }
 0xde6   : > { %32388 = vmatpush3.bf16.msra.mxu1 %v39443_v46  ;;  %29730 = vmatprep.mubr.msk.f32.mxu1 %vm34583_vm1, %v39101_v9 }
 0xde7   : > { %32389 = vmatprep.subr.bf16.mxu1 %v39254_v6 }
 0xdea   : > { %32391 = vmatpush3.bf16.msra.mxu1 %v39444_v48 }
 0xdeb   : > { %32392 = vmatprep.subr.bf16.mxu1 %v39254_v6 }
 0xded   : > { %29731 = vmatmul.mubr.f32.vlgmr.msra.gmra.mrb[52].mxu1 %v13932_v3  ;;  %v39448_v3 = vld [vmem:[#allocation104_spill] sm:$0xff] }
 0xdee   : > { %32394 = vmatpush3.bf16.msra.mxu1 %v39445_v56  ;;  %29741 = vmatprep.mubr.msk.f32.mxu1 %vm34583_vm1, %v39101_v9 }
 0xdef   : > { %32395 = vmatprep.subr.bf16.mxu1 %v39254_v6 }
 0xdf2   : > { %32397 = vmatpush3.bf16.msra.mxu1 %v39446_v28 }
 0xdf3   : > { %32398 = vmatprep.subr.bf16.mxu1 %v39254_v6 }
 0xdf5   : > { %29742 = vmatmul.mubr.f32.vlgmr.msra.gmra.mrb[54].mxu1 %v37320_v35 }
 0xdf6   : > { %32400 = vmatpush3.bf16.msra.mxu1 %v39447_v26  ;;  %29752 = vmatprep.mubr.msk.f32.mxu1 %vm34583_vm1, %v39101_v9  ;;  %v39449_v26 = vld [vmem:[#allocation105_spill] sm:$0xff] }
 0xdf7   : > { %32401 = vmatprep.subr.bf16.mxu1 %v39254_v6 }
 0xdfa   : > { %32403 = vmatpush3.bf16.msra.mxu1 %v39448_v3 }
 0xdfb   : > { %32404 = vmatprep.subr.bf16.mxu1 %v39254_v6 }
 0xdfd   : > { %29753 = vmatmul.mubr.f32.vlgmr.msra.gmra.mrb[56].mxu1 %v13929_v36  ;;  %v39450_v36 = vld [vmem:[#allocation106_spill] sm:$0xff] }
 0xdfe   : > { %32406 = vmatpush3.bf16.msra.mxu1 %v39443_v46  ;;  %29763 = vmatprep.mubr.msk.f32.mxu1 %vm34583_vm1, %v39101_v9 }
 0xdff   : > { %32407 = vmatprep.subr.bf16.mxu1 %v39254_v6 }
 0xe02   : > { %32409 = vmatpush3.bf16.msra.mxu1 %v39444_v48 }
 0xe03   : > { %32410 = vmatprep.subr.bf16.mxu1 %v39254_v6 }
 0xe05   : > { %29764 = vmatmul.mubr.f32.vlgmr.msra.gmra.mrb[58].mxu1 %v13930_v23 }
 0xe06   : > { %32412 = vmatpush3.bf16.msra.mxu1 %v39449_v26  ;;  %29774 = vmatprep.mubr.msk.f32.mxu1 %vm34583_vm1, %v39101_v9 }
 0xe07   : > { %32413 = vmatprep.subr.bf16.mxu1 %v39254_v6 }
 0xe0a   : > { %32415 = vmatpush3.bf16.msra.mxu1 %v39450_v36  ;;  %v39451_v36 = vld [vmem:[#allocation55_spill] sm:$0xff] }
 0xe0b   : > { %32416 = vmatprep.subr.bf16.mxu1 %v39254_v6 }
 0xe0d   : > { %29775 = vmatmul.mubr.f32.vlgmr.msra.gmra.mrb[60].mxu1 %v37320_v35 }
 0xe0e   : > { %32418 = vmatpush3.bf16.msra.mxu1 %v39443_v46  ;;  %29785 = vmatprep.mubr.msk.f32.mxu1 %vm34583_vm1, %v39101_v9  ;;  %v39452_v46 = vld [vmem:[#allocation107_spill] sm:$0xff] }
 0xe0f   : > { %32419 = vmatprep.subr.bf16.mxu1 %v39254_v6 }
 0xe12   : > { %32421 = vmatpush3.bf16.msra.mxu1 %v39444_v48 }
 0xe13   : > { %32422 = vmatprep.subr.bf16.mxu1 %v39254_v6 }
 0xe15   : > { %29786 = vmatmul.mubr.f32.vlgmr.msra.gmra.mrb[62].mxu1 %v37320_v35 }
 0xe16   : > { %32424 = vmatpush3.bf16.msra.mxu1 %v36581_v7  ;;  %29796 = vmatprep.mubr.msk.f32.mxu1 %vm34583_vm1, %v39101_v9 }
 0xe17   : > { %32425 = vmatprep.subr.bf16.mxu1 %v39254_v6 }
 0xe1a   : > { %32427 = vmatpush3.bf16.msra.mxu1 %v36591_v59 }
 0xe1b   : > { %32428 = vmatprep.subr.bf16.mxu1 %v39254_v6 }
 0xeb8   : > { %v14393_v23 = vpop.f32.mrb[16].mxu1 }
 0xeb9   : > { %v33677_v26 = vadd.f32 %v39451_v36, %v14393_v23  ;;  %v14395_v3 = vpop.f32.mrb[17].mxu1 }
 0xeba   : > { %v33679_v34 = vadd.f32 %v36624_v4, %v14395_v3 }
 0xebb   : > { %v26983_v28 = vmul.f32 -1.442695, %v33677_v26 }
 0xebc   : > { %v26984_v23 = vmul.f32 -1.442695, %v33679_v34 }
 0xebd   : > { %34408 = vpow2.f32 %v26983_v28 }
 0xec0   : > { %v14473_v56 = vpop.f32.mrb[52].mxu1 }
 0xec1   : > { %v29732_v48 = vpop.f32.mrb[53].mxu1  ;;  %v14474_v30 = vadd.f32 %v14473_v56, %v39452_v46 }
 0xec7   : > { %v34409_v35 = vpop.eup %34408 }
 0xec8   : > { %v14887_v2 = vadd.f32 1.0, %v34409_v35  ;;  %v14564_v25 = vpop.f32.mrb[54].mxu1 }
 0xec9   : > { %v14565_v58 = vadd.f32 %v14564_v25, %v14474_v30  ;;  %v29743_v53 = vpop.f32.mrb[55].mxu1 }
 0xeca   : > { %34410 = vrcp.f32 %v14887_v2 }
 0xecb   : > { %34412 = vpow2.f32 %v26984_v23 }
 0xed0   : > { %v14644_v5 = vpop.f32.mrb[56].mxu1 }
 0xed1   : > { %v14645_v60 = vadd.f32 %v14644_v5, %v14565_v58  ;;  %v29754_v11 = vpop.f32.mrb[57].mxu1 }
 0xed4   : > { %v34411_v21 = vpop.eup %34410 }
 0xed5   : > { %v14897_v26 = vmul.f32 %v34411_v21, %v37201_v15  ;;  %v34413_v46 = vpop.eup %34412 }
 0xed6   : > { %v14894_v25 = vadd.f32 1.0, %v34413_v46 }
 0xed8   : > { %v14721_v28 = vpop.f32.mrb[58].mxu1  ;;  %34414 = vrcp.f32 %v14894_v25  ;;  %v39458_v25 = vld [vmem:[#allocation70_spill] sm:$0xff] }
 0xed9   : > { %v14722_v48 = vadd.f32 %v14721_v28, %v14645_v60  ;;  %v29765_v36 = vpop.f32.mrb[59].mxu1  ;;  %v39454_v28 = vld [vmem:[#allocation18_spill] sm:$0xff] }
 0xee0   : > { %v14804_v22 = vpop.f32.mrb[60].mxu1 }
 0xee1   : > { %v14805_v56 = vadd.f32 %v14804_v22, %v14722_v48  ;;  %v29776_v35 = vpop.f32.mrb[61].mxu1  ;;  %v39455_v48 = vld [vmem:[#allocation35_spill] sm:$0xff] }
 0xee2   : > { %v34415_v11 = vpop.eup %34414  ;;  %v39457_v35 = vld [vmem:[#allocation69_spill] sm:$0xff] }
 0xee3   : > { %v14900_v5 = vsub.f32 1.0, %v34415_v11  ;;  %v14902_v21 = vmul.f32 %v34415_v11, %v37015_v38  ;;  %v39453_v38 = vld [vmem:[#allocation33_spill] sm:$0xff]  ;;  %v39463_v11 = vld [vmem:[#allocation75_spill] sm:$0xff] }
 0xee8   : > { %v14879_v53 = vpop.f32.mrb[62].mxu1 }
 0xee9   : > { %v14880_v2 = vadd.f32 %v14879_v53, %v14805_v56  ;;  %v29787_v30 = vpop.f32.mrb[63].mxu1  ;;  %v39456_v56 = vld [vmem:[#allocation68_spill] sm:$0xff]  ;;  %v39459_v53 = vld [vmem:[#allocation71_spill] sm:$0xff] }
 0xeea   : > { %v39461_v30 = vld [vmem:[#allocation73_spill] sm:$0xff] }
 0xeeb   : > { %v14898_v3 = vadd.f32 %v14897_v26, %v14880_v2  ;;  %v39460_v2 = vld [vmem:[#allocation72_spill] sm:$0xff] }
 0xeed   : > { %34416 = vtanh.f32 %v14898_v3  ;;  %v39462_v3 = vld [vmem:[#allocation74_spill] sm:$0xff] }
 0xef7   : > { %v34417_v34 = vpop.eup %34416 }
 0xef8   : > { %v14901_v15 = vmul.f32 %v34417_v34, %v14900_v5  ;;  %v39464_v5 = vld [vmem:[#allocation76_spill] sm:$0xff]  ;;  %v39465_v34 = vld [vmem:[#allocation77_spill] sm:$0xff] }
 0xefa   : > { %v37401_v58 = vadd.f32 %v14902_v21, %v14901_v15  ;;  %v39466_v21 = vld [vmem:[#allocation78_spill] sm:$0xff]  ;;  %v39467_v15 = vld [vmem:[#allocation79_spill] sm:$0xff] }
 0xefc   : > { %v14905_v22 = vsel %vm450_vm0, %v37401_v58, 0 }
 0xefd   : > { %v37405_v60 = vand.u32 4294901760, %v14905_v22 }
 0xeff   : > { %v37408_v46 = vsub.f32 %v14905_v22, %v37405_v60  ;;  %v39468_v22 = vld [vmem:[#allocation80_spill] sm:$0xff] }
 0xf01   : > { %v37411_v36 = vand.u32 4294901760, %v37408_v46 }
 0xf03   : > { %v14979_v23 = vsub.f32 %v37408_v46, %v37411_v36 }
 0xf05   : > { %v37415_v26 = vand.u32 4294901760, %v14979_v23  ;;  %v39469_v23 = vld [vmem:[#allocation81_spill] sm:$0xff] }
 0xf07   : > { %29797 = vmatmul.mubr.f32.vlgmr.msra.gmra.mrb[64].mxu1 %v37415_v26  ;;  %29863 = vmatmul.mubr.f32.vlgmr.msra.gmra.mrb[40].mxu0 %v37415_v26 }
 0xf08   : > { %32430 = vmatpush3.bf16.msra.mxu1 %v36595_v12  ;;  %32562 = vmatpush3.bf16.msra.mxu0 %v39308_v37 }
 0xf09   : > { %32431 = vmatprep.subr.bf16.mxu1 %v39254_v6  ;;  %32563 = vmatprep.subr.bf16.mxu0 %v39254_v6 }
 0xf0a   : > { %29807 = vmatprep.mubr.msk.f32.mxu1 %vm34583_vm1, %v39101_v9  ;;  %29873 = vmatprep.mubr.msk.f32.mxu0 %vm34583_vm1, %v39101_v9 }
 0xf0c   : > { %32433 = vmatpush3.bf16.msra.mxu1 %v36597_v52  ;;  %32565 = vmatpush3.bf16.msra.mxu0 %v39309_v55 }
 0xf0d   : > { %32434 = vmatprep.subr.bf16.mxu1 %v39254_v6  ;;  %32566 = vmatprep.subr.bf16.mxu0 %v39254_v6 }
 0xf0f   : > { %29808 = vmatmul.mubr.f32.vlgmr.msra.gmra.mrb[64].mxu1 %v37405_v60  ;;  %29874 = vmatmul.mubr.f32.vlgmr.msra.gmra.mrb[40].mxu0 %v37405_v60 }
 0xf10   : > { %32436 = vmatpush3.bf16.msra.mxu1 %v36599_v50  ;;  %32568 = vmatpush3.bf16.msra.mxu0 %v39310_v10 }
 0xf11   : > { %32437 = vmatprep.subr.bf16.mxu1 %v39254_v6  ;;  %32569 = vmatprep.subr.bf16.mxu0 %v39254_v6 }
 0xf12   : > { %29818 = vmatprep.mubr.msk.f32.mxu1 %vm34583_vm1, %v39101_v9  ;;  %29884 = vmatprep.mubr.msk.f32.mxu0 %vm34583_vm1, %v39101_v9 }
 0xf14   : > { %32439 = vmatpush3.bf16.msra.mxu1 %v36601_v29  ;;  %32571 = vmatpush3.bf16.msra.mxu0 %v39311_v47 }
 0xf15   : > { %32440 = vmatprep.subr.bf16.mxu1 %v39254_v6  ;;  %32572 = vmatprep.subr.bf16.mxu0 %v39254_v6 }
 0xf17   : > { %29819 = vmatmul.mubr.f32.vlgmr.msra.gmra.mrb[64].mxu1 %v37408_v46  ;;  %29885 = vmatmul.mubr.f32.vlgmr.msra.gmra.mrb[40].mxu0 %v37408_v46 }
 0xf18   : > { %32442 = vmatpush3.bf16.msra.mxu1 %v36581_v7  ;;  %32574 = vmatpush3.bf16.msra.mxu0 %v35784_v43 }
 0xf19   : > { %32443 = vmatprep.subr.bf16.mxu1 %v39254_v6  ;;  %32575 = vmatprep.subr.bf16.mxu0 %v39254_v6 }
 0xf1a   : > { %29829 = vmatprep.mubr.msk.f32.mxu1 %vm34583_vm1, %v39101_v9  ;;  %29895 = vmatprep.mubr.msk.f32.mxu0 %vm34583_vm1, %v39101_v9 }
 0xf1c   : > { %32445 = vmatpush3.bf16.msra.mxu1 %v36591_v59  ;;  %32577 = vmatpush3.bf16.msra.mxu0 %v35812_v24 }
 0xf1d   : > { %32446 = vmatprep.subr.bf16.mxu1 %v39254_v6  ;;  %32578 = vmatprep.subr.bf16.mxu0 %v39254_v6 }
 0xf1f   : > { %29830 = vmatmul.mubr.f32.vlgmr.msra.gmra.mrb[64].mxu1 %v37411_v36  ;;  %29896 = vmatmul.mubr.f32.vlgmr.msra.gmra.mrb[40].mxu0 %v37411_v36 }
 0xf20   : > { %32448 = vmatpush3.bf16.msra.mxu1 %v36603_v45  ;;  %32580 = vmatpush3.bf16.msra.mxu0 %v39312_v40 }
 0xf21   : > { %32449 = vmatprep.subr.bf16.mxu1 %v39254_v6  ;;  %32581 = vmatprep.subr.bf16.mxu0 %v39254_v6 }
 0xf22   : > { %29840 = vmatprep.mubr.msk.f32.mxu1 %vm34583_vm1, %v39101_v9  ;;  %29906 = vmatprep.mubr.msk.f32.mxu0 %vm34583_vm1, %v39101_v9 }
 0xf24   : > { %32451 = vmatpush3.bf16.msra.mxu1 %v36605_v31  ;;  %32583 = vmatpush3.bf16.msra.mxu0 %v39313_v44 }
 0xf25   : > { %32452 = vmatprep.subr.bf16.mxu1 %v39254_v6  ;;  %32584 = vmatprep.subr.bf16.mxu0 %v39254_v6 }
 0xf27   : > { %29841 = vmatmul.mubr.f32.vlgmr.msra.gmra.mrb[64].mxu1 %v37405_v60  ;;  %29907 = vmatmul.mubr.f32.vlgmr.msra.gmra.mrb[40].mxu0 %v37405_v60 }
 0xf28   : > { %32454 = vmatpush3.bf16.msra.mxu1 %v36581_v7  ;;  %32586 = vmatpush3.bf16.msra.mxu0 %v35784_v43 }
 0xf29   : > { %32455 = vmatprep.subr.bf16.mxu1 %v39254_v6  ;;  %32587 = vmatprep.subr.bf16.mxu0 %v39254_v6 }
 0xf2a   : > { %29851 = vmatprep.mubr.msk.f32.mxu1 %vm34583_vm1, %v39101_v9  ;;  %29917 = vmatprep.mubr.msk.f32.mxu0 %vm34583_vm1, %v39101_v9 }
 0xf2c   : > { %32457 = vmatpush3.bf16.msra.mxu1 %v36591_v59  ;;  %32589 = vmatpush3.bf16.msra.mxu0 %v35812_v24 }
 0xf2d   : > { %32459 = vmatprep.subr.bf16.mxu1 %v39314_v17  ;;  %32590 = vmatprep.subr.bf16.mxu0 %v39254_v6 }
 0xf2f   : > { %29852 = vmatmul.mubr.f32.vlgmr.msra.gmra.mrb[64].mxu1 %v37405_v60  ;;  %29918 = vmatmul.mubr.f32.vlgmr.msra.gmra.mrb[40].mxu0 %v37405_v60 }
 0xf30   : > { %32461 = vmatpush1.bf16.msra.mxu1 %v39315_v16  ;;  %32592 = vmatpush3.bf16.msra.mxu0 %v35987_v41 }
 0xf31   : > { %32463 = vmatprep.subr.bf16.mxu1 %v39316_v51  ;;  %32593 = vmatprep.subr.bf16.mxu0 %v39254_v6 }
 0xf32   : > { %15482 = vmatprep.mubr.f32.mxu1 %v39101_v9  ;;  %29952 = vmatprep.mubr.msk.f32.mxu0 %vm34583_vm1, %v39101_v9 }
 0xf34   : > { %32465 = vmatpush1.bf16.msra.mxu1 %v39317_v32  ;;  %32595 = vmatpush3.bf16.msra.mxu0 %v35995_v63 }
 0xf35   : > { %32467 = vmatprep.subr.bf16.mxu1 %v39318_v33  ;;  %32596 = vmatprep.subr.bf16.mxu0 %v39254_v6 }
 0xf37   : > { %15488 = vmatmul.mubr.f32.vlgmr.msra.gmra.mrb[0].mxu1 %v37415_v26 }
 0xf38   : > { %32469 = vmatpush1.bf16.msra.mxu1 %v39380_v42  ;;  %32598 = vmatpush3.bf16.msra.mxu0 %v36005_v8 }
 0xf39   : > { %32471 = vmatprep.subr.bf16.mxu1 %v39381_v49  ;;  %32599 = vmatprep.subr.bf16.mxu0 %v39254_v6 }
 0xf3a   : > { %15598 = vmatprep.mubr.f32.mxu1 %v39101_v9 }
 0xf3c   : > { %32473 = vmatpush1.bf16.msra.mxu1 %v39321_v57  ;;  %32601 = vmatpush3.bf16.msra.mxu0 %v36013_v20 }
 0xf3d   : > { %32475 = vmatprep.subr.bf16.mxu1 %v39382_v19  ;;  %32602 = vmatprep.subr.bf16.mxu0 %v39254_v6 }
 0xf3f   : > { %15600 = vmatmul.mubr.f32.vlgmr.msra.gmra.mrb[0].mxu1 %v37405_v60 }
 0xf40   : > { %32477 = vmatpush1.bf16.msra.mxu1 %v39383_v54  ;;  %32604 = vmatpush3.bf16.msra.mxu0 %v36023_v13 }
 0xf41   : > { %32479 = vmatprep.subr.bf16.mxu1 %v39384_v1  ;;  %32605 = vmatprep.subr.bf16.mxu0 %v39254_v6 }
 0xf42   : > { %15686 = vmatprep.mubr.f32.mxu1 %v39101_v9 }
 0xf44   : > { %32481 = vmatpush1.bf16.msra.mxu1 %v39385_v61  ;;  %32607 = vmatpush3.bf16.msra.mxu0 %v36033_v39 }
 0xf45   : > { %32483 = vmatprep.subr.bf16.mxu1 %v39314_v17  ;;  %32608 = vmatprep.subr.bf16.mxu0 %v39254_v6 }
 0xf47   : > { %15689 = vmatmul.mubr.f32.vlgmr.msra.gmra.mrb[0].mxu1 %v37408_v46 }
 0xf48   : > { %32485 = vmatpush1.bf16.msra.mxu1 %v39315_v16  ;;  %32610 = vmatpush3.bf16.msra.mxu0 %v36043_v18 }
 0xf49   : > { %32487 = vmatprep.subr.bf16.mxu1 %v39316_v51  ;;  %32611 = vmatprep.subr.bf16.mxu0 %v39254_v6 }
 0xf4a   : > { %15767 = vmatprep.mubr.f32.mxu1 %v39101_v9 }
 0xf4c   : > { %32489 = vmatpush1.bf16.msra.mxu1 %v39317_v32  ;;  %32613 = vmatpush3.bf16.msra.mxu0 %v36055_v62 }
 0xf4d   : > { %32491 = vmatprep.subr.bf16.mxu1 %v39326_v0  ;;  %32614 = vmatprep.subr.bf16.mxu0 %v39254_v6 }
 0xf4f   : > { %15771 = vmatmul.mubr.f32.vlgmr.msra.gmra.mrb[0].mxu1 %v37411_v36 }
 0xf50   : > { %32493 = vmatpush1.bf16.msra.mxu1 %v39453_v38  ;;  %15865 = vmatprep.mubr.f32.mxu1 %v39101_v9 }
 0xf51   : > { %32495 = vmatprep.subr.bf16.mxu1 %v39454_v28  ;;  %v39504_v28 = vld [vmem:[#allocation89_spill] sm:$0xff] }
 0xf54   : > { %32497 = vmatpush1.bf16.msra.mxu1 %v39455_v48  ;;  %v39503_v48 = vld [vmem:[#allocation88_spill] sm:$0xff] }
 0xf55   : > { %32499 = vmatprep.subr.bf16.mxu1 %v39314_v17 }
 0xf57   : > { %15867 = vmatmul.mubr.f32.vlgmr.msra.gmra.mrb[0].mxu1 %v37405_v60 }
 0xf58   : > { %32501 = vmatpush1.bf16.msra.mxu1 %v39315_v16  ;;  %15945 = vmatprep.mubr.f32.mxu1 %v39101_v9 }
 0xf59   : > { %32503 = vmatprep.subr.bf16.mxu1 %v39316_v51 }
 0xf5c   : > { %32505 = vmatpush1.bf16.msra.mxu1 %v39317_v32 }
 0xf5d   : > { %32507 = vmatprep.subr.bf16.mxu1 %v39456_v56 }
 0xf5f   : > { %15947 = vmatmul.mubr.f32.vlgmr.msra.gmra.mrb[0].mxu1 %v37405_v60 }
 0xf60   : > { %32509 = vmatpush1.bf16.msra.mxu1 %v39457_v35  ;;  %16025 = vmatprep.mubr.f32.mxu1 %v39101_v9 }
 0xf61   : > { %32511 = vmatprep.subr.bf16.mxu1 %v39458_v25 }
 0xf64   : > { %32513 = vmatpush1.bf16.msra.mxu1 %v39459_v53 }
 0xf65   : > { %32515 = vmatprep.subr.bf16.mxu1 %v39460_v2 }
 0xf67   : > { %16031 = vmatmul.mubr.f32.vlgmr.msra.gmra.mrb[18].mxu1 %v37415_v26  ;;  %v39470_v26 = vld [vmem:[#allocation82_spill] sm:$0xff] }
 0xf68   : > { %32517 = vmatpush1.bf16.msra.mxu1 %v39461_v30  ;;  %16141 = vmatprep.mubr.f32.mxu1 %v39101_v9 }
 0xf69   : > { %32519 = vmatprep.subr.bf16.mxu1 %v39462_v3 }
 0xf6c   : > { %32521 = vmatpush1.bf16.msra.mxu1 %v39463_v11 }
 0xf6d   : > { %32523 = vmatprep.subr.bf16.mxu1 %v39464_v5 }
 0xf6f   : > { %16143 = vmatmul.mubr.f32.vlgmr.msra.gmra.mrb[18].mxu1 %v37405_v60 }
 0xf70   : > { %32525 = vmatpush1.bf16.msra.mxu1 %v39465_v34  ;;  %16229 = vmatprep.mubr.f32.mxu1 %v39101_v9 }
 0xf71   : > { %32527 = vmatprep.subr.bf16.mxu1 %v39466_v21 }
 0xf74   : > { %32529 = vmatpush1.bf16.msra.mxu1 %v39467_v15  ;;  %v39471_v15 = vld [vmem:[#allocation83_spill] sm:$0xff] }
 0xf75   : > { %32531 = vmatprep.subr.bf16.mxu1 %v39456_v56 }
 0xf77   : > { %16232 = vmatmul.mubr.f32.vlgmr.msra.gmra.mrb[18].mxu1 %v37408_v46  ;;  %v39472_v46 = vld [vmem:[#allocation85_spill] sm:$0xff] }
 0xf78   : > { %32533 = vmatpush1.bf16.msra.mxu1 %v39457_v35  ;;  %16310 = vmatprep.mubr.f32.mxu1 %v39101_v9 }
 0xf79   : > { %32535 = vmatprep.subr.bf16.mxu1 %v39458_v25 }
 0xf7c   : > { %32537 = vmatpush1.bf16.msra.mxu1 %v39459_v53 }
 0xf7d   : > { %32539 = vmatprep.subr.bf16.mxu1 %v39468_v22  ;;  %v39476_v22 = vld [vmem:[#allocation63_spill] sm:$0xff] }
 0xf7f   : > { %16314 = vmatmul.mubr.f32.vlgmr.msra.gmra.mrb[18].mxu1 %v37411_v36  ;;  %v39473_v36 = vld [vmem:[#allocation86_spill] sm:$0xff] }
 0xf80   : > { %32541 = vmatpush1.bf16.msra.mxu1 %v39469_v23  ;;  %16408 = vmatprep.mubr.f32.mxu1 %v39101_v9 }
 0xf81   : > { %32543 = vmatprep.subr.bf16.mxu1 %v39470_v26 }
 0xf84   : > { %32545 = vmatpush1.bf16.msra.mxu1 %v39471_v15  ;;  %v39474_v15 = vld [vmem:[#allocation87_spill] sm:$0xff] }
 0xf85   : > { %32547 = vmatprep.subr.bf16.mxu1 %v39456_v56 }
 0xf87   : > { %16410 = vmatmul.mubr.f32.vlgmr.msra.gmra.mrb[18].mxu1 %v37405_v60 }
 0xf88   : > { %32549 = vmatpush1.bf16.msra.mxu1 %v39457_v35  ;;  %16488 = vmatprep.mubr.f32.mxu1 %v39101_v9 }
 0xf89   : > { %32551 = vmatprep.subr.bf16.mxu1 %v39458_v25 }
 0xf8c   : > { %32553 = vmatpush1.bf16.msra.mxu1 %v39459_v53 }
 0xf8d   : > { %32735 = vmatprep.subr.bf16.mxu1 %v36408_v27 }
 0xf8f   : > { %16490 = vmatmul.mubr.f32.vlgmr.msra.gmra.mrb[18].mxu1 %v37405_v60  ;;  %v39477_v60 = vld [vmem:[#allocation56_spill] sm:$0xff] }
 0xf90   : > { %32737 = vmatpush1.bf16.msra.mxu1 %v36410_v14  ;;  %17719 = vmatprep.mubr.f32.mxu1 %v39101_v9 }
 0xf91   : > { %32739 = vmatprep.subr.bf16.mxu1 %v39472_v46 }
 0xf94   : > { %32741 = vmatpush1.bf16.msra.mxu1 %v39473_v36 }
 0xf95   : > { %32743 = vmatprep.subr.bf16.mxu1 %v39474_v15 }
0x1002   : > { %v37584_v26 = vpop.f32.mrb[64].mxu1  ;;  %v16977_v23 = vpop.f32.mrb[40].mxu0 }
0x1003   : > { %39475 = vst [vmem:[#allocation38_spill] sm:$0xff] %v37584_v26  ;;  %v37587_v21 = vadd.f32 %v39476_v22, %v16977_v23  ;;  %v29853_v34 = vpop.f32.mrb[65].mxu1  ;;  %v29919_v5 = vpop.f32.mrb[41].mxu0  ;;  %v39478_v23 = vld [vmem:[#allocation36_spill] sm:$0xff] }
0x1032   : > { %v15948_v11 = vpop.f32.mrb[0].mxu1 }
0x1033   : > { %v33662_v3 = vadd.f32 %v15948_v11, %v39477_v60  ;;  %v37590_v30 = vpop.f32.mrb[1].mxu1 }
0x1035   : > { %16986 = vmax.xlane.f32.xlu0 %v33662_v3 }
0x10c2   : > { %v16987_v2 = vpop.xlane.xlu0 %16986 }
0x10c3   : > { %v16988_v53 = vsub.f32 %v33662_v3, %v16987_v2  ;;  %v39481_v2 = vld [vmem:[#allocation16_spill] sm:$0xff]  ;;  %v39482_v3 = vld [vmem:[#allocation47_spill] sm:$0xff] }
0x10c5   : > { %v16989_v25 = vmul.f32 1.442695, %v16988_v53  ;;  %v39480_v53 = vld [vmem:[#allocation26_spill] sm:$0xff] }
0x10c7   : > { %34418 = vpow2.f32 %v16989_v25  ;;  %v39479_v25 = vld [vmem:[#allocation10_spill] sm:$0xff] }
0x10d1   : > { %v37592_v35 = vpop.eup %34418 }
0x10d2   : > { %16991 = vadd.xlane.f32.xlu1 %v37592_v35  ;;  %v37596_v26 = vand.u32 4294901760, %v37592_v35 }
0x10d4   : > { %v17075_v5 = vsub.f32 %v37592_v35, %v37596_v26 }
0x10d6   : > { %v17076_v34 = vand.u32 4294901760, %v17075_v5 }
0x10d8   : > { %v17077_v22 = vsub.f32 %v17075_v5, %v17076_v34 }
0x10da   : > { %v17078_v11 = vand.u32 4294901760, %v17077_v22  ;;  %v39483_v22 = vld [vmem:[#allocation49_spill] sm:$0xff] }
0x10dc   : > { %29953 = vmatmul.mubr.f32.vlgmr.msra.gmra.mrb[42].mxu0 %v17078_v11  ;;  %v39484_v11 = vld [vmem:[#allocation52_spill] sm:$0xff] }
0x10dd   : > { %32616 = vmatpush3.bf16.msra.mxu0 %v39478_v23  ;;  %29987 = vmatprep.mubr.msk.f32.mxu0 %vm34583_vm1, %v39101_v9 }
0x10de   : > { %32617 = vmatprep.subr.bf16.mxu0 %v39254_v6 }
0x10e1   : > { %32619 = vmatpush3.bf16.msra.mxu0 %v39479_v25  ;;  %v39485_v25 = vld [vmem:[#allocation54_spill] sm:$0xff] }
0x10e2   : > { %32620 = vmatprep.subr.bf16.mxu0 %v39254_v6 }
0x10e5   : > { %32622 = vmatpush3.bf16.msra.mxu0 %v39480_v53  ;;  %v39492_v53 = vld [vmem:[#allocation48_spill] sm:$0xff] }
0x10e6   : > { %32623 = vmatprep.subr.bf16.mxu0 %v39254_v6 }
0x10e9   : > { %32625 = vmatpush3.bf16.msra.mxu0 %v39481_v2  ;;  %v39486_v2 = vld [vmem:[#allocation23_spill] sm:$0xff] }
0x10ea   : > { %32626 = vmatprep.subr.bf16.mxu0 %v39254_v6 }
0x10ed   : > { %32628 = vmatpush3.bf16.msra.mxu0 %v39482_v3  ;;  %v39490_v3 = vld [vmem:[#allocation13_spill] sm:$0xff] }
0x10ee   : > { %32629 = vmatprep.subr.bf16.mxu0 %v39254_v6 }
0x10f1   : > { %32631 = vmatpush3.bf16.msra.mxu0 %v39483_v22  ;;  %v39487_v22 = vld [vmem:[#allocation41_spill] sm:$0xff] }
0x10f2   : > { %32632 = vmatprep.subr.bf16.mxu0 %v39254_v6 }
0x10f5   : > { %32634 = vmatpush3.bf16.msra.mxu0 %v39484_v11  ;;  %v39488_v11 = vld [vmem:[#allocation45_spill] sm:$0xff] }
0x10f6   : > { %32635 = vmatprep.subr.bf16.mxu0 %v39254_v6 }
0x10f9   : > { %32637 = vmatpush3.bf16.msra.mxu0 %v39485_v25  ;;  %v39489_v25 = vld [vmem:[#allocation14_spill] sm:$0xff] }
0x10fa   : > { %32638 = vmatprep.subr.bf16.mxu0 %v39254_v6 }
0x10fc   : > { %29988 = vmatmul.mubr.f32.vlgmr.msra.gmra.mrb[42].mxu0 %v37596_v26 }
0x10fd   : > { %32640 = vmatpush3.bf16.msra.mxu0 %v39486_v2  ;;  %30022 = vmatprep.mubr.msk.f32.mxu0 %vm34583_vm1, %v39101_v9  ;;  %v39491_v2 = vld [vmem:[#allocation20_spill] sm:$0xff] }
0x10fe   : > { %32641 = vmatprep.subr.bf16.mxu0 %v39254_v6 }
0x1101   : > { %32643 = vmatpush3.bf16.msra.mxu0 %v39487_v22  ;;  %v39493_v22 = vld [vmem:[#allocation51_spill] sm:$0xff] }
0x1102   : > { %32644 = vmatprep.subr.bf16.mxu0 %v39254_v6 }
0x1105   : > { %32646 = vmatpush3.bf16.msra.mxu0 %v39488_v11 }
0x1106   : > { %32647 = vmatprep.subr.bf16.mxu0 %v39254_v6 }
0x1109   : > { %32649 = vmatpush3.bf16.msra.mxu0 %v39489_v25 }
0x110a   : > { %32650 = vmatprep.subr.bf16.mxu0 %v39254_v6 }
0x110d   : > { %32652 = vmatpush3.bf16.msra.mxu0 %v39490_v3  ;;  %v39500_v3 = vld [vmem:[#allocation50_spill] sm:$0xff] }
0x110e   : > { %32653 = vmatprep.subr.bf16.mxu0 %v39254_v6 }
0x1111   : > { %32655 = vmatpush3.bf16.msra.mxu0 %v39491_v2  ;;  %v39497_v2 = vld [vmem:[#allocation19_spill] sm:$0xff] }
0x1112   : > { %32656 = vmatprep.subr.bf16.mxu0 %v39254_v6 }
0x1115   : > { %32658 = vmatpush3.bf16.msra.mxu0 %v39492_v53  ;;  %v39496_v53 = vld [vmem:[#allocation12_spill] sm:$0xff] }
0x1116   : > { %32659 = vmatprep.subr.bf16.mxu0 %v39254_v6 }
0x1119   : > { %32661 = vmatpush3.bf16.msra.mxu0 %v39493_v22  ;;  %v39495_v22 = vld [vmem:[#allocation44_spill] sm:$0xff] }
0x111a   : > { %32662 = vmatprep.subr.bf16.mxu0 %v39254_v6 }
0x111c   : > { %30023 = vmatmul.mubr.f32.vlgmr.msra.gmra.mrb[42].mxu0 %v17075_v5  ;;  %v39494_v5 = vld [vmem:[#allocation40_spill] sm:$0xff] }
0x111d   : > { %32664 = vmatpush3.bf16.msra.mxu0 %v35987_v41  ;;  %30057 = vmatprep.mubr.msk.f32.mxu0 %vm34583_vm1, %v39101_v9 }
0x111e   : > { %32665 = vmatprep.subr.bf16.mxu0 %v39254_v6 }
0x1121   : > { %32667 = vmatpush3.bf16.msra.mxu0 %v35995_v63 }
0x1122   : > { %32668 = vmatprep.subr.bf16.mxu0 %v39254_v6 }
0x1125   : > { %32670 = vmatpush3.bf16.msra.mxu0 %v36005_v8 }
0x1126   : > { %32671 = vmatprep.subr.bf16.mxu0 %v39254_v6 }
0x1129   : > { %32673 = vmatpush3.bf16.msra.mxu0 %v36013_v20 }
0x112a   : > { %32674 = vmatprep.subr.bf16.mxu0 %v39254_v6 }
0x112d   : > { %32676 = vmatpush3.bf16.msra.mxu0 %v36023_v13 }
0x112e   : > { %32677 = vmatprep.subr.bf16.mxu0 %v39254_v6 }
0x1131   : > { %32679 = vmatpush3.bf16.msra.mxu0 %v36033_v39 }
0x1132   : > { %32680 = vmatprep.subr.bf16.mxu0 %v39254_v6 }
0x1135   : > { %32682 = vmatpush3.bf16.msra.mxu0 %v36043_v18 }
0x1136   : > { %32683 = vmatprep.subr.bf16.mxu0 %v39254_v6 }
0x1139   : > { %32685 = vmatpush3.bf16.msra.mxu0 %v36055_v62 }
0x113a   : > { %32686 = vmatprep.subr.bf16.mxu0 %v39254_v6 }
0x113c   : > { %30058 = vmatmul.mubr.f32.vlgmr.msra.gmra.mrb[42].mxu0 %v17076_v34  ;;  %v39498_v34 = vld [vmem:[#allocation15_spill] sm:$0xff] }
0x113d   : > { %32688 = vmatpush3.bf16.msra.mxu0 %v39494_v5  ;;  %30092 = vmatprep.mubr.msk.f32.mxu0 %vm34583_vm1, %v39101_v9  ;;  %v39499_v5 = vld [vmem:[#allocation29_spill] sm:$0xff] }
0x113e   : > { %32689 = vmatprep.subr.bf16.mxu0 %v39254_v6 }
0x1141   : > { %32691 = vmatpush3.bf16.msra.mxu0 %v39495_v22  ;;  %v39501_v22 = vld [vmem:[#allocation53_spill] sm:$0xff] }
0x1142   : > { %32692 = vmatprep.subr.bf16.mxu0 %v39254_v6 }
0x1145   : > { %32694 = vmatpush3.bf16.msra.mxu0 %v39496_v53 }
0x1146   : > { %32695 = vmatprep.subr.bf16.mxu0 %v39254_v6 }
0x1149   : > { %32697 = vmatpush3.bf16.msra.mxu0 %v39497_v2 }
0x114a   : > { %32698 = vmatprep.subr.bf16.mxu0 %v39254_v6 }
0x114d   : > { %32700 = vmatpush3.bf16.msra.mxu0 %v39498_v34 }
0x114e   : > { %32701 = vmatprep.subr.bf16.mxu0 %v39254_v6 }
0x1151   : > { %32703 = vmatpush3.bf16.msra.mxu0 %v39499_v5 }
0x1152   : > { %32704 = vmatprep.subr.bf16.mxu0 %v39254_v6 }
0x1155   : > { %32706 = vmatpush3.bf16.msra.mxu0 %v39500_v3 }
0x1156   : > { %32707 = vmatprep.subr.bf16.mxu0 %v39254_v6 }
0x1159   : > { %32709 = vmatpush3.bf16.msra.mxu0 %v39501_v22 }
0x115a   : > { %32710 = vmatprep.subr.bf16.mxu0 %v39254_v6 }
0x115c   : > { %30093 = vmatmul.mubr.f32.vlgmr.msra.gmra.mrb[42].mxu0 %v37596_v26 }
0x115d   : > { %32712 = vmatpush3.bf16.msra.mxu0 %v35987_v41  ;;  %30127 = vmatprep.mubr.msk.f32.mxu0 %vm34583_vm1, %v39101_v9 }
0x115e   : > { %32713 = vmatprep.subr.bf16.mxu0 %v39254_v6 }
0x115f   : > { %v16992_v5 = vpop.xlane.xlu1 %16991 }
0x1160   : > { %34420 = vrcp.f32 %v16992_v5 }
0x1161   : > { %32715 = vmatpush3.bf16.msra.mxu0 %v35995_v63 }
0x1162   : > { %32716 = vmatprep.subr.bf16.mxu0 %v39254_v6 }
0x1165   : > { %32718 = vmatpush3.bf16.msra.mxu0 %v36005_v8 }
0x1166   : > { %32719 = vmatprep.subr.bf16.mxu0 %v39254_v6 }
0x1169   : > { %32721 = vmatpush3.bf16.msra.mxu0 %v36013_v20 }
0x116a   : > { %v34421_v22 = vpop.eup %34420  ;;  %32722 = vmatprep.subr.bf16.mxu0 %v39254_v6 }
0x116b   : > { %v17635_v3 = vmul.f32 %v34421_v22, %v16992_v5 }
0x116d   : > { %v17636_v34 = vsub.f32 2.0, %v17635_v3  ;;  %32724 = vmatpush3.bf16.msra.mxu0 %v36023_v13 }
0x116e   : > { %32725 = vmatprep.subr.bf16.mxu0 %v39254_v6 }
0x116f   : > { %v17637_v2 = vmul.f32 %v34421_v22, %v17636_v34 }
0x1171   : > { %32727 = vmatpush3.bf16.msra.mxu0 %v36033_v39  ;;  %v17638_v53 = vmul.f32 %v37592_v35, %v17637_v2 }
0x1172   : > { %32728 = vmatprep.subr.bf16.mxu0 %v39254_v6 }
0x1173   : > { %26986 = vst [vmem:[%s36378_s25 + $0x18] sm:$0xff] %v17638_v53  ;;  %v39502_v53 = vld [vmem:[#allocation57_spill] sm:$0xff] }
0x1174   : > { %v33663_v3 = vadd.f32 %v37590_v30, %v39502_v53  ;;  %v39505_v30 = vld [vmem:[#allocation90_spill] sm:$0xff] }
0x1175   : > { %32730 = vmatpush3.bf16.msra.mxu0 %v36043_v18 }
0x1176   : > { %32731 = vmatprep.subr.bf16.mxu0 %v39254_v6 }
0x1179   : > { %32733 = vmatpush3.bf16.msra.mxu0 %v36055_v62 }
0x117a   : > { %32950 = vmatprep.subr.bf16.mxu0 %v39254_v6 }
0x117c   : > { %30128 = vmatmul.mubr.f32.vlgmr.msra.gmra.mrb[42].mxu0 %v37596_v26 }
0x117d   : > { %32952 = vmatpush3.bf16.msra.mxu0 %v35784_v43  ;;  %30270 = vmatprep.mubr.msk.f32.mxu0 %vm34583_vm1, %v39101_v9 }
0x117e   : > { %32953 = vmatprep.subr.bf16.mxu0 %v39254_v6 }
0x1181   : > { %32955 = vmatpush3.bf16.msra.mxu0 %v35812_v24 }
0x1182   : > { %32956 = vmatprep.subr.bf16.mxu0 %v39254_v6 }
0x124f   : > { %v17630_v35 = vpop.f32.mrb[42].mxu0 }
0x1250   : > { %v17641_v22 = vmul.f32 %v17637_v2, %v17630_v35  ;;  %v30129_v5 = vpop.f32.mrb[43].mxu0  ;;  %v39506_v2 = vld [vmem:[#allocation91_spill] sm:$0xff]  ;;  %v39508_v35 = vld [vmem:[#allocation93_spill] sm:$0xff] }
0x1251   : > { %v39512_v5 = vld [vmem:[#allocation97_spill] sm:$0xff] }
0x1252   : > { %v17642_v34 = vadd.f32 %v33663_v3, %v17641_v22  ;;  %v39510_v3 = vld [vmem:[#allocation95_spill] sm:$0xff]  ;;  %v39511_v22 = vld [vmem:[#allocation96_spill] sm:$0xff] }
0x1254   : > { %v17643_v25 = vmax.f32 %v17642_v34, 0.0  ;;  %v39513_v34 = vld [vmem:[#allocation98_spill] sm:$0xff] }
0x1256   : > { %v17645_v26 = vsel %vm450_vm0, %v17643_v25, 0  ;;  %v39507_v25 = vld [vmem:[#allocation92_spill] sm:$0xff] }
0x1257   : > { %v37704_v11 = vand.u32 4294901760, %v17645_v26 }
0x1259   : > { %v17721_v23 = vsub.f32 %v17645_v26, %v37704_v11  ;;  %v39514_v26 = vld [vmem:[#allocation99_spill] sm:$0xff] }
0x125b   : > { %v17722_v60 = vand.u32 4294901760, %v17721_v23 }
0x125d   : > { %v17723_v15 = vsub.f32 %v17721_v23, %v17722_v60 }
0x125f   : > { %v17724_v56 = vand.u32 4294901760, %v17723_v15  ;;  %v39509_v15 = vld [vmem:[#allocation94_spill] sm:$0xff] }
0x1261   : > { %17725 = vmatmul.mubr.f32.vlgmr.msra.gmra.mrb[18].mxu1 %v17724_v56 }
0x1262   : > { %32745 = vmatpush1.bf16.msra.mxu1 %v39503_v48  ;;  %17835 = vmatprep.mubr.f32.mxu1 %v39101_v9 }
0x1263   : > { %32747 = vmatprep.subr.bf16.mxu1 %v39504_v28 }
0x1266   : > { %32749 = vmatpush1.bf16.msra.mxu1 %v39505_v30 }
0x1267   : > { %32751 = vmatprep.subr.bf16.mxu1 %v39506_v2 }
0x1269   : > { %17837 = vmatmul.mubr.f32.vlgmr.msra.gmra.mrb[18].mxu1 %v37704_v11 }
0x126a   : > { %32753 = vmatpush1.bf16.msra.mxu1 %v39507_v25  ;;  %17923 = vmatprep.mubr.f32.mxu1 %v39101_v9 }
0x126b   : > { %32755 = vmatprep.subr.bf16.mxu1 %v39508_v35 }
0x126e   : > { %32757 = vmatpush1.bf16.msra.mxu1 %v39509_v15 }
0x126f   : > { %32759 = vmatprep.subr.bf16.mxu1 %v36408_v27 }
0x1271   : > { %17926 = vmatmul.mubr.f32.vlgmr.msra.gmra.mrb[18].mxu1 %v17721_v23 }
0x1272   : > { %32761 = vmatpush1.bf16.msra.mxu1 %v36410_v14  ;;  %18004 = vmatprep.mubr.f32.mxu1 %v39101_v9 }
0x1273   : > { %32763 = vmatprep.subr.bf16.mxu1 %v39472_v46 }
0x1276   : > { %32765 = vmatpush1.bf16.msra.mxu1 %v39473_v36 }
0x1277   : > { %32767 = vmatprep.subr.bf16.mxu1 %v39510_v3  ;;  %v39518_v3 = vld [vmem:[#allocation103_spill] sm:$0xff] }
0x1279   : > { %18008 = vmatmul.mubr.f32.vlgmr.msra.gmra.mrb[18].mxu1 %v17722_v60 }
0x127a   : > { %32769 = vmatpush1.bf16.msra.mxu1 %v39511_v22  ;;  %18102 = vmatprep.mubr.f32.mxu1 %v39101_v9  ;;  %v39517_v22 = vld [vmem:[#allocation102_spill] sm:$0xff] }
0x127b   : > { %32771 = vmatprep.subr.bf16.mxu1 %v39512_v5  ;;  %v39516_v5 = vld [vmem:[#allocation101_spill] sm:$0xff] }
0x127e   : > { %32773 = vmatpush1.bf16.msra.mxu1 %v39513_v34  ;;  %v39515_v34 = vld [vmem:[#allocation100_spill] sm:$0xff] }
0x127f   : > { %32775 = vmatprep.subr.bf16.mxu1 %v36408_v27 }
0x1281   : > { %18104 = vmatmul.mubr.f32.vlgmr.msra.gmra.mrb[18].mxu1 %v37704_v11 }
0x1282   : > { %32777 = vmatpush1.bf16.msra.mxu1 %v36410_v14  ;;  %18182 = vmatprep.mubr.f32.mxu1 %v39101_v9 }
0x1283   : > { %32779 = vmatprep.subr.bf16.mxu1 %v39472_v46 }
0x1286   : > { %32781 = vmatpush1.bf16.msra.mxu1 %v39473_v36 }
0x1287   : > { %32782 = vmatprep.subr.bf16.mxu1 %v39254_v6 }
0x1289   : > { %18184 = vmatmul.mubr.f32.vlgmr.msra.gmra.mrb[18].mxu1 %v37704_v11 }
0x128a   : > { %32784 = vmatpush3.bf16.msra.mxu1 %v39514_v26  ;;  %30138 = vmatprep.mubr.msk.f32.mxu1 %vm34583_vm1, %v39101_v9 }
0x128b   : > { %32785 = vmatprep.subr.bf16.mxu1 %v39254_v6 }
0x128e   : > { %32787 = vmatpush3.bf16.msra.mxu1 %v39515_v34 }
0x128f   : > { %32788 = vmatprep.subr.bf16.mxu1 %v39254_v6 }
0x1291   : > { %30139 = vmatmul.mubr.f32.vlgmr.msra.gmra.mrb[66].mxu1 %v17724_v56  ;;  %v39519_v56 = vld [vmem:[#allocation104_spill] sm:$0xff] }
0x1292   : > { %32790 = vmatpush3.bf16.msra.mxu1 %v39516_v5  ;;  %30149 = vmatprep.mubr.msk.f32.mxu1 %vm34583_vm1, %v39101_v9 }
0x1293   : > { %32791 = vmatprep.subr.bf16.mxu1 %v39254_v6 }
0x1296   : > { %32793 = vmatpush3.bf16.msra.mxu1 %v39517_v22 }
0x1297   : > { %32794 = vmatprep.subr.bf16.mxu1 %v39254_v6 }
0x1299   : > { %30150 = vmatmul.mubr.f32.vlgmr.msra.gmra.mrb[68].mxu1 %v37704_v11 }
0x129a   : > { %32796 = vmatpush3.bf16.msra.mxu1 %v39518_v3  ;;  %30160 = vmatprep.mubr.msk.f32.mxu1 %vm34583_vm1, %v39101_v9  ;;  %v39520_v3 = vld [vmem:[#allocation105_spill] sm:$0xff] }
0x129b   : > { %32797 = vmatprep.subr.bf16.mxu1 %v39254_v6 }
0x129e   : > { %32799 = vmatpush3.bf16.msra.mxu1 %v39519_v56 }
0x129f   : > { %32800 = vmatprep.subr.bf16.mxu1 %v39254_v6 }
0x12a1   : > { %30161 = vmatmul.mubr.f32.vlgmr.msra.gmra.mrb[70].mxu1 %v17721_v23  ;;  %v39521_v23 = vld [vmem:[#allocation106_spill] sm:$0xff] }
0x12a2   : > { %32802 = vmatpush3.bf16.msra.mxu1 %v39514_v26  ;;  %30171 = vmatprep.mubr.msk.f32.mxu1 %vm34583_vm1, %v39101_v9 }
0x12a3   : > { %32803 = vmatprep.subr.bf16.mxu1 %v39254_v6 }
0x12a6   : > { %32805 = vmatpush3.bf16.msra.mxu1 %v39515_v34 }
0x12a7   : > { %32806 = vmatprep.subr.bf16.mxu1 %v39254_v6 }
0x12a9   : > { %30172 = vmatmul.mubr.f32.vlgmr.msra.gmra.mrb[72].mxu1 %v17722_v60 }
0x12aa   : > { %32808 = vmatpush3.bf16.msra.mxu1 %v39520_v3  ;;  %30182 = vmatprep.mubr.msk.f32.mxu1 %vm34583_vm1, %v39101_v9 }
0x12ab   : > { %32809 = vmatprep.subr.bf16.mxu1 %v39254_v6 }
0x12ae   : > { %32811 = vmatpush3.bf16.msra.mxu1 %v39521_v23  ;;  %v39522_v23 = vld [vmem:[#allocation55_spill] sm:$0xff] }
0x12af   : > { %32812 = vmatprep.subr.bf16.mxu1 %v39254_v6 }
0x12b1   : > { %30183 = vmatmul.mubr.f32.vlgmr.msra.gmra.mrb[74].mxu1 %v37704_v11 }
0x12b2   : > { %32814 = vmatpush3.bf16.msra.mxu1 %v39514_v26  ;;  %30193 = vmatprep.mubr.msk.f32.mxu1 %vm34583_vm1, %v39101_v9  ;;  %v39523_v26 = vld [vmem:[#allocation107_spill] sm:$0xff] }
0x12b3   : > { %32815 = vmatprep.subr.bf16.mxu1 %v39254_v6 }
0x12b6   : > { %32817 = vmatpush3.bf16.msra.mxu1 %v39515_v34 }
0x12b7   : > { %32818 = vmatprep.subr.bf16.mxu1 %v39254_v6 }
0x12b9   : > { %30194 = vmatmul.mubr.f32.vlgmr.msra.gmra.mrb[76].mxu1 %v37704_v11 }
0x12ba   : > { %32820 = vmatpush3.bf16.msra.mxu1 %v36581_v7  ;;  %30204 = vmatprep.mubr.msk.f32.mxu1 %vm34583_vm1, %v39101_v9 }
0x12bb   : > { %32821 = vmatprep.subr.bf16.mxu1 %v39254_v6 }
0x12be   : > { %32823 = vmatpush3.bf16.msra.mxu1 %v36591_v59 }
0x12bf   : > { %32824 = vmatprep.subr.bf16.mxu1 %v39254_v6 }
0x135c   : > { %v18185_v60 = vpop.f32.mrb[18].mxu1 }
0x135d   : > { %v33681_v3 = vadd.f32 %v39522_v23, %v18185_v60  ;;  %v18187_v56 = vpop.f32.mrb[19].mxu1 }
0x135e   : > { %v33683_v28 = vadd.f32 %v36624_v4, %v18187_v56 }
0x135f   : > { %v26987_v22 = vmul.f32 -1.442695, %v33681_v3 }
0x1360   : > { %v26988_v60 = vmul.f32 -1.442695, %v33683_v28 }
0x1361   : > { %34422 = vpow2.f32 %v26987_v22 }
0x1364   : > { %v18265_v5 = vpop.f32.mrb[66].mxu1 }
0x1365   : > { %v30140_v34 = vpop.f32.mrb[67].mxu1  ;;  %v18266_v15 = vadd.f32 %v18265_v5, %v39523_v26 }
0x136b   : > { %v34423_v11 = vpop.eup %34422 }
0x136c   : > { %v18679_v35 = vadd.f32 1.0, %v34423_v11  ;;  %v18356_v25 = vpop.f32.mrb[68].mxu1 }
0x136d   : > { %v18357_v2 = vadd.f32 %v18356_v25, %v18266_v15  ;;  %v30151_v30 = vpop.f32.mrb[69].mxu1 }
0x136e   : > { %34424 = vrcp.f32 %v18679_v35 }
0x136f   : > { %34426 = vpow2.f32 %v26988_v60 }
0x1374   : > { %v18436_v48 = vpop.f32.mrb[70].mxu1 }
0x1375   : > { %v18437_v53 = vadd.f32 %v18436_v48, %v18357_v2  ;;  %v30162_v36 = vpop.f32.mrb[71].mxu1 }
0x1378   : > { %v34425_v46 = vpop.eup %34424 }
0x1379   : > { %v18689_v3 = vmul.f32 %v34425_v46, %v37587_v21  ;;  %v34427_v26 = vpop.eup %34426 }
0x137a   : > { %v18686_v25 = vadd.f32 1.0, %v34427_v26 }
0x137c   : > { %v18513_v22 = vpop.f32.mrb[72].mxu1  ;;  %34428 = vrcp.f32 %v18686_v25  ;;  %v39529_v25 = vld [vmem:[#allocation71_spill] sm:$0xff] }
0x137d   : > { %v18514_v34 = vadd.f32 %v18513_v22, %v18437_v53  ;;  %v30173_v23 = vpop.f32.mrb[73].mxu1  ;;  %v39525_v22 = vld [vmem:[#allocation35_spill] sm:$0xff] }
0x1384   : > { %v18596_v14 = vpop.f32.mrb[74].mxu1 }
0x1385   : > { %v18597_v5 = vadd.f32 %v18596_v14, %v18514_v34  ;;  %v30184_v11 = vpop.f32.mrb[75].mxu1  ;;  %v39526_v34 = vld [vmem:[#allocation68_spill] sm:$0xff] }
0x1386   : > { %v34429_v48 = vpop.eup %34428  ;;  %v39528_v11 = vld [vmem:[#allocation70_spill] sm:$0xff] }
0x1387   : > { %v18692_v36 = vsub.f32 1.0, %v34429_v48  ;;  %v18694_v21 = vmul.f32 %v34429_v48, %v37401_v58  ;;  %v39524_v58 = vld [vmem:[#allocation18_spill] sm:$0xff]  ;;  %v39534_v48 = vld [vmem:[#allocation76_spill] sm:$0xff] }
0x138c   : > { %v18671_v30 = vpop.f32.mrb[76].mxu1 }
0x138d   : > { %v18672_v35 = vadd.f32 %v18671_v30, %v18597_v5  ;;  %v30195_v15 = vpop.f32.mrb[77].mxu1  ;;  %v39527_v5 = vld [vmem:[#allocation69_spill] sm:$0xff]  ;;  %v39530_v30 = vld [vmem:[#allocation72_spill] sm:$0xff] }
0x138e   : > { %v39532_v15 = vld [vmem:[#allocation74_spill] sm:$0xff] }
0x138f   : > { %v18690_v56 = vadd.f32 %v18689_v3, %v18672_v35  ;;  %v39531_v35 = vld [vmem:[#allocation73_spill] sm:$0xff] }
0x1391   : > { %34430 = vtanh.f32 %v18690_v56  ;;  %v39533_v56 = vld [vmem:[#allocation75_spill] sm:$0xff] }
0x139b   : > { %v34431_v28 = vpop.eup %34430 }
0x139c   : > { %v18693_v46 = vmul.f32 %v34431_v28, %v18692_v36  ;;  %v39535_v36 = vld [vmem:[#allocation77_spill] sm:$0xff]  ;;  %v39536_v28 = vld [vmem:[#allocation78_spill] sm:$0xff] }
0x139e   : > { %v37785_v2 = vadd.f32 %v18694_v21, %v18693_v46  ;;  %v39537_v21 = vld [vmem:[#allocation79_spill] sm:$0xff]  ;;  %v39538_v46 = vld [vmem:[#allocation80_spill] sm:$0xff] }
0x13a0   : > { %v18697_v14 = vsel %vm450_vm0, %v37785_v2, 0 }
0x13a1   : > { %v37789_v53 = vand.u32 4294901760, %v18697_v14 }
0x13a3   : > { %v37792_v26 = vsub.f32 %v18697_v14, %v37789_v53  ;;  %v39539_v14 = vld [vmem:[#allocation81_spill] sm:$0xff] }
0x13a5   : > { %v37795_v23 = vand.u32 4294901760, %v37792_v26 }
0x13a7   : > { %v18771_v60 = vsub.f32 %v37792_v26, %v37795_v23 }
0x13a9   : > { %v37799_v3 = vand.u32 4294901760, %v18771_v60  ;;  %v39540_v60 = vld [vmem:[#allocation82_spill] sm:$0xff] }
0x13ab   : > { %30205 = vmatmul.mubr.f32.vlgmr.msra.gmra.mrb[78].mxu1 %v37799_v3  ;;  %30271 = vmatmul.mubr.f32.vlgmr.msra.gmra.mrb[44].mxu0 %v37799_v3 }
0x13ac   : > { %32826 = vmatpush3.bf16.msra.mxu1 %v36595_v12  ;;  %32958 = vmatpush3.bf16.msra.mxu0 %v39308_v37 }
0x13ad   : > { %32827 = vmatprep.subr.bf16.mxu1 %v39254_v6  ;;  %32959 = vmatprep.subr.bf16.mxu0 %v39254_v6 }
0x13ae   : > { %30215 = vmatprep.mubr.msk.f32.mxu1 %vm34583_vm1, %v39101_v9  ;;  %30281 = vmatprep.mubr.msk.f32.mxu0 %vm34583_vm1, %v39101_v9 }
0x13b0   : > { %32829 = vmatpush3.bf16.msra.mxu1 %v36597_v52  ;;  %32961 = vmatpush3.bf16.msra.mxu0 %v39309_v55 }
0x13b1   : > { %32830 = vmatprep.subr.bf16.mxu1 %v39254_v6  ;;  %32962 = vmatprep.subr.bf16.mxu0 %v39254_v6 }
0x13b3   : > { %30216 = vmatmul.mubr.f32.vlgmr.msra.gmra.mrb[78].mxu1 %v37789_v53  ;;  %30282 = vmatmul.mubr.f32.vlgmr.msra.gmra.mrb[44].mxu0 %v37789_v53 }
0x13b4   : > { %32832 = vmatpush3.bf16.msra.mxu1 %v36599_v50  ;;  %32964 = vmatpush3.bf16.msra.mxu0 %v39310_v10 }
0x13b5   : > { %32833 = vmatprep.subr.bf16.mxu1 %v39254_v6  ;;  %32965 = vmatprep.subr.bf16.mxu0 %v39254_v6 }
0x13b6   : > { %30226 = vmatprep.mubr.msk.f32.mxu1 %vm34583_vm1, %v39101_v9  ;;  %30292 = vmatprep.mubr.msk.f32.mxu0 %vm34583_vm1, %v39101_v9 }
0x13b8   : > { %32835 = vmatpush3.bf16.msra.mxu1 %v36601_v29  ;;  %32967 = vmatpush3.bf16.msra.mxu0 %v39311_v47 }
0x13b9   : > { %32836 = vmatprep.subr.bf16.mxu1 %v39254_v6  ;;  %32968 = vmatprep.subr.bf16.mxu0 %v39254_v6 }
0x13bb   : > { %30227 = vmatmul.mubr.f32.vlgmr.msra.gmra.mrb[78].mxu1 %v37792_v26  ;;  %30293 = vmatmul.mubr.f32.vlgmr.msra.gmra.mrb[44].mxu0 %v37792_v26 }
0x13bc   : > { %32838 = vmatpush3.bf16.msra.mxu1 %v36581_v7  ;;  %32970 = vmatpush3.bf16.msra.mxu0 %v35784_v43 }
0x13bd   : > { %32839 = vmatprep.subr.bf16.mxu1 %v39254_v6  ;;  %32971 = vmatprep.subr.bf16.mxu0 %v39254_v6 }
0x13be   : > { %30237 = vmatprep.mubr.msk.f32.mxu1 %vm34583_vm1, %v39101_v9  ;;  %30303 = vmatprep.mubr.msk.f32.mxu0 %vm34583_vm1, %v39101_v9 }
0x13c0   : > { %32841 = vmatpush3.bf16.msra.mxu1 %v36591_v59  ;;  %32973 = vmatpush3.bf16.msra.mxu0 %v35812_v24 }
0x13c1   : > { %32842 = vmatprep.subr.bf16.mxu1 %v39254_v6  ;;  %32974 = vmatprep.subr.bf16.mxu0 %v39254_v6 }
0x13c3   : > { %30238 = vmatmul.mubr.f32.vlgmr.msra.gmra.mrb[78].mxu1 %v37795_v23  ;;  %30304 = vmatmul.mubr.f32.vlgmr.msra.gmra.mrb[44].mxu0 %v37795_v23 }
0x13c4   : > { %32844 = vmatpush3.bf16.msra.mxu1 %v36603_v45  ;;  %32976 = vmatpush3.bf16.msra.mxu0 %v39312_v40 }
0x13c5   : > { %32845 = vmatprep.subr.bf16.mxu1 %v39254_v6  ;;  %32977 = vmatprep.subr.bf16.mxu0 %v39254_v6 }
0x13c6   : > { %30248 = vmatprep.mubr.msk.f32.mxu1 %vm34583_vm1, %v39101_v9  ;;  %30314 = vmatprep.mubr.msk.f32.mxu0 %vm34583_vm1, %v39101_v9 }
0x13c8   : > { %32847 = vmatpush3.bf16.msra.mxu1 %v36605_v31  ;;  %32979 = vmatpush3.bf16.msra.mxu0 %v39313_v44 }
0x13c9   : > { %32848 = vmatprep.subr.bf16.mxu1 %v39254_v6  ;;  %32980 = vmatprep.subr.bf16.mxu0 %v39254_v6 }
0x13cb   : > { %30249 = vmatmul.mubr.f32.vlgmr.msra.gmra.mrb[78].mxu1 %v37789_v53  ;;  %30315 = vmatmul.mubr.f32.vlgmr.msra.gmra.mrb[44].mxu0 %v37789_v53 }
0x13cc   : > { %32850 = vmatpush3.bf16.msra.mxu1 %v36581_v7  ;;  %32982 = vmatpush3.bf16.msra.mxu0 %v35784_v43 }
0x13cd   : > { %32851 = vmatprep.subr.bf16.mxu1 %v39254_v6  ;;  %32983 = vmatprep.subr.bf16.mxu0 %v39254_v6 }
0x13ce   : > { %30259 = vmatprep.mubr.msk.f32.mxu1 %vm34583_vm1, %v39101_v9  ;;  %30325 = vmatprep.mubr.msk.f32.mxu0 %vm34583_vm1, %v39101_v9 }
0x13d0   : > { %32853 = vmatpush3.bf16.msra.mxu1 %v36591_v59  ;;  %32985 = vmatpush3.bf16.msra.mxu0 %v35812_v24 }
0x13d1   : > { %32855 = vmatprep.subr.bf16.mxu1 %v39314_v17  ;;  %32986 = vmatprep.subr.bf16.mxu0 %v39254_v6 }
0x13d3   : > { %30260 = vmatmul.mubr.f32.vlgmr.msra.gmra.mrb[78].mxu1 %v37789_v53  ;;  %30326 = vmatmul.mubr.f32.vlgmr.msra.gmra.mrb[44].mxu0 %v37789_v53 }
0x13d4   : > { %32857 = vmatpush1.bf16.msra.mxu1 %v39315_v16  ;;  %32988 = vmatpush3.bf16.msra.mxu0 %v35987_v41 }
0x13d5   : > { %32859 = vmatprep.subr.bf16.mxu1 %v39316_v51  ;;  %32989 = vmatprep.subr.bf16.mxu0 %v39254_v6 }
0x13d6   : > { %19274 = vmatprep.mubr.f32.mxu1 %v39101_v9  ;;  %30360 = vmatprep.mubr.msk.f32.mxu0 %vm34583_vm1, %v39101_v9 }
0x13d8   : > { %32861 = vmatpush1.bf16.msra.mxu1 %v39317_v32  ;;  %32991 = vmatpush3.bf16.msra.mxu0 %v35995_v63 }
0x13d9   : > { %32863 = vmatprep.subr.bf16.mxu1 %v39318_v33  ;;  %32992 = vmatprep.subr.bf16.mxu0 %v39254_v6 }
0x13db   : > { %19280 = vmatmul.mubr.f32.vlgmr.msra.gmra.mrb[2].mxu1 %v37799_v3 }
0x13dc   : > { %32865 = vmatpush1.bf16.msra.mxu1 %v39380_v42  ;;  %32994 = vmatpush3.bf16.msra.mxu0 %v36005_v8 }
0x13dd   : > { %32867 = vmatprep.subr.bf16.mxu1 %v39381_v49  ;;  %32995 = vmatprep.subr.bf16.mxu0 %v39254_v6 }
0x13de   : > { %19390 = vmatprep.mubr.f32.mxu1 %v39101_v9 }
0x13e0   : > { %32869 = vmatpush1.bf16.msra.mxu1 %v39321_v57  ;;  %32997 = vmatpush3.bf16.msra.mxu0 %v36013_v20 }
0x13e1   : > { %32871 = vmatprep.subr.bf16.mxu1 %v39382_v19  ;;  %32998 = vmatprep.subr.bf16.mxu0 %v39254_v6 }
0x13e3   : > { %19392 = vmatmul.mubr.f32.vlgmr.msra.gmra.mrb[2].mxu1 %v37789_v53 }
0x13e4   : > { %32873 = vmatpush1.bf16.msra.mxu1 %v39383_v54  ;;  %33000 = vmatpush3.bf16.msra.mxu0 %v36023_v13 }
0x13e5   : > { %32875 = vmatprep.subr.bf16.mxu1 %v39384_v1  ;;  %33001 = vmatprep.subr.bf16.mxu0 %v39254_v6 }
0x13e6   : > { %19478 = vmatprep.mubr.f32.mxu1 %v39101_v9 }
0x13e8   : > { %32877 = vmatpush1.bf16.msra.mxu1 %v39385_v61  ;;  %33003 = vmatpush3.bf16.msra.mxu0 %v36033_v39 }
0x13e9   : > { %32879 = vmatprep.subr.bf16.mxu1 %v39314_v17  ;;  %33004 = vmatprep.subr.bf16.mxu0 %v39254_v6 }
0x13eb   : > { %19481 = vmatmul.mubr.f32.vlgmr.msra.gmra.mrb[2].mxu1 %v37792_v26 }
0x13ec   : > { %32881 = vmatpush1.bf16.msra.mxu1 %v39315_v16  ;;  %33006 = vmatpush3.bf16.msra.mxu0 %v36043_v18 }
0x13ed   : > { %32883 = vmatprep.subr.bf16.mxu1 %v39316_v51  ;;  %33007 = vmatprep.subr.bf16.mxu0 %v39254_v6 }
0x13ee   : > { %19559 = vmatprep.mubr.f32.mxu1 %v39101_v9 }
0x13f0   : > { %32885 = vmatpush1.bf16.msra.mxu1 %v39317_v32  ;;  %33009 = vmatpush3.bf16.msra.mxu0 %v36055_v62 }
0x13f1   : > { %32887 = vmatprep.subr.bf16.mxu1 %v39326_v0  ;;  %33010 = vmatprep.subr.bf16.mxu0 %v39254_v6 }
0x13f3   : > { %19563 = vmatmul.mubr.f32.vlgmr.msra.gmra.mrb[2].mxu1 %v37795_v23 }
0x13f4   : > { %32889 = vmatpush1.bf16.msra.mxu1 %v39453_v38  ;;  %19657 = vmatprep.mubr.f32.mxu1 %v39101_v9 }
0x13f5   : > { %32891 = vmatprep.subr.bf16.mxu1 %v39524_v58  ;;  %v39575_v58 = vld [vmem:[#allocation89_spill] sm:$0xff] }
0x13f8   : > { %32893 = vmatpush1.bf16.msra.mxu1 %v39525_v22  ;;  %v39574_v22 = vld [vmem:[#allocation88_spill] sm:$0xff] }
0x13f9   : > { %32895 = vmatprep.subr.bf16.mxu1 %v39314_v17 }
0x13fb   : > { %19659 = vmatmul.mubr.f32.vlgmr.msra.gmra.mrb[2].mxu1 %v37789_v53 }
0x13fc   : > { %32897 = vmatpush1.bf16.msra.mxu1 %v39315_v16  ;;  %19737 = vmatprep.mubr.f32.mxu1 %v39101_v9 }
0x13fd   : > { %32899 = vmatprep.subr.bf16.mxu1 %v39316_v51 }
0x1400   : > { %32901 = vmatpush1.bf16.msra.mxu1 %v39317_v32 }
0x1401   : > { %32903 = vmatprep.subr.bf16.mxu1 %v39526_v34 }
0x1403   : > { %19739 = vmatmul.mubr.f32.vlgmr.msra.gmra.mrb[2].mxu1 %v37789_v53 }
0x1404   : > { %32905 = vmatpush1.bf16.msra.mxu1 %v39527_v5  ;;  %19817 = vmatprep.mubr.f32.mxu1 %v39101_v9 }
0x1405   : > { %32907 = vmatprep.subr.bf16.mxu1 %v39528_v11 }
0x1408   : > { %32909 = vmatpush1.bf16.msra.mxu1 %v39529_v25 }
0x1409   : > { %32911 = vmatprep.subr.bf16.mxu1 %v39530_v30 }
0x140b   : > { %19823 = vmatmul.mubr.f32.vlgmr.msra.gmra.mrb[20].mxu1 %v37799_v3  ;;  %v39541_v3 = vld [vmem:[#allocation83_spill] sm:$0xff] }
0x140c   : > { %32913 = vmatpush1.bf16.msra.mxu1 %v39531_v35  ;;  %19933 = vmatprep.mubr.f32.mxu1 %v39101_v9 }
0x140d   : > { %32915 = vmatprep.subr.bf16.mxu1 %v39532_v15 }
0x1410   : > { %32917 = vmatpush1.bf16.msra.mxu1 %v39533_v56 }
0x1411   : > { %32919 = vmatprep.subr.bf16.mxu1 %v39534_v48 }
0x1413   : > { %19935 = vmatmul.mubr.f32.vlgmr.msra.gmra.mrb[20].mxu1 %v37789_v53 }
0x1414   : > { %32921 = vmatpush1.bf16.msra.mxu1 %v39535_v36  ;;  %20021 = vmatprep.mubr.f32.mxu1 %v39101_v9 }
0x1415   : > { %32923 = vmatprep.subr.bf16.mxu1 %v39536_v28 }
0x1418   : > { %32925 = vmatpush1.bf16.msra.mxu1 %v39537_v21  ;;  %v39547_v21 = vld [vmem:[#allocation66_spill] sm:$0xff] }
0x1419   : > { %32927 = vmatprep.subr.bf16.mxu1 %v39526_v34 }
0x141b   : > { %20024 = vmatmul.mubr.f32.vlgmr.msra.gmra.mrb[20].mxu1 %v37792_v26  ;;  %v39542_v26 = vld [vmem:[#allocation84_spill] sm:$0xff] }
0x141c   : > { %32929 = vmatpush1.bf16.msra.mxu1 %v39527_v5  ;;  %20102 = vmatprep.mubr.f32.mxu1 %v39101_v9 }
0x141d   : > { %32931 = vmatprep.subr.bf16.mxu1 %v39528_v11 }
0x1420   : > { %32933 = vmatpush1.bf16.msra.mxu1 %v39529_v25 }
0x1421   : > { %32935 = vmatprep.subr.bf16.mxu1 %v39538_v46 }
0x1423   : > { %20106 = vmatmul.mubr.f32.vlgmr.msra.gmra.mrb[20].mxu1 %v37795_v23  ;;  %v39543_v23 = vld [vmem:[#allocation85_spill] sm:$0xff] }
0x1424   : > { %32937 = vmatpush1.bf16.msra.mxu1 %v39539_v14  ;;  %20200 = vmatprep.mubr.f32.mxu1 %v39101_v9 }
0x1425   : > { %32939 = vmatprep.subr.bf16.mxu1 %v39540_v60  ;;  %v39545_v60 = vld [vmem:[#allocation87_spill] sm:$0xff] }
0x1428   : > { %32941 = vmatpush1.bf16.msra.mxu1 %v39541_v3  ;;  %v39544_v3 = vld [vmem:[#allocation86_spill] sm:$0xff] }
0x1429   : > { %32943 = vmatprep.subr.bf16.mxu1 %v39526_v34 }
0x142b   : > { %20202 = vmatmul.mubr.f32.vlgmr.msra.gmra.mrb[20].mxu1 %v37789_v53 }
0x142c   : > { %32945 = vmatpush1.bf16.msra.mxu1 %v39527_v5  ;;  %20280 = vmatprep.mubr.f32.mxu1 %v39101_v9 }
0x142d   : > { %32947 = vmatprep.subr.bf16.mxu1 %v39528_v11 }
0x1430   : > { %32949 = vmatpush1.bf16.msra.mxu1 %v39529_v25 }
0x1431   : > { %33131 = vmatprep.subr.bf16.mxu1 %v36408_v27 }
0x1433   : > { %20282 = vmatmul.mubr.f32.vlgmr.msra.gmra.mrb[20].mxu1 %v37789_v53  ;;  %v39548_v53 = vld [vmem:[#allocation56_spill] sm:$0xff] }
0x1434   : > { %33133 = vmatpush1.bf16.msra.mxu1 %v39542_v26  ;;  %21511 = vmatprep.mubr.f32.mxu1 %v39101_v9 }
0x1435   : > { %33135 = vmatprep.subr.bf16.mxu1 %v39543_v23 }
0x1438   : > { %33137 = vmatpush1.bf16.msra.mxu1 %v39544_v3 }
0x1439   : > { %33139 = vmatprep.subr.bf16.mxu1 %v39545_v60 }
0x14a6   : > { %v37968_v14 = vpop.f32.mrb[78].mxu1  ;;  %v20769_v46 = vpop.f32.mrb[44].mxu0 }
0x14a7   : > { %39546 = vst [vmem:[#allocation43_spill] sm:$0xff] %v37968_v14  ;;  %v37971_v28 = vadd.f32 %v39547_v21, %v20769_v46  ;;  %v30261_v36 = vpop.f32.mrb[79].mxu1  ;;  %v30327_v48 = vpop.f32.mrb[45].mxu0  ;;  %v39549_v46 = vld [vmem:[#allocation36_spill] sm:$0xff] }
0x14d6   : > { %v19740_v56 = vpop.f32.mrb[2].mxu1 }
0x14d7   : > { %v33664_v15 = vadd.f32 %v19740_v56, %v39548_v53  ;;  %v37974_v35 = vpop.f32.mrb[3].mxu1 }
0x14d9   : > { %20778 = vmax.xlane.f32.xlu0 %v33664_v15 }
0x1566   : > { %v20779_v30 = vpop.xlane.xlu0 %20778 }
0x1567   : > { %v20780_v25 = vsub.f32 %v33664_v15, %v20779_v30  ;;  %v39552_v30 = vld [vmem:[#allocation16_spill] sm:$0xff]  ;;  %v39553_v15 = vld [vmem:[#allocation47_spill] sm:$0xff] }
0x1569   : > { %v20781_v11 = vmul.f32 1.442695, %v20780_v25  ;;  %v39551_v25 = vld [vmem:[#allocation26_spill] sm:$0xff] }
0x156b   : > { %34432 = vpow2.f32 %v20781_v11  ;;  %v39550_v11 = vld [vmem:[#allocation10_spill] sm:$0xff] }
0x1575   : > { %v37976_v5 = vpop.eup %34432 }
0x1576   : > { %20783 = vadd.xlane.f32.xlu1 %v37976_v5  ;;  %v37980_v14 = vand.u32 4294901760, %v37976_v5 }
0x1578   : > { %v20867_v48 = vsub.f32 %v37976_v5, %v37980_v14 }
0x157a   : > { %v20868_v36 = vand.u32 4294901760, %v20867_v48 }
0x157c   : > { %v20869_v21 = vsub.f32 %v20867_v48, %v20868_v36 }
0x157e   : > { %v20870_v56 = vand.u32 4294901760, %v20869_v21  ;;  %v39554_v21 = vld [vmem:[#allocation49_spill] sm:$0xff] }
0x1580   : > { %30361 = vmatmul.mubr.f32.vlgmr.msra.gmra.mrb[46].mxu0 %v20870_v56  ;;  %v39555_v56 = vld [vmem:[#allocation52_spill] sm:$0xff] }
0x1581   : > { %33012 = vmatpush3.bf16.msra.mxu0 %v39549_v46  ;;  %30395 = vmatprep.mubr.msk.f32.mxu0 %vm34583_vm1, %v39101_v9 }
0x1582   : > { %33013 = vmatprep.subr.bf16.mxu0 %v39254_v6 }
0x1585   : > { %33015 = vmatpush3.bf16.msra.mxu0 %v39550_v11  ;;  %v39556_v11 = vld [vmem:[#allocation54_spill] sm:$0xff] }
0x1586   : > { %33016 = vmatprep.subr.bf16.mxu0 %v39254_v6 }
0x1589   : > { %33018 = vmatpush3.bf16.msra.mxu0 %v39551_v25  ;;  %v39563_v25 = vld [vmem:[#allocation48_spill] sm:$0xff] }
0x158a   : > { %33019 = vmatprep.subr.bf16.mxu0 %v39254_v6 }
0x158d   : > { %33021 = vmatpush3.bf16.msra.mxu0 %v39552_v30  ;;  %v39557_v30 = vld [vmem:[#allocation23_spill] sm:$0xff] }
0x158e   : > { %33022 = vmatprep.subr.bf16.mxu0 %v39254_v6 }
0x1591   : > { %33024 = vmatpush3.bf16.msra.mxu0 %v39553_v15  ;;  %v39561_v15 = vld [vmem:[#allocation13_spill] sm:$0xff] }
0x1592   : > { %33025 = vmatprep.subr.bf16.mxu0 %v39254_v6 }
0x1595   : > { %33027 = vmatpush3.bf16.msra.mxu0 %v39554_v21  ;;  %v39558_v21 = vld [vmem:[#allocation41_spill] sm:$0xff] }
0x1596   : > { %33028 = vmatprep.subr.bf16.mxu0 %v39254_v6 }
0x1599   : > { %33030 = vmatpush3.bf16.msra.mxu0 %v39555_v56  ;;  %v39559_v56 = vld [vmem:[#allocation45_spill] sm:$0xff] }
0x159a   : > { %33031 = vmatprep.subr.bf16.mxu0 %v39254_v6 }
0x159d   : > { %33033 = vmatpush3.bf16.msra.mxu0 %v39556_v11  ;;  %v39560_v11 = vld [vmem:[#allocation14_spill] sm:$0xff] }
0x159e   : > { %33034 = vmatprep.subr.bf16.mxu0 %v39254_v6 }
0x15a0   : > { %30396 = vmatmul.mubr.f32.vlgmr.msra.gmra.mrb[46].mxu0 %v37980_v14 }
0x15a1   : > { %33036 = vmatpush3.bf16.msra.mxu0 %v39557_v30  ;;  %30430 = vmatprep.mubr.msk.f32.mxu0 %vm34583_vm1, %v39101_v9  ;;  %v39562_v30 = vld [vmem:[#allocation20_spill] sm:$0xff] }
0x15a2   : > { %33037 = vmatprep.subr.bf16.mxu0 %v39254_v6 }
0x15a5   : > { %33039 = vmatpush3.bf16.msra.mxu0 %v39558_v21  ;;  %v39564_v21 = vld [vmem:[#allocation51_spill] sm:$0xff] }
0x15a6   : > { %33040 = vmatprep.subr.bf16.mxu0 %v39254_v6 }
0x15a9   : > { %33042 = vmatpush3.bf16.msra.mxu0 %v39559_v56 }
0x15aa   : > { %33043 = vmatprep.subr.bf16.mxu0 %v39254_v6 }
0x15ad   : > { %33045 = vmatpush3.bf16.msra.mxu0 %v39560_v11 }
0x15ae   : > { %33046 = vmatprep.subr.bf16.mxu0 %v39254_v6 }
0x15b1   : > { %33048 = vmatpush3.bf16.msra.mxu0 %v39561_v15  ;;  %v39571_v15 = vld [vmem:[#allocation50_spill] sm:$0xff] }
0x15b2   : > { %33049 = vmatprep.subr.bf16.mxu0 %v39254_v6 }
0x15b5   : > { %33051 = vmatpush3.bf16.msra.mxu0 %v39562_v30  ;;  %v39568_v30 = vld [vmem:[#allocation19_spill] sm:$0xff] }
0x15b6   : > { %33052 = vmatprep.subr.bf16.mxu0 %v39254_v6 }
0x15b9   : > { %33054 = vmatpush3.bf16.msra.mxu0 %v39563_v25  ;;  %v39567_v25 = vld [vmem:[#allocation12_spill] sm:$0xff] }
0x15ba   : > { %33055 = vmatprep.subr.bf16.mxu0 %v39254_v6 }
0x15bd   : > { %33057 = vmatpush3.bf16.msra.mxu0 %v39564_v21  ;;  %v39566_v21 = vld [vmem:[#allocation44_spill] sm:$0xff] }
0x15be   : > { %33058 = vmatprep.subr.bf16.mxu0 %v39254_v6 }
0x15c0   : > { %30431 = vmatmul.mubr.f32.vlgmr.msra.gmra.mrb[46].mxu0 %v20867_v48  ;;  %v39565_v48 = vld [vmem:[#allocation40_spill] sm:$0xff] }
0x15c1   : > { %33060 = vmatpush3.bf16.msra.mxu0 %v35987_v41  ;;  %30465 = vmatprep.mubr.msk.f32.mxu0 %vm34583_vm1, %v39101_v9 }
0x15c2   : > { %33061 = vmatprep.subr.bf16.mxu0 %v39254_v6 }
0x15c5   : > { %33063 = vmatpush3.bf16.msra.mxu0 %v35995_v63 }
0x15c6   : > { %33064 = vmatprep.subr.bf16.mxu0 %v39254_v6 }
0x15c9   : > { %33066 = vmatpush3.bf16.msra.mxu0 %v36005_v8 }
0x15ca   : > { %33067 = vmatprep.subr.bf16.mxu0 %v39254_v6 }
0x15cd   : > { %33069 = vmatpush3.bf16.msra.mxu0 %v36013_v20 }
0x15ce   : > { %33070 = vmatprep.subr.bf16.mxu0 %v39254_v6 }
0x15d1   : > { %33072 = vmatpush3.bf16.msra.mxu0 %v36023_v13 }
0x15d2   : > { %33073 = vmatprep.subr.bf16.mxu0 %v39254_v6 }
0x15d5   : > { %33075 = vmatpush3.bf16.msra.mxu0 %v36033_v39 }
0x15d6   : > { %33076 = vmatprep.subr.bf16.mxu0 %v39254_v6 }
0x15d9   : > { %33078 = vmatpush3.bf16.msra.mxu0 %v36043_v18 }
0x15da   : > { %33079 = vmatprep.subr.bf16.mxu0 %v39254_v6 }
0x15dd   : > { %33081 = vmatpush3.bf16.msra.mxu0 %v36055_v62 }
0x15de   : > { %33082 = vmatprep.subr.bf16.mxu0 %v39254_v6 }
0x15e0   : > { %30466 = vmatmul.mubr.f32.vlgmr.msra.gmra.mrb[46].mxu0 %v20868_v36  ;;  %v39569_v36 = vld [vmem:[#allocation15_spill] sm:$0xff] }
0x15e1   : > { %33084 = vmatpush3.bf16.msra.mxu0 %v39565_v48  ;;  %30500 = vmatprep.mubr.msk.f32.mxu0 %vm34583_vm1, %v39101_v9  ;;  %v39570_v48 = vld [vmem:[#allocation29_spill] sm:$0xff] }
0x15e2   : > { %33085 = vmatprep.subr.bf16.mxu0 %v39254_v6 }
0x15e5   : > { %33087 = vmatpush3.bf16.msra.mxu0 %v39566_v21  ;;  %v39572_v21 = vld [vmem:[#allocation53_spill] sm:$0xff] }
0x15e6   : > { %33088 = vmatprep.subr.bf16.mxu0 %v39254_v6 }
0x15e9   : > { %33090 = vmatpush3.bf16.msra.mxu0 %v39567_v25 }
0x15ea   : > { %33091 = vmatprep.subr.bf16.mxu0 %v39254_v6 }
0x15ed   : > { %33093 = vmatpush3.bf16.msra.mxu0 %v39568_v30 }
0x15ee   : > { %33094 = vmatprep.subr.bf16.mxu0 %v39254_v6 }
0x15f1   : > { %33096 = vmatpush3.bf16.msra.mxu0 %v39569_v36 }
0x15f2   : > { %33097 = vmatprep.subr.bf16.mxu0 %v39254_v6 }
0x15f5   : > { %33099 = vmatpush3.bf16.msra.mxu0 %v39570_v48 }
0x15f6   : > { %33100 = vmatprep.subr.bf16.mxu0 %v39254_v6 }
0x15f9   : > { %33102 = vmatpush3.bf16.msra.mxu0 %v39571_v15 }
0x15fa   : > { %33103 = vmatprep.subr.bf16.mxu0 %v39254_v6 }
0x15fd   : > { %33105 = vmatpush3.bf16.msra.mxu0 %v39572_v21 }
0x15fe   : > { %33106 = vmatprep.subr.bf16.mxu0 %v39254_v6 }
0x1600   : > { %30501 = vmatmul.mubr.f32.vlgmr.msra.gmra.mrb[46].mxu0 %v37980_v14 }
0x1601   : > { %33108 = vmatpush3.bf16.msra.mxu0 %v35987_v41  ;;  %30535 = vmatprep.mubr.msk.f32.mxu0 %vm34583_vm1, %v39101_v9 }
0x1602   : > { %33109 = vmatprep.subr.bf16.mxu0 %v39254_v6 }
0x1603   : > { %v20784_v48 = vpop.xlane.xlu1 %20783 }
0x1604   : > { %34434 = vrcp.f32 %v20784_v48 }
0x1605   : > { %33111 = vmatpush3.bf16.msra.mxu0 %v35995_v63 }
0x1606   : > { %33112 = vmatprep.subr.bf16.mxu0 %v39254_v6 }
0x1609   : > { %33114 = vmatpush3.bf16.msra.mxu0 %v36005_v8 }
0x160a   : > { %33115 = vmatprep.subr.bf16.mxu0 %v39254_v6 }
0x160d   : > { %33117 = vmatpush3.bf16.msra.mxu0 %v36013_v20 }
0x160e   : > { %v34435_v21 = vpop.eup %34434  ;;  %33118 = vmatprep.subr.bf16.mxu0 %v39254_v6 }
0x160f   : > { %v21427_v15 = vmul.f32 %v34435_v21, %v20784_v48 }
0x1611   : > { %v21428_v36 = vsub.f32 2.0, %v21427_v15  ;;  %33120 = vmatpush3.bf16.msra.mxu0 %v36023_v13 }
0x1612   : > { %33121 = vmatprep.subr.bf16.mxu0 %v39254_v6 }
0x1613   : > { %v21429_v30 = vmul.f32 %v34435_v21, %v21428_v36 }
0x1615   : > { %33123 = vmatpush3.bf16.msra.mxu0 %v36033_v39  ;;  %v21430_v25 = vmul.f32 %v37976_v5, %v21429_v30 }
0x1616   : > { %33124 = vmatprep.subr.bf16.mxu0 %v39254_v6 }
0x1617   : > { %26990 = vst [vmem:[%s36378_s25 + $0x20] sm:$0xff] %v21430_v25  ;;  %v39573_v25 = vld [vmem:[#allocation57_spill] sm:$0xff] }
0x1618   : > { %v33665_v15 = vadd.f32 %v37974_v35, %v39573_v25  ;;  %v39576_v35 = vld [vmem:[#allocation90_spill] sm:$0xff] }
0x1619   : > { %33126 = vmatpush3.bf16.msra.mxu0 %v36043_v18 }
0x161a   : > { %33127 = vmatprep.subr.bf16.mxu0 %v39254_v6 }
0x161d   : > { %33129 = vmatpush3.bf16.msra.mxu0 %v36055_v62 }
0x161e   : > { %33346 = vmatprep.subr.bf16.mxu0 %v39254_v6 }
0x1620   : > { %30536 = vmatmul.mubr.f32.vlgmr.msra.gmra.mrb[46].mxu0 %v37980_v14 }
0x1621   : > { %33348 = vmatpush3.bf16.msra.mxu0 %v35784_v43  ;;  %30678 = vmatprep.mubr.msk.f32.mxu0 %vm34583_vm1, %v39101_v9 }
0x1622   : > { %33349 = vmatprep.subr.bf16.mxu0 %v39254_v6 }
0x1625   : > { %33351 = vmatpush3.bf16.msra.mxu0 %v35812_v24 }
0x1626   : > { %33352 = vmatprep.subr.bf16.mxu0 %v39254_v6 }
0x16f3   : > { %v21422_v5 = vpop.f32.mrb[46].mxu0 }
0x16f4   : > { %v21433_v21 = vmul.f32 %v21429_v30, %v21422_v5  ;;  %v30537_v48 = vpop.f32.mrb[47].mxu0  ;;  %v39577_v30 = vld [vmem:[#allocation91_spill] sm:$0xff]  ;;  %v39579_v5 = vld [vmem:[#allocation93_spill] sm:$0xff] }
0x16f5   : > { %v39583_v48 = vld [vmem:[#allocation97_spill] sm:$0xff] }
0x16f6   : > { %v21434_v36 = vadd.f32 %v33665_v15, %v21433_v21  ;;  %v39581_v15 = vld [vmem:[#allocation95_spill] sm:$0xff]  ;;  %v39582_v21 = vld [vmem:[#allocation96_spill] sm:$0xff] }
0x16f8   : > { %v21435_v11 = vmax.f32 %v21434_v36, 0.0  ;;  %v39584_v36 = vld [vmem:[#allocation98_spill] sm:$0xff] }
0x16fa   : > { %v21437_v14 = vsel %vm450_vm0, %v21435_v11, 0  ;;  %v39578_v11 = vld [vmem:[#allocation92_spill] sm:$0xff] }
0x16fb   : > { %v38088_v56 = vand.u32 4294901760, %v21437_v14 }
0x16fd   : > { %v21513_v46 = vsub.f32 %v21437_v14, %v38088_v56  ;;  %v39585_v14 = vld [vmem:[#allocation99_spill] sm:$0xff] }
0x16ff   : > { %v21514_v53 = vand.u32 4294901760, %v21513_v46 }
0x1701   : > { %v21515_v60 = vsub.f32 %v21513_v46, %v21514_v53 }
0x1703   : > { %v21516_v34 = vand.u32 4294901760, %v21515_v60  ;;  %v39580_v60 = vld [vmem:[#allocation94_spill] sm:$0xff] }
0x1705   : > { %21517 = vmatmul.mubr.f32.vlgmr.msra.gmra.mrb[20].mxu1 %v21516_v34 }
0x1706   : > { %33141 = vmatpush1.bf16.msra.mxu1 %v39574_v22  ;;  %21627 = vmatprep.mubr.f32.mxu1 %v39101_v9 }
0x1707   : > { %33143 = vmatprep.subr.bf16.mxu1 %v39575_v58 }
0x170a   : > { %33145 = vmatpush1.bf16.msra.mxu1 %v39576_v35 }
0x170b   : > { %33147 = vmatprep.subr.bf16.mxu1 %v39577_v30 }
0x170d   : > { %21629 = vmatmul.mubr.f32.vlgmr.msra.gmra.mrb[20].mxu1 %v38088_v56 }
0x170e   : > { %33149 = vmatpush1.bf16.msra.mxu1 %v39578_v11  ;;  %21715 = vmatprep.mubr.f32.mxu1 %v39101_v9 }
0x170f   : > { %33151 = vmatprep.subr.bf16.mxu1 %v39579_v5 }
0x1712   : > { %33153 = vmatpush1.bf16.msra.mxu1 %v39580_v60 }
0x1713   : > { %33155 = vmatprep.subr.bf16.mxu1 %v36408_v27 }
0x1715   : > { %21718 = vmatmul.mubr.f32.vlgmr.msra.gmra.mrb[20].mxu1 %v21513_v46 }
0x1716   : > { %33157 = vmatpush1.bf16.msra.mxu1 %v39542_v26  ;;  %21796 = vmatprep.mubr.f32.mxu1 %v39101_v9 }
0x1717   : > { %33159 = vmatprep.subr.bf16.mxu1 %v39543_v23 }
0x171a   : > { %33161 = vmatpush1.bf16.msra.mxu1 %v39544_v3 }
0x171b   : > { %33163 = vmatprep.subr.bf16.mxu1 %v39581_v15  ;;  %v39589_v15 = vld [vmem:[#allocation103_spill] sm:$0xff] }
0x171d   : > { %21800 = vmatmul.mubr.f32.vlgmr.msra.gmra.mrb[20].mxu1 %v21514_v53 }
0x171e   : > { %33165 = vmatpush1.bf16.msra.mxu1 %v39582_v21  ;;  %21894 = vmatprep.mubr.f32.mxu1 %v39101_v9  ;;  %v39588_v21 = vld [vmem:[#allocation102_spill] sm:$0xff] }
0x171f   : > { %33167 = vmatprep.subr.bf16.mxu1 %v39583_v48  ;;  %v39587_v48 = vld [vmem:[#allocation101_spill] sm:$0xff] }
0x1722   : > { %33169 = vmatpush1.bf16.msra.mxu1 %v39584_v36  ;;  %v39586_v36 = vld [vmem:[#allocation100_spill] sm:$0xff] }
0x1723   : > { %33171 = vmatprep.subr.bf16.mxu1 %v36408_v27 }
0x1725   : > { %21896 = vmatmul.mubr.f32.vlgmr.msra.gmra.mrb[20].mxu1 %v38088_v56 }
0x1726   : > { %33173 = vmatpush1.bf16.msra.mxu1 %v39542_v26  ;;  %21974 = vmatprep.mubr.f32.mxu1 %v39101_v9 }
0x1727   : > { %33175 = vmatprep.subr.bf16.mxu1 %v39543_v23 }
0x172a   : > { %33177 = vmatpush1.bf16.msra.mxu1 %v39544_v3 }
0x172b   : > { %33178 = vmatprep.subr.bf16.mxu1 %v39254_v6 }
0x172d   : > { %21976 = vmatmul.mubr.f32.vlgmr.msra.gmra.mrb[20].mxu1 %v38088_v56 }
0x172e   : > { %33180 = vmatpush3.bf16.msra.mxu1 %v39585_v14  ;;  %30546 = vmatprep.mubr.msk.f32.mxu1 %vm34583_vm1, %v39101_v9 }
0x172f   : > { %33181 = vmatprep.subr.bf16.mxu1 %v39254_v6 }
0x1732   : > { %33183 = vmatpush3.bf16.msra.mxu1 %v39586_v36 }
0x1733   : > { %33184 = vmatprep.subr.bf16.mxu1 %v39254_v6 }
0x1735   : > { %30547 = vmatmul.mubr.f32.vlgmr.msra.gmra.mrb[80].mxu1 %v21516_v34  ;;  %v39590_v34 = vld [vmem:[#allocation104_spill] sm:$0xff] }
0x1736   : > { %33186 = vmatpush3.bf16.msra.mxu1 %v39587_v48  ;;  %30557 = vmatprep.mubr.msk.f32.mxu1 %vm34583_vm1, %v39101_v9 }
0x1737   : > { %33187 = vmatprep.subr.bf16.mxu1 %v39254_v6 }
0x173a   : > { %33189 = vmatpush3.bf16.msra.mxu1 %v39588_v21 }
0x173b   : > { %33190 = vmatprep.subr.bf16.mxu1 %v39254_v6 }
0x173d   : > { %30558 = vmatmul.mubr.f32.vlgmr.msra.gmra.mrb[82].mxu1 %v38088_v56 }
0x173e   : > { %33192 = vmatpush3.bf16.msra.mxu1 %v39589_v15  ;;  %30568 = vmatprep.mubr.msk.f32.mxu1 %vm34583_vm1, %v39101_v9  ;;  %v39591_v15 = vld [vmem:[#allocation105_spill] sm:$0xff] }
0x173f   : > { %33193 = vmatprep.subr.bf16.mxu1 %v39254_v6 }
0x1742   : > { %33195 = vmatpush3.bf16.msra.mxu1 %v39590_v34 }
0x1743   : > { %33196 = vmatprep.subr.bf16.mxu1 %v39254_v6 }
0x1745   : > { %30569 = vmatmul.mubr.f32.vlgmr.msra.gmra.mrb[84].mxu1 %v21513_v46  ;;  %v39592_v46 = vld [vmem:[#allocation106_spill] sm:$0xff] }
0x1746   : > { %33198 = vmatpush3.bf16.msra.mxu1 %v39585_v14  ;;  %30579 = vmatprep.mubr.msk.f32.mxu1 %vm34583_vm1, %v39101_v9 }
0x1747   : > { %33199 = vmatprep.subr.bf16.mxu1 %v39254_v6 }
0x174a   : > { %33201 = vmatpush3.bf16.msra.mxu1 %v39586_v36 }
0x174b   : > { %33202 = vmatprep.subr.bf16.mxu1 %v39254_v6 }
0x174d   : > { %30580 = vmatmul.mubr.f32.vlgmr.msra.gmra.mrb[86].mxu1 %v21514_v53 }
0x174e   : > { %33204 = vmatpush3.bf16.msra.mxu1 %v39591_v15  ;;  %30590 = vmatprep.mubr.msk.f32.mxu1 %vm34583_vm1, %v39101_v9 }
0x174f   : > { %33205 = vmatprep.subr.bf16.mxu1 %v39254_v6 }
0x1752   : > { %33207 = vmatpush3.bf16.msra.mxu1 %v39592_v46  ;;  %v39593_v46 = vld [vmem:[#allocation55_spill] sm:$0xff] }
0x1753   : > { %33208 = vmatprep.subr.bf16.mxu1 %v39254_v6 }
0x1755   : > { %30591 = vmatmul.mubr.f32.vlgmr.msra.gmra.mrb[88].mxu1 %v38088_v56 }
0x1756   : > { %33210 = vmatpush3.bf16.msra.mxu1 %v39585_v14  ;;  %30601 = vmatprep.mubr.msk.f32.mxu1 %vm34583_vm1, %v39101_v9  ;;  %v39594_v14 = vld [vmem:[#allocation107_spill] sm:$0xff] }
0x1757   : > { %33211 = vmatprep.subr.bf16.mxu1 %v39254_v6 }
0x175a   : > { %33213 = vmatpush3.bf16.msra.mxu1 %v39586_v36 }
0x175b   : > { %33214 = vmatprep.subr.bf16.mxu1 %v39254_v6 }
0x175d   : > { %30602 = vmatmul.mubr.f32.vlgmr.msra.gmra.mrb[90].mxu1 %v38088_v56 }
0x175e   : > { %33216 = vmatpush3.bf16.msra.mxu1 %v36581_v7  ;;  %30612 = vmatprep.mubr.msk.f32.mxu1 %vm34583_vm1, %v39101_v9 }
0x175f   : > { %33217 = vmatprep.subr.bf16.mxu1 %v39254_v6 }
0x1762   : > { %33219 = vmatpush3.bf16.msra.mxu1 %v36591_v59 }
0x1763   : > { %33220 = vmatprep.subr.bf16.mxu1 %v39254_v6 }
0x1800   : > { %v21977_v53 = vpop.f32.mrb[20].mxu1 }
0x1801   : > { %v33685_v15 = vadd.f32 %v39593_v46, %v21977_v53  ;;  %v21979_v34 = vpop.f32.mrb[21].mxu1 }
0x1802   : > { %v33687_v58 = vadd.f32 %v36624_v4, %v21979_v34 }
0x1803   : > { %v26991_v21 = vmul.f32 -1.442695, %v33685_v15 }
0x1804   : > { %v26992_v53 = vmul.f32 -1.442695, %v33687_v58 }
0x1805   : > { %34436 = vpow2.f32 %v26991_v21 }
0x1808   : > { %v22057_v48 = vpop.f32.mrb[80].mxu1 }
0x1809   : > { %v30548_v36 = vpop.f32.mrb[81].mxu1  ;;  %v22058_v60 = vadd.f32 %v22057_v48, %v39594_v14 }
0x180f   : > { %v34437_v56 = vpop.eup %34436 }
0x1810   : > { %v22471_v5 = vadd.f32 1.0, %v34437_v56  ;;  %v22148_v11 = vpop.f32.mrb[82].mxu1 }
0x1811   : > { %v22149_v30 = vadd.f32 %v22148_v11, %v22058_v60  ;;  %v30559_v35 = vpop.f32.mrb[83].mxu1 }
0x1812   : > { %34438 = vrcp.f32 %v22471_v5 }
0x1813   : > { %34440 = vpow2.f32 %v26992_v53 }
0x1818   : > { %v22228_v22 = vpop.f32.mrb[84].mxu1 }
0x1819   : > { %v22229_v25 = vadd.f32 %v22228_v22, %v22149_v30  ;;  %v30570_v3 = vpop.f32.mrb[85].mxu1 }
0x181c   : > { %v34439_v23 = vpop.eup %34438 }
0x181d   : > { %v22481_v15 = vmul.f32 %v34439_v23, %v37971_v28  ;;  %v34441_v14 = vpop.eup %34440 }
0x181e   : > { %v22478_v11 = vadd.f32 1.0, %v34441_v14 }
0x1820   : > { %v22305_v21 = vpop.f32.mrb[86].mxu1  ;;  %34442 = vrcp.f32 %v22478_v11 }
0x1821   : > { %v22306_v36 = vadd.f32 %v22305_v21, %v22229_v25  ;;  %v30581_v46 = vpop.f32.mrb[87].mxu1 }
0x1828   : > { %v22388_v26 = vpop.f32.mrb[88].mxu1 }
0x1829   : > { %v22389_v48 = vadd.f32 %v22388_v26, %v22306_v36  ;;  %v30592_v56 = vpop.f32.mrb[89].mxu1  ;;  %v39617_v36 = vld [vmem:[#allocation65_spill] sm:$0xff] }
0x182a   : > { %v34443_v22 = vpop.eup %34442 }
0x182b   : > { %v22484_v3 = vsub.f32 1.0, %v34443_v22  ;;  %v22486_v28 = vmul.f32 %v34443_v22, %v37785_v2  ;;  %v38361_v22 = vld [vmem:[%s38734_s6 + $0x8] ss:$0 sm:$0xff] }
0x1830   : > { %v22463_v35 = vpop.f32.mrb[90].mxu1 }
0x1831   : > { %v22464_v5 = vadd.f32 %v22463_v35, %v22389_v48  ;;  %v30603_v60 = vpop.f32.mrb[91].mxu1 }
0x1833   : > { %v22482_v34 = vadd.f32 %v22481_v15, %v22464_v5  ;;  %v39618_v5 = vld [vmem:[#allocation56_spill] sm:$0xff] }
0x1835   : > { %34444 = vtanh.f32 %v22482_v34 }
0x183f   : > { %v34445_v58 = vpop.eup %34444 }
0x1840   : > { %v22485_v23 = vmul.f32 %v34445_v58, %v22484_v3  ;;  %v39619_v3 = vld [vmem:[#allocation67_spill] sm:$0xff] }
0x1841   : > { %v38365_v58 = vadd.f32 %v38361_v22, %v39619_v3  ;;  %v39630_v3 = vld [vmem:[#allocation54_spill] sm:$0xff] }
0x1842   : > { %v38169_v30 = vadd.f32 %v22486_v28, %v22485_v23  ;;  %v39620_v28 = vld [vmem:[#allocation38_spill] sm:$0xff] }
0x1843   : > { %v38370_v23 = vadd.f32 %v38361_v22, %v39620_v28  ;;  %v39631_v28 = vld [vmem:[#allocation23_spill] sm:$0xff] }
0x1844   : > { %v22489_v26 = vsel %vm450_vm0, %v38169_v30, 0 }
0x1845   : > { %v38173_v25 = vand.u32 4294901760, %v22489_v26 }
0x1847   : > { %v38176_v14 = vsub.f32 %v22489_v26, %v38173_v25 }
0x1849   : > { %v38179_v46 = vand.u32 4294901760, %v38176_v14 }
0x184b   : > { %v22563_v53 = vsub.f32 %v38176_v14, %v38179_v46 }
0x184d   : > { %v38183_v15 = vand.u32 4294901760, %v22563_v53 }
0x184f   : > { %30613 = vmatmul.mubr.f32.vlgmr.msra.gmra.mrb[92].mxu1 %v38183_v15  ;;  %30679 = vmatmul.mubr.f32.vlgmr.msra.gmra.mrb[48].mxu0 %v38183_v15 }
0x1850   : > { %33222 = vmatpush3.bf16.msra.mxu1 %v36595_v12  ;;  %33354 = vmatpush3.bf16.msra.mxu0 %v39308_v37  ;;  %v39597_v37 = vld [vmem:[#allocation68_spill] sm:$0xff] }
0x1851   : > { %33223 = vmatprep.subr.bf16.mxu1 %v39254_v6  ;;  %33355 = vmatprep.subr.bf16.mxu0 %v39254_v6 }
0x1852   : > { %30623 = vmatprep.mubr.msk.f32.mxu1 %vm34583_vm1, %v39101_v9  ;;  %30689 = vmatprep.mubr.msk.f32.mxu0 %vm34583_vm1, %v39101_v9 }
0x1854   : > { %33225 = vmatpush3.bf16.msra.mxu1 %v36597_v52  ;;  %33357 = vmatpush3.bf16.msra.mxu0 %v39309_v55  ;;  %v39598_v55 = vld [vmem:[#allocation69_spill] sm:$0xff] }
0x1855   : > { %33226 = vmatprep.subr.bf16.mxu1 %v39254_v6  ;;  %33358 = vmatprep.subr.bf16.mxu0 %v39254_v6 }
0x1857   : > { %30624 = vmatmul.mubr.f32.vlgmr.msra.gmra.mrb[92].mxu1 %v38173_v25  ;;  %30690 = vmatmul.mubr.f32.vlgmr.msra.gmra.mrb[48].mxu0 %v38173_v25 }
0x1858   : > { %33228 = vmatpush3.bf16.msra.mxu1 %v36599_v50  ;;  %33360 = vmatpush3.bf16.msra.mxu0 %v39310_v10  ;;  %v39599_v10 = vld [vmem:[#allocation70_spill] sm:$0xff] }
0x1859   : > { %33229 = vmatprep.subr.bf16.mxu1 %v39254_v6  ;;  %33361 = vmatprep.subr.bf16.mxu0 %v39254_v6 }
0x185a   : > { %30634 = vmatprep.mubr.msk.f32.mxu1 %vm34583_vm1, %v39101_v9  ;;  %30700 = vmatprep.mubr.msk.f32.mxu0 %vm34583_vm1, %v39101_v9 }
0x185c   : > { %33231 = vmatpush3.bf16.msra.mxu1 %v36601_v29  ;;  %33363 = vmatpush3.bf16.msra.mxu0 %v39311_v47  ;;  %v39600_v47 = vld [vmem:[#allocation71_spill] sm:$0xff] }
0x185d   : > { %33232 = vmatprep.subr.bf16.mxu1 %v39254_v6  ;;  %33364 = vmatprep.subr.bf16.mxu0 %v39254_v6 }
0x185f   : > { %30635 = vmatmul.mubr.f32.vlgmr.msra.gmra.mrb[92].mxu1 %v38176_v14  ;;  %30701 = vmatmul.mubr.f32.vlgmr.msra.gmra.mrb[48].mxu0 %v38176_v14 }
0x1860   : > { %33234 = vmatpush3.bf16.msra.mxu1 %v36581_v7  ;;  %33366 = vmatpush3.bf16.msra.mxu0 %v35784_v43 }
0x1861   : > { %33235 = vmatprep.subr.bf16.mxu1 %v39254_v6  ;;  %33367 = vmatprep.subr.bf16.mxu0 %v39254_v6 }
0x1862   : > { %30645 = vmatprep.mubr.msk.f32.mxu1 %vm34583_vm1, %v39101_v9  ;;  %30711 = vmatprep.mubr.msk.f32.mxu0 %vm34583_vm1, %v39101_v9 }
0x1864   : > { %33237 = vmatpush3.bf16.msra.mxu1 %v36591_v59  ;;  %33369 = vmatpush3.bf16.msra.mxu0 %v35812_v24 }
0x1865   : > { %33238 = vmatprep.subr.bf16.mxu1 %v39254_v6  ;;  %33370 = vmatprep.subr.bf16.mxu0 %v39254_v6 }
0x1867   : > { %30646 = vmatmul.mubr.f32.vlgmr.msra.gmra.mrb[92].mxu1 %v38179_v46  ;;  %30712 = vmatmul.mubr.f32.vlgmr.msra.gmra.mrb[48].mxu0 %v38179_v46 }
0x1868   : > { %33240 = vmatpush3.bf16.msra.mxu1 %v36603_v45  ;;  %33372 = vmatpush3.bf16.msra.mxu0 %v39312_v40  ;;  %v39601_v40 = vld [vmem:[#allocation72_spill] sm:$0xff] }
0x1869   : > { %33241 = vmatprep.subr.bf16.mxu1 %v39254_v6  ;;  %33373 = vmatprep.subr.bf16.mxu0 %v39254_v6 }
0x186a   : > { %30656 = vmatprep.mubr.msk.f32.mxu1 %vm34583_vm1, %v39101_v9  ;;  %30722 = vmatprep.mubr.msk.f32.mxu0 %vm34583_vm1, %v39101_v9 }
0x186c   : > { %33243 = vmatpush3.bf16.msra.mxu1 %v36605_v31  ;;  %33375 = vmatpush3.bf16.msra.mxu0 %v39313_v44  ;;  %v39602_v44 = vld [vmem:[#allocation73_spill] sm:$0xff] }
0x186d   : > { %33244 = vmatprep.subr.bf16.mxu1 %v39254_v6  ;;  %33376 = vmatprep.subr.bf16.mxu0 %v39254_v6 }
0x186f   : > { %30657 = vmatmul.mubr.f32.vlgmr.msra.gmra.mrb[92].mxu1 %v38173_v25  ;;  %30723 = vmatmul.mubr.f32.vlgmr.msra.gmra.mrb[48].mxu0 %v38173_v25 }
0x1870   : > { %33246 = vmatpush3.bf16.msra.mxu1 %v36581_v7  ;;  %33378 = vmatpush3.bf16.msra.mxu0 %v35784_v43  ;;  %v39595_v43 = vld [vmem:[#allocation18_spill] sm:$0xff] }
0x1871   : > { %33247 = vmatprep.subr.bf16.mxu1 %v39254_v6  ;;  %33379 = vmatprep.subr.bf16.mxu0 %v39254_v6 }
0x1872   : > { %30667 = vmatprep.mubr.msk.f32.mxu1 %vm34583_vm1, %v39101_v9  ;;  %30733 = vmatprep.mubr.msk.f32.mxu0 %vm34583_vm1, %v39101_v9 }
0x1874   : > { %33249 = vmatpush3.bf16.msra.mxu1 %v36591_v59  ;;  %33381 = vmatpush3.bf16.msra.mxu0 %v35812_v24  ;;  %v39596_v24 = vld [vmem:[#allocation35_spill] sm:$0xff] }
0x1875   : > { %33251 = vmatprep.subr.bf16.mxu1 %v39314_v17  ;;  %33382 = vmatprep.subr.bf16.mxu0 %v39254_v6 }
0x1877   : > { %30668 = vmatmul.mubr.f32.vlgmr.msra.gmra.mrb[92].mxu1 %v38173_v25  ;;  %30734 = vmatmul.mubr.f32.vlgmr.msra.gmra.mrb[48].mxu0 %v38173_v25 }
0x1878   : > { %33253 = vmatpush1.bf16.msra.mxu1 %v39315_v16  ;;  %33384 = vmatpush3.bf16.msra.mxu0 %v35987_v41 }
0x1879   : > { %33255 = vmatprep.subr.bf16.mxu1 %v39316_v51  ;;  %33385 = vmatprep.subr.bf16.mxu0 %v39254_v6 }
0x187a   : > { %23066 = vmatprep.mubr.f32.mxu1 %v39101_v9  ;;  %30768 = vmatprep.mubr.msk.f32.mxu0 %vm34583_vm1, %v39101_v9 }
0x187c   : > { %33257 = vmatpush1.bf16.msra.mxu1 %v39317_v32  ;;  %33387 = vmatpush3.bf16.msra.mxu0 %v35995_v63 }
0x187d   : > { %33259 = vmatprep.subr.bf16.mxu1 %v39318_v33  ;;  %33388 = vmatprep.subr.bf16.mxu0 %v39254_v6  ;;  %v39607_v33 = vld [vmem:[#allocation78_spill] sm:$0xff] }
0x187f   : > { %23072 = vmatmul.mubr.f32.vlgmr.msra.gmra.mrb[4].mxu1 %v38183_v15 }
0x1880   : > { %33261 = vmatpush1.bf16.msra.mxu1 %v39380_v42  ;;  %33390 = vmatpush3.bf16.msra.mxu0 %v36005_v8  ;;  %v39610_v42 = vld [vmem:[#allocation81_spill] sm:$0xff] }
0x1881   : > { %33263 = vmatprep.subr.bf16.mxu1 %v39381_v49  ;;  %33391 = vmatprep.subr.bf16.mxu0 %v39254_v6  ;;  %v39611_v49 = vld [vmem:[#allocation82_spill] sm:$0xff] }
0x1882   : > { %23182 = vmatprep.mubr.f32.mxu1 %v39101_v9 }
0x1884   : > { %33265 = vmatpush1.bf16.msra.mxu1 %v39321_v57  ;;  %33393 = vmatpush3.bf16.msra.mxu0 %v36013_v20  ;;  %v39609_v57 = vld [vmem:[#allocation80_spill] sm:$0xff] }
0x1885   : > { %33267 = vmatprep.subr.bf16.mxu1 %v39382_v19  ;;  %33394 = vmatprep.subr.bf16.mxu0 %v39254_v6  ;;  %v39612_v19 = vld [vmem:[#allocation83_spill] sm:$0xff] }
0x1887   : > { %23184 = vmatmul.mubr.f32.vlgmr.msra.gmra.mrb[4].mxu1 %v38173_v25 }
0x1888   : > { %33269 = vmatpush1.bf16.msra.mxu1 %v39383_v54  ;;  %33396 = vmatpush3.bf16.msra.mxu0 %v36023_v13  ;;  %v39613_v54 = vld [vmem:[#allocation84_spill] sm:$0xff] }
0x1889   : > { %33271 = vmatprep.subr.bf16.mxu1 %v39384_v1  ;;  %33397 = vmatprep.subr.bf16.mxu0 %v39254_v6  ;;  %v39614_v1 = vld [vmem:[#allocation85_spill] sm:$0xff] }
0x188a   : > { %23270 = vmatprep.mubr.f32.mxu1 %v39101_v9 }
0x188c   : > { %33273 = vmatpush1.bf16.msra.mxu1 %v39385_v61  ;;  %33399 = vmatpush3.bf16.msra.mxu0 %v36033_v39  ;;  %v39615_v61 = vld [vmem:[#allocation86_spill] sm:$0xff] }
0x188d   : > { %33275 = vmatprep.subr.bf16.mxu1 %v39314_v17  ;;  %33400 = vmatprep.subr.bf16.mxu0 %v39254_v6 }
0x188f   : > { %23273 = vmatmul.mubr.f32.vlgmr.msra.gmra.mrb[4].mxu1 %v38176_v14 }
0x1890   : > { %33277 = vmatpush1.bf16.msra.mxu1 %v39315_v16  ;;  %33402 = vmatpush3.bf16.msra.mxu0 %v36043_v18 }
0x1891   : > { %33279 = vmatprep.subr.bf16.mxu1 %v39316_v51  ;;  %33403 = vmatprep.subr.bf16.mxu0 %v39254_v6 }
0x1892   : > { %23351 = vmatprep.mubr.f32.mxu1 %v39101_v9 }
0x1894   : > { %33281 = vmatpush1.bf16.msra.mxu1 %v39317_v32  ;;  %33405 = vmatpush3.bf16.msra.mxu0 %v36055_v62 }
0x1895   : > { %33283 = vmatprep.subr.bf16.mxu1 %v39326_v0  ;;  %33406 = vmatprep.subr.bf16.mxu0 %v39254_v6  ;;  %v39608_v0 = vld [vmem:[#allocation79_spill] sm:$0xff] }
0x1897   : > { %23355 = vmatmul.mubr.f32.vlgmr.msra.gmra.mrb[4].mxu1 %v38179_v46 }
0x1898   : > { %33285 = vmatpush1.bf16.msra.mxu1 %v39453_v38  ;;  %23449 = vmatprep.mubr.f32.mxu1 %v39101_v9  ;;  %v39616_v38 = vld [vmem:[#allocation87_spill] sm:$0xff] }
0x1899   : > { %33287 = vmatprep.subr.bf16.mxu1 %v39595_v43 }
0x189c   : > { %33289 = vmatpush1.bf16.msra.mxu1 %v39596_v24 }
0x189d   : > { %33291 = vmatprep.subr.bf16.mxu1 %v39314_v17  ;;  %v39603_v17 = vld [vmem:[#allocation74_spill] sm:$0xff] }
0x189f   : > { %23451 = vmatmul.mubr.f32.vlgmr.msra.gmra.mrb[4].mxu1 %v38173_v25 }
0x18a0   : > { %33293 = vmatpush1.bf16.msra.mxu1 %v39315_v16  ;;  %23529 = vmatprep.mubr.f32.mxu1 %v39101_v9  ;;  %v39604_v16 = vld [vmem:[#allocation75_spill] sm:$0xff] }
0x18a1   : > { %33295 = vmatprep.subr.bf16.mxu1 %v39316_v51  ;;  %v39605_v51 = vld [vmem:[#allocation76_spill] sm:$0xff] }
0x18a4   : > { %33297 = vmatpush1.bf16.msra.mxu1 %v39317_v32  ;;  %v39606_v32 = vld [vmem:[#allocation77_spill] sm:$0xff] }
0x18a5   : > { %33299 = vmatprep.subr.bf16.mxu1 %v39597_v37 }
0x18a7   : > { %23531 = vmatmul.mubr.f32.vlgmr.msra.gmra.mrb[4].mxu1 %v38173_v25 }
0x18a8   : > { %33301 = vmatpush1.bf16.msra.mxu1 %v39598_v55  ;;  %23609 = vmatprep.mubr.f32.mxu1 %v39101_v9 }
0x18a9   : > { %33303 = vmatprep.subr.bf16.mxu1 %v39599_v10 }
0x18ac   : > { %33305 = vmatpush1.bf16.msra.mxu1 %v39600_v47 }
0x18ad   : > { %33307 = vmatprep.subr.bf16.mxu1 %v39601_v40 }
0x18af   : > { %23615 = vmatmul.mubr.f32.vlgmr.msra.gmra.mrb[22].mxu1 %v38183_v15 }
0x18b0   : > { %33309 = vmatpush1.bf16.msra.mxu1 %v39602_v44  ;;  %23725 = vmatprep.mubr.f32.mxu1 %v39101_v9 }
0x18b1   : > { %33311 = vmatprep.subr.bf16.mxu1 %v39603_v17 }
0x18b4   : > { %33313 = vmatpush1.bf16.msra.mxu1 %v39604_v16  ;;  %v39621_v16 = vld [vmem:[#allocation30_spill] sm:$0xff] }
0x18b5   : > { %33315 = vmatprep.subr.bf16.mxu1 %v39605_v51  ;;  %v38397_v51 = vadd.f32 %v38361_v22, %v39621_v16  ;;  %v39641_v16 = vld [vmem:[#allocation12_spill] sm:$0xff] }
0x18b7   : > { %23727 = vmatmul.mubr.f32.vlgmr.msra.gmra.mrb[22].mxu1 %v38173_v25 }
0x18b8   : > { %33317 = vmatpush1.bf16.msra.mxu1 %v39606_v32  ;;  %23813 = vmatprep.mubr.f32.mxu1 %v39101_v9 }
0x18b9   : > { %33319 = vmatprep.subr.bf16.mxu1 %v39607_v33 }
0x18bc   : > { %33321 = vmatpush1.bf16.msra.mxu1 %v39608_v0 }
0x18bd   : > { %33323 = vmatprep.subr.bf16.mxu1 %v39597_v37 }
0x18bf   : > { %23816 = vmatmul.mubr.f32.vlgmr.msra.gmra.mrb[22].mxu1 %v38176_v14 }
0x18c0   : > { %33325 = vmatpush1.bf16.msra.mxu1 %v39598_v55  ;;  %23894 = vmatprep.mubr.f32.mxu1 %v39101_v9 }
0x18c1   : > { %33327 = vmatprep.subr.bf16.mxu1 %v39599_v10 }
0x18c4   : > { %33329 = vmatpush1.bf16.msra.mxu1 %v39600_v47 }
0x18c5   : > { %33331 = vmatprep.subr.bf16.mxu1 %v39609_v57  ;;  %v39622_v57 = vld [vmem:[#allocation43_spill] sm:$0xff] }
0x18c7   : > { %23898 = vmatmul.mubr.f32.vlgmr.msra.gmra.mrb[22].mxu1 %v38179_v46 }
0x18c8   : > { %33333 = vmatpush1.bf16.msra.mxu1 %v39610_v42  ;;  %23992 = vmatprep.mubr.f32.mxu1 %v39101_v9  ;;  %v38407_v42 = vadd.f32 %v38361_v22, %v39622_v57  ;;  %v39645_v57 = vld [vmem:[#allocation50_spill] sm:$0xff] }
0x18c9   : > { %33335 = vmatprep.subr.bf16.mxu1 %v39611_v49 }
0x18cc   : > { %33337 = vmatpush1.bf16.msra.mxu1 %v39612_v19 }
0x18cd   : > { %33339 = vmatprep.subr.bf16.mxu1 %v39597_v37 }
0x18cf   : > { %23994 = vmatmul.mubr.f32.vlgmr.msra.gmra.mrb[22].mxu1 %v38173_v25 }
0x18d0   : > { %33341 = vmatpush1.bf16.msra.mxu1 %v39598_v55  ;;  %24072 = vmatprep.mubr.f32.mxu1 %v39101_v9 }
0x18d1   : > { %33343 = vmatprep.subr.bf16.mxu1 %v39599_v10 }
0x18d4   : > { %33345 = vmatpush1.bf16.msra.mxu1 %v39600_v47 }
0x18d5   : > { %33527 = vmatprep.subr.bf16.mxu1 %v36408_v27 }
0x18d7   : > { %24074 = vmatmul.mubr.f32.vlgmr.msra.gmra.mrb[22].mxu1 %v38173_v25 }
0x18d8   : > { %33529 = vmatpush1.bf16.msra.mxu1 %v39613_v54  ;;  %25303 = vmatprep.mubr.f32.mxu1 %v39101_v9 }
0x18d9   : > { %33531 = vmatprep.subr.bf16.mxu1 %v39614_v1 }
0x18dc   : > { %33533 = vmatpush1.bf16.msra.mxu1 %v39615_v61 }
0x18dd   : > { %33535 = vmatprep.subr.bf16.mxu1 %v39616_v38 }
0x194a   : > { %v22972_v2 = vpop.f32.mrb[92].mxu1  ;;  %v24561_v21 = vpop.f32.mrb[48].mxu0 }
0x194b   : > { %v38353_v48 = vadd.f32 %v39617_v36, %v24561_v21  ;;  %v30669_v56 = vpop.f32.mrb[93].mxu1  ;;  %v30735_v11 = vpop.f32.mrb[49].mxu0  ;;  %v38374_v26 = vadd.f32 %v38361_v22, %v22972_v2  ;;  %v39623_v21 = vld [vmem:[#allocation36_spill] sm:$0xff]  ;;  %v39624_v36 = vld [vmem:[#allocation10_spill] sm:$0xff] }
0x194c   : > { %v39625_v56 = vld [vmem:[#allocation26_spill] sm:$0xff]  ;;  %v39626_v11 = vld [vmem:[#allocation16_spill] sm:$0xff] }
0x197a   : > { %v23532_v35 = vpop.f32.mrb[4].mxu1 }
0x197b   : > { %v33666_v60 = vadd.f32 %v23532_v35, %v39618_v5  ;;  %v38356_v34 = vpop.f32.mrb[5].mxu1  ;;  %v39627_v35 = vld [vmem:[#allocation47_spill] sm:$0xff]  ;;  %v39628_v5 = vld [vmem:[#allocation49_spill] sm:$0xff] }
0x197d   : > { %24570 = vmax.xlane.f32.xlu0 %v33666_v60 }
0x1981   : > { %7809 = vmax.xlane.f32.xlu0 %v38365_v58 }
0x1985   : > { %15392 = vmax.xlane.f32.xlu0 %v38370_v23 }
0x1989   : > { %22976 = vmax.xlane.f32.xlu0 %v38374_v26 }
0x1a0a   : > { %v24571_v25 = vpop.xlane.xlu0 %24570 }
0x1a0b   : > { %v24572_v14 = vsub.f32 %v33666_v60, %v24571_v25  ;;  %v39629_v60 = vld [vmem:[#allocation52_spill] sm:$0xff]  ;;  %v39632_v25 = vld [vmem:[#allocation41_spill] sm:$0xff] }
0x1a0d   : > { %v24573_v46 = vmul.f32 1.442695, %v24572_v14  ;;  %v39633_v14 = vld [vmem:[#allocation45_spill] sm:$0xff] }
0x1a0e   : > { %v38377_v53 = vpop.xlane.xlu0 %7809 }
0x1a0f   : > { %34446 = vpow2.f32 %v24573_v46  ;;  %v7811_v15 = vsub.f32 %v38365_v58, %v38377_v53  ;;  %v39634_v46 = vld [vmem:[#allocation14_spill] sm:$0xff] }
0x1a11   : > { %v7812_v43 = vmul.f32 1.442695, %v7811_v15  ;;  %v39635_v15 = vld [vmem:[#allocation13_spill] sm:$0xff] }
0x1a12   : > { %v38381_v24 = vpop.xlane.xlu0 %15392 }
0x1a13   : > { %34448 = vpow2.f32 %v7812_v43  ;;  %v15394_v37 = vsub.f32 %v38370_v23, %v38381_v24  ;;  %v39636_v43 = vld [vmem:[#allocation20_spill] sm:$0xff] }
0x1a15   : > { %v15395_v55 = vmul.f32 1.442695, %v15394_v37  ;;  %v39637_v37 = vld [vmem:[#allocation48_spill] sm:$0xff] }
0x1a16   : > { %v38385_v10 = vpop.xlane.xlu0 %22976 }
0x1a17   : > { %34450 = vpow2.f32 %v15395_v55  ;;  %v22978_v47 = vsub.f32 %v38374_v26, %v38385_v10  ;;  %v39638_v55 = vld [vmem:[#allocation51_spill] sm:$0xff] }
0x1a19   : > { %v38389_v40 = vpop.eup %34446  ;;  %v22979_v44 = vmul.f32 1.442695, %v22978_v47  ;;  %v39639_v47 = vld [vmem:[#allocation40_spill] sm:$0xff] }
0x1a1a   : > { %24575 = vadd.xlane.f32.xlu1 %v38389_v40  ;;  %v38393_v17 = vand.u32 4294901760, %v38389_v40 }
0x1a1b   : > { %34452 = vpow2.f32 %v22979_v44  ;;  %v39640_v44 = vld [vmem:[#allocation44_spill] sm:$0xff] }
0x1a1c   : > { %v38401_v32 = vsub.f32 %v38389_v40, %v38393_v17 }
0x1a1d   : > { %v34449_v33 = vpop.eup %34448 }
0x1a1e   : > { %11600 = vmax.xlane.f32.xlu1 %v38397_v51  ;;  %7814 = vadd.xlane.f32.xlu0 %v34449_v33  ;;  %v24660_v0 = vand.u32 4294901760, %v38401_v32  ;;  %v39643_v33 = vld [vmem:[#allocation15_spill] sm:$0xff] }
0x1a20   : > { %v24661_v49 = vsub.f32 %v38401_v32, %v24660_v0 }
0x1a21   : > { %v34451_v19 = vpop.eup %34450 }
0x1a22   : > { %19184 = vmax.xlane.f32.xlu1 %v38407_v42  ;;  %15397 = vadd.xlane.f32.xlu0 %v34451_v19  ;;  %v24662_v38 = vand.u32 4294901760, %v24661_v49  ;;  %v39646_v49 = vld [vmem:[#allocation53_spill] sm:$0xff] }
0x1a24   : > { %30769 = vmatmul.mubr.f32.vlgmr.msra.gmra.mrb[50].mxu0 %v24662_v38 }
0x1a25   : > { %v34453_v2 = vpop.eup %34452  ;;  %33408 = vmatpush3.bf16.msra.mxu0 %v39623_v21  ;;  %30803 = vmatprep.mubr.msk.f32.mxu0 %vm34583_vm1, %v39101_v9 }
0x1a26   : > { %22981 = vadd.xlane.f32.xlu0 %v34453_v2  ;;  %33409 = vmatprep.subr.bf16.mxu0 %v39254_v6 }
0x1a29   : > { %33411 = vmatpush3.bf16.msra.mxu0 %v39624_v36 }
0x1a2a   : > { %33412 = vmatprep.subr.bf16.mxu0 %v39254_v6 }
0x1a2d   : > { %33414 = vmatpush3.bf16.msra.mxu0 %v39625_v56 }
0x1a2e   : > { %33415 = vmatprep.subr.bf16.mxu0 %v39254_v6 }
0x1a31   : > { %33417 = vmatpush3.bf16.msra.mxu0 %v39626_v11 }
0x1a32   : > { %33418 = vmatprep.subr.bf16.mxu0 %v39254_v6 }
0x1a35   : > { %33420 = vmatpush3.bf16.msra.mxu0 %v39627_v35 }
0x1a36   : > { %33421 = vmatprep.subr.bf16.mxu0 %v39254_v6 }
0x1a39   : > { %33423 = vmatpush3.bf16.msra.mxu0 %v39628_v5 }
0x1a3a   : > { %33424 = vmatprep.subr.bf16.mxu0 %v39254_v6 }
0x1a3d   : > { %33426 = vmatpush3.bf16.msra.mxu0 %v39629_v60 }
0x1a3e   : > { %33427 = vmatprep.subr.bf16.mxu0 %v39254_v6 }
0x1a41   : > { %33429 = vmatpush3.bf16.msra.mxu0 %v39630_v3 }
0x1a42   : > { %33430 = vmatprep.subr.bf16.mxu0 %v39254_v6 }
0x1a44   : > { %30804 = vmatmul.mubr.f32.vlgmr.msra.gmra.mrb[50].mxu0 %v38393_v17 }
0x1a45   : > { %33432 = vmatpush3.bf16.msra.mxu0 %v39631_v28  ;;  %30838 = vmatprep.mubr.msk.f32.mxu0 %vm34583_vm1, %v39101_v9 }
0x1a46   : > { %33433 = vmatprep.subr.bf16.mxu0 %v39254_v6 }
0x1a49   : > { %33435 = vmatpush3.bf16.msra.mxu0 %v39632_v25 }
0x1a4a   : > { %33436 = vmatprep.subr.bf16.mxu0 %v39254_v6 }
0x1a4d   : > { %33438 = vmatpush3.bf16.msra.mxu0 %v39633_v14 }
0x1a4e   : > { %33439 = vmatprep.subr.bf16.mxu0 %v39254_v6 }
0x1a51   : > { %33441 = vmatpush3.bf16.msra.mxu0 %v39634_v46 }
0x1a52   : > { %33442 = vmatprep.subr.bf16.mxu0 %v39254_v6 }
0x1a55   : > { %33444 = vmatpush3.bf16.msra.mxu0 %v39635_v15 }
0x1a56   : > { %33445 = vmatprep.subr.bf16.mxu0 %v39254_v6 }
0x1a59   : > { %33447 = vmatpush3.bf16.msra.mxu0 %v39636_v43 }
0x1a5a   : > { %33448 = vmatprep.subr.bf16.mxu0 %v39254_v6 }
0x1a5d   : > { %33450 = vmatpush3.bf16.msra.mxu0 %v39637_v37 }
0x1a5e   : > { %33451 = vmatprep.subr.bf16.mxu0 %v39254_v6 }
0x1a61   : > { %33453 = vmatpush3.bf16.msra.mxu0 %v39638_v55 }
0x1a62   : > { %33454 = vmatprep.subr.bf16.mxu0 %v39254_v6 }
0x1a64   : > { %30839 = vmatmul.mubr.f32.vlgmr.msra.gmra.mrb[50].mxu0 %v38401_v32  ;;  %v39642_v32 = vld [vmem:[#allocation19_spill] sm:$0xff] }
0x1a65   : > { %33456 = vmatpush3.bf16.msra.mxu0 %v35987_v41  ;;  %30873 = vmatprep.mubr.msk.f32.mxu0 %vm34583_vm1, %v39101_v9 }
0x1a66   : > { %33457 = vmatprep.subr.bf16.mxu0 %v39254_v6 }
0x1a69   : > { %33459 = vmatpush3.bf16.msra.mxu0 %v35995_v63 }
0x1a6a   : > { %33460 = vmatprep.subr.bf16.mxu0 %v39254_v6 }
0x1a6d   : > { %33462 = vmatpush3.bf16.msra.mxu0 %v36005_v8 }
0x1a6e   : > { %33463 = vmatprep.subr.bf16.mxu0 %v39254_v6 }
0x1a71   : > { %33465 = vmatpush3.bf16.msra.mxu0 %v36013_v20 }
0x1a72   : > { %33466 = vmatprep.subr.bf16.mxu0 %v39254_v6 }
0x1a75   : > { %33468 = vmatpush3.bf16.msra.mxu0 %v36023_v13 }
0x1a76   : > { %33469 = vmatprep.subr.bf16.mxu0 %v39254_v6 }
0x1a79   : > { %33471 = vmatpush3.bf16.msra.mxu0 %v36033_v39 }
0x1a7a   : > { %33472 = vmatprep.subr.bf16.mxu0 %v39254_v6 }
0x1a7d   : > { %33474 = vmatpush3.bf16.msra.mxu0 %v36043_v18 }
0x1a7e   : > { %33475 = vmatprep.subr.bf16.mxu0 %v39254_v6 }
0x1a81   : > { %33477 = vmatpush3.bf16.msra.mxu0 %v36055_v62 }
0x1a82   : > { %33478 = vmatprep.subr.bf16.mxu0 %v39254_v6 }
0x1a84   : > { %30874 = vmatmul.mubr.f32.vlgmr.msra.gmra.mrb[50].mxu0 %v24660_v0  ;;  %v39644_v0 = vld [vmem:[#allocation29_spill] sm:$0xff] }
0x1a85   : > { %33480 = vmatpush3.bf16.msra.mxu0 %v39639_v47  ;;  %30908 = vmatprep.mubr.msk.f32.mxu0 %vm34583_vm1, %v39101_v9  ;;  %v39649_v47 = vld [vmem:[#allocation89_spill] sm:$0xff] }
0x1a86   : > { %33481 = vmatprep.subr.bf16.mxu0 %v39254_v6 }
0x1a89   : > { %33483 = vmatpush3.bf16.msra.mxu0 %v39640_v44  ;;  %v39651_v44 = vld [vmem:[#allocation91_spill] sm:$0xff] }
0x1a8a   : > { %33484 = vmatprep.subr.bf16.mxu0 %v39254_v6 }
0x1a8d   : > { %33486 = vmatpush3.bf16.msra.mxu0 %v39641_v16  ;;  %v39652_v16 = vld [vmem:[#allocation92_spill] sm:$0xff] }
0x1a8e   : > { %33487 = vmatprep.subr.bf16.mxu0 %v39254_v6 }
0x1a91   : > { %33489 = vmatpush3.bf16.msra.mxu0 %v39642_v32  ;;  %v39653_v32 = vld [vmem:[#allocation93_spill] sm:$0xff] }
0x1a92   : > { %33490 = vmatprep.subr.bf16.mxu0 %v39254_v6 }
0x1a95   : > { %33492 = vmatpush3.bf16.msra.mxu0 %v39643_v33  ;;  %v39654_v33 = vld [vmem:[#allocation94_spill] sm:$0xff] }
0x1a96   : > { %33493 = vmatprep.subr.bf16.mxu0 %v39254_v6 }
0x1a99   : > { %33495 = vmatpush3.bf16.msra.mxu0 %v39644_v0  ;;  %v39655_v0 = vld [vmem:[#allocation95_spill] sm:$0xff] }
0x1a9a   : > { %33496 = vmatprep.subr.bf16.mxu0 %v39254_v6 }
0x1a9d   : > { %33498 = vmatpush3.bf16.msra.mxu0 %v39645_v57  ;;  %v39656_v57 = vld [vmem:[#allocation96_spill] sm:$0xff] }
0x1a9e   : > { %33499 = vmatprep.subr.bf16.mxu0 %v39254_v6 }
0x1aa1   : > { %33501 = vmatpush3.bf16.msra.mxu0 %v39646_v49  ;;  %v39657_v49 = vld [vmem:[#allocation97_spill] sm:$0xff] }
0x1aa2   : > { %33502 = vmatprep.subr.bf16.mxu0 %v39254_v6 }
0x1aa4   : > { %30909 = vmatmul.mubr.f32.vlgmr.msra.gmra.mrb[50].mxu0 %v38393_v17 }
0x1aa5   : > { %33504 = vmatpush3.bf16.msra.mxu0 %v35987_v41  ;;  %30943 = vmatprep.mubr.msk.f32.mxu0 %vm34583_vm1, %v39101_v9 }
0x1aa6   : > { %33505 = vmatprep.subr.bf16.mxu0 %v39254_v6 }
0x1aa7   : > { %v24576_v19 = vpop.xlane.xlu1 %24575 }
0x1aa8   : > { %34454 = vrcp.f32 %v24576_v19 }
0x1aa9   : > { %33507 = vmatpush3.bf16.msra.mxu0 %v35995_v63 }
0x1aaa   : > { %33508 = vmatprep.subr.bf16.mxu0 %v39254_v6 }
0x1aab   : > { %v7815_v38 = vpop.xlane.xlu0 %7814 }
0x1aac   : > { %34456 = vlog2.f32 %v7815_v38  ;;  %v39659_v38 = vld [vmem:[#allocation99_spill] sm:$0xff] }
0x1aad   : > { %33510 = vmatpush3.bf16.msra.mxu0 %v36005_v8 }
0x1aae   : > { %33511 = vmatprep.subr.bf16.mxu0 %v39254_v6 }
0x1aaf   : > { %v15398_v2 = vpop.xlane.xlu0 %15397 }
0x1ab0   : > { %34458 = vlog2.f32 %v15398_v2  ;;  %v39664_v2 = vld [vmem:[#allocation104_spill] sm:$0xff] }
0x1ab1   : > { %33513 = vmatpush3.bf16.msra.mxu0 %v36013_v20 }
0x1ab2   : > { %v34455_v41 = vpop.eup %34454  ;;  %33514 = vmatprep.subr.bf16.mxu0 %v39254_v6 }
0x1ab3   : > { %v25219_v21 = vmul.f32 %v34455_v41, %v24576_v19  ;;  %v22982_v63 = vpop.xlane.xlu0 %22981  ;;  %v39658_v19 = vld [vmem:[#allocation98_spill] sm:$0xff] }
0x1ab4   : > { %34460 = vlog2.f32 %v22982_v63 }
0x1ab5   : > { %v25220_v36 = vsub.f32 2.0, %v25219_v21  ;;  %33516 = vmatpush3.bf16.msra.mxu0 %v36023_v13  ;;  %v39666_v21 = vld [vmem:[#allocation106_spill] sm:$0xff] }
0x1ab6   : > { %v34457_v8 = vpop.eup %34456  ;;  %33517 = vmatprep.subr.bf16.mxu0 %v39254_v6 }
0x1ab7   : > { %v7817_v56 = vmul.f32 0.6931472, %v34457_v8  ;;  %v25221_v11 = vmul.f32 %v34455_v41, %v25220_v36  ;;  %v39665_v41 = vld [vmem:[#allocation105_spill] sm:$0xff]  ;;  %v39667_v36 = vld [vmem:[#allocation55_spill] sm:$0xff] }
0x1ab9   : > { %v7818_v20 = vadd.f32 %v7817_v56, %v38377_v53  ;;  %33519 = vmatpush3.bf16.msra.mxu0 %v36033_v39  ;;  %v25222_v35 = vmul.f32 %v38389_v40, %v25221_v11 }
0x1aba   : > { %33520 = vmatprep.subr.bf16.mxu0 %v39254_v6  ;;  %v34459_v5 = vpop.eup %34458 }
0x1abb   : > { %v7819_v60 = vsub.f32 %v38365_v58, %v7818_v20  ;;  %26994 = vst [vmem:[%s36378_s25 + $0x28] sm:$0xff] %v25222_v35  ;;  %v15400_v3 = vmul.f32 0.6931472, %v34459_v5  ;;  %s26969_s25 = sshll.u32 %s38497_s29, 3 }
0x1abc   : > { %s38607_s17 = scalar_lea.vmem [#allocation5], %s26969_s25  ;;  %s34489_s25 = sshll.u32 %s34584_s14, 4  ;;  %s34490_s25 = int_to_ptr.vmem [resolvable:$false] %s34489_s25 }
0x1abd   : > { %7820 = vst [vmem:[%s38508_s16] sm:$0xff] %v7819_v60  ;;  %33522 = vmatpush3.bf16.msra.mxu0 %v36043_v18  ;;  %v15401_v13 = vadd.f32 %v15400_v3, %v38381_v24  ;;  %v39647_v18 = vld [vmem:[#allocation57_spill] sm:$0xff]  ;;  %v39668_v60 = vld [vmem:[#allocation107_spill] sm:$0xff]  ;;  %s26825_s27 = sshll.u32 %s38607_s17, 4  ;;  %s34491_s0 = scalar_lea.vmem %s34490_s25, 256  ;;  %s26826_s27 = int_to_ptr.vmem [resolvable:$true] %s26825_s27 }
0x1abe   : > { %33523 = vmatprep.subr.bf16.mxu0 %v39254_v6  ;;  %v34461_v39 = vpop.eup %34460  ;;  %v33667_v24 = vadd.f32 %v38356_v34, %v39647_v18  ;;  %v39650_v34 = vld [vmem:[#allocation90_spill] sm:$0xff]  ;;  %s34485_s28 = scalar_lea.vmem %s26826_s27, 128  ;;  %p34492_p0 = scmp.lt.s32.totalorder %s26826_s27, %s34490_s25 }
0x1abf   : > { %v15402_v53 = vsub.f32 %v38370_v23, %v15401_v13  ;;  %v22984_v40 = vmul.f32 0.6931472, %v34461_v39  ;;  %p34486_p11 = scmp.ne.s32.totalorder %s26826_s27, %s34485_s28  ;;  %p34493_p1 = scmp.lt.s32.totalorder %s34491_s0, %s34485_s28 }
0x1ac1   : > { %33525 = vmatpush3.bf16.msra.mxu0 %v36055_v62  ;;  %26985 = vst [vmem:[%s38508_s16 + $0x10] sm:$0xff] %v15402_v53  ;;  %v22985_v58 = vadd.f32 %v22984_v40, %v38385_v10  ;;  %p34487_p12 = pnand %p34486_p11, %p34676_p5  ;;  %p34494_p2 = por %p34493_p1, %p34492_p0 }
0x1ac3   : > { %v22986_v28 = vsub.f32 %v38374_v26, %v22985_v58  ;;  %p34488_p13 = pneg %p34487_p12 }
0x1ac4   : > { %30944 = vmatmul.mubr.f32.vlgmr.msra.gmra.mrb[50].mxu0 %v38393_v17  ;;  %v39648_v17 = vld [vmem:[#allocation88_spill] sm:$0xff] }
0x1ac5   : > { %26993 = vst [vmem:[%s38508_s16 + $0x20] sm:$0xff] %v22986_v28  ;;  %p34495_p3 = pnand %p34494_p2, %p34488_p13 }
0x1b97   : > { %v25214_v25 = vpop.f32.mrb[50].mxu0 }
0x1b98   : > { %v25225_v14 = vmul.f32 %v25221_v11, %v25214_v25  ;;  %v30945_v46 = vpop.f32.mrb[51].mxu0 }
0x1b9a   : > { %v25226_v15 = vadd.f32 %v33667_v24, %v25225_v14 }
0x1b9c   : > { %v25227_v43 = vmax.f32 %v25226_v15, 0.0 }
0x1b9e   : > { %v25229_v23 = vsel %vm450_vm0, %v25227_v43, 0 }
0x1b9f   : > { %v38524_v37 = vand.u32 4294901760, %v25229_v23 }
0x1ba1   : > { %v25305_v62 = vsub.f32 %v25229_v23, %v38524_v37 }
0x1ba3   : > { %v25306_v10 = vand.u32 4294901760, %v25305_v62 }
0x1ba5   : > { %v25307_v55 = vsub.f32 %v25305_v62, %v25306_v10 }
0x1ba7   : > { %v25308_v26 = vand.u32 4294901760, %v25307_v55 }
0x1ba9   : > { %25309 = vmatmul.mubr.f32.vlgmr.msra.gmra.mrb[22].mxu1 %v25308_v26 }
0x1baa   : > { %33537 = vmatpush1.bf16.msra.mxu1 %v39648_v17  ;;  %25419 = vmatprep.mubr.f32.mxu1 %v39101_v9 }
0x1bab   : > { %33539 = vmatprep.subr.bf16.mxu1 %v39649_v47 }
0x1bae   : > { %33541 = vmatpush1.bf16.msra.mxu1 %v39650_v34 }
0x1baf   : > { %33543 = vmatprep.subr.bf16.mxu1 %v39651_v44 }
0x1bb1   : > { %25421 = vmatmul.mubr.f32.vlgmr.msra.gmra.mrb[22].mxu1 %v38524_v37 }
0x1bb2   : > { %33545 = vmatpush1.bf16.msra.mxu1 %v39652_v16  ;;  %25507 = vmatprep.mubr.f32.mxu1 %v39101_v9 }
0x1bb3   : > { %33547 = vmatprep.subr.bf16.mxu1 %v39653_v32 }
0x1bb6   : > { %33549 = vmatpush1.bf16.msra.mxu1 %v39654_v33 }
0x1bb7   : > { %33551 = vmatprep.subr.bf16.mxu1 %v36408_v27 }
0x1bb9   : > { %25510 = vmatmul.mubr.f32.vlgmr.msra.gmra.mrb[22].mxu1 %v25305_v62 }
0x1bba   : > { %33553 = vmatpush1.bf16.msra.mxu1 %v39613_v54  ;;  %25588 = vmatprep.mubr.f32.mxu1 %v39101_v9 }
0x1bbb   : > { %33555 = vmatprep.subr.bf16.mxu1 %v39614_v1 }
0x1bbe   : > { %33557 = vmatpush1.bf16.msra.mxu1 %v39615_v61 }
0x1bbf   : > { %33559 = vmatprep.subr.bf16.mxu1 %v39655_v0 }
0x1bc1   : > { %25592 = vmatmul.mubr.f32.vlgmr.msra.gmra.mrb[22].mxu1 %v25306_v10 }
0x1bc2   : > { %33561 = vmatpush1.bf16.msra.mxu1 %v39656_v57  ;;  %25686 = vmatprep.mubr.f32.mxu1 %v39101_v9 }
0x1bc3   : > { %33563 = vmatprep.subr.bf16.mxu1 %v39657_v49 }
0x1bc6   : > { %33565 = vmatpush1.bf16.msra.mxu1 %v39658_v19 }
0x1bc7   : > { %33567 = vmatprep.subr.bf16.mxu1 %v36408_v27  ;;  %v39660_v27 = vld [vmem:[#allocation100_spill] sm:$0xff] }
0x1bc9   : > { %25688 = vmatmul.mubr.f32.vlgmr.msra.gmra.mrb[22].mxu1 %v38524_v37 }
0x1bca   : > { %33569 = vmatpush1.bf16.msra.mxu1 %v39613_v54  ;;  %25766 = vmatprep.mubr.f32.mxu1 %v39101_v9  ;;  %v39661_v54 = vld [vmem:[#allocation101_spill] sm:$0xff] }
0x1bcb   : > { %33571 = vmatprep.subr.bf16.mxu1 %v39614_v1  ;;  %v39662_v1 = vld [vmem:[#allocation102_spill] sm:$0xff] }
0x1bce   : > { %33573 = vmatpush1.bf16.msra.mxu1 %v39615_v61  ;;  %v39663_v61 = vld [vmem:[#allocation103_spill] sm:$0xff] }
0x1bcf   : > { %33574 = vmatprep.subr.bf16.mxu1 %v39254_v6 }
0x1bd1   : > { %25768 = vmatmul.mubr.f32.vlgmr.msra.gmra.mrb[22].mxu1 %v38524_v37 }
0x1bd2   : > { %33576 = vmatpush3.bf16.msra.mxu1 %v39659_v38  ;;  %30954 = vmatprep.mubr.msk.f32.mxu1 %vm34583_vm1, %v39101_v9 }
0x1bd3   : > { %33577 = vmatprep.subr.bf16.mxu1 %v39254_v6 }
0x1bd6   : > { %33579 = vmatpush3.bf16.msra.mxu1 %v39660_v27 }
0x1bd7   : > { %33580 = vmatprep.subr.bf16.mxu1 %v39254_v6 }
0x1bd9   : > { %30955 = vmatmul.mubr.f32.vlgmr.msra.gmra.mrb[94].mxu1 %v25308_v26 }
0x1bda   : > { %33582 = vmatpush3.bf16.msra.mxu1 %v39661_v54  ;;  %30965 = vmatprep.mubr.msk.f32.mxu1 %vm34583_vm1, %v39101_v9 }
0x1bdb   : > { %33583 = vmatprep.subr.bf16.mxu1 %v39254_v6 }
0x1bde   : > { %33585 = vmatpush3.bf16.msra.mxu1 %v39662_v1 }
0x1bdf   : > { %33586 = vmatprep.subr.bf16.mxu1 %v39254_v6 }
0x1be1   : > { %30966 = vmatmul.mubr.f32.vlgmr.msra.gmra.mrb[96].mxu1 %v38524_v37 }
0x1be2   : > { %33588 = vmatpush3.bf16.msra.mxu1 %v39663_v61  ;;  %30976 = vmatprep.mubr.msk.f32.mxu1 %vm34583_vm1, %v39101_v9 }
0x1be3   : > { %33589 = vmatprep.subr.bf16.mxu1 %v39254_v6 }
0x1be6   : > { %33591 = vmatpush3.bf16.msra.mxu1 %v39664_v2 }
0x1be7   : > { %33592 = vmatprep.subr.bf16.mxu1 %v39254_v6 }
0x1be9   : > { %30977 = vmatmul.mubr.f32.vlgmr.msra.gmra.mrb[98].mxu1 %v25305_v62 }
0x1bea   : > { %33594 = vmatpush3.bf16.msra.mxu1 %v39659_v38  ;;  %30987 = vmatprep.mubr.msk.f32.mxu1 %vm34583_vm1, %v39101_v9 }
0x1beb   : > { %33595 = vmatprep.subr.bf16.mxu1 %v39254_v6 }
0x1bee   : > { %33597 = vmatpush3.bf16.msra.mxu1 %v39660_v27 }
0x1bef   : > { %33598 = vmatprep.subr.bf16.mxu1 %v39254_v6 }
0x1bf1   : > { %30988 = vmatmul.mubr.f32.vlgmr.msra.gmra.mrb[100].mxu1 %v25306_v10 }
0x1bf2   : > { %33600 = vmatpush3.bf16.msra.mxu1 %v39665_v41  ;;  %30998 = vmatprep.mubr.msk.f32.mxu1 %vm34583_vm1, %v39101_v9 }
0x1bf3   : > { %33601 = vmatprep.subr.bf16.mxu1 %v39254_v6 }
0x1bf6   : > { %33603 = vmatpush3.bf16.msra.mxu1 %v39666_v21 }
0x1bf7   : > { %33604 = vmatprep.subr.bf16.mxu1 %v39254_v6 }
0x1bf9   : > { %30999 = vmatmul.mubr.f32.vlgmr.msra.gmra.mrb[102].mxu1 %v38524_v37 }
0x1bfa   : > { %33606 = vmatpush3.bf16.msra.mxu1 %v39659_v38  ;;  %31009 = vmatprep.mubr.msk.f32.mxu1 %vm34583_vm1, %v39101_v9 }
0x1bfb   : > { %33607 = vmatprep.subr.bf16.mxu1 %v39254_v6 }
0x1bfe   : > { %33609 = vmatpush3.bf16.msra.mxu1 %v39660_v27 }
0x1bff   : > { %33610 = vmatprep.subr.bf16.mxu1 %v39254_v6 }
0x1c01   : > { %31010 = vmatmul.mubr.f32.vlgmr.msra.gmra.mrb[104].mxu1 %v38524_v37 }
0x1c02   : > { %33612 = vmatpush3.bf16.msra.mxu1 %v36581_v7  ;;  %31020 = vmatprep.mubr.msk.f32.mxu1 %vm34583_vm1, %v39101_v9 }
0x1c03   : > { %33613 = vmatprep.subr.bf16.mxu1 %v39254_v6 }
0x1c06   : > { %33615 = vmatpush3.bf16.msra.mxu1 %v36591_v59 }
0x1c07   : > { %33616 = vmatprep.subr.bf16.mxu1 %v39254_v6 }
0x1ca4   : > { %v25769_v63 = vpop.f32.mrb[22].mxu1 }
0x1ca5   : > { %v33689_v8 = vadd.f32 %v39667_v36, %v25769_v63  ;;  %v25771_v56 = vpop.f32.mrb[23].mxu1 }
0x1ca6   : > { %v33691_v58 = vadd.f32 %v36624_v4, %v25771_v56 }
0x1ca7   : > { %v26995_v11 = vmul.f32 -1.442695, %v33689_v8 }
0x1ca8   : > { %v26996_v14 = vmul.f32 -1.442695, %v33691_v58 }
0x1ca9   : > { %34462 = vpow2.f32 %v26995_v11 }
0x1cac   : > { %v25849_v20 = vpop.f32.mrb[94].mxu1 }
0x1cad   : > { %v30956_v35 = vpop.f32.mrb[95].mxu1  ;;  %v25850_v3 = vadd.f32 %v25849_v20, %v39668_v60 }
0x1cb3   : > { %v34463_v5 = vpop.eup %34462 }
0x1cb4   : > { %v26263_v13 = vadd.f32 1.0, %v34463_v5  ;;  %v25940_v39 = vpop.f32.mrb[96].mxu1 }
0x1cb5   : > { %v25941_v53 = vadd.f32 %v25940_v39, %v25850_v3  ;;  %v30967_v40 = vpop.f32.mrb[97].mxu1 }
0x1cb6   : > { %34464 = vrcp.f32 %v26263_v13 }
0x1cb7   : > { %34466 = vpow2.f32 %v26996_v14 }
0x1cbc   : > { %v26020_v28 = vpop.f32.mrb[98].mxu1 }
0x1cbd   : > { %v26021_v25 = vadd.f32 %v26020_v28, %v25941_v53  ;;  %v30978_v18 = vpop.f32.mrb[99].mxu1 }
0x1cc0   : > { %v34465_v24 = vpop.eup %34464 }
0x1cc1   : > { %v26273_v46 = vmul.f32 %v34465_v24, %v38353_v48  ;;  %v34467_v55 = vpop.eup %34466 }
0x1cc2   : > { %v26270_v26 = vadd.f32 1.0, %v34467_v55 }
0x1cc4   : > { %v26097_v15 = vpop.f32.mrb[100].mxu1  ;;  %34468 = vrcp.f32 %v26270_v26 }
0x1cc5   : > { %v26098_v43 = vadd.f32 %v26097_v15, %v26021_v25  ;;  %v30989_v23 = vpop.f32.mrb[101].mxu1 }
0x1ccc   : > { %v26180_v37 = vpop.f32.mrb[102].mxu1 }
0x1ccd   : > { %v26181_v62 = vadd.f32 %v26180_v37, %v26098_v43  ;;  %v31000_v10 = vpop.f32.mrb[103].mxu1 }
0x1cce   : > { %v34469_v44 = vpop.eup %34468 }
0x1ccf   : > { %v26276_v16 = vsub.f32 1.0, %v34469_v44  ;;  %v26278_v32 = vmul.f32 %v34469_v44, %v38169_v30 }
0x1cd4   : > { %v26255_v17 = vpop.f32.mrb[104].mxu1 }
0x1cd5   : > { %v26256_v4 = vadd.f32 %v26255_v17, %v26181_v62  ;;  %v31011_v47 = vpop.f32.mrb[105].mxu1 }
0x1cd7   : > { %v26274_v34 = vadd.f32 %v26273_v46, %v26256_v4 }
0x1cd9   : > { %34470 = vtanh.f32 %v26274_v34 }
0x1ce3   : > { %v34471_v48 = vpop.eup %34470 }
0x1ce4   : > { %v26277_v33 = vmul.f32 %v34471_v48, %v26276_v16 }
0x1ce6   : > { %v26279_v0 = vadd.f32 %v26278_v32, %v26277_v33 }
0x1ce8   : > { %v26281_v57 = vsel %vm450_vm0, %v26279_v0, 0  ;;  %26781 = vst.msk [vmem:[%s38607_s17] sm:$0xff] %vm450_vm0, %v26279_v0 }
0x1ce9   : > { %v26352_v49 = vand.u32 4294901760, %v26281_v57 }
0x1ceb   : > { %v26353_v19 = vsub.f32 %v26281_v57, %v26352_v49 }
0x1ced   : > { %v26354_v38 = vand.u32 4294901760, %v26353_v19 }
0x1cef   : > { %v26355_v27 = vsub.f32 %v26353_v19, %v26354_v38 }
0x1cf1   : > { %v26356_v54 = vand.u32 4294901760, %v26355_v27 }
0x1cf3   : > { %31021 = vmatmul.mubr.f32.vlgmr.msra.gmra.mrb[106].mxu1 %v26356_v54 }
0x1cf4   : > { %33618 = vmatpush3.bf16.msra.mxu1 %v36595_v12  ;;  %31031 = vmatprep.mubr.msk.f32.mxu1 %vm34583_vm1, %v39101_v9 }
0x1cf5   : > { %33619 = vmatprep.subr.bf16.mxu1 %v39254_v6 }
0x1cf8   : > { %33621 = vmatpush3.bf16.msra.mxu1 %v36597_v52 }
0x1cf9   : > { %33622 = vmatprep.subr.bf16.mxu1 %v39254_v6 }
0x1cfb   : > { %31032 = vmatmul.mubr.f32.vlgmr.msra.gmra.mrb[106].mxu1 %v26352_v49 }
0x1cfc   : > { %33624 = vmatpush3.bf16.msra.mxu1 %v36599_v50  ;;  %31042 = vmatprep.mubr.msk.f32.mxu1 %vm34583_vm1, %v39101_v9  ;;  %v11601_v50 = vpop.xlane.xlu1 %11600 }
0x1cfd   : > { %33625 = vmatprep.subr.bf16.mxu1 %v39254_v6  ;;  %v11602_v52 = vsub.f32 %v38397_v51, %v11601_v50 }
0x1d00   : > { %33627 = vmatpush3.bf16.msra.mxu1 %v36601_v29  ;;  %v19185_v12 = vpop.xlane.xlu1 %19184  ;;  %v11603_v29 = vmul.f32 1.442695, %v11602_v52 }
0x1d01   : > { %33628 = vmatprep.subr.bf16.mxu1 %v39254_v6 }
0x1d02   : > { %34472 = vpow2.f32 %v11603_v29 }
0x1d03   : > { %31043 = vmatmul.mubr.f32.vlgmr.msra.gmra.mrb[106].mxu1 %v26353_v19 }
0x1d04   : > { %33630 = vmatpush3.bf16.msra.mxu1 %v36581_v7  ;;  %31053 = vmatprep.mubr.msk.f32.mxu1 %vm34583_vm1, %v39101_v9 }
0x1d05   : > { %33631 = vmatprep.subr.bf16.mxu1 %v39254_v6 }
0x1d08   : > { %33633 = vmatpush3.bf16.msra.mxu1 %v36591_v59 }
0x1d09   : > { %33634 = vmatprep.subr.bf16.mxu1 %v39254_v6 }
0x1d0b   : > { %31054 = vmatmul.mubr.f32.vlgmr.msra.gmra.mrb[106].mxu1 %v26354_v38 }
0x1d0c   : > { %33636 = vmatpush3.bf16.msra.mxu1 %v36603_v45  ;;  %31064 = vmatprep.mubr.msk.f32.mxu1 %vm34583_vm1, %v39101_v9  ;;  %v19186_v45 = vsub.f32 %v38407_v42, %v19185_v12 }
0x1d0d   : > { %33637 = vmatprep.subr.bf16.mxu1 %v39254_v6 }
0x1d10   : > { %33639 = vmatpush3.bf16.msra.mxu1 %v36605_v31  ;;  %v19187_v31 = vmul.f32 1.442695, %v19186_v45 }
0x1d11   : > { %33640 = vmatprep.subr.bf16.mxu1 %v39254_v6 }
0x1d12   : > { %34474 = vpow2.f32 %v19187_v31 }
0x1d13   : > { %31065 = vmatmul.mubr.f32.vlgmr.msra.gmra.mrb[106].mxu1 %v26352_v49 }
0x1d14   : > { %33642 = vmatpush3.bf16.msra.mxu1 %v36581_v7  ;;  %31075 = vmatprep.mubr.msk.f32.mxu1 %vm34583_vm1, %v39101_v9 }
0x1d15   : > { %33643 = vmatprep.subr.bf16.mxu1 %v39254_v6  ;;  %v34473_v6 = vpop.eup %34472 }
0x1d18   : > { %33645 = vmatpush3.bf16.msra.mxu1 %v36591_v59 }
0x1d1b   : > { %31076 = vmatmul.mubr.f32.vlgmr.msra.gmra.mrb[106].mxu1 %v26352_v49 }
0x1d1c   : > { %v34475_v59 = vpop.eup %34474 }
0x1dee   : > { %v26764_v30 = vpop.f32.mrb[106].mxu1 }
0x1def   : > { %v38643_v7 = vadd.f32 %v38361_v22, %v26764_v30  ;;  %v31077_v9 = vpop.f32.mrb[107].mxu1 }
0x1df1   : > { %26768 = vmax.xlane.f32.xlu1 %v38643_v7 }
0x1df5   : > { %11605 = vadd.xlane.f32.xlu1 %v34473_v6 }
0x1df9   : > { %19189 = vadd.xlane.f32.xlu1 %v34475_v59 }
0x1e7e   : > { %v26769_v1 = vpop.xlane.xlu1 %26768 }
0x1e7f   : > { %v26770_v61 = vsub.f32 %v38643_v7, %v26769_v1 }
0x1e81   : > { %v26771_v2 = vmul.f32 1.442695, %v26770_v61 }
0x1e82   : > { %v11606_v41 = vpop.xlane.xlu1 %11605 }
0x1e83   : > { %34476 = vpow2.f32 %v26771_v2 }
0x1e84   : > { %34478 = vlog2.f32 %v11606_v41 }
0x1e86   : > { %v19190_v21 = vpop.xlane.xlu1 %19189 }
0x1e87   : > { %34480 = vlog2.f32 %v19190_v21 }
0x1e8d   : > { %v34477_v22 = vpop.eup %34476 }
0x1e8e   : > { %v34479_v63 = vpop.eup %34478  ;;  %26773 = vadd.xlane.f32.xlu1 %v34477_v22 }
0x1e8f   : > { %v11608_v36 = vmul.f32 0.6931472, %v34479_v63 }
0x1e91   : > { %v34481_v8 = vpop.eup %34480  ;;  %v11609_v56 = vadd.f32 %v11608_v36, %v11601_v50 }
0x1e92   : > { %v19192_v11 = vmul.f32 0.6931472, %v34481_v8 }
0x1e93   : > { %v11610_v20 = vsub.f32 %v38397_v51, %v11609_v56 }
0x1e94   : > { %v19193_v35 = vadd.f32 %v19192_v11, %v19185_v12 }
0x1e95   : > { %26981 = vst [vmem:[%s38508_s16 + $0x8] sm:$0xff] %v11610_v20 }
0x1e96   : > { %v19194_v5 = vsub.f32 %v38407_v42, %v19193_v35 }
0x1e98   : > { %26989 = vst [vmem:[%s38508_s16 + $0x18] sm:$0xff] %v19194_v5 }
0x1e99   : > { %34498 = shalt.err (!%p34495_p3)
}
0x1e9a   : > { %s34499_s17 = scalar_lea.hbm %s38655_s26, 128  ;;  %s34503_s23 = scalar_lea.hbm %s38737_s9, 256 }
0x1e9b   : > { %p34500_p4 = scmp.ne.s32.totalorder %s38655_s26, %s34499_s17  ;;  %p34504_p9 = scmp.lt.u32.totalorder %s38655_s26, %s38737_s9 }
0x1e9c   : > { %p34505_p10 = scmp.lt.u32.totalorder %s34503_s23, %s34499_s17  ;;  %p34507_p12 = scmp.lt.u32.totalorder %s34499_s17, %s38655_s26 }
0x1e9d   : > { %p34501_p7 = pnand %p34500_p4, %p34676_p5 }
0x1e9e   : > { %p34506_p11 = por %p34505_p10, %p34504_p9 }
0x1e9f   : > { %p34502_p8 = pneg %p34501_p7 }
0x1ea0   : > { %p34508_p13 = por %p34507_p12, %p34506_p11 }
0x1ea2   : > { %p34509_p0 = pnand %p34508_p13, %p34502_p8 }
0x1ea4   : > { %34512 = shalt.err (!%p34509_p0)
}
0x1ea5   : > { %34328 = dma.vmem_to_hbm [thread:$0]  (%p34676_p5), %s26826_s27, 128, %s38655_s26, %s26793_s22  }
0x1ea6   : > { %s34326_s0 = smul.u32 768, %s34659_s13  ;;  %s26806_s28 = sshll.u32 %s38508_s16, 4  ;;  %s38683_s28 = int_to_ptr.vmem [resolvable:$true] %s26806_s28 }
0x1ea7   : > { %s26783_s26 = scalar_lea.sflag [#allocation4], %s38497_s29  ;;  %s34513_s27 = scalar_lea.vmem %s38683_s28, 768 }
0x1ea8   : > { %s38681_s21 = scalar_lea.hbm %s38735_s7, %s34326_s0  ;;  %p34514_p1 = scmp.ne.s32.totalorder %s38683_s28, %s34513_s27 }
0x1ea9   : > { %s34585_s13 = smov [#allocation3]  }
0x1eaa   : > { %p34515_p2 = pnand %p34514_p1, %p34676_p5  ;;  %s34517_s22 = sshll.u32 %s34585_s13, 4  ;;  %s34518_s22 = int_to_ptr.vmem [resolvable:$false] %s34517_s22 }
0x1eab   : > { %s34519_s23 = scalar_lea.vmem %s34518_s22, 1536  ;;  %p34520_p4 = scmp.lt.s32.totalorder %s38683_s28, %s34518_s22 }
0x1eac   : > { %p34516_p3 = pneg %p34515_p2  ;;  %p34521_p7 = scmp.lt.s32.totalorder %s34519_s23, %s34513_s27 }
0x1eae   : > { %p34522_p8 = por %p34521_p7, %p34520_p4 }
0x1eb0   : > { %p34523_p9 = pnand %p34522_p8, %p34516_p3 }
0x1f1b   : > { %v26774_v51 = vpop.xlane.xlu1 %26773 }
0x1f1c   : > { %34482 = vlog2.f32 %v26774_v51 }
0x1f26   : > { %v34483_v42 = vpop.eup %34482 }
0x1f27   : > { %v26776_v60 = vmul.f32 0.6931472, %v34483_v42 }
0x1f29   : > { %v26777_v3 = vadd.f32 %v26776_v60, %v26769_v1 }
0x1f2b   : > { %v26778_v13 = vsub.f32 %v38643_v7, %v26777_v3 }
0x1f2d   : > { %26997 = vst [vmem:[%s38508_s16 + $0x28] sm:$0xff] %v26778_v13 }
0x1f2e   : > { %34526 = shalt.err (!%p34523_p9)
}
0x1f2f   : > { %s34527_s16 = scalar_lea.hbm %s38681_s21, 768  ;;  %s34531_s0 = scalar_lea.hbm %s38735_s7, 1536 }
0x1f30   : > { %p34528_p10 = scmp.ne.s32.totalorder %s38681_s21, %s34527_s16  ;;  %p34532_p13 = scmp.lt.u32.totalorder %s38681_s21, %s38735_s7 }
0x1f31   : > { %p34533_p0 = scmp.lt.u32.totalorder %s34531_s0, %s34527_s16  ;;  %p34535_p2 = scmp.lt.u32.totalorder %s34527_s16, %s38681_s21 }
0x1f32   : > { %p34529_p11 = pnand %p34528_p10, %p34676_p5 }
0x1f33   : > { %p34534_p1 = por %p34533_p0, %p34532_p13 }
0x1f34   : > { %p34530_p12 = pneg %p34529_p11 }
0x1f35   : > { %p34536_p3 = por %p34535_p2, %p34534_p1 }
0x1f37   : > { %p34537_p4 = pnand %p34536_p3, %p34530_p12 }
0x1f39   : > { %34540 = shalt.err (!%p34537_p4)
}
0x1f3a   : > { %s34586_s27 = smov 128   ;;  %s34587_s13 = smov 8  }
0x1f3b   : > { %34327 = dma.vmem_to_hbm [thread:$0]  (%p34676_p5), %s38683_s28, 768, %s38681_s21, %s26783_s26, %s34586_s27, %s34586_s27, %s34587_s13  }
0x1f3c PF: > { %p34338_p7 = scmp.ge.s32.totalorder %s34579_s12, 2  ;;  %s26837_s22 = sand.u32 1, %s34567_s30  }
0x1f3d   : > { %s26838_s23 = scalar_lea.sflag [#allocation4], %s26837_s22 }
0x1f3e   : > { %p34332_p8 = pnand %p34338_p7, %p34680_p6 }
0x1f40   : > { %34558 = dma.done.wait (!%p34332_p8), %s26838_s23, 768  }
0x1f41   : > { %34560 = vsyncadd (!%p34332_p8), %s26838_s23, 4294966528  ;;  %s26855_s16 = scalar_lea.sflag [#allocation6], %s26837_s22 }
0x1f42   : > { %34562 = dma.done.wait (!%p34332_p8), %s26855_s16, 128  }
0x1f43   : > { %34564 = vsyncadd (!%p34332_p8), %s26855_s16, 4294967168  ;;  %p23_p5 = scmp.ge.s32.totalorder %s34663_s15, 4   ;;  %s39669_s30 = smov %s34571_s10 }
0x1f44   : > { %s39670_s10 = smov %s34575_s11  ;;  %s39671_s11 = smov %s34674_s18 }
0x1f45   : > { %s39672_s12 = smov %s34663_s15  ;;  %25 = sbr.rel (!%p23_p5) target bundleno = 7 (0x7), region = 128 }
0x1f4c   :  { %26860 = vsyncpa [#allocation4], 1 }
0x1f4d   :  { %26862 = vsyncpa [#allocation4 + $0x1], 1 }
0x1f4e   :  { %26863 = vsyncpa [#allocation6], 1 }
0x1f4f   :  { %26865 = vsyncpa [#allocation6 + $0x1], 1 }

</bundles_post_ra>
